<compile_context>
chip_gen: v6e
topology: v6e:2x2x1
jax: 0.10.0
libtpu: 0.0.40
codegen_flags: <defaults>
</compile_context>

<pallas_src>
import functools

import jax
import jax.numpy as jnp
import numpy as np
from jax.experimental import pallas as pl
from jax.experimental.pallas import tpu as pltpu


def _round_up(x, m):
    return (x + m - 1) // m * m


def _cdiv(a, b):
    return -(-a // b)


# ----------------------------------------------------------------------------- kernel
def decoder_block_kernel(x_ref, w1_ref, b1_ref, v_ref, b2_ref, o_ref,
                         xf_scr, h_scr, *, H, W, WP, TH):
    # x_ref  : (1, 1, (TH+5)*WP, Cin)   bf16  halo'd, zero-padded, flattened input tile
    # w1_ref : (3, 3, Cin, Cmid)        f32   conv3x3 weights, tap-major
    # b1_ref : (1, Cmid)                f32
    # v_ref  : (2, 2, 3, Cmid, C2P)     f32   deconv weights, column parity folded, padded
    # b2_ref : (1, C2P)                 f32
    # o_ref  : (1, 1, TH, 2, WP, C2P)   f32   o[..,i',a,j,b*Cout+c] = y[2(i0+i')+a, 2j+b, c]
    # xf_scr : ((TH+5)*WP, Cin)         f32   single-cast staging of the input tile
    # h_scr  : ((TH+3)*WP, Cmid)        f32   zero-padded conv output h_pad, flattened
    Cmid = w1_ref.shape[3]
    C2P = o_ref.shape[5]
    RXT = (TH + 5) * WP
    RGT = (TH + 2) * WP
    R2T = TH * WP

    # Single cast pass bf16 -> f32 (review: "cast x once, not per tap").
    xf_scr[...] = x_ref[0, 0].astype(jnp.float32)

    # ---- Stage 1: 3x3 conv + bias + ReLU over the padded tile grid.
    acc = jnp.zeros((RGT, Cmid), jnp.float32)
    for dy in range(3):
        for dx in range(3):
            off = dy * WP + dx
            acc = acc + jnp.dot(xf_scr[off:off + RGT, :], w1_ref[dy, dx],
                                preferred_element_type=jnp.float32)
    h = jnp.maximum(acc + b1_ref[...], 0.0).reshape(TH + 2, WP, Cmid)

    # In-kernel interior mask (replaces the HBM mask input): keep only rows/cols that
    # belong to the real h interior; everything else (padding ring, junk wrap columns,
    # rows from the H-padding when H % TH != 0) becomes the exact zero ring of h_pad.
    row0 = pl.program_id(1) * TH
    mrow = jax.lax.broadcasted_iota(jnp.int32, (TH + 2, WP, 1), 0) + row0
    ncol = jax.lax.broadcasted_iota(jnp.int32, (TH + 2, WP, 1), 1)
    keep = (mrow >= 1) & (mrow <= H) & (ncol >= 1) & (ncol <= W)
    h = jnp.where(keep, h, 0.0)

    h_scr[0:RGT, :] = h.reshape(RGT, Cmid)
    h_scr[RGT:(TH + 3) * WP, :] = jnp.zeros((WP, Cmid), jnp.float32)

    # ---- Stage 2: ConvTranspose2d(4,2,1) + bias + ReLU, one slab per row parity a.
    #      y[2i+a, 2j+b, c] = sum_{t,u} h_pad[i+a+t, j+u, :] @ V[a,t,u][:, b*Cout+c]
    for a in range(2):
        acc2 = jnp.zeros((R2T, C2P), jnp.float32)
        for t in range(2):
            for u in range(3):
                off = (a + t) * WP + u
                acc2 = acc2 + jnp.dot(h_scr[off:off + R2T, :], v_ref[a, t, u],
                                      preferred_element_type=jnp.float32)
        slab = jnp.maximum(acc2 + b2_ref[...], 0.0)
        # Full-WP, lane-dense (C2P % 128 == 0) aligned store; crops happen in the wrapper.
        o_ref[0, 0, :, a, :, :] = slab.reshape(TH, WP, C2P)


# --------------------------------------------------------------------------- weights
def _deconv_weights_folded(wt):
    """wt: (Cmid, Cout, 4, 4) PyTorch ConvTranspose2d weight ->
       V: (2, 2, 3, Cmid, 2*Cout) with
       V[a, t, u][:, b*Cout + c] = wt[:, c, 3-a-2t, 3-b-2s], s = u - b in {0,1}, else 0."""
    Cmid, Cout = wt.shape[0], wt.shape[1]
    a_blocks = []
    for a in range(2):
        t_blocks = []
        for t in range(2):
            u_blocks = []
            for u in range(3):
                cols = []
                for b in range(2):
                    s = u - b
                    if 0 <= s <= 1:
                        cols.append(wt[:, :, 3 - a - 2 * t, 3 - b - 2 * s])
                    else:
                        cols.append(jnp.zeros((Cmid, Cout), wt.dtype))
                u_blocks.append(jnp.concatenate(cols, axis=1))     # (Cmid, 2*Cout)
            t_blocks.append(jnp.stack(u_blocks, axis=0))
        a_blocks.append(jnp.stack(t_blocks, axis=0))
    return jnp.stack(a_blocks, axis=0)


# -------------------------------------------------------------------- tiling / VMEM
_VMEM_STEP_BUDGET = 40 << 20   # per-step working-set target: fits v7x 64 MiB/TC w/ headroom


def _step_vmem_bytes(TH, WP, Cin, Cmid, C2P):
    lane = lambda c: max(_round_up(c, 128), 128)   # VMEM lane padding
    sub = lambda r: max(_round_up(r, 8), 8)
    rxt, rgt, r2t = (TH + 5) * WP, (TH + 2) * WP, TH * WP
    x_blk = 2 * rxt * lane(Cin) * 2                       # bf16 input block, 2 buffers
    x_stg = rxt * lane(Cin) * 4                           # f32 staging scratch
    h_stg = (TH + 3) * WP * lane(Cmid) * 4                # f32 h_pad scratch
    o_blk = 2 * TH * 2 * WP * C2P * 4                     # f32 output block, 2 buffers
    w_all = 2 * (9 * sub(Cin) * lane(Cmid) + 12 * sub(Cmid) * C2P
                 + lane(Cmid) + C2P) * 4                  # weights + biases, 2 buffers
    live = rgt * lane(Cmid) * 4 + r2t * C2P * 4           # live accumulators
    return x_blk + x_stg + h_stg + o_blk + w_all + live


def _choose_row_tile(N, H, WP, Cin, Cmid, C2P, budget=_VMEM_STEP_BUDGET):
    cands = [c for c in (128, 96, 64, 48, 32, 24, 16, 12, 8, 6, 4, 2, 1) if c <= H] or [1]
    th = cands[-1]
    for c in cands:
        if _step_vmem_bytes(c, WP, Cin, Cmid, C2P) <= budget:
            th = c
            break
    # Guarantee >=2 parallel grid steps so both TensorCores get work even at batch 1.
    if N * _cdiv(H, th) < 2 and H > 1:
        th = _cdiv(H, 2)
    return th


# --------------------------------------------------------------------------- wrapper
def decoder_block_forward(x_nchw, w1, b1, wt, bt, *, row_tile=None):
    """x: (N, Cin, H, W); w1: (Cmid, Cin, 3, 3); b1: (Cmid,);
       wt: (Cmid, Cout, 4, 4); bt: (Cout,)   (PyTorch conventions)."""
    N, Cin, H, W = x_nchw.shape
    Cmid = w1.shape[0]
    Cout = wt.shape[1]
    WP = _round_up(W + 4, 8)                  # flattened row stride (multiple of 8)
    C2P = _round_up(2 * Cout, 128)            # lane-dense folded output channel width

    TH = row_tile if row_tile is not None else _choose_row_tile(N, H, WP, Cin, Cmid, C2P)
    T = _cdiv(H, TH)
    HP = T * TH
    RXT = (TH + 5) * WP

    # NCHW -> NHWC at the module boundary, bf16 for half-size HBM->VMEM DMA, zero-pad
    # by 2 (conv) and flatten spatial dims with row stride WP; gather overlapping row
    # tiles with a 5-row halo so BlockSpec blocks never overlap.
    x = jnp.transpose(x_nchw, (0, 2, 3, 1)).astype(jnp.bfloat16)
    x = jnp.pad(x, ((0, 0), (2, HP - H + 3), (2, WP - W - 2), (0, 0)))
    x_tiles = jnp.stack([x[:, t * TH: t * TH + TH + 5] for t in range(T)], axis=1)
    x_tiles = x_tiles.reshape(N, T, RXT, Cin)

    w1k = jnp.transpose(w1, (2, 3, 1, 0)).astype(jnp.float32)      # (3,3,Cin,Cmid)
    b1k = b1.reshape(1, Cmid).astype(jnp.float32)
    vk = _deconv_weights_folded(wt.astype(jnp.float32))            # (2,2,3,Cmid,2Cout)
    vk = jnp.pad(vk, ((0, 0), (0, 0), (0, 0), (0, 0), (0, C2P - 2 * Cout)))
    b2k = jnp.pad(jnp.concatenate([bt, bt]), (0, C2P - 2 * Cout))
    b2k = b2k.reshape(1, C2P).astype(jnp.float32)

    kernel = functools.partial(decoder_block_kernel, H=H, W=W, WP=WP, TH=TH)

    step_bytes = _step_vmem_bytes(TH, WP, Cin, Cmid, C2P)
    vmem_limit = int(min(max(2 * step_bytes, 24 << 20), 60 << 20))

    out = pl.pallas_call(
        kernel,
        out_shape=jax.ShapeDtypeStruct((N, T, TH, 2, WP, C2P), jnp.float32),
        grid=(N, T),
        in_specs=[
            pl.BlockSpec((1, 1, RXT, Cin), lambda n, t: (n, t, 0, 0)),
            pl.BlockSpec((3, 3, Cin, Cmid), lambda n, t: (0, 0, 0, 0)),
            pl.BlockSpec((1, Cmid), lambda n, t: (0, 0)),
            pl.BlockSpec((2, 2, 3, Cmid, C2P), lambda n, t: (0, 0, 0, 0, 0)),
            pl.BlockSpec((1, C2P), lambda n, t: (0, 0)),
        ],
        out_specs=pl.BlockSpec((1, 1, TH, 2, WP, C2P),
                               lambda n, t: (n, t, 0, 0, 0, 0)),
        scratch_shapes=[pltpu.VMEM((RXT, Cin), jnp.float32),
                        pltpu.VMEM(((TH + 3) * WP, Cmid), jnp.float32)],
        compiler_params=pltpu.CompilerParams(
            dimension_semantics=("parallel", "parallel"),
            vmem_limit_bytes=vmem_limit),
    )(x_tiles, w1k, b1k, vk, b2k)

    # Crop junk wrap columns / channel pad on HBM, then the pixel interleave is a pure
    # row-major reshape: (n, t, i', a, j, b, c) -> y[n, 2*(t*TH+i')+a, 2j+b, c].
    out = out[:, :, :, :, :W, :2 * Cout]
    out = out.reshape(N, T, TH, 2, W, 2, Cout)
    out = out.reshape(N, 2 * HP, 2 * W, Cout)[:, :2 * H]
    return jnp.transpose(out, (0, 3, 1, 2))                         # back to NCHW


# ------------------------------------------------------------------------- reference
def _reference(x, w1, b1, wt, bt):
    """Pure-JAX/XLA reference matching PyTorch semantics (NCHW, f32)."""
    dn = ("NCHW", "OIHW", "NCHW")
    h = jax.lax.conv_general_dilated(x, w1, (1, 1), [(1, 1), (1, 1)],
                                     dimension_numbers=dn)
    h = jnp.maximum(h + b1[None, :, None, None], 0.0)
    # ConvTranspose2d(k=4,s=2,p=1) == conv with lhs_dilation=2, pad=k-1-p=2, flipped kernel
    wtf = jnp.transpose(jnp.flip(wt, (2, 3)), (1, 0, 2, 3))
    o = jax.lax.conv_general_dilated(h, wtf, (1, 1), [(2, 2), (2, 2)],
                                     lhs_dilation=(2, 2), dimension_numbers=dn)
    return jnp.maximum(o + bt[None, :, None, None], 0.0)


if __name__ == "__main__":
    N, Cin, Cmid, Cout, H, W = 2, 4, 8, 4, 16, 16

    key = jax.random.PRNGKey(0)
    k1, k2, k3, k4, k5 = jax.random.split(key, 5)
    x = jax.random.normal(k1, (N, Cin, H, W), jnp.float32)
    w1 = jax.random.normal(k2, (Cmid, Cin, 3, 3), jnp.float32) * 0.1
    b1 = jax.random.normal(k3, (Cmid,), jnp.float32) * 0.1
    wt = jax.random.normal(k4, (Cmid, Cout, 4, 4), jnp.float32) * 0.1
    bt = jax.random.normal(k5, (Cout,), jnp.float32) * 0.1

    ref = _reference(x, w1, b1, wt, bt)

    # Run the auto-tiled config and a multi-tile config (row_tile=6 -> T=3, HP=18>H=16)
    # that exercises the halo handling and the ragged-H masking/crop.
    for rt in (None, 6):
        fn = jax.jit(functools.partial(decoder_block_forward, row_tile=rt))
        out = jax.block_until_ready(fn(x, w1, b1, wt, bt))
        assert out.shape == (N, Cout, 2 * H, 2 * W), out.shape
        # Input is rounded to bf16 for the HBM->VMEM transfer -> loose-ish tolerance.
        np.testing.assert_allclose(np.asarray(out), np.asarray(ref),
                                   rtol=2e-2, atol=2e-2)

    print("KERNEL_OK")
</pallas_src>

<mosaic_0001>
module attributes {stable_mosaic.version = 11 : i64} {
  func.func @decoder_block_kernel(%arg0: i32, %arg1: i32, %arg2: memref<1x1x504x4xbf16, #tpu.memory_space<vmem>>, %arg3: memref<3x3x4x8xf32, #tpu.memory_space<vmem>>, %arg4: memref<1x8xf32, #tpu.memory_space<vmem>>, %arg5: memref<2x2x3x8x128xf32, #tpu.memory_space<vmem>>, %arg6: memref<1x128xf32, #tpu.memory_space<vmem>>, %arg7: memref<1x1x16x2x24x128xf32, #tpu.memory_space<vmem>>, %arg8: memref<504x4xf32, #tpu.memory_space<vmem>>, %arg9: memref<456x8xf32, #tpu.memory_space<vmem>>) attributes {dimension_semantics = [#tpu.dimension_semantics<parallel>, #tpu.dimension_semantics<parallel>], iteration_bounds = array<i64: 2, 1>, scalar_prefetch = 0 : i64, scratch_operands = 2 : i64, tpu.core_type = #tpu.core_type<tc>, window_params = [{transform_indices = @transform_0, window_bounds = array<i64: 1, 1, 504, 4>}, {pipeline_mode = #tpu.pipeline_mode<synchronous>, transform_indices = @transform_1, window_bounds = array<i64: 3, 3, 4, 8>}, {pipeline_mode = #tpu.pipeline_mode<synchronous>, transform_indices = @transform_2, window_bounds = array<i64: 1, 8>}, {pipeline_mode = #tpu.pipeline_mode<synchronous>, transform_indices = @transform_3, window_bounds = array<i64: 2, 2, 3, 8, 128>}, {pipeline_mode = #tpu.pipeline_mode<synchronous>, transform_indices = @transform_4, window_bounds = array<i64: 1, 128>}, {transform_indices = @transform_5, window_bounds = array<i64: 1, 1, 16, 2, 24, 128>}]} {
    %c0 = arith.constant 0 : index
    %c0_0 = arith.constant 0 : index
    %c0_1 = arith.constant 0 : index
    %c0_2 = arith.constant 0 : index
    %0 = vector.load %arg2[%c0, %c0_0, %c0_1, %c0_2] : memref<1x1x504x4xbf16, #tpu.memory_space<vmem>>, vector<1x1x504x4xbf16>
    %1 = vector.shape_cast %0 : vector<1x1x504x4xbf16> to vector<504x4xbf16>
    %2 = arith.extf %1 : vector<504x4xbf16> to vector<504x4xf32>
    %c0_3 = arith.constant 0 : index
    %c0_4 = arith.constant 0 : index
    %3 = vector.load %arg8[%c0_3, %c0_4] : memref<504x4xf32, #tpu.memory_space<vmem>>, vector<504x4xf32>
    tpu.vector_store %arg8[%c0_3, %c0_4], %2 {strides = array<i32>} : memref<504x4xf32, #tpu.memory_space<vmem>>, vector<504x4xf32>,
    %cst = arith.constant 0.000000e+00 : f32
    %4 = vector.broadcast %cst : f32 to vector<432x8xf32>
    %c0_5 = arith.constant 0 : index
    %c0_6 = arith.constant 0 : index
    %5 = vector.load %arg8[%c0_5, %c0_6] : memref<504x4xf32, #tpu.memory_space<vmem>>, vector<432x4xf32>
    %c0_7 = arith.constant 0 : index
    %c0_8 = arith.constant 0 : index
    %c0_9 = arith.constant 0 : index
    %c0_10 = arith.constant 0 : index
    %6 = vector.load %arg3[%c0_7, %c0_8, %c0_9, %c0_10] : memref<3x3x4x8xf32, #tpu.memory_space<vmem>>, vector<1x1x4x8xf32>
    %7 = vector.shape_cast %6 : vector<1x1x4x8xf32> to vector<4x8xf32>
    %cst_11 = arith.constant dense<0.000000e+00> : vector<432x8xf32>
    %8 = tpu.matmul %5, %7, %cst_11 {dimension_numbers = #tpu.dot_dimension_numbers<[1], [0], [0], [1], [0, 0, 1, 1], [], []>} : vector<432x4xf32>, vector<4x8xf32>, vector<432x8xf32> -> vector<432x8xf32>
    %9 = arith.addf %4, %8 : vector<432x8xf32>
    %c1 = arith.constant 1 : index
    %c0_12 = arith.constant 0 : index
    %10 = vector.load %arg8[%c1, %c0_12] : memref<504x4xf32, #tpu.memory_space<vmem>>, vector<432x4xf32>
    %c0_13 = arith.constant 0 : index
    %c1_14 = arith.constant 1 : index
    %c0_15 = arith.constant 0 : index
    %c0_16 = arith.constant 0 : index
    %11 = vector.load %arg3[%c0_13, %c1_14, %c0_15, %c0_16] : memref<3x3x4x8xf32, #tpu.memory_space<vmem>>, vector<1x1x4x8xf32>
    %12 = vector.shape_cast %11 : vector<1x1x4x8xf32> to vector<4x8xf32>
    %cst_17 = arith.constant dense<0.000000e+00> : vector<432x8xf32>
    %13 = tpu.matmul %10, %12, %cst_17 {dimension_numbers = #tpu.dot_dimension_numbers<[1], [0], [0], [1], [0, 0, 1, 1], [], []>} : vector<432x4xf32>, vector<4x8xf32>, vector<432x8xf32> -> vector<432x8xf32>
    %14 = arith.addf %9, %13 : vector<432x8xf32>
    %c2 = arith.constant 2 : index
    %c0_18 = arith.constant 0 : index
    %15 = vector.load %arg8[%c2, %c0_18] : memref<504x4xf32, #tpu.memory_space<vmem>>, vector<432x4xf32>
    %c0_19 = arith.constant 0 : index
    %c2_20 = arith.constant 2 : index
    %c0_21 = arith.constant 0 : index
    %c0_22 = arith.constant 0 : index
    %16 = vector.load %arg3[%c0_19, %c2_20, %c0_21, %c0_22] : memref<3x3x4x8xf32, #tpu.memory_space<vmem>>, vector<1x1x4x8xf32>
    %17 = vector.shape_cast %16 : vector<1x1x4x8xf32> to vector<4x8xf32>
    %cst_23 = arith.constant dense<0.000000e+00> : vector<432x8xf32>
    %18 = tpu.matmul %15, %17, %cst_23 {dimension_numbers = #tpu.dot_dimension_numbers<[1], [0], [0], [1], [0, 0, 1, 1], [], []>} : vector<432x4xf32>, vector<4x8xf32>, vector<432x8xf32> -> vector<432x8xf32>
    %19 = arith.addf %14, %18 : vector<432x8xf32>
    %c24 = arith.constant 24 : index
    %c0_24 = arith.constant 0 : index
    %20 = vector.load %arg8[%c24, %c0_24] : memref<504x4xf32, #tpu.memory_space<vmem>>, vector<432x4xf32>
    %c1_25 = arith.constant 1 : index
    %c0_26 = arith.constant 0 : index
    %c0_27 = arith.constant 0 : index
    %c0_28 = arith.constant 0 : index
    %21 = vector.load %arg3[%c1_25, %c0_26, %c0_27, %c0_28] : memref<3x3x4x8xf32, #tpu.memory_space<vmem>>, vector<1x1x4x8xf32>
    %22 = vector.shape_cast %21 : vector<1x1x4x8xf32> to vector<4x8xf32>
    %cst_29 = arith.constant dense<0.000000e+00> : vector<432x8xf32>
    %23 = tpu.matmul %20, %22, %cst_29 {dimension_numbers = #tpu.dot_dimension_numbers<[1], [0], [0], [1], [0, 0, 1, 1], [], []>} : vector<432x4xf32>, vector<4x8xf32>, vector<432x8xf32> -> vector<432x8xf32>
    %24 = arith.addf %19, %23 : vector<432x8xf32>
    %c25 = arith.constant 25 : index
    %c0_30 = arith.constant 0 : index
    %25 = vector.load %arg8[%c25, %c0_30] : memref<504x4xf32, #tpu.memory_space<vmem>>, vector<432x4xf32>
    %c1_31 = arith.constant 1 : index
    %c1_32 = arith.constant 1 : index
    %c0_33 = arith.constant 0 : index
    %c0_34 = arith.constant 0 : index
    %26 = vector.load %arg3[%c1_31, %c1_32, %c0_33, %c0_34] : memref<3x3x4x8xf32, #tpu.memory_space<vmem>>, vector<1x1x4x8xf32>
    %27 = vector.shape_cast %26 : vector<1x1x4x8xf32> to vector<4x8xf32>
    %cst_35 = arith.constant dense<0.000000e+00> : vector<432x8xf32>
    %28 = tpu.matmul %25, %27, %cst_35 {dimension_numbers = #tpu.dot_dimension_numbers<[1], [0], [0], [1], [0, 0, 1, 1], [], []>} : vector<432x4xf32>, vector<4x8xf32>, vector<432x8xf32> -> vector<432x8xf32>
    %29 = arith.addf %24, %28 : vector<432x8xf32>
    %c26 = arith.constant 26 : index
    %c0_36 = arith.constant 0 : index
    %30 = vector.load %arg8[%c26, %c0_36] : memref<504x4xf32, #tpu.memory_space<vmem>>, vector<432x4xf32>
    %c1_37 = arith.constant 1 : index
    %c2_38 = arith.constant 2 : index
    %c0_39 = arith.constant 0 : index
    %c0_40 = arith.constant 0 : index
    %31 = vector.load %arg3[%c1_37, %c2_38, %c0_39, %c0_40] : memref<3x3x4x8xf32, #tpu.memory_space<vmem>>, vector<1x1x4x8xf32>
    %32 = vector.shape_cast %31 : vector<1x1x4x8xf32> to vector<4x8xf32>
    %cst_41 = arith.constant dense<0.000000e+00> : vector<432x8xf32>
    %33 = tpu.matmul %30, %32, %cst_41 {dimension_numbers = #tpu.dot_dimension_numbers<[1], [0], [0], [1], [0, 0, 1, 1], [], []>} : vector<432x4xf32>, vector<4x8xf32>, vector<432x8xf32> -> vector<432x8xf32>
    %34 = arith.addf %29, %33 : vector<432x8xf32>
    %c48 = arith.constant 48 : index
    %c0_42 = arith.constant 0 : index
    %35 = vector.load %arg8[%c48, %c0_42] : memref<504x4xf32, #tpu.memory_space<vmem>>, vector<432x4xf32>
    %c2_43 = arith.constant 2 : index
    %c0_44 = arith.constant 0 : index
    %c0_45 = arith.constant 0 : index
    %c0_46 = arith.constant 0 : index
    %36 = vector.load %arg3[%c2_43, %c0_44, %c0_45, %c0_46] : memref<3x3x4x8xf32, #tpu.memory_space<vmem>>, vector<1x1x4x8xf32>
    %37 = vector.shape_cast %36 : vector<1x1x4x8xf32> to vector<4x8xf32>
    %cst_47 = arith.constant dense<0.000000e+00> : vector<432x8xf32>
    %38 = tpu.matmul %35, %37, %cst_47 {dimension_numbers = #tpu.dot_dimension_numbers<[1], [0], [0], [1], [0, 0, 1, 1], [], []>} : vector<432x4xf32>, vector<4x8xf32>, vector<432x8xf32> -> vector<432x8xf32>
    %39 = arith.addf %34, %38 : vector<432x8xf32>
    %c49 = arith.constant 49 : index
    %c0_48 = arith.constant 0 : index
    %40 = vector.load %arg8[%c49, %c0_48] : memref<504x4xf32, #tpu.memory_space<vmem>>, vector<432x4xf32>
    %c2_49 = arith.constant 2 : index
    %c1_50 = arith.constant 1 : index
    %c0_51 = arith.constant 0 : index
    %c0_52 = arith.constant 0 : index
    %41 = vector.load %arg3[%c2_49, %c1_50, %c0_51, %c0_52] : memref<3x3x4x8xf32, #tpu.memory_space<vmem>>, vector<1x1x4x8xf32>
    %42 = vector.shape_cast %41 : vector<1x1x4x8xf32> to vector<4x8xf32>
    %cst_53 = arith.constant dense<0.000000e+00> : vector<432x8xf32>
    %43 = tpu.matmul %40, %42, %cst_53 {dimension_numbers = #tpu.dot_dimension_numbers<[1], [0], [0], [1], [0, 0, 1, 1], [], []>} : vector<432x4xf32>, vector<4x8xf32>, vector<432x8xf32> -> vector<432x8xf32>
    %44 = arith.addf %39, %43 : vector<432x8xf32>
    %c50 = arith.constant 50 : index
    %c0_54 = arith.constant 0 : index
    %45 = vector.load %arg8[%c50, %c0_54] : memref<504x4xf32, #tpu.memory_space<vmem>>, vector<432x4xf32>
    %c2_55 = arith.constant 2 : index
    %c2_56 = arith.constant 2 : index
    %c0_57 = arith.constant 0 : index
    %c0_58 = arith.constant 0 : index
    %46 = vector.load %arg3[%c2_55, %c2_56, %c0_57, %c0_58] : memref<3x3x4x8xf32, #tpu.memory_space<vmem>>, vector<1x1x4x8xf32>
    %47 = vector.shape_cast %46 : vector<1x1x4x8xf32> to vector<4x8xf32>
    %cst_59 = arith.constant dense<0.000000e+00> : vector<432x8xf32>
    %48 = tpu.matmul %45, %47, %cst_59 {dimension_numbers = #tpu.dot_dimension_numbers<[1], [0], [0], [1], [0, 0, 1, 1], [], []>} : vector<432x4xf32>, vector<4x8xf32>, vector<432x8xf32> -> vector<432x8xf32>
    %49 = arith.addf %44, %48 : vector<432x8xf32>
    %c0_60 = arith.constant 0 : index
    %c0_61 = arith.constant 0 : index
    %50 = vector.load %arg4[%c0_60, %c0_61] : memref<1x8xf32, #tpu.memory_space<vmem>>, vector<1x8xf32>
    %51 = vector.broadcast %50 : vector<1x8xf32> to vector<432x8xf32>
    %52 = arith.addf %49, %51 : vector<432x8xf32>
    %cst_62 = arith.constant 0.000000e+00 : f32
    %53 = vector.broadcast %cst_62 : f32 to vector<432x8xf32>
    %54 = arith.maximumf %52, %53 : vector<432x8xf32>
    %55 = vector.shape_cast %54 : vector<432x8xf32> to vector<18x24x8xf32>
    %c16_i32 = arith.constant 16 : i32
    %56 = arith.muli %arg1, %c16_i32 : i32
    %57 = tpu.iota {dimensions = array<i32: 0>} : vector<18x24x1xi32>
    %58 = vector.broadcast %56 : i32 to vector<18x24x1xi32>
    %59 = arith.addi %57, %58 : vector<18x24x1xi32>
    %60 = tpu.iota {dimensions = array<i32: 1>} : vector<18x24x1xi32>
    %c1_i32 = arith.constant 1 : i32
    %61 = vector.broadcast %c1_i32 : i32 to vector<18x24x1xi32>
    %62 = arith.cmpi sge, %59, %61 : vector<18x24x1xi32>
    %c16_i32_63 = arith.constant 16 : i32
    %63 = vector.broadcast %c16_i32_63 : i32 to vector<18x24x1xi32>
    %64 = arith.cmpi sle, %59, %63 : vector<18x24x1xi32>
    %65 = arith.andi %62, %64 : vector<18x24x1xi1>
    %c1_i32_64 = arith.constant 1 : i32
    %66 = vector.broadcast %c1_i32_64 : i32 to vector<18x24x1xi32>
    %67 = arith.cmpi sge, %60, %66 : vector<18x24x1xi32>
    %68 = arith.andi %65, %67 : vector<18x24x1xi1>
    %c16_i32_65 = arith.constant 16 : i32
    %69 = vector.broadcast %c16_i32_65 : i32 to vector<18x24x1xi32>
    %70 = arith.cmpi sle, %60, %69 : vector<18x24x1xi32>
    %71 = arith.andi %68, %70 : vector<18x24x1xi1>
    %cst_66 = arith.constant 0.000000e+00 : f32
    %72 = vector.shape_cast %71 : vector<18x24x1xi1> to vector<18x24x1xi1>
    %73 = vector.broadcast %72 : vector<18x24x1xi1> to vector<18x24x8xi1>
    %74 = vector.broadcast %cst_66 : f32 to vector<18x24x8xf32>
    %75 = arith.select %73, %55, %74 : vector<18x24x8xi1>, vector<18x24x8xf32>
    %76 = vector.shape_cast %75 : vector<18x24x8xf32> to vector<432x8xf32>
    %c0_67 = arith.constant 0 : index
    %c0_68 = arith.constant 0 : index
    %77 = vector.load %arg9[%c0_67, %c0_68] : memref<456x8xf32, #tpu.memory_space<vmem>>, vector<432x8xf32>
    tpu.vector_store %arg9[%c0_67, %c0_68], %76 {strides = array<i32>} : memref<456x8xf32, #tpu.memory_space<vmem>>, vector<432x8xf32>,
    %cst_69 = arith.constant 0.000000e+00 : f32
    %78 = vector.broadcast %cst_69 : f32 to vector<24x8xf32>
    %c432 = arith.constant 432 : index
    %c0_70 = arith.constant 0 : index
    %79 = vector.load %arg9[%c432, %c0_70] : memref<456x8xf32, #tpu.memory_space<vmem>>, vector<24x8xf32>
    tpu.vector_store %arg9[%c432, %c0_70], %78 {strides = array<i32>} : memref<456x8xf32, #tpu.memory_space<vmem>>, vector<24x8xf32>,
    %cst_71 = arith.constant 0.000000e+00 : f32
    %80 = vector.broadcast %cst_71 : f32 to vector<384x128xf32>
    %c0_72 = arith.constant 0 : index
    %c0_73 = arith.constant 0 : index
    %81 = vector.load %arg9[%c0_72, %c0_73] : memref<456x8xf32, #tpu.memory_space<vmem>>, vector<384x8xf32>
    %c0_74 = arith.constant 0 : index
    %c0_75 = arith.constant 0 : index
    %c0_76 = arith.constant 0 : index
    %c0_77 = arith.constant 0 : index
    %c0_78 = arith.constant 0 : index
    %82 = vector.load %arg5[%c0_74, %c0_75, %c0_76, %c0_77, %c0_78] : memref<2x2x3x8x128xf32, #tpu.memory_space<vmem>>, vector<1x1x1x8x128xf32>
    %83 = vector.shape_cast %82 : vector<1x1x1x8x128xf32> to vector<8x128xf32>
    %cst_79 = arith.constant dense<0.000000e+00> : vector<384x128xf32>
    %84 = tpu.matmul %81, %83, %cst_79 {dimension_numbers = #tpu.dot_dimension_numbers<[1], [0], [0], [1], [0, 0, 1, 1], [], []>} : vector<384x8xf32>, vector<8x128xf32>, vector<384x128xf32> -> vector<384x128xf32>
    %85 = arith.addf %80, %84 : vector<384x128xf32>
    %c1_80 = arith.constant 1 : index
    %c0_81 = arith.constant 0 : index
    %86 = vector.load %arg9[%c1_80, %c0_81] : memref<456x8xf32, #tpu.memory_space<vmem>>, vector<384x8xf32>
    %c0_82 = arith.constant 0 : index
    %c0_83 = arith.constant 0 : index
    %c1_84 = arith.constant 1 : index
    %c0_85 = arith.constant 0 : index
    %c0_86 = arith.constant 0 : index
    %87 = vector.load %arg5[%c0_82, %c0_83, %c1_84, %c0_85, %c0_86] : memref<2x2x3x8x128xf32, #tpu.memory_space<vmem>>, vector<1x1x1x8x128xf32>
    %88 = vector.shape_cast %87 : vector<1x1x1x8x128xf32> to vector<8x128xf32>
    %cst_87 = arith.constant dense<0.000000e+00> : vector<384x128xf32>
    %89 = tpu.matmul %86, %88, %cst_87 {dimension_numbers = #tpu.dot_dimension_numbers<[1], [0], [0], [1], [0, 0, 1, 1], [], []>} : vector<384x8xf32>, vector<8x128xf32>, vector<384x128xf32> -> vector<384x128xf32>
    %90 = arith.addf %85, %89 : vector<384x128xf32>
    %c2_88 = arith.constant 2 : index
    %c0_89 = arith.constant 0 : index
    %91 = vector.load %arg9[%c2_88, %c0_89] : memref<456x8xf32, #tpu.memory_space<vmem>>, vector<384x8xf32>
    %c0_90 = arith.constant 0 : index
    %c0_91 = arith.constant 0 : index
    %c2_92 = arith.constant 2 : index
    %c0_93 = arith.constant 0 : index
    %c0_94 = arith.constant 0 : index
    %92 = vector.load %arg5[%c0_90, %c0_91, %c2_92, %c0_93, %c0_94] : memref<2x2x3x8x128xf32, #tpu.memory_space<vmem>>, vector<1x1x1x8x128xf32>
    %93 = vector.shape_cast %92 : vector<1x1x1x8x128xf32> to vector<8x128xf32>
    %cst_95 = arith.constant dense<0.000000e+00> : vector<384x128xf32>
    %94 = tpu.matmul %91, %93, %cst_95 {dimension_numbers = #tpu.dot_dimension_numbers<[1], [0], [0], [1], [0, 0, 1, 1], [], []>} : vector<384x8xf32>, vector<8x128xf32>, vector<384x128xf32> -> vector<384x128xf32>
    %95 = arith.addf %90, %94 : vector<384x128xf32>
    %c24_96 = arith.constant 24 : index
    %c0_97 = arith.constant 0 : index
    %96 = vector.load %arg9[%c24_96, %c0_97] : memref<456x8xf32, #tpu.memory_space<vmem>>, vector<384x8xf32>
    %c0_98 = arith.constant 0 : index
    %c1_99 = arith.constant 1 : index
    %c0_100 = arith.constant 0 : index
    %c0_101 = arith.constant 0 : index
    %c0_102 = arith.constant 0 : index
    %97 = vector.load %arg5[%c0_98, %c1_99, %c0_100, %c0_101, %c0_102] : memref<2x2x3x8x128xf32, #tpu.memory_space<vmem>>, vector<1x1x1x8x128xf32>
    %98 = vector.shape_cast %97 : vector<1x1x1x8x128xf32> to vector<8x128xf32>
    %cst_103 = arith.constant dense<0.000000e+00> : vector<384x128xf32>
    %99 = tpu.matmul %96, %98, %cst_103 {dimension_numbers = #tpu.dot_dimension_numbers<[1], [0], [0], [1], [0, 0, 1, 1], [], []>} : vector<384x8xf32>, vector<8x128xf32>, vector<384x128xf32> -> vector<384x128xf32>
    %100 = arith.addf %95, %99 : vector<384x128xf32>
    %c25_104 = arith.constant 25 : index
    %c0_105 = arith.constant 0 : index
    %101 = vector.load %arg9[%c25_104, %c0_105] : memref<456x8xf32, #tpu.memory_space<vmem>>, vector<384x8xf32>
    %c0_106 = arith.constant 0 : index
    %c1_107 = arith.constant 1 : index
    %c1_108 = arith.constant 1 : index
    %c0_109 = arith.constant 0 : index
    %c0_110 = arith.constant 0 : index
    %102 = vector.load %arg5[%c0_106, %c1_107, %c1_108, %c0_109, %c0_110] : memref<2x2x3x8x128xf32, #tpu.memory_space<vmem>>, vector<1x1x1x8x128xf32>
    %103 = vector.shape_cast %102 : vector<1x1x1x8x128xf32> to vector<8x128xf32>
    %cst_111 = arith.constant dense<0.000000e+00> : vector<384x128xf32>
    %104 = tpu.matmul %101, %103, %cst_111 {dimension_numbers = #tpu.dot_dimension_numbers<[1], [0], [0], [1], [0, 0, 1, 1], [], []>} : vector<384x8xf32>, vector<8x128xf32>, vector<384x128xf32> -> vector<384x128xf32>
    %105 = arith.addf %100, %104 : vector<384x128xf32>
    %c26_112 = arith.constant 26 : index
    %c0_113 = arith.constant 0 : index
    %106 = vector.load %arg9[%c26_112, %c0_113] : memref<456x8xf32, #tpu.memory_space<vmem>>, vector<384x8xf32>
    %c0_114 = arith.constant 0 : index
    %c1_115 = arith.constant 1 : index
    %c2_116 = arith.constant 2 : index
    %c0_117 = arith.constant 0 : index
    %c0_118 = arith.constant 0 : index
    %107 = vector.load %arg5[%c0_114, %c1_115, %c2_116, %c0_117, %c0_118] : memref<2x2x3x8x128xf32, #tpu.memory_space<vmem>>, vector<1x1x1x8x128xf32>
    %108 = vector.shape_cast %107 : vector<1x1x1x8x128xf32> to vector<8x128xf32>
    %cst_119 = arith.constant dense<0.000000e+00> : vector<384x128xf32>
    %109 = tpu.matmul %106, %108, %cst_119 {dimension_numbers = #tpu.dot_dimension_numbers<[1], [0], [0], [1], [0, 0, 1, 1], [], []>} : vector<384x8xf32>, vector<8x128xf32>, vector<384x128xf32> -> vector<384x128xf32>
    %110 = arith.addf %105, %109 : vector<384x128xf32>
    %c0_120 = arith.constant 0 : index
    %c0_121 = arith.constant 0 : index
    %111 = vector.load %arg6[%c0_120, %c0_121] : memref<1x128xf32, #tpu.memory_space<vmem>>, vector<1x128xf32>
    %112 = vector.broadcast %111 : vector<1x128xf32> to vector<384x128xf32>
    %113 = arith.addf %110, %112 : vector<384x128xf32>
    %cst_122 = arith.constant 0.000000e+00 : f32
    %114 = vector.broadcast %cst_122 : f32 to vector<384x128xf32>
    %115 = arith.maximumf %113, %114 : vector<384x128xf32>
    %116 = vector.shape_cast %115 : vector<384x128xf32> to vector<16x24x128xf32>
    %c0_123 = arith.constant 0 : index
    %c0_124 = arith.constant 0 : index
    %c0_125 = arith.constant 0 : index
    %c0_126 = arith.constant 0 : index
    %c0_127 = arith.constant 0 : index
    %c0_128 = arith.constant 0 : index
    %117 = vector.load %arg7[%c0_123, %c0_124, %c0_125, %c0_126, %c0_127, %c0_128] : memref<1x1x16x2x24x128xf32, #tpu.memory_space<vmem>>, vector<1x1x16x1x24x128xf32>
    %118 = vector.shape_cast %117 : vector<1x1x16x1x24x128xf32> to vector<16x24x128xf32>
    %119 = vector.shape_cast %116 : vector<16x24x128xf32> to vector<1x1x16x1x24x128xf32>
    tpu.vector_store %arg7[%c0_123, %c0_124, %c0_125, %c0_126, %c0_127, %c0_128], %119 {strides = array<i32>} : memref<1x1x16x2x24x128xf32, #tpu.memory_space<vmem>>, vector<1x1x16x1x24x128xf32>,
    %cst_129 = arith.constant 0.000000e+00 : f32
    %120 = vector.broadcast %cst_129 : f32 to vector<384x128xf32>
    %c24_130 = arith.constant 24 : index
    %c0_131 = arith.constant 0 : index
    %121 = vector.load %arg9[%c24_130, %c0_131] : memref<456x8xf32, #tpu.memory_space<vmem>>, vector<384x8xf32>
    %c1_132 = arith.constant 1 : index
    %c0_133 = arith.constant 0 : index
    %c0_134 = arith.constant 0 : index
    %c0_135 = arith.constant 0 : index
    %c0_136 = arith.constant 0 : index
    %122 = vector.load %arg5[%c1_132, %c0_133, %c0_134, %c0_135, %c0_136] : memref<2x2x3x8x128xf32, #tpu.memory_space<vmem>>, vector<1x1x1x8x128xf32>
    %123 = vector.shape_cast %122 : vector<1x1x1x8x128xf32> to vector<8x128xf32>
    %cst_137 = arith.constant dense<0.000000e+00> : vector<384x128xf32>
    %124 = tpu.matmul %121, %123, %cst_137 {dimension_numbers = #tpu.dot_dimension_numbers<[1], [0], [0], [1], [0, 0, 1, 1], [], []>} : vector<384x8xf32>, vector<8x128xf32>, vector<384x128xf32> -> vector<384x128xf32>
    %125 = arith.addf %120, %124 : vector<384x128xf32>
    %c25_138 = arith.constant 25 : index
    %c0_139 = arith.constant 0 : index
    %126 = vector.load %arg9[%c25_138, %c0_139] : memref<456x8xf32, #tpu.memory_space<vmem>>, vector<384x8xf32>
    %c1_140 = arith.constant 1 : index
    %c0_141 = arith.constant 0 : index
    %c1_142 = arith.constant 1 : index
    %c0_143 = arith.constant 0 : index
    %c0_144 = arith.constant 0 : index
    %127 = vector.load %arg5[%c1_140, %c0_141, %c1_142, %c0_143, %c0_144] : memref<2x2x3x8x128xf32, #tpu.memory_space<vmem>>, vector<1x1x1x8x128xf32>
    %128 = vector.shape_cast %127 : vector<1x1x1x8x128xf32> to vector<8x128xf32>
    %cst_145 = arith.constant dense<0.000000e+00> : vector<384x128xf32>
    %129 = tpu.matmul %126, %128, %cst_145 {dimension_numbers = #tpu.dot_dimension_numbers<[1], [0], [0], [1], [0, 0, 1, 1], [], []>} : vector<384x8xf32>, vector<8x128xf32>, vector<384x128xf32> -> vector<384x128xf32>
    %130 = arith.addf %125, %129 : vector<384x128xf32>
    %c26_146 = arith.constant 26 : index
    %c0_147 = arith.constant 0 : index
    %131 = vector.load %arg9[%c26_146, %c0_147] : memref<456x8xf32, #tpu.memory_space<vmem>>, vector<384x8xf32>
    %c1_148 = arith.constant 1 : index
    %c0_149 = arith.constant 0 : index
    %c2_150 = arith.constant 2 : index
    %c0_151 = arith.constant 0 : index
    %c0_152 = arith.constant 0 : index
    %132 = vector.load %arg5[%c1_148, %c0_149, %c2_150, %c0_151, %c0_152] : memref<2x2x3x8x128xf32, #tpu.memory_space<vmem>>, vector<1x1x1x8x128xf32>
    %133 = vector.shape_cast %132 : vector<1x1x1x8x128xf32> to vector<8x128xf32>
    %cst_153 = arith.constant dense<0.000000e+00> : vector<384x128xf32>
    %134 = tpu.matmul %131, %133, %cst_153 {dimension_numbers = #tpu.dot_dimension_numbers<[1], [0], [0], [1], [0, 0, 1, 1], [], []>} : vector<384x8xf32>, vector<8x128xf32>, vector<384x128xf32> -> vector<384x128xf32>
    %135 = arith.addf %130, %134 : vector<384x128xf32>
    %c48_154 = arith.constant 48 : index
    %c0_155 = arith.constant 0 : index
    %136 = vector.load %arg9[%c48_154, %c0_155] : memref<456x8xf32, #tpu.memory_space<vmem>>, vector<384x8xf32>
    %c1_156 = arith.constant 1 : index
    %c1_157 = arith.constant 1 : index
    %c0_158 = arith.constant 0 : index
    %c0_159 = arith.constant 0 : index
    %c0_160 = arith.constant 0 : index
    %137 = vector.load %arg5[%c1_156, %c1_157, %c0_158, %c0_159, %c0_160] : memref<2x2x3x8x128xf32, #tpu.memory_space<vmem>>, vector<1x1x1x8x128xf32>
    %138 = vector.shape_cast %137 : vector<1x1x1x8x128xf32> to vector<8x128xf32>
    %cst_161 = arith.constant dense<0.000000e+00> : vector<384x128xf32>
    %139 = tpu.matmul %136, %138, %cst_161 {dimension_numbers = #tpu.dot_dimension_numbers<[1], [0], [0], [1], [0, 0, 1, 1], [], []>} : vector<384x8xf32>, vector<8x128xf32>, vector<384x128xf32> -> vector<384x128xf32>
    %140 = arith.addf %135, %139 : vector<384x128xf32>
    %c49_162 = arith.constant 49 : index
    %c0_163 = arith.constant 0 : index
    %141 = vector.load %arg9[%c49_162, %c0_163] : memref<456x8xf32, #tpu.memory_space<vmem>>, vector<384x8xf32>
    %c1_164 = arith.constant 1 : index
    %c1_165 = arith.constant 1 : index
    %c1_166 = arith.constant 1 : index
    %c0_167 = arith.constant 0 : index
    %c0_168 = arith.constant 0 : index
    %142 = vector.load %arg5[%c1_164, %c1_165, %c1_166, %c0_167, %c0_168] : memref<2x2x3x8x128xf32, #tpu.memory_space<vmem>>, vector<1x1x1x8x128xf32>
    %143 = vector.shape_cast %142 : vector<1x1x1x8x128xf32> to vector<8x128xf32>
    %cst_169 = arith.constant dense<0.000000e+00> : vector<384x128xf32>
    %144 = tpu.matmul %141, %143, %cst_169 {dimension_numbers = #tpu.dot_dimension_numbers<[1], [0], [0], [1], [0, 0, 1, 1], [], []>} : vector<384x8xf32>, vector<8x128xf32>, vector<384x128xf32> -> vector<384x128xf32>
    %145 = arith.addf %140, %144 : vector<384x128xf32>
    %c50_170 = arith.constant 50 : index
    %c0_171 = arith.constant 0 : index
    %146 = vector.load %arg9[%c50_170, %c0_171] : memref<456x8xf32, #tpu.memory_space<vmem>>, vector<384x8xf32>
    %c1_172 = arith.constant 1 : index
    %c1_173 = arith.constant 1 : index
    %c2_174 = arith.constant 2 : index
    %c0_175 = arith.constant 0 : index
    %c0_176 = arith.constant 0 : index
    %147 = vector.load %arg5[%c1_172, %c1_173, %c2_174, %c0_175, %c0_176] : memref<2x2x3x8x128xf32, #tpu.memory_space<vmem>>, vector<1x1x1x8x128xf32>
    %148 = vector.shape_cast %147 : vector<1x1x1x8x128xf32> to vector<8x128xf32>
    %cst_177 = arith.constant dense<0.000000e+00> : vector<384x128xf32>
    %149 = tpu.matmul %146, %148, %cst_177 {dimension_numbers = #tpu.dot_dimension_numbers<[1], [0], [0], [1], [0, 0, 1, 1], [], []>} : vector<384x8xf32>, vector<8x128xf32>, vector<384x128xf32> -> vector<384x128xf32>
    %150 = arith.addf %145, %149 : vector<384x128xf32>
    %c0_178 = arith.constant 0 : index
    %c0_179 = arith.constant 0 : index
    %151 = vector.load %arg6[%c0_178, %c0_179] : memref<1x128xf32, #tpu.memory_space<vmem>>, vector<1x128xf32>
    %152 = vector.broadcast %151 : vector<1x128xf32> to vector<384x128xf32>
    %153 = arith.addf %150, %152 : vector<384x128xf32>
    %cst_180 = arith.constant 0.000000e+00 : f32
    %154 = vector.broadcast %cst_180 : f32 to vector<384x128xf32>
    %155 = arith.maximumf %153, %154 : vector<384x128xf32>
    %156 = vector.shape_cast %155 : vector<384x128xf32> to vector<16x24x128xf32>
    %c0_181 = arith.constant 0 : index
    %c0_182 = arith.constant 0 : index
    %c0_183 = arith.constant 0 : index
    %c1_184 = arith.constant 1 : index
    %c0_185 = arith.constant 0 : index
    %c0_186 = arith.constant 0 : index
    %157 = vector.load %arg7[%c0_181, %c0_182, %c0_183, %c1_184, %c0_185, %c0_186] : memref<1x1x16x2x24x128xf32, #tpu.memory_space<vmem>>, vector<1x1x16x1x24x128xf32>
    %158 = vector.shape_cast %157 : vector<1x1x16x1x24x128xf32> to vector<16x24x128xf32>
    %159 = vector.shape_cast %156 : vector<16x24x128xf32> to vector<1x1x16x1x24x128xf32>
    tpu.vector_store %arg7[%c0_181, %c0_182, %c0_183, %c1_184, %c0_185, %c0_186], %159 {strides = array<i32>} : memref<1x1x16x2x24x128xf32, #tpu.memory_space<vmem>>, vector<1x1x16x1x24x128xf32>,
    return
  }
  func.func @transform_0(%arg0: i32, %arg1: i32) -> (i32, i32, i32, i32) {
    %c0_i32 = arith.constant 0 : i32
    %c0_i32_0 = arith.constant 0 : i32
    %c0_i32_1 = arith.constant 0 : i32
    return %arg0, %arg1, %c0_i32, %c0_i32_0 : i32, i32, i32, i32
  }
  func.func @transform_1(%arg0: i32, %arg1: i32) -> (i32, i32, i32, i32) {
    %c0_i32 = arith.constant 0 : i32
    %c0_i32_0 = arith.constant 0 : i32
    %c0_i32_1 = arith.constant 0 : i32
    %c0_i32_2 = arith.constant 0 : i32
    %c0_i32_3 = arith.constant 0 : i32
    return %c0_i32, %c0_i32_0, %c0_i32_1, %c0_i32_2 : i32, i32, i32, i32
  }
  func.func @transform_2(%arg0: i32, %arg1: i32) -> (i32, i32) {
    %c0_i32 = arith.constant 0 : i32
    %c0_i32_0 = arith.constant 0 : i32
    %c0_i32_1 = arith.constant 0 : i32
    return %c0_i32, %c0_i32_0 : i32, i32
  }
  func.func @transform_3(%arg0: i32, %arg1: i32) -> (i32, i32, i32, i32, i32) {
    %c0_i32 = arith.constant 0 : i32
    %c0_i32_0 = arith.constant 0 : i32
    %c0_i32_1 = arith.constant 0 : i32
    %c0_i32_2 = arith.constant 0 : i32
    %c0_i32_3 = arith.constant 0 : i32
    %c0_i32_4 = arith.constant 0 : i32
    return %c0_i32, %c0_i32_0, %c0_i32_1, %c0_i32_2, %c0_i32_3 : i32, i32, i32, i32, i32
  }
  func.func @transform_4(%arg0: i32, %arg1: i32) -> (i32, i32) {
    %c0_i32 = arith.constant 0 : i32
    %c0_i32_0 = arith.constant 0 : i32
    %c0_i32_1 = arith.constant 0 : i32
    return %c0_i32, %c0_i32_0 : i32, i32
  }
  func.func @transform_5(%arg0: i32, %arg1: i32) -> (i32, i32, i32, i32, i32, i32) {
    %c0_i32 = arith.constant 0 : i32
    %c0_i32_0 = arith.constant 0 : i32
    %c0_i32_1 = arith.constant 0 : i32
    %c0_i32_2 = arith.constant 0 : i32
    %c0_i32_3 = arith.constant 0 : i32
    return %arg0, %arg1, %c0_i32, %c0_i32_0, %c0_i32_1, %c0_i32_2 : i32, i32, i32, i32, i32, i32
  }
}

</mosaic_0001>

<bundles_post_ra>
// kernel: decoder_block_forward.1
= control target key start
LH: loop header
LB: loop body
LE: loop exit
PB: predicated region body
PF: predicated region fallthrough
CT: control target
= control target key end

     0   :  { %s17233_s18 = smov 0   ;;  %s17235_s19 = smov 0   ;;  %s22622_s0 = inlined_call_operand.vmem [shape: bf16[2,1,504,4], index: 0, kind: input, shape index: {}]   ;;  %s22623_s1 = inlined_call_operand.vmem [shape: f32[3,3,4,8], index: 1, kind: input, shape index: {}]   ;;  %s22624_s2 = inlined_call_operand.vmem [shape: f32[1,8], index: 2, kind: input, shape index: {}]   ;;  %s22625_s3 = inlined_call_operand.vmem [shape: f32[2,2,3,8,128], index: 3, kind: input, shape index: {}]   ;;  %s22626_s4 = inlined_call_operand.vmem [shape: f32[1,128], index: 4, kind: input, shape index: {}]   ;;  %s22627_s5 = inlined_call_operand.vmem [shape: f32[2,1,16,2,24,128], index: 5, kind: output, shape index: {}]  }
   0x1   :  { %s17237_s20 = smov 0  }
   0x2 LB: > { %s27_s21 = sadd.s32 1, %s17196_s19  ;;  %p13129_p0 = scmp.ge.s32.totalorder %s17200_s20, 1  ;;  %s17200_s20 = sphi %s17237_s20, %s15_s20   ;;  %s17196_s19 = sphi %s17235_s19, %s23655_s19   ;;  %s17192_s18 = sphi %s17233_s18, %s23654_s18  }
   0x3   : > { %p29_p1 = scmp.ge.s32.totalorder %s27_s21, 2  ;;  %p207_p2 = scmp.lt.s32.totalorder %s17200_s20, 3 }
   0x5   : > { %s23657_s21 = smov (%p29_p1, %s27_s21), 0  ;;  %p208_p3 = pnand %p13129_p0, %p207_p2 }
   0x7   : > { %211 = sbr.rel (%p208_p3) target bundleno = 1589 (0x635), region = 40 }
   0xc   : > { %v13132_v0 = vld [vmem:[%s22623_s1 + $0x4] sm:$0xf]  ;;  %vm724_vm0 = vcmask 1043456   ;;  %p243_p4 = scmp.lt.s32.totalorder %s17192_s18, 1  ;;  %v17258_v1 = vld [vmem:[%s22623_s1] sm:$0xf] }
   0xd   : > { %15512 = vmatprep.subr.msk.mxu0 %vm724_vm0, %v13132_v0  ;;  %17147 = vmatprep.subr.msk.mxu1 %vm724_vm0, %v17258_v1  ;;  %vm387_vm1 = vcmask 31744   ;;  %v17330_v62 = vld [vmem:[%s22623_s1 + $0x8] sm:$0xf]  ;;  %vm6301_vm2 = vcmask 64512  }
   0xe   : > { %15513 = vmatpush3.msk.msra.mxu0 %vm724_vm0, %v13132_v0  ;;  %s23659_s18 = smov (!%p243_p4, %s17192_s18), 1  ;;  %17148 = vmatpush3.msk.msra.mxu1 %vm724_vm0, %v17258_v1 }
   0xf   : > { %15595 = vmatprep.subr.msk.mxu0 %vm724_vm0, %v17258_v1  ;;  %s17149_s26 = smul.u32 252, %s23659_s18 }
  0x10   : > { %s17150_s7 = smul.u32 768, %s23659_s18 }
  0x11   : > { %s17273_s29 = scalar_lea.vmem %s22622_s0, %s17149_s26 }
  0x12   : > { %v14276_v2 = vld [vmem:[%s17273_s29] sm:$0xff]   ;;  %v14399_v3 = vld [vmem:[%s17273_s29 + $0x8] sm:$0xff]   ;;  %v14400_v7 = vld [vmem:[%s17273_s29 + $0x10] sm:$0xff]   ;;  %s21595_s11 = scalar_lea.vmem %s22627_s5, %s17150_s7 }
  0x13   : > { %v14277_v4 = vunpack.c.l.bf16 %v14276_v2  ;;  %v14278_v5 = vunpack.c.h.bf16 %v14276_v2  ;;  %v14281_v6 = vunpack.c.l.bf16 %v14399_v3  ;;  %v14401_v8 = vld [vmem:[%s17273_s29 + $0x18] sm:$0xff]   ;;  %v14402_v9 = vld [vmem:[%s17273_s29 + $0x20] sm:$0xff]   ;;  %v14282_v10 = vunpack.c.h.bf16 %v14399_v3  ;;  %v14403_v14 = vld [vmem:[%s17273_s29 + $0x28] sm:$0xff]  }
  0x14   : > { %v14285_v11 = vunpack.c.l.bf16 %v14400_v7  ;;  %v14286_v12 = vunpack.c.h.bf16 %v14400_v7  ;;  %v14289_v13 = vunpack.c.l.bf16 %v14401_v8  ;;  %v14404_v15 = vld [vmem:[%s17273_s29 + $0x30] sm:$0xff]   ;;  %v14405_v16 = vld [vmem:[%s17273_s29 + $0x38] sm:$0xff]   ;;  %v14290_v17 = vunpack.c.h.bf16 %v14401_v8  ;;  %v14406_v21 = vld [vmem:[%s17273_s29 + $0x40] sm:$0xff]  }
  0x15   : > { %388 = vst.msk [vmem:[#allocation2] sm:$0xff] %vm387_vm1, %v14277_v4  ;;  %389 = vst.msk [vmem:[#allocation2 + $0x8] sm:$0xff] %vm387_vm1, %v14278_v5  ;;  %v14293_v18 = vunpack.c.l.bf16 %v14402_v9  ;;  %v14294_v19 = vunpack.c.h.bf16 %v14402_v9  ;;  %v14297_v20 = vunpack.c.l.bf16 %v14403_v14  ;;  %v14407_v22 = vld [vmem:[%s17273_s29 + $0x48] sm:$0xff]   ;;  %v14408_v23 = vld [vmem:[%s17273_s29 + $0x50] sm:$0xff]   ;;  %v14298_v24 = vunpack.c.h.bf16 %v14403_v14 }
  0x16   : > { %390 = vst.msk [vmem:[#allocation2 + $0x10] sm:$0xff] %vm387_vm1, %v14281_v6  ;;  %391 = vst.msk [vmem:[#allocation2 + $0x18] sm:$0xff] %vm387_vm1, %v14282_v10  ;;  %v14301_v25 = vunpack.c.l.bf16 %v14404_v15  ;;  %v14302_v26 = vunpack.c.h.bf16 %v14404_v15  ;;  %v14305_v27 = vunpack.c.l.bf16 %v14405_v16  ;;  %v14409_v28 = vld [vmem:[%s17273_s29 + $0x58] sm:$0xff]   ;;  %v14410_v29 = vld [vmem:[%s17273_s29 + $0x60] sm:$0xff]   ;;  %v14306_v31 = vunpack.c.h.bf16 %v14405_v16 }
  0x17   : > { %392 = vst.msk [vmem:[#allocation2 + $0x20] sm:$0xff] %vm387_vm1, %v14285_v11  ;;  %393 = vst.msk [vmem:[#allocation2 + $0x28] sm:$0xff] %vm387_vm1, %v14286_v12  ;;  %v14411_v30 = vld [vmem:[%s17273_s29 + $0x68] sm:$0xff]   ;;  %v14309_v32 = vunpack.c.l.bf16 %v14406_v21  ;;  %v14310_v33 = vunpack.c.h.bf16 %v14406_v21  ;;  %v14313_v34 = vunpack.c.l.bf16 %v14407_v22  ;;  %v14412_v35 = vld [vmem:[%s17273_s29 + $0x70] sm:$0xff]   ;;  %v14314_v37 = vunpack.c.h.bf16 %v14407_v22 }
  0x18   : > { %394 = vst.msk [vmem:[#allocation2 + $0x30] sm:$0xff] %vm387_vm1, %v14289_v13  ;;  %395 = vst.msk [vmem:[#allocation2 + $0x38] sm:$0xff] %vm387_vm1, %v14290_v17  ;;  %v14413_v36 = vld [vmem:[%s17273_s29 + $0x78] sm:$0xff]   ;;  %v14317_v38 = vunpack.c.l.bf16 %v14408_v23  ;;  %v14318_v39 = vunpack.c.h.bf16 %v14408_v23  ;;  %v14321_v40 = vunpack.c.l.bf16 %v14409_v28  ;;  %v14414_v41 = vld [vmem:[%s17273_s29 + $0x80] sm:$0xff]   ;;  %v14322_v43 = vunpack.c.h.bf16 %v14409_v28 }
  0x19   : > { %396 = vst.msk [vmem:[#allocation2 + $0x40] sm:$0xff] %vm387_vm1, %v14293_v18  ;;  %397 = vst.msk [vmem:[#allocation2 + $0x48] sm:$0xff] %vm387_vm1, %v14294_v19  ;;  %v14415_v42 = vld [vmem:[%s17273_s29 + $0x88] sm:$0xff]   ;;  %v14325_v44 = vunpack.c.l.bf16 %v14410_v29  ;;  %v14326_v45 = vunpack.c.h.bf16 %v14410_v29  ;;  %v14329_v46 = vunpack.c.l.bf16 %v14411_v30  ;;  %v14416_v47 = vld [vmem:[%s17273_s29 + $0x90] sm:$0xff]   ;;  %v14330_v49 = vunpack.c.h.bf16 %v14411_v30 }
  0x1a   : > { %398 = vst.msk [vmem:[#allocation2 + $0x50] sm:$0xff] %vm387_vm1, %v14297_v20  ;;  %399 = vst.msk [vmem:[#allocation2 + $0x58] sm:$0xff] %vm387_vm1, %v14298_v24  ;;  %v14417_v48 = vld [vmem:[%s17273_s29 + $0x98] sm:$0xff]   ;;  %v14333_v50 = vunpack.c.l.bf16 %v14412_v35  ;;  %v14334_v51 = vunpack.c.h.bf16 %v14412_v35  ;;  %v14337_v52 = vunpack.c.l.bf16 %v14413_v36  ;;  %v14418_v53 = vld [vmem:[%s17273_s29 + $0xa0] sm:$0xff]   ;;  %v14338_v55 = vunpack.c.h.bf16 %v14413_v36 }
  0x1b   : > { %400 = vst.msk [vmem:[#allocation2 + $0x60] sm:$0xff] %vm387_vm1, %v14301_v25  ;;  %401 = vst.msk [vmem:[#allocation2 + $0x68] sm:$0xff] %vm387_vm1, %v14302_v26  ;;  %v14419_v54 = vld [vmem:[%s17273_s29 + $0xa8] sm:$0xff]   ;;  %v14341_v56 = vunpack.c.l.bf16 %v14414_v41  ;;  %v14342_v57 = vunpack.c.h.bf16 %v14414_v41  ;;  %v14345_v58 = vunpack.c.l.bf16 %v14415_v42  ;;  %v14420_v59 = vld [vmem:[%s17273_s29 + $0xb0] sm:$0xff]   ;;  %v14346_v2 = vunpack.c.h.bf16 %v14415_v42 }
  0x1c   : > { %402 = vst.msk [vmem:[#allocation2 + $0x70] sm:$0xff] %vm387_vm1, %v14305_v27  ;;  %403 = vst.msk [vmem:[#allocation2 + $0x78] sm:$0xff] %vm387_vm1, %v14306_v31  ;;  %v14421_v60 = vld [vmem:[%s17273_s29 + $0xb8] sm:$0xff]   ;;  %v14422_v61 = vld [vmem:[%s17273_s29 + $0xc0] sm:$0xff]   ;;  %v14349_v3 = vunpack.c.l.bf16 %v14416_v47  ;;  %v14350_v4 = vunpack.c.h.bf16 %v14416_v47  ;;  %v14353_v5 = vunpack.c.l.bf16 %v14417_v48  ;;  %v14354_v8 = vunpack.c.h.bf16 %v14417_v48 }
  0x1d   : > { %404 = vst.msk [vmem:[#allocation2 + $0x80] sm:$0xff] %vm387_vm1, %v14309_v32  ;;  %405 = vst.msk [vmem:[#allocation2 + $0x88] sm:$0xff] %vm387_vm1, %v14310_v33  ;;  %v506_v63 = vld [vmem:[#allocation2 + $0x1] sm:$0xff]  ;;  %v507_v0 = vld [vmem:[#allocation2 + $0x9] sm:$0xff]  ;;  %v14357_v9 = vunpack.c.l.bf16 %v14418_v53  ;;  %v14358_v10 = vunpack.c.h.bf16 %v14418_v53  ;;  %v14361_v11 = vunpack.c.l.bf16 %v14419_v54  ;;  %v14362_v14 = vunpack.c.h.bf16 %v14419_v54 }
  0x1e   : > { %406 = vst.msk [vmem:[#allocation2 + $0x90] sm:$0xff] %vm387_vm1, %v14313_v34  ;;  %407 = vst.msk [vmem:[#allocation2 + $0x98] sm:$0xff] %vm387_vm1, %v14314_v37  ;;  %v14423_v6 = vld [vmem:[%s17273_s29 + $0xc8] sm:$0xff]   ;;  %15514 = vmatprep.mubr.msk.f32.mxu0 %vm387_vm1, %v506_v63  ;;  %v508_v7 = vld [vmem:[#allocation2 + $0x11] sm:$0xff]  ;;  %v14365_v15 = vunpack.c.l.bf16 %v14420_v59  ;;  %v14366_v16 = vunpack.c.h.bf16 %v14420_v59  ;;  %v14369_v17 = vunpack.c.l.bf16 %v14421_v60  ;;  %v14370_v19 = vunpack.c.h.bf16 %v14421_v60 }
  0x1f   : > { %408 = vst.msk [vmem:[#allocation2 + $0xa0] sm:$0xff] %vm387_vm1, %v14317_v38  ;;  %409 = vst.msk [vmem:[#allocation2 + $0xa8] sm:$0xff] %vm387_vm1, %v14318_v39  ;;  %v14424_v12 = vld [vmem:[%s17273_s29 + $0xd0] sm:$0xff]   ;;  %v17344_v13 = vld [vmem:[%s17273_s29 + $0xd8] sm:$0xff]   ;;  %15515 = vmatmul.mubr.msk.f32.vlgmr.msra.gmra.mxu0 %vm387_vm1, %v507_v0  ;;  %v14373_v20 = vunpack.c.l.bf16 %v14422_v61  ;;  %v14374_v21 = vunpack.c.h.bf16 %v14422_v61  ;;  %v14377_v22 = vunpack.c.l.bf16 %v14423_v6 }
  0x20   : > { %410 = vst.msk [vmem:[#allocation2 + $0xb0] sm:$0xff] %vm387_vm1, %v14321_v40  ;;  %411 = vst.msk [vmem:[#allocation2 + $0xb8] sm:$0xff] %vm387_vm1, %v14322_v43  ;;  %15596 = vmatpush3.msk.msra.mxu0 %vm724_vm0, %v17258_v1  ;;  %15517 = vmatprep.mubr.msk.f32.mxu0 %vm387_vm1, %v508_v7  ;;  %v509_v18 = vld [vmem:[#allocation2 + $0x19] sm:$0xff]  ;;  %v510_v23 = vld [vmem:[#allocation2 + $0x21] sm:$0xff]  ;;  %v14378_v1 = vunpack.c.h.bf16 %v14423_v6  ;;  %v14381_v24 = vunpack.c.l.bf16 %v14424_v12  ;;  %v14382_v25 = vunpack.c.h.bf16 %v14424_v12  ;;  %v14385_v26 = vunpack.c.l.bf16 %v17344_v13 }
  0x21   : > { %412 = vst.msk [vmem:[#allocation2 + $0xc0] sm:$0xff] %vm387_vm1, %v14325_v44  ;;  %413 = vst.msk [vmem:[#allocation2 + $0xc8] sm:$0xff] %vm387_vm1, %v14326_v45  ;;  %15678 = vmatprep.subr.msk.mxu0 %vm724_vm0, %v17330_v62  ;;  %v511_v27 = vld [vmem:[#allocation2 + $0x29] sm:$0xff]  ;;  %v512_v29 = vld [vmem:[#allocation2 + $0x31] sm:$0xff] }
  0x22   : > { %414 = vst.msk [vmem:[#allocation2 + $0xd0] sm:$0xff] %vm387_vm1, %v14329_v46  ;;  %415 = vst.msk [vmem:[#allocation2 + $0xd8] sm:$0xff] %vm387_vm1, %v14330_v49  ;;  %v513_v33 = vld [vmem:[#allocation2 + $0x39] sm:$0xff]  ;;  %v514_v35 = vld [vmem:[#allocation2 + $0x41] sm:$0xff] }
  0x23   : > { %416 = vst.msk [vmem:[#allocation2 + $0xe0] sm:$0xff] %vm387_vm1, %v14333_v50  ;;  %417 = vst.msk [vmem:[#allocation2 + $0xe8] sm:$0xff] %vm387_vm1, %v14334_v51  ;;  %15518 = vmatmul.mubr.msk.f32.gmra.mxu0 %vm387_vm1, %v509_v18  ;;  %v515_v37 = vld [vmem:[#allocation2 + $0x49] sm:$0xff]  ;;  %v516_v39 = vld [vmem:[#allocation2 + $0x51] sm:$0xff] }
  0x24   : > { %418 = vst.msk [vmem:[#allocation2 + $0xf0] sm:$0xff] %vm387_vm1, %v14337_v52  ;;  %419 = vst.msk [vmem:[#allocation2 + $0xf8] sm:$0xff] %vm387_vm1, %v14338_v55  ;;  %15520 = vmatprep.mubr.msk.f32.mxu0 %vm387_vm1, %v510_v23  ;;  %v517_v41 = vld [vmem:[#allocation2 + $0x59] sm:$0xff]  ;;  %v518_v43 = vld [vmem:[#allocation2 + $0x61] sm:$0xff] }
  0x25   : > { %420 = vst.msk [vmem:[#allocation2 + $0x100] sm:$0xff] %vm387_vm1, %v14341_v56  ;;  %421 = vst.msk [vmem:[#allocation2 + $0x108] sm:$0xff] %vm387_vm1, %v14342_v57  ;;  %v519_v45 = vld [vmem:[#allocation2 + $0x69] sm:$0xff]  ;;  %v520_v47 = vld [vmem:[#allocation2 + $0x71] sm:$0xff] }
  0x26   : > { %422 = vst.msk [vmem:[#allocation2 + $0x110] sm:$0xff] %vm387_vm1, %v14345_v58  ;;  %423 = vst.msk [vmem:[#allocation2 + $0x118] sm:$0xff] %vm387_vm1, %v14346_v2  ;;  %v17375_v28 = vld [vmem:[#allocation2 + $0xa0] sm:$0xff]  ;;  %v17379_v30 = vld [vmem:[#allocation2 + $0xa8] sm:$0xff] }
  0x27   : > { %424 = vst.msk [vmem:[#allocation2 + $0x120] sm:$0xff] %vm387_vm1, %v14349_v3  ;;  %425 = vst.msk [vmem:[#allocation2 + $0x128] sm:$0xff] %vm387_vm1, %v14350_v4  ;;  %15627 = vmatprep.mubr.msk.f32.mxu1 %vm387_vm1, %v17375_v28  ;;  %v17381_v31 = vld [vmem:[#allocation2 + $0xb0] sm:$0xff]  ;;  %15521 = vmatmul.mubr.msk.f32.gmra.mxu0 %vm387_vm1, %v511_v27  ;;  %v17388_v32 = vld [vmem:[#allocation2 + $0xb8] sm:$0xff] }
  0x28   : > { %426 = vst.msk [vmem:[#allocation2 + $0x130] sm:$0xff] %vm387_vm1, %v14353_v5  ;;  %427 = vst.msk [vmem:[#allocation2 + $0x138] sm:$0xff] %vm387_vm1, %v14354_v8  ;;  %15628 = vmatmul.mubr.msk.f32.vlgmr.msra.gmra.mxu1 %vm387_vm1, %v17379_v30  ;;  %15523 = vmatprep.mubr.msk.f32.mxu0 %vm387_vm1, %v512_v29  ;;  %v17391_v34 = vld [vmem:[#allocation2 + $0xc0] sm:$0xff]  ;;  %v17398_v36 = vld [vmem:[#allocation2 + $0xc8] sm:$0xff] }
  0x29   : > { %428 = vst.msk [vmem:[#allocation2 + $0x140] sm:$0xff] %vm387_vm1, %v14357_v9  ;;  %429 = vst.msk [vmem:[#allocation2 + $0x148] sm:$0xff] %vm387_vm1, %v14358_v10  ;;  %15630 = vmatprep.mubr.msk.f32.mxu1 %vm387_vm1, %v17381_v31  ;;  %v17401_v38 = vld [vmem:[#allocation2 + $0xd0] sm:$0xff]  ;;  %v17408_v40 = vld [vmem:[#allocation2 + $0xd8] sm:$0xff] }
  0x2a   : > { %430 = vst.msk [vmem:[#allocation2 + $0x150] sm:$0xff] %vm387_vm1, %v14361_v11  ;;  %431 = vst.msk [vmem:[#allocation2 + $0x158] sm:$0xff] %vm387_vm1, %v14362_v14  ;;  %v17411_v42 = vld [vmem:[#allocation2 + $0xe0] sm:$0xff]  ;;  %v17418_v44 = vld [vmem:[#allocation2 + $0xe8] sm:$0xff] }
  0x2b   : > { %432 = vst.msk [vmem:[#allocation2 + $0x160] sm:$0xff] %vm387_vm1, %v14365_v15  ;;  %433 = vst.msk [vmem:[#allocation2 + $0x168] sm:$0xff] %vm387_vm1, %v14366_v16  ;;  %15524 = vmatmul.mubr.msk.f32.gmra.mxu0 %vm387_vm1, %v513_v33  ;;  %v17421_v46 = vld [vmem:[#allocation2 + $0xf0] sm:$0xff]  ;;  %v17428_v48 = vld [vmem:[#allocation2 + $0xf8] sm:$0xff] }
  0x2c   : > { %434 = vst.msk [vmem:[#allocation2 + $0x170] sm:$0xff] %vm387_vm1, %v14369_v17  ;;  %435 = vst.msk [vmem:[#allocation2 + $0x178] sm:$0xff] %vm387_vm1, %v14370_v19  ;;  %15631 = vmatmul.mubr.msk.f32.gmra.mxu1 %vm387_vm1, %v17388_v32  ;;  %15526 = vmatprep.mubr.msk.f32.mxu0 %vm387_vm1, %v514_v35  ;;  %v521_v49 = vld [vmem:[#allocation2 + $0x79] sm:$0xff]  ;;  %v522_v51 = vld [vmem:[#allocation2 + $0x81] sm:$0xff] }
  0x2d   : > { %436 = vst.msk [vmem:[#allocation2 + $0x180] sm:$0xff] %vm387_vm1, %v14373_v20  ;;  %437 = vst.msk [vmem:[#allocation2 + $0x188] sm:$0xff] %vm387_vm1, %v14374_v21  ;;  %15633 = vmatprep.mubr.msk.f32.mxu1 %vm387_vm1, %v17391_v34  ;;  %v17431_v50 = vld [vmem:[#allocation2 + $0x100] sm:$0xff]  ;;  %v17438_v52 = vld [vmem:[#allocation2 + $0x108] sm:$0xff] }
  0x2e   : > { %438 = vst.msk [vmem:[#allocation2 + $0x190] sm:$0xff] %vm387_vm1, %v14377_v22  ;;  %439 = vst.msk [vmem:[#allocation2 + $0x198] sm:$0xff] %vm387_vm1, %v14378_v1  ;;  %v523_v53 = vld [vmem:[#allocation2 + $0x89] sm:$0xff]  ;;  %v524_v55 = vld [vmem:[#allocation2 + $0x91] sm:$0xff] }
  0x2f   : > { %440 = vst.msk [vmem:[#allocation2 + $0x1a0] sm:$0xff] %vm387_vm1, %v14381_v24  ;;  %441 = vst.msk [vmem:[#allocation2 + $0x1a8] sm:$0xff] %vm387_vm1, %v14382_v25  ;;  %15527 = vmatmul.mubr.msk.f32.gmra.mxu0 %vm387_vm1, %v515_v37  ;;  %v17441_v54 = vld [vmem:[#allocation2 + $0x110] sm:$0xff]  ;;  %v17448_v56 = vld [vmem:[#allocation2 + $0x118] sm:$0xff] }
  0x30   : > { %442 = vst.msk [vmem:[#allocation2 + $0x1b0] sm:$0xff] %vm387_vm1, %v14385_v26  ;;  %15634 = vmatmul.mubr.msk.f32.gmra.mxu1 %vm387_vm1, %v17398_v36  ;;  %15529 = vmatprep.mubr.msk.f32.mxu0 %vm387_vm1, %v516_v39  ;;  %v525_v57 = vld [vmem:[#allocation2 + $0x99] sm:$0xff]  ;;  %v526_v59 = vld [vmem:[#allocation2 + $0xa1] sm:$0xff]  ;;  %v13299_v60 = vld [vmem:[%s22623_s1 + $0xc] sm:$0xf] }
  0x31   : > { %15636 = vmatprep.mubr.msk.f32.mxu1 %vm387_vm1, %v17401_v38  ;;  %v17451_v58 = vld [vmem:[#allocation2 + $0x120] sm:$0xff]  ;;  %v17461_v61 = vld [vmem:[#allocation2 + $0x128] sm:$0xff]  ;;  %v17464_v0 = vld [vmem:[#allocation2 + $0x130] sm:$0xff]  ;;  %15761 = vmatprep.subr.msk.mxu1 %vm724_vm0, %v13299_v60 }
  0x32   : > { %v527_v63 = vld [vmem:[#allocation2 + $0xa9] sm:$0xff]  ;;  %v528_v2 = vld [vmem:[#allocation2 + $0xb1] sm:$0xff]  ;;  %15762 = vmatpush3.msk.msra.mxu1 %vm724_vm0, %v13299_v60  ;;  %v529_v4 = vld [vmem:[#allocation2 + $0xb9] sm:$0xff] }
  0x33   : > { %15530 = vmatmul.mubr.msk.f32.gmra.mxu0 %vm387_vm1, %v517_v41  ;;  %v17473_v3 = vld [vmem:[#allocation2 + $0x138] sm:$0xff]  ;;  %v17476_v5 = vld [vmem:[#allocation2 + $0x140] sm:$0xff]  ;;  %v17483_v7 = vld [vmem:[#allocation2 + $0x148] sm:$0xff] }
  0x34   : > { %15637 = vmatmul.mubr.msk.f32.gmra.mxu1 %vm387_vm1, %v17408_v40  ;;  %15532 = vmatprep.mubr.msk.f32.mxu0 %vm387_vm1, %v518_v43  ;;  %v530_v6 = vld [vmem:[#allocation2 + $0xc1] sm:$0xff]  ;;  %v531_v8 = vld [vmem:[#allocation2 + $0xc9] sm:$0xff]  ;;  %v532_v10 = vld [vmem:[#allocation2 + $0xd1] sm:$0xff] }
  0x35   : > { %15639 = vmatprep.mubr.msk.f32.mxu1 %vm387_vm1, %v17411_v42  ;;  %v17486_v9 = vld [vmem:[#allocation2 + $0x150] sm:$0xff]  ;;  %v17493_v11 = vld [vmem:[#allocation2 + $0x158] sm:$0xff]  ;;  %v17496_v14 = vld [vmem:[#allocation2 + $0x160] sm:$0xff] }
  0x36   : > { %v533_v12 = vld [vmem:[#allocation2 + $0xd9] sm:$0xff]  ;;  %v534_v15 = vld [vmem:[#allocation2 + $0xe1] sm:$0xff]  ;;  %v535_v17 = vld [vmem:[#allocation2 + $0xe9] sm:$0xff] }
  0x37   : > { %15533 = vmatmul.mubr.msk.f32.gmra.mxu0 %vm387_vm1, %v519_v45  ;;  %v17503_v16 = vld [vmem:[#allocation2 + $0x168] sm:$0xff]  ;;  %v17506_v18 = vld [vmem:[#allocation2 + $0x170] sm:$0xff]  ;;  %v17513_v20 = vld [vmem:[#allocation2 + $0x178] sm:$0xff] }
  0x38   : > { %15640 = vmatmul.mubr.msk.f32.gmra.mxu1 %vm387_vm1, %v17418_v44  ;;  %15535 = vmatprep.mubr.msk.f32.mxu0 %vm387_vm1, %v520_v47  ;;  %v536_v19 = vld [vmem:[#allocation2 + $0xf1] sm:$0xff]  ;;  %v537_v21 = vld [vmem:[#allocation2 + $0xf9] sm:$0xff]  ;;  %v538_v23 = vld [vmem:[#allocation2 + $0x101] sm:$0xff] }
  0x39   : > { %15642 = vmatprep.mubr.msk.f32.mxu1 %vm387_vm1, %v17421_v46  ;;  %v17516_v22 = vld [vmem:[#allocation2 + $0x180] sm:$0xff]  ;;  %v17523_v1 = vld [vmem:[#allocation2 + $0x188] sm:$0xff]  ;;  %v17526_v25 = vld [vmem:[#allocation2 + $0x190] sm:$0xff] }
  0x3a   : > { %v539_v24 = vld [vmem:[#allocation2 + $0x109] sm:$0xff]  ;;  %v540_v26 = vld [vmem:[#allocation2 + $0x111] sm:$0xff]  ;;  %v541_v29 = vld [vmem:[#allocation2 + $0x119] sm:$0xff] }
  0x3b   : > { %15536 = vmatmul.mubr.msk.f32.gmra.mxu0 %vm387_vm1, %v521_v49  ;;  %v17533_v27 = vld [vmem:[#allocation2 + $0x198] sm:$0xff]  ;;  %v17536_v33 = vld [vmem:[#allocation2 + $0x1a0] sm:$0xff]  ;;  %v17543_v37 = vld [vmem:[#allocation2 + $0x1a8] sm:$0xff] }
  0x3c   : > { %15643 = vmatmul.mubr.msk.f32.gmra.mxu1 %vm387_vm1, %v17428_v48  ;;  %15538 = vmatprep.mubr.msk.f32.mxu0 %vm387_vm1, %v522_v51  ;;  %v542_v35 = vld [vmem:[#allocation2 + $0x121] sm:$0xff]  ;;  %v543_v39 = vld [vmem:[#allocation2 + $0x129] sm:$0xff]  ;;  %v544_v41 = vld [vmem:[#allocation2 + $0x131] sm:$0xff] }
  0x3d   : > { %15645 = vmatprep.mubr.msk.f32.mxu1 %vm387_vm1, %v17431_v50  ;;  %v17546_v43 = vld [vmem:[#allocation2 + $0x18] sm:$0xff]  ;;  %v546_v47 = vld [vmem:[#allocation2 + $0x141] sm:$0xff] }
  0x3e   : > { %v545_v45 = vld [vmem:[#allocation2 + $0x139] sm:$0xff]  ;;  %v17556_v51 = vld [vmem:[#allocation2 + $0x28] sm:$0xff] }
  0x3f   : > { %15539 = vmatmul.mubr.msk.f32.gmra.mxu0 %vm387_vm1, %v523_v53  ;;  %v17554_v49 = vld [vmem:[#allocation2 + $0x20] sm:$0xff]  ;;  %v547_v53 = vld [vmem:[#allocation2 + $0x149] sm:$0xff] }
  0x40   : > { %15646 = vmatmul.mubr.msk.f32.gmra.mxu1 %vm387_vm1, %v17438_v52  ;;  %15541 = vmatprep.mubr.msk.f32.mxu0 %vm387_vm1, %v524_v55  ;;  %v548_v55 = vld [vmem:[#allocation2 + $0x151] sm:$0xff]  ;;  %v549_v60 = vld [vmem:[#allocation2 + $0x159] sm:$0xff] }
  0x41   : > { %15648 = vmatprep.mubr.msk.f32.mxu1 %vm387_vm1, %v17441_v54 }
  0x43   : > { %15542 = vmatmul.mubr.msk.f32.gmra.mxu0 %vm387_vm1, %v525_v57  ;;  %v17564_v57 = vld [vmem:[#allocation2 + $0x30] sm:$0xff] }
  0x44   : > { %15649 = vmatmul.mubr.msk.f32.gmra.mxu1 %vm387_vm1, %v17448_v56  ;;  %15544 = vmatprep.mubr.msk.f32.mxu0 %vm387_vm1, %v526_v59  ;;  %v17566_v59 = vld [vmem:[#allocation2 + $0x38] sm:$0xff] }
  0x45   : > { %15651 = vmatprep.mubr.msk.f32.mxu1 %vm387_vm1, %v17451_v58 }
  0x47   : > { %15545 = vmatmul.mubr.msk.f32.gmra.mxu0 %vm387_vm1, %v527_v63  ;;  %v550_v63 = vld [vmem:[#allocation2 + $0x161] sm:$0xff] }
  0x48   : > { %15652 = vmatmul.mubr.msk.f32.gmra.mxu1 %vm387_vm1, %v17461_v61  ;;  %15547 = vmatprep.mubr.msk.f32.mxu0 %vm387_vm1, %v528_v2  ;;  %v17574_v2 = vld [vmem:[#allocation2 + $0x40] sm:$0xff] }
  0x49   : > { %15654 = vmatprep.mubr.msk.f32.mxu1 %vm387_vm1, %v17464_v0 }
  0x4b   : > { %15548 = vmatmul.mubr.msk.f32.gmra.mxu0 %vm387_vm1, %v529_v4  ;;  %v17576_v4 = vld [vmem:[#allocation2 + $0x48] sm:$0xff] }
  0x4c   : > { %15655 = vmatmul.mubr.msk.f32.gmra.mxu1 %vm387_vm1, %v17473_v3  ;;  %15550 = vmatprep.mubr.msk.f32.mxu0 %vm387_vm1, %v530_v6  ;;  %v551_v6 = vld [vmem:[#allocation2 + $0x169] sm:$0xff] }
  0x4d   : > { %15657 = vmatprep.mubr.msk.f32.mxu1 %vm387_vm1, %v17476_v5 }
  0x4f   : > { %15551 = vmatmul.mubr.msk.f32.gmra.mxu0 %vm387_vm1, %v531_v8  ;;  %v552_v8 = vld [vmem:[#allocation2 + $0x171] sm:$0xff] }
  0x50   : > { %15658 = vmatmul.mubr.msk.f32.gmra.mxu1 %vm387_vm1, %v17483_v7  ;;  %15553 = vmatprep.mubr.msk.f32.mxu0 %vm387_vm1, %v532_v10  ;;  %v17584_v10 = vld [vmem:[#allocation2 + $0x50] sm:$0xff] }
  0x51   : > { %15660 = vmatprep.mubr.msk.f32.mxu1 %vm387_vm1, %v17486_v9 }
  0x53   : > { %15554 = vmatmul.mubr.msk.f32.gmra.mxu0 %vm387_vm1, %v533_v12  ;;  %v17586_v12 = vld [vmem:[#allocation2 + $0x58] sm:$0xff] }
  0x54   : > { %15661 = vmatmul.mubr.msk.f32.gmra.mxu1 %vm387_vm1, %v17493_v11  ;;  %15556 = vmatprep.mubr.msk.f32.mxu0 %vm387_vm1, %v534_v15  ;;  %v553_v15 = vld [vmem:[#allocation2 + $0x179] sm:$0xff] }
  0x55   : > { %15663 = vmatprep.mubr.msk.f32.mxu1 %vm387_vm1, %v17496_v14 }
  0x57   : > { %15557 = vmatmul.mubr.msk.f32.gmra.mxu0 %vm387_vm1, %v535_v17  ;;  %v554_v17 = vld [vmem:[#allocation2 + $0x181] sm:$0xff] }
  0x58   : > { %15664 = vmatmul.mubr.msk.f32.gmra.mxu1 %vm387_vm1, %v17503_v16  ;;  %15559 = vmatprep.mubr.msk.f32.mxu0 %vm387_vm1, %v536_v19  ;;  %v17594_v19 = vld [vmem:[#allocation2 + $0x60] sm:$0xff] }
  0x59   : > { %15666 = vmatprep.mubr.msk.f32.mxu1 %vm387_vm1, %v17506_v18 }
  0x5b   : > { %15560 = vmatmul.mubr.msk.f32.gmra.mxu0 %vm387_vm1, %v537_v21  ;;  %v17596_v21 = vld [vmem:[#allocation2 + $0x68] sm:$0xff] }
  0x5c   : > { %15667 = vmatmul.mubr.msk.f32.gmra.mxu1 %vm387_vm1, %v17513_v20  ;;  %15562 = vmatprep.mubr.msk.f32.mxu0 %vm387_vm1, %v538_v23  ;;  %v555_v23 = vld [vmem:[#allocation2 + $0x189] sm:$0xff] }
  0x5d   : > { %15669 = vmatprep.mubr.msk.f32.mxu1 %vm387_vm1, %v17516_v22 }
  0x5f   : > { %15563 = vmatmul.mubr.msk.f32.gmra.mxu0 %vm387_vm1, %v539_v24  ;;  %v556_v24 = vld [vmem:[#allocation2 + $0x191] sm:$0xff] }
  0x60   : > { %15670 = vmatmul.mubr.msk.f32.gmra.mxu1 %vm387_vm1, %v17523_v1  ;;  %15565 = vmatprep.mubr.msk.f32.mxu0 %vm387_vm1, %v540_v26  ;;  %v17604_v26 = vld [vmem:[#allocation2 + $0x70] sm:$0xff] }
  0x61   : > { %15672 = vmatprep.mubr.msk.f32.mxu1 %vm387_vm1, %v17526_v25 }
  0x63   : > { %15566 = vmatmul.mubr.msk.f32.gmra.mxu0 %vm387_vm1, %v541_v29  ;;  %v17606_v29 = vld [vmem:[#allocation2 + $0x78] sm:$0xff] }
  0x64   : > { %15673 = vmatmul.mubr.msk.f32.gmra.mxu1 %vm387_vm1, %v17533_v27  ;;  %15568 = vmatprep.mubr.msk.f32.mxu0 %vm387_vm1, %v542_v35  ;;  %v557_v35 = vld [vmem:[#allocation2 + $0x199] sm:$0xff] }
  0x65   : > { %15675 = vmatprep.mubr.msk.f32.mxu1 %vm387_vm1, %v17536_v33 }
  0x67   : > { %15569 = vmatmul.mubr.msk.f32.gmra.mxu0 %vm387_vm1, %v543_v39  ;;  %v558_v39 = vld [vmem:[#allocation2 + $0x1a1] sm:$0xff] }
  0x68   : > { %15676 = vmatmul.mubr.msk.f32.gmra.mxu1 %vm387_vm1, %v17543_v37  ;;  %15571 = vmatprep.mubr.msk.f32.mxu0 %vm387_vm1, %v544_v41  ;;  %v467_v41 = vld [vmem:[#allocation2 + $0x80] sm:$0xff] }
  0x69   : > { %15763 = vmatprep.mubr.msk.f32.mxu1 %vm387_vm1, %v17546_v43 }
  0x6b   : > { %15572 = vmatmul.mubr.msk.f32.gmra.mxu0 %vm387_vm1, %v545_v45  ;;  %v468_v45 = vld [vmem:[#allocation2 + $0x88] sm:$0xff] }
  0x6c   : > { %15764 = vmatmul.mubr.msk.f32.vlgmr.msra.gmra.mxu1 %vm387_vm1, %v17554_v49  ;;  %15574 = vmatprep.mubr.msk.f32.mxu0 %vm387_vm1, %v546_v47  ;;  %v559_v47 = vld [vmem:[#allocation2 + $0x1a9] sm:$0xff] }
  0x6d   : > { %15766 = vmatprep.mubr.msk.f32.mxu1 %vm387_vm1, %v17556_v51 }
  0x6f   : > { %15575 = vmatmul.mubr.msk.f32.gmra.mxu0 %vm387_vm1, %v547_v53  ;;  %v451_v53 = vld [vmem:[#allocation2] sm:$0xff] }
  0x70   : > { %15767 = vmatmul.mubr.msk.f32.gmra.mxu1 %vm387_vm1, %v17564_v57  ;;  %15577 = vmatprep.mubr.msk.f32.mxu0 %vm387_vm1, %v548_v55  ;;  %v469_v55 = vld [vmem:[#allocation2 + $0x90] sm:$0xff] }
  0x71   : > { %15769 = vmatprep.mubr.msk.f32.mxu1 %vm387_vm1, %v17566_v59 }
  0x73   : > { %15578 = vmatmul.mubr.msk.f32.gmra.mxu0 %vm387_vm1, %v549_v60  ;;  %v470_v60 = vld [vmem:[#allocation2 + $0x98] sm:$0xff] }
  0x74   : > { %15770 = vmatmul.mubr.msk.f32.gmra.mxu1 %vm387_vm1, %v17574_v2  ;;  %15580 = vmatprep.mubr.msk.f32.mxu0 %vm387_vm1, %v550_v63  ;;  %v452_v63 = vld [vmem:[#allocation2 + $0x8] sm:$0xff] }
  0x75   : > { %15772 = vmatprep.mubr.msk.f32.mxu1 %vm387_vm1, %v17576_v4 }
  0x77   : > { %15581 = vmatmul.mubr.msk.f32.gmra.mxu0 %vm387_vm1, %v551_v6  ;;  %v453_v6 = vld [vmem:[#allocation2 + $0x10] sm:$0xff] }
  0x78   : > { %15773 = vmatmul.mubr.msk.f32.gmra.mxu1 %vm387_vm1, %v17584_v10  ;;  %15583 = vmatprep.mubr.msk.f32.mxu0 %vm387_vm1, %v552_v8  ;;  %v13355_v8 = vld [vmem:[%s22623_s1 + $0x10] sm:$0xf] }
  0x79   : > { %15775 = vmatprep.mubr.msk.f32.mxu1 %vm387_vm1, %v17586_v12 }
  0x7b   : > { %15584 = vmatmul.mubr.msk.f32.gmra.mxu0 %vm387_vm1, %v553_v15 }
  0x7c   : > { %15776 = vmatmul.mubr.msk.f32.gmra.mxu1 %vm387_vm1, %v17594_v19  ;;  %15586 = vmatprep.mubr.msk.f32.mxu0 %vm387_vm1, %v554_v17 }
  0x7d   : > { %15778 = vmatprep.mubr.msk.f32.mxu1 %vm387_vm1, %v17596_v21 }
  0x7f   : > { %15587 = vmatmul.mubr.msk.f32.gmra.mxu0 %vm387_vm1, %v555_v23 }
  0x80   : > { %15779 = vmatmul.mubr.msk.f32.gmra.mxu1 %vm387_vm1, %v17604_v26  ;;  %15589 = vmatprep.mubr.msk.f32.mxu0 %vm387_vm1, %v556_v24  ;;  %v17849_v24 = vld [vmem:[#allocation2 + $0xfa] sm:$0xff] }
  0x81   : > { %15781 = vmatprep.mubr.msk.f32.mxu1 %vm387_vm1, %v17606_v29 }
  0x83   : > { %15590 = vmatmul.mubr.msk.f32.gmra.mxu0 %vm387_vm1, %v557_v35  ;;  %v17855_v35 = vld [vmem:[#allocation2 + $0x102] sm:$0xff] }
  0x84   : > { %15782 = vmatmul.mubr.msk.f32.gmra.mxu1 %vm387_vm1, %v467_v41  ;;  %15592 = vmatprep.mubr.msk.f32.mxu0 %vm387_vm1, %v558_v39 }
  0x85   : > { %15784 = vmatprep.mubr.msk.f32.mxu1 %vm387_vm1, %v468_v45 }
  0x87   : > { %15593 = vmatmul.mubr.msk.f32.gmra.mxu0 %vm387_vm1, %v559_v47 }
  0x88   : > { %15785 = vmatmul.mubr.msk.f32.gmra.mxu1 %vm387_vm1, %v469_v55  ;;  %15597 = vmatprep.mubr.msk.f32.mxu0 %vm387_vm1, %v451_v53 }
  0x89   : > { %15787 = vmatprep.mubr.msk.f32.mxu1 %vm387_vm1, %v470_v60 }
  0x8b   : > { %15598 = vmatmul.mubr.msk.f32.vlgmr.msra.gmra.mxu0 %vm387_vm1, %v452_v63 }
  0x8c   : > { %15788 = vmatmul.mubr.msk.f32.gmra.mxu1 %vm387_vm1, %v17375_v28  ;;  %15679 = vmatpush3.msk.msra.mxu0 %vm724_vm0, %v17330_v62  ;;  %v14386_v62 = vunpack.c.h.bf16 %v17344_v13  ;;  %v14426_v28 = vld [vmem:[%s17273_s29 + $0xe0] sm:$0xff]   ;;  %v13411_v13 = vld [vmem:[%s22623_s1 + $0x14] sm:$0xf] }
  0x8d   : > { %15790 = vmatprep.mubr.msk.f32.mxu1 %vm387_vm1, %v17379_v30  ;;  %15600 = vmatprep.mubr.msk.f32.mxu0 %vm387_vm1, %v453_v6  ;;  %v14389_v30 = vunpack.c.l.bf16 %v14426_v28  ;;  %v17888_v6 = vld [vmem:[#allocation2 + $0x11a] sm:$0xff] }
  0x8e   : > { %15844 = vmatprep.subr.msk.mxu0 %vm724_vm0, %v13355_v8  ;;  %443 = vst.msk [vmem:[#allocation2 + $0x1b8] sm:$0xff] %vm387_vm1, %v14386_v62  ;;  %15927 = vmatprep.subr.msk.mxu1 %vm724_vm0, %v13411_v13 }
  0x8f   : > { %15601 = vmatmul.mubr.msk.f32.gmra.mxu0 %vm387_vm1, %v17546_v43  ;;  %444 = vst.msk [vmem:[#allocation2 + $0x1c0] sm:$0xff] %vm387_vm1, %v14389_v30  ;;  %15928 = vmatpush3.msk.msra.mxu1 %vm724_vm0, %v13411_v13 }
  0x90   : > { %15791 = vmatmul.mubr.msk.f32.gmra.mxu1 %vm387_vm1, %v17381_v31  ;;  %15603 = vmatprep.mubr.msk.f32.mxu0 %vm387_vm1, %v17554_v49  ;;  %v14390_v31 = vunpack.c.h.bf16 %v14426_v28  ;;  %v17807_v49 = vld [vmem:[#allocation2 + $0xd2] sm:$0xff]  ;;  %v17894_v28 = vld [vmem:[#allocation2 + $0x122] sm:$0xff] }
  0x91   : > { %15793 = vmatprep.mubr.msk.f32.mxu1 %vm387_vm1, %v17388_v32  ;;  %v1563_v32 = vld [vmem:[#allocation2 + $0x2] sm:$0xff] }
  0x92   : > { %445 = vst.msk [vmem:[#allocation2 + $0x1c8] sm:$0xff] %vm387_vm1, %v14390_v31  ;;  %v17908_v31 = vld [vmem:[#allocation2 + $0x12a] sm:$0xff] }
  0x93   : > { %15604 = vmatmul.mubr.msk.f32.gmra.mxu0 %vm387_vm1, %v17556_v51 }
  0x94   : > { %15794 = vmatmul.mubr.msk.f32.gmra.mxu1 %vm387_vm1, %v17391_v34  ;;  %15606 = vmatprep.mubr.msk.f32.mxu0 %vm387_vm1, %v17564_v57  ;;  %v1564_v34 = vld [vmem:[#allocation2 + $0xa] sm:$0xff]  ;;  %v17817_v57 = vld [vmem:[#allocation2 + $0xda] sm:$0xff] }
  0x95   : > { %15796 = vmatprep.mubr.msk.f32.mxu1 %vm387_vm1, %v17398_v36  ;;  %v1565_v36 = vld [vmem:[#allocation2 + $0x12] sm:$0xff] }
  0x97   : > { %15607 = vmatmul.mubr.msk.f32.gmra.mxu0 %vm387_vm1, %v17566_v59 }
  0x98   : > { %15797 = vmatmul.mubr.msk.f32.gmra.mxu1 %vm387_vm1, %v17401_v38  ;;  %15609 = vmatprep.mubr.msk.f32.mxu0 %vm387_vm1, %v17574_v2  ;;  %v17716_v38 = vld [vmem:[%s22623_s1 + $0x18] sm:$0xf]  ;;  %v17819_v2 = vld [vmem:[#allocation2 + $0xe2] sm:$0xff] }
  0x99   : > { %15799 = vmatprep.mubr.msk.f32.mxu1 %vm387_vm1, %v17408_v40  ;;  %v1566_v40 = vld [vmem:[#allocation2 + $0x1a] sm:$0xff] }
  0x9b   : > { %15610 = vmatmul.mubr.msk.f32.gmra.mxu0 %vm387_vm1, %v17576_v4 }
  0x9c   : > { %15800 = vmatmul.mubr.msk.f32.gmra.mxu1 %vm387_vm1, %v17411_v42  ;;  %15612 = vmatprep.mubr.msk.f32.mxu0 %vm387_vm1, %v17584_v10  ;;  %v1567_v42 = vld [vmem:[#allocation2 + $0x22] sm:$0xff] }
  0x9d   : > { %15802 = vmatprep.mubr.msk.f32.mxu1 %vm387_vm1, %v17418_v44  ;;  %v1568_v44 = vld [vmem:[#allocation2 + $0x2a] sm:$0xff] }
  0x9f   : > { %15613 = vmatmul.mubr.msk.f32.gmra.mxu0 %vm387_vm1, %v17586_v12  ;;  %v17831_v12 = vld [vmem:[#allocation2 + $0xea] sm:$0xff] }
  0xa0   : > { %15803 = vmatmul.mubr.msk.f32.gmra.mxu1 %vm387_vm1, %v17421_v46  ;;  %15615 = vmatprep.mubr.msk.f32.mxu0 %vm387_vm1, %v17594_v19  ;;  %v1569_v46 = vld [vmem:[#allocation2 + $0x32] sm:$0xff] }
  0xa1   : > { %15805 = vmatprep.mubr.msk.f32.mxu1 %vm387_vm1, %v17428_v48  ;;  %v1570_v48 = vld [vmem:[#allocation2 + $0x3a] sm:$0xff]  ;;  %v17837_v19 = vld [vmem:[#allocation2 + $0xf2] sm:$0xff] }
  0xa3   : > { %15616 = vmatmul.mubr.msk.f32.gmra.mxu0 %vm387_vm1, %v17596_v21 }
  0xa4   : > { %15806 = vmatmul.mubr.msk.f32.gmra.mxu1 %vm387_vm1, %v17431_v50  ;;  %15618 = vmatprep.mubr.msk.f32.mxu0 %vm387_vm1, %v17604_v26  ;;  %v1571_v50 = vld [vmem:[#allocation2 + $0x42] sm:$0xff] }
  0xa5   : > { %15808 = vmatprep.mubr.msk.f32.mxu1 %vm387_vm1, %v17438_v52  ;;  %v1572_v52 = vld [vmem:[#allocation2 + $0x4a] sm:$0xff] }
  0xa7   : > { %15619 = vmatmul.mubr.msk.f32.gmra.mxu0 %vm387_vm1, %v17606_v29 }
  0xa8   : > { %15809 = vmatmul.mubr.msk.f32.gmra.mxu1 %vm387_vm1, %v17441_v54  ;;  %15621 = vmatprep.mubr.msk.f32.mxu0 %vm387_vm1, %v467_v41  ;;  %v1573_v54 = vld [vmem:[#allocation2 + $0x52] sm:$0xff] }
  0xa9   : > { %15811 = vmatprep.mubr.msk.f32.mxu1 %vm387_vm1, %v17448_v56  ;;  %v1574_v56 = vld [vmem:[#allocation2 + $0x5a] sm:$0xff] }
  0xab   : > { %15622 = vmatmul.mubr.msk.f32.gmra.mxu0 %vm387_vm1, %v468_v45  ;;  %v17868_v45 = vld [vmem:[#allocation2 + $0x10a] sm:$0xff] }
  0xac   : > { %15812 = vmatmul.mubr.msk.f32.gmra.mxu1 %vm387_vm1, %v17451_v58  ;;  %15624 = vmatprep.mubr.msk.f32.mxu0 %vm387_vm1, %v469_v55  ;;  %v1575_v58 = vld [vmem:[#allocation2 + $0x62] sm:$0xff]  ;;  %v17874_v55 = vld [vmem:[#allocation2 + $0x112] sm:$0xff] }
  0xad   : > { %15814 = vmatprep.mubr.msk.f32.mxu1 %vm387_vm1, %v17461_v61  ;;  %v1576_v61 = vld [vmem:[#allocation2 + $0x6a] sm:$0xff] }
  0xaf   : > { %15625 = vmatmul.mubr.msk.f32.gmra.mxu0 %vm387_vm1, %v470_v60 }
  0xb0   : > { %15815 = vmatmul.mubr.msk.f32.gmra.mxu1 %vm387_vm1, %v17464_v0  ;;  %15680 = vmatprep.mubr.msk.f32.mxu0 %vm387_vm1, %v1563_v32  ;;  %v1577_v0 = vld [vmem:[#allocation2 + $0x72] sm:$0xff] }
  0xb1   : > { %15817 = vmatprep.mubr.msk.f32.mxu1 %vm387_vm1, %v17473_v3  ;;  %v2224_v3 = vld [vmem:[#allocation2 + $0x1b0] sm:$0xff] }
  0xb3   : > { %15681 = vmatmul.mubr.msk.f32.vlgmr.msra.gmra.mxu0 %vm387_vm1, %v1564_v34 }
  0xb4   : > { %15818 = vmatmul.mubr.msk.f32.gmra.mxu1 %vm387_vm1, %v17476_v5  ;;  %15845 = vmatpush3.msk.msra.mxu0 %vm724_vm0, %v13355_v8  ;;  %v1578_v5 = vld [vmem:[#allocation2 + $0x7a] sm:$0xff] }
  0xb5   : > { %15820 = vmatprep.mubr.msk.f32.mxu1 %vm387_vm1, %v17483_v7  ;;  %15683 = vmatprep.mubr.msk.f32.mxu0 %vm387_vm1, %v1565_v36  ;;  %v2225_v7 = vld [vmem:[#allocation2 + $0x1b8] sm:$0xff] }
  0xb6   : > { %16010 = vmatprep.subr.msk.mxu0 %vm724_vm0, %v17716_v38  ;;  %v17914_v36 = vld [vmem:[#allocation2 + $0x132] sm:$0xff] }
  0xb7   : > { %15684 = vmatmul.mubr.msk.f32.gmra.mxu0 %vm387_vm1, %v1566_v40 }
  0xb8   : > { %15821 = vmatmul.mubr.msk.f32.gmra.mxu1 %vm387_vm1, %v17486_v9  ;;  %15686 = vmatprep.mubr.msk.f32.mxu0 %vm387_vm1, %v1567_v42  ;;  %v17761_v9 = vld [vmem:[#allocation2 + $0x82] sm:$0xff] }
  0xb9   : > { %15823 = vmatprep.mubr.msk.f32.mxu1 %vm387_vm1, %v17493_v11  ;;  %v2226_v11 = vld [vmem:[#allocation2 + $0x1c0] sm:$0xff] }
  0xbb   : > { %15687 = vmatmul.mubr.msk.f32.gmra.mxu0 %vm387_vm1, %v1568_v44 }
  0xbc   : > { %15824 = vmatmul.mubr.msk.f32.gmra.mxu1 %vm387_vm1, %v17496_v14  ;;  %15689 = vmatprep.mubr.msk.f32.mxu0 %vm387_vm1, %v1569_v46  ;;  %v1580_v14 = vld [vmem:[#allocation2 + $0x8a] sm:$0xff] }
  0xbd   : > { %15826 = vmatprep.mubr.msk.f32.mxu1 %vm387_vm1, %v17503_v16  ;;  %v17768_v16 = vld [vmem:[#allocation2 + $0x92] sm:$0xff] }
  0xbf   : > { %15690 = vmatmul.mubr.msk.f32.gmra.mxu0 %vm387_vm1, %v1570_v48 }
  0xc0   : > { %15827 = vmatmul.mubr.msk.f32.gmra.mxu1 %vm387_vm1, %v17506_v18  ;;  %15692 = vmatprep.mubr.msk.f32.mxu0 %vm387_vm1, %v1571_v50  ;;  %v17775_v18 = vld [vmem:[#allocation2 + $0x9a] sm:$0xff] }
  0xc1   : > { %15829 = vmatprep.mubr.msk.f32.mxu1 %vm387_vm1, %v17513_v20  ;;  %v17777_v20 = vld [vmem:[#allocation2 + $0xa2] sm:$0xff] }
  0xc3   : > { %15693 = vmatmul.mubr.msk.f32.gmra.mxu0 %vm387_vm1, %v1572_v52 }
  0xc4   : > { %15830 = vmatmul.mubr.msk.f32.gmra.mxu1 %vm387_vm1, %v17516_v22  ;;  %15695 = vmatprep.mubr.msk.f32.mxu0 %vm387_vm1, %v1573_v54  ;;  %v17785_v22 = vld [vmem:[#allocation2 + $0xaa] sm:$0xff] }
  0xc5   : > { %15832 = vmatprep.mubr.msk.f32.mxu1 %vm387_vm1, %v17523_v1  ;;  %v17787_v1 = vld [vmem:[#allocation2 + $0xb2] sm:$0xff] }
  0xc7   : > { %15696 = vmatmul.mubr.msk.f32.gmra.mxu0 %vm387_vm1, %v1574_v56 }
  0xc8   : > { %15833 = vmatmul.mubr.msk.f32.gmra.mxu1 %vm387_vm1, %v17526_v25  ;;  %15698 = vmatprep.mubr.msk.f32.mxu0 %vm387_vm1, %v1575_v58  ;;  %v17795_v25 = vld [vmem:[#allocation2 + $0xba] sm:$0xff] }
  0xc9   : > { %15835 = vmatprep.mubr.msk.f32.mxu1 %vm387_vm1, %v17533_v27  ;;  %v17797_v27 = vld [vmem:[#allocation2 + $0xc2] sm:$0xff] }
  0xcb   : > { %15699 = vmatmul.mubr.msk.f32.gmra.mxu0 %vm387_vm1, %v1576_v61 }
  0xcc   : > { %15836 = vmatmul.mubr.msk.f32.gmra.mxu1 %vm387_vm1, %v17536_v33  ;;  %15701 = vmatprep.mubr.msk.f32.mxu0 %vm387_vm1, %v1577_v0 }
  0xcd   : > { %15838 = vmatprep.mubr.msk.f32.mxu1 %vm387_vm1, %v17543_v37  ;;  %v17805_v37 = vld [vmem:[#allocation2 + $0xca] sm:$0xff] }
  0xcf   : > { %15702 = vmatmul.mubr.msk.f32.gmra.mxu0 %vm387_vm1, %v1578_v5 }
  0xd0   : > { %15839 = vmatmul.mubr.msk.f32.gmra.mxu1 %vm387_vm1, %v2224_v3  ;;  %15704 = vmatprep.mubr.msk.f32.mxu0 %vm387_vm1, %v17761_v9 }
  0xd1   : > { %15841 = vmatprep.mubr.msk.f32.mxu1 %vm387_vm1, %v2225_v7  ;;  %v17968_v7 = vld [vmem:[#allocation2 + $0x15a] sm:$0xff] }
  0xd3   : > { %15705 = vmatmul.mubr.msk.f32.gmra.mxu0 %vm387_vm1, %v1580_v14 }
  0xd4   : > { %15842 = vmatmul.mubr.msk.f32.gmra.mxu1 %vm387_vm1, %v2226_v11  ;;  %15707 = vmatprep.mubr.msk.f32.mxu0 %vm387_vm1, %v17768_v16 }
  0xd5   : > { %15929 = vmatprep.mubr.msk.f32.mxu1 %vm387_vm1, %v1566_v40 }
  0xd7   : > { %15708 = vmatmul.mubr.msk.f32.gmra.mxu0 %vm387_vm1, %v17775_v18 }
  0xd8   : > { %15930 = vmatmul.mubr.msk.f32.vlgmr.msra.gmra.mxu1 %vm387_vm1, %v1567_v42  ;;  %15710 = vmatprep.mubr.msk.f32.mxu0 %vm387_vm1, %v17777_v20 }
  0xd9   : > { %15932 = vmatprep.mubr.msk.f32.mxu1 %vm387_vm1, %v1568_v44  ;;  %v17928_v44 = vld [vmem:[#allocation2 + $0x13a] sm:$0xff] }
  0xdb   : > { %15711 = vmatmul.mubr.msk.f32.gmra.mxu0 %vm387_vm1, %v17785_v22 }
  0xdc   : > { %15933 = vmatmul.mubr.msk.f32.gmra.mxu1 %vm387_vm1, %v1569_v46  ;;  %15713 = vmatprep.mubr.msk.f32.mxu0 %vm387_vm1, %v17787_v1 }
  0xdd   : > { %15935 = vmatprep.mubr.msk.f32.mxu1 %vm387_vm1, %v1570_v48 }
  0xdf   : > { %v15516_v33 = vpop.f32.mrf.mxu0  ;;  %15714 = vmatmul.mubr.msk.f32.gmra.mxu0 %vm387_vm1, %v17795_v25 }
  0xe0   : > { %15936 = vmatmul.mubr.msk.f32.gmra.mxu1 %vm387_vm1, %v1571_v50  ;;  %15716 = vmatprep.mubr.msk.f32.mxu0 %vm387_vm1, %v17797_v27  ;;  %v17934_v50 = vld [vmem:[#allocation2 + $0x142] sm:$0xff]  ;;  %v17996_v33 = vld [vmem:[#allocation2 + $0x172] sm:$0xff] }
  0xe1   : > { %15938 = vmatprep.mubr.msk.f32.mxu1 %vm387_vm1, %v1572_v52  ;;  %v794_v43 = vpop.f32.mrf.mxu0 }
  0xe3   : > { %v17810_v51 = vpop.f32.mrf.mxu0  ;;  %15717 = vmatmul.mubr.msk.f32.gmra.mxu0 %vm387_vm1, %v17805_v37 }
  0xe4   : > { %15939 = vmatmul.mubr.msk.f32.gmra.mxu1 %vm387_vm1, %v1573_v54  ;;  %15719 = vmatprep.mubr.msk.f32.mxu0 %vm387_vm1, %v17807_v49 }
  0xe5   : > { %15941 = vmatprep.mubr.msk.f32.mxu1 %vm387_vm1, %v1574_v56  ;;  %v804_v59 = vpop.f32.mrf.mxu0  ;;  %v17948_v56 = vld [vmem:[#allocation2 + $0x14a] sm:$0xff] }
  0xe6   : > { %v18015_v59 = vld [vmem:[#allocation2 + $0x17a] sm:$0xff] }
  0xe7   : > { %v17824_v10 = vpop.f32.mrf.mxu0  ;;  %15720 = vmatmul.mubr.msk.f32.gmra.mxu0 %vm387_vm1, %v17817_v57 }
  0xe8   : > { %v17821_v4 = vpop.f32.mrf.mxu1  ;;  %15942 = vmatmul.mubr.msk.f32.gmra.mxu1 %vm387_vm1, %v1575_v58  ;;  %15722 = vmatprep.mubr.msk.f32.mxu0 %vm387_vm1, %v17819_v2 }
  0xe9   : > { %15944 = vmatprep.mubr.msk.f32.mxu1 %vm387_vm1, %v1576_v61  ;;  %v17835_v17 = vpop.f32.mrf.mxu0 }
  0xea   : > { %v17833_v15 = vpop.f32.mrf.mxu1 }
  0xeb   : > { %v17842_v23 = vpop.f32.mrf.mxu0  ;;  %15723 = vmatmul.mubr.msk.f32.gmra.mxu0 %vm387_vm1, %v17831_v12 }
  0xec   : > { %v17839_v21 = vpop.f32.mrf.mxu1  ;;  %15945 = vmatmul.mubr.msk.f32.gmra.mxu1 %vm387_vm1, %v1577_v0  ;;  %15725 = vmatprep.mubr.msk.f32.mxu0 %vm387_vm1, %v17837_v19  ;;  %v17954_v0 = vld [vmem:[#allocation2 + $0x152] sm:$0xff] }
  0xed   : > { %15947 = vmatprep.mubr.msk.f32.mxu1 %vm387_vm1, %v1578_v5  ;;  %v17853_v29 = vpop.f32.mrf.mxu0 }
  0xee   : > { %v17851_v26 = vpop.f32.mrf.mxu1 }
  0xef   : > { %v17861_v41 = vpop.f32.mrf.mxu0  ;;  %15726 = vmatmul.mubr.msk.f32.gmra.mxu0 %vm387_vm1, %v17849_v24 }
  0xf0   : > { %v17857_v39 = vpop.f32.mrf.mxu1  ;;  %15948 = vmatmul.mubr.msk.f32.gmra.mxu1 %vm387_vm1, %v17761_v9  ;;  %15728 = vmatprep.mubr.msk.f32.mxu0 %vm387_vm1, %v17855_v35 }
  0xf1   : > { %15950 = vmatprep.mubr.msk.f32.mxu1 %vm387_vm1, %v1580_v14  ;;  %v17872_v53 = vpop.f32.mrf.mxu0  ;;  %v17974_v14 = vld [vmem:[#allocation2 + $0x162] sm:$0xff] }
  0xf2   : > { %v17870_v47 = vpop.f32.mrf.mxu1 }
  0xf3   : > { %v17880_v63 = vpop.f32.mrf.mxu0  ;;  %15729 = vmatmul.mubr.msk.f32.gmra.mxu0 %vm387_vm1, %v17868_v45 }
  0xf4   : > { %v17876_v60 = vpop.f32.mrf.mxu1  ;;  %15951 = vmatmul.mubr.msk.f32.gmra.mxu1 %vm387_vm1, %v17768_v16  ;;  %15731 = vmatprep.mubr.msk.f32.mxu0 %vm387_vm1, %v17874_v55 }
  0xf5   : > { %15953 = vmatprep.mubr.msk.f32.mxu1 %vm387_vm1, %v17775_v18  ;;  %v17892_v62 = vpop.f32.mrf.mxu0 }
  0xf6   : > { %v17890_v8 = vpop.f32.mrf.mxu1 }
  0xf7   : > { %v17900_v13 = vpop.f32.mrf.mxu0  ;;  %15732 = vmatmul.mubr.msk.f32.gmra.mxu0 %vm387_vm1, %v17888_v6 }
  0xf8   : > { %v17896_v30 = vpop.f32.mrf.mxu1  ;;  %15954 = vmatmul.mubr.msk.f32.gmra.mxu1 %vm387_vm1, %v17777_v20  ;;  %15734 = vmatprep.mubr.msk.f32.mxu0 %vm387_vm1, %v17894_v28 }
  0xf9   : > { %15956 = vmatprep.mubr.msk.f32.mxu1 %vm387_vm1, %v17785_v22  ;;  %v17912_v34 = vpop.f32.mrf.mxu0  ;;  %v17989_v22 = vld [vmem:[#allocation2 + $0x16a] sm:$0xff] }
  0xfa   : > { %v17910_v32 = vpop.f32.mrf.mxu1 }
  0xfb   : > { %v17920_v42 = vpop.f32.mrf.mxu0  ;;  %15735 = vmatmul.mubr.msk.f32.gmra.mxu0 %vm387_vm1, %v17908_v31 }
  0xfc   : > { %v17916_v40 = vpop.f32.mrf.mxu1  ;;  %15957 = vmatmul.mubr.msk.f32.gmra.mxu1 %vm387_vm1, %v17787_v1  ;;  %15737 = vmatprep.mubr.msk.f32.mxu0 %vm387_vm1, %v17914_v36 }
  0xfd   : > { %15959 = vmatprep.mubr.msk.f32.mxu1 %vm387_vm1, %v17795_v25  ;;  %v17932_v48 = vpop.f32.mrf.mxu0  ;;  %v13523_v25 = vld [vmem:[%s22623_s1 + $0x1c] sm:$0xf] }
  0xfe   : > { %v17930_v46 = vpop.f32.mrf.mxu1  ;;  %16093 = vmatprep.subr.msk.mxu1 %vm724_vm0, %v13523_v25 }
  0xff   : > { %v17940_v54 = vpop.f32.mrf.mxu0  ;;  %15738 = vmatmul.mubr.msk.f32.gmra.mxu0 %vm387_vm1, %v17928_v44  ;;  %16094 = vmatpush3.msk.msra.mxu1 %vm724_vm0, %v13523_v25 }
 0x100   : > { %v17936_v52 = vpop.f32.mrf.mxu1  ;;  %15960 = vmatmul.mubr.msk.f32.gmra.mxu1 %vm387_vm1, %v17797_v27  ;;  %15740 = vmatprep.mubr.msk.f32.mxu0 %vm387_vm1, %v17934_v50 }
 0x101   : > { %15962 = vmatprep.mubr.msk.f32.mxu1 %vm387_vm1, %v17805_v37  ;;  %v17952_v61 = vpop.f32.mrf.mxu0 }
 0x102   : > { %v17950_v58 = vpop.f32.mrf.mxu1 }
 0x103   : > { %v17960_v5 = vpop.f32.mrf.mxu0  ;;  %15741 = vmatmul.mubr.msk.f32.gmra.mxu0 %vm387_vm1, %v17948_v56 }
 0x104   : > { %v17956_v3 = vpop.f32.mrf.mxu1  ;;  %15963 = vmatmul.mubr.msk.f32.gmra.mxu1 %vm387_vm1, %v17807_v49  ;;  %15743 = vmatprep.mubr.msk.f32.mxu0 %vm387_vm1, %v17954_v0 }
 0x105   : > { %15965 = vmatprep.mubr.msk.f32.mxu1 %vm387_vm1, %v17817_v57  ;;  %v17972_v11 = vpop.f32.mrf.mxu0 }
 0x106   : > { %v17970_v9 = vpop.f32.mrf.mxu1 }
 0x107   : > { %v15546_v18 = vpop.f32.mrf.mxu0  ;;  %15744 = vmatmul.mubr.msk.f32.gmra.mxu0 %vm387_vm1, %v17968_v7 }
 0x108   : > { %v17976_v16 = vpop.f32.mrf.mxu1  ;;  %15966 = vmatmul.mubr.msk.f32.gmra.mxu1 %vm387_vm1, %v17819_v2  ;;  %v17985_v20 = vadd.f32 %v17821_v4, %v15546_v18  ;;  %15746 = vmatprep.mubr.msk.f32.mxu0 %vm387_vm1, %v17974_v14 }
 0x109   : > { %15968 = vmatprep.mubr.msk.f32.mxu1 %vm387_vm1, %v17831_v12  ;;  %v894_v27 = vpop.f32.mrf.mxu0  ;;  %v18020_v12 = vld [vmem:[#allocation2 + $0x182] sm:$0xff] }
 0x10a   : > { %v17991_v1 = vpop.f32.mrf.mxu1  ;;  %v18000_v37 = vadd.f32 %v17833_v15, %v894_v27  ;;  %v18042_v27 = vld [vmem:[#allocation2 + $0x192] sm:$0xff] }
 0x10b   : > { %v15549_v49 = vpop.f32.mrf.mxu0  ;;  %15747 = vmatmul.mubr.msk.f32.gmra.mxu0 %vm387_vm1, %v17989_v22 }
 0x10c   : > { %v18002_v43 = vpop.f32.mrf.mxu1  ;;  %15969 = vmatmul.mubr.msk.f32.gmra.mxu1 %vm387_vm1, %v17837_v19  ;;  %v18011_v57 = vadd.f32 %v17839_v21, %v15549_v49  ;;  %15749 = vmatprep.mubr.msk.f32.mxu0 %vm387_vm1, %v17996_v33 }
 0x10d   : > { %15971 = vmatprep.mubr.msk.f32.mxu1 %vm387_vm1, %v17849_v24  ;;  %v904_v4 = vpop.f32.mrf.mxu0 }
 0x10e   : > { %v18017_v2 = vpop.f32.mrf.mxu1  ;;  %v18023_v15 = vadd.f32 %v17851_v26, %v904_v4  ;;  %v18038_v26 = vld [vmem:[#allocation2 + $0x18a] sm:$0xff] }
 0x10f   : > { %v15552_v21 = vpop.f32.mrf.mxu0  ;;  %15750 = vmatmul.mubr.msk.f32.gmra.mxu0 %vm387_vm1, %v18015_v59 }
 0x110   : > { %v18025_v19 = vpop.f32.mrf.mxu1  ;;  %15972 = vmatmul.mubr.msk.f32.gmra.mxu1 %vm387_vm1, %v17855_v35  ;;  %v18034_v24 = vadd.f32 %v17857_v39, %v15552_v21  ;;  %15752 = vmatprep.mubr.msk.f32.mxu0 %vm387_vm1, %v18020_v12 }
 0x111   : > { %15974 = vmatprep.mubr.msk.f32.mxu1 %vm387_vm1, %v17868_v45  ;;  %v914_v25 = vpop.f32.mrf.mxu0 }
 0x112   : > { %v18040_v18 = vpop.f32.mrf.mxu1  ;;  %v18045_v35 = vadd.f32 %v17870_v47, %v914_v25  ;;  %v18060_v47 = vld [vmem:[#allocation2 + $0x19a] sm:$0xff]  ;;  %v18064_v25 = vld [vmem:[#allocation2 + $0x1a2] sm:$0xff] }
 0x113   : > { %v15555_v39 = vpop.f32.mrf.mxu0  ;;  %15753 = vmatmul.mubr.msk.f32.gmra.mxu0 %vm387_vm1, %v18038_v26 }
 0x114   : > { %22660 = vst [vmem:[#allocation4_spill] sm:$0xff] %v18045_v35  ;;  %v18047_v49 = vpop.f32.mrf.mxu1  ;;  %15975 = vmatmul.mubr.msk.f32.gmra.mxu1 %vm387_vm1, %v17874_v55  ;;  %v18056_v45 = vadd.f32 %v17876_v60, %v15555_v39  ;;  %15755 = vmatprep.mubr.msk.f32.mxu0 %vm387_vm1, %v18042_v27 }
 0x115   : > { %15977 = vmatprep.mubr.msk.f32.mxu1 %vm387_vm1, %v17888_v6  ;;  %v924_v21 = vpop.f32.mrf.mxu0 }
 0x116   : > { %22661 = vst [vmem:[#allocation5_spill] sm:$0xff] %v18056_v45  ;;  %v18062_v4 = vpop.f32.mrf.mxu1  ;;  %v18067_v55 = vadd.f32 %v17890_v8, %v924_v21  ;;  %v18082_v8 = vld [vmem:[#allocation2 + $0x1aa] sm:$0xff] }
 0x117   : > { %v15558_v60 = vpop.f32.mrf.mxu0  ;;  %15756 = vmatmul.mubr.msk.f32.gmra.mxu0 %vm387_vm1, %v18060_v47 }
 0x118   : > { %22662 = vst [vmem:[#allocation6_spill] sm:$0xff] %v18067_v55  ;;  %v18069_v35 = vpop.f32.mrf.mxu1  ;;  %15978 = vmatmul.mubr.msk.f32.gmra.mxu1 %vm387_vm1, %v17894_v28  ;;  %v18078_v6 = vadd.f32 %v17896_v30, %v15558_v60  ;;  %15758 = vmatprep.mubr.msk.f32.mxu0 %vm387_vm1, %v18064_v25  ;;  %v2783_v55 = vld [vmem:[#allocation2 + $0x19] sm:$0xff]  ;;  %v2784_v60 = vld [vmem:[#allocation2 + $0x21] sm:$0xff] }
 0x119   : > { %15980 = vmatprep.mubr.msk.f32.mxu1 %vm387_vm1, %v17908_v31  ;;  %v934_v21 = vpop.f32.mrf.mxu0 }
 0x11a   : > { %22663 = vst [vmem:[#allocation7_spill] sm:$0xff] %v18078_v6  ;;  %v18084_v39 = vpop.f32.mrf.mxu1  ;;  %v18087_v28 = vadd.f32 %v17910_v32, %v934_v21 }
 0x11b   : > { %v15561_v31 = vpop.f32.mrf.mxu0  ;;  %15759 = vmatmul.mubr.msk.f32.gmra.mxu0 %vm387_vm1, %v18082_v8 }
 0x11c   : > { %22664 = vst [vmem:[#allocation8_spill] sm:$0xff] %v18087_v28  ;;  %v18089_v45 = vpop.f32.mrf.mxu1  ;;  %15981 = vmatmul.mubr.msk.f32.gmra.mxu1 %vm387_vm1, %v17914_v36  ;;  %v18098_v30 = vadd.f32 %v17916_v40, %v15561_v31  ;;  %15846 = vmatprep.mubr.msk.f32.mxu0 %vm387_vm1, %v2783_v55  ;;  %v2785_v28 = vld [vmem:[#allocation2 + $0x29] sm:$0xff]  ;;  %v18113_v40 = vld [vmem:[%s22623_s1 + $0x20] sm:$0xf] }
 0x11d   : > { %15983 = vmatprep.mubr.msk.f32.mxu1 %vm387_vm1, %v17928_v44  ;;  %v944_v21 = vpop.f32.mrf.mxu0 }
 0x11e   : > { %v18101_v32 = vpop.f32.mrf.mxu1  ;;  %v18104_v6 = vadd.f32 %v17930_v46, %v944_v21  ;;  %v18124_v46 = vld [vmem:[#allocation2 + $0x31] sm:$0xff]  ;;  %v18128_v21 = vld [vmem:[#allocation2 + $0x39] sm:$0xff] }
 0x11f   : > { %v15564_v44 = vpop.f32.mrf.mxu0  ;;  %15847 = vmatmul.mubr.msk.f32.vlgmr.msra.gmra.mxu0 %vm387_vm1, %v2784_v60  ;;  %v18146_v60 = vld [vmem:[#allocation2 + $0x41] sm:$0xff] }
 0x120   : > { %22665 = vst [vmem:[#allocation9_spill] sm:$0xff] %v18104_v6  ;;  %v18106_v36 = vpop.f32.mrf.mxu1  ;;  %15984 = vmatmul.mubr.msk.f32.gmra.mxu1 %vm387_vm1, %v17934_v50  ;;  %v18119_v55 = vadd.f32 %v17936_v52, %v15564_v44  ;;  %16011 = vmatpush3.msk.msra.mxu0 %vm724_vm0, %v17716_v38  ;;  %v18542_v6 = vld [vmem:[#allocation2 + $0x189] sm:$0xff] }
 0x121   : > { %15986 = vmatprep.mubr.msk.f32.mxu1 %vm387_vm1, %v17948_v56  ;;  %15849 = vmatprep.mubr.msk.f32.mxu0 %vm387_vm1, %v2785_v28  ;;  %v954_v31 = vpop.f32.mrf.mxu0 }
 0x122   : > { %22666 = vst [vmem:[#allocation10_spill] sm:$0xff] %v18119_v55  ;;  %v18126_v50 = vpop.f32.mrf.mxu1  ;;  %16176 = vmatprep.subr.msk.mxu0 %vm724_vm0, %v18113_v40  ;;  %v18133_v56 = vadd.f32 %v17950_v58, %v954_v31  ;;  %v18150_v31 = vld [vmem:[#allocation2 + $0x49] sm:$0xff] }
 0x123   : > { %v15567_v38 = vpop.f32.mrf.mxu0  ;;  %15850 = vmatmul.mubr.msk.f32.gmra.mxu0 %vm387_vm1, %v18124_v46 }
 0x124   : > { %22667 = vst [vmem:[#allocation11_spill] sm:$0xff] %v18133_v56  ;;  %v15674_v52 = vpop.f32.mrf.mxu1  ;;  %15987 = vmatmul.mubr.msk.f32.gmra.mxu1 %vm387_vm1, %v17954_v0  ;;  %v18142_v28 = vadd.f32 %v17956_v3, %v15567_v38  ;;  %15852 = vmatprep.mubr.msk.f32.mxu0 %vm387_vm1, %v18128_v21  ;;  %v18166_v38 = vld [vmem:[#allocation2 + $0x51] sm:$0xff] }
 0x125   : > { %15989 = vmatprep.mubr.msk.f32.mxu1 %vm387_vm1, %v17968_v7  ;;  %v964_v44 = vpop.f32.mrf.mxu0 }
 0x126   : > { %22668 = vst [vmem:[#allocation12_spill] sm:$0xff] %v18142_v28  ;;  %v18148_v58 = vpop.f32.mrf.mxu1  ;;  %v18153_v0 = vadd.f32 %v17970_v9, %v964_v44 }
 0x127   : > { %v15570_v7 = vpop.f32.mrf.mxu0  ;;  %15853 = vmatmul.mubr.msk.f32.gmra.mxu0 %vm387_vm1, %v18146_v60 }
 0x128   : > { %22669 = vst [vmem:[#allocation13_spill] sm:$0xff] %v18153_v0  ;;  %v15677_v52 = vpop.f32.mrf.mxu1  ;;  %15990 = vmatmul.mubr.msk.f32.gmra.mxu1 %vm387_vm1, %v17974_v14  ;;  %v18162_v3 = vadd.f32 %v17976_v16, %v15570_v7  ;;  %15855 = vmatprep.mubr.msk.f32.mxu0 %vm387_vm1, %v18150_v31  ;;  %v18184_v7 = vld [vmem:[#allocation2 + $0x61] sm:$0xff] }
 0x129   : > { %15992 = vmatprep.mubr.msk.f32.mxu1 %vm387_vm1, %v17989_v22  ;;  %v974_v44 = vpop.f32.mrf.mxu0  ;;  %v18168_v52 = vld [vmem:[#allocation2 + $0x59] sm:$0xff] }
 0x12a   : > { %22670 = vst [vmem:[#allocation14_spill] sm:$0xff] %v18162_v3  ;;  %v1554_v9 = vpop.f32.mrf.mxu1  ;;  %v18171_v14 = vadd.f32 %v17991_v1, %v974_v44 }
 0x12b   : > { %v15573_v22 = vpop.f32.mrf.mxu0  ;;  %15856 = vmatmul.mubr.msk.f32.gmra.mxu0 %vm387_vm1, %v18166_v38  ;;  %v18186_v9 = vld [vmem:[#allocation2 + $0x69] sm:$0xff] }
 0x12c   : > { %22671 = vst [vmem:[#allocation15_spill] sm:$0xff] %v18171_v14  ;;  %v15765_v0 = vpop.f32.mrf.mxu1  ;;  %15993 = vmatmul.mubr.msk.f32.gmra.mxu1 %vm387_vm1, %v17996_v33  ;;  %v18180_v16 = vadd.f32 %v18002_v43, %v15573_v22  ;;  %15858 = vmatprep.mubr.msk.f32.mxu0 %vm387_vm1, %v18168_v52 }
 0x12d   : > { %15995 = vmatprep.mubr.msk.f32.mxu1 %vm387_vm1, %v18015_v59  ;;  %v984_v0 = vpop.f32.mrf.mxu0 }
 0x12e   : > { %22672 = vst [vmem:[#allocation16_spill] sm:$0xff] %v18180_v16  ;;  %v2460_v1 = vpop.f32.mrf.mxu1  ;;  %v18189_v33 = vadd.f32 %v18017_v2, %v984_v0  ;;  %v18204_v2 = vld [vmem:[#allocation2 + $0x71] sm:$0xff]  ;;  %v18206_v0 = vld [vmem:[#allocation2 + $0x79] sm:$0xff] }
 0x12f   : > { %v15576_v59 = vpop.f32.mrf.mxu0  ;;  %15859 = vmatmul.mubr.msk.f32.gmra.mxu0 %vm387_vm1, %v18184_v7 }
 0x130   : > { %22673 = vst [vmem:[#allocation17_spill] sm:$0xff] %v18189_v33  ;;  %v18191_v44 = vpop.f32.mrf.mxu1  ;;  %15996 = vmatmul.mubr.msk.f32.gmra.mxu1 %vm387_vm1, %v18020_v12  ;;  %v18200_v43 = vadd.f32 %v18025_v19, %v15576_v59  ;;  %15861 = vmatprep.mubr.msk.f32.mxu0 %vm387_vm1, %v18186_v9 }
 0x131   : > { %22674 = vst [vmem:[#allocation18_spill] sm:$0xff] %v18191_v44  ;;  %15998 = vmatprep.mubr.msk.f32.mxu1 %vm387_vm1, %v18038_v26  ;;  %v994_v1 = vpop.f32.mrf.mxu0 }
 0x132   : > { %22675 = vst [vmem:[#allocation19_spill] sm:$0xff] %v18200_v43  ;;  %v2470_v22 = vpop.f32.mrf.mxu1  ;;  %v18209_v12 = vadd.f32 %v18040_v18, %v994_v1  ;;  %v18224_v18 = vld [vmem:[#allocation2 + $0x81] sm:$0xff]  ;;  %v18228_v1 = vld [vmem:[#allocation2 + $0x89] sm:$0xff] }
 0x133   : > { %v15579_v26 = vpop.f32.mrf.mxu0  ;;  %15862 = vmatmul.mubr.msk.f32.gmra.mxu0 %vm387_vm1, %v18204_v2  ;;  %v14427_v43 = vld [vmem:[%s17273_s29 + $0xe8] sm:$0xff]  }
 0x134   : > { %22676 = vst [vmem:[#allocation20_spill] sm:$0xff] %v18209_v12  ;;  %v18211_v44 = vpop.f32.mrf.mxu1  ;;  %15999 = vmatmul.mubr.msk.f32.gmra.mxu1 %vm387_vm1, %v18042_v27  ;;  %v18220_v19 = vadd.f32 %v18047_v49, %v15579_v26  ;;  %15864 = vmatprep.mubr.msk.f32.mxu0 %vm387_vm1, %v18206_v0  ;;  %v14394_v14 = vunpack.c.h.bf16 %v14427_v43 }
 0x135   : > { %22677 = vst [vmem:[#allocation21_spill] sm:$0xff] %v18211_v44  ;;  %16001 = vmatprep.mubr.msk.f32.mxu1 %vm387_vm1, %v18060_v47  ;;  %v1004_v22 = vpop.f32.mrf.mxu0  ;;  %v3444_v47 = vld [vmem:[#allocation2 + $0x1b2] sm:$0xff] }
 0x136   : > { %22678 = vst [vmem:[#allocation22_spill] sm:$0xff] %v18220_v19  ;;  %v18226_v59 = vpop.f32.mrf.mxu1  ;;  %v18231_v27 = vadd.f32 %v18062_v4, %v1004_v22  ;;  %v18246_v4 = vld [vmem:[#allocation2 + $0x91] sm:$0xff]  ;;  %447 = vst.msk [vmem:[#allocation2 + $0x1d8] sm:$0xff] %vm387_vm1, %v14394_v14 }
 0x137   : > { %22679 = vst [vmem:[#allocation23_spill] sm:$0xff] %v18226_v59  ;;  %v15582_v49 = vpop.f32.mrf.mxu0  ;;  %15865 = vmatmul.mubr.msk.f32.gmra.mxu0 %vm387_vm1, %v18224_v18  ;;  %v18250_v59 = vld [vmem:[#allocation2 + $0x99] sm:$0xff]  ;;  %v18520_v14 = vld [vmem:[#allocation2 + $0x171] sm:$0xff] }
 0x138   : > { %22680 = vst [vmem:[#allocation24_spill] sm:$0xff] %v18231_v27  ;;  %v18233_v44 = vpop.f32.mrf.mxu1  ;;  %16002 = vmatmul.mubr.msk.f32.gmra.mxu1 %vm387_vm1, %v18064_v25  ;;  %v18242_v26 = vadd.f32 %v18069_v35, %v15582_v49  ;;  %15867 = vmatprep.mubr.msk.f32.mxu0 %vm387_vm1, %v18228_v1 }
 0x139   : > { %22681 = vst [vmem:[#allocation25_spill] sm:$0xff] %v18233_v44  ;;  %16004 = vmatprep.mubr.msk.f32.mxu1 %vm387_vm1, %v18082_v8  ;;  %v3445_v44 = vld [vmem:[#allocation2 + $0x1ba] sm:$0xff]  ;;  %v1014_v25 = vpop.f32.mrf.mxu0  ;;  %v3446_v8 = vld [vmem:[#allocation2 + $0x1c2] sm:$0xff] }
 0x13a   : > { %22682 = vst [vmem:[#allocation26_spill] sm:$0xff] %v18242_v26  ;;  %v18248_v22 = vpop.f32.mrf.mxu1  ;;  %v18253_v27 = vadd.f32 %v18084_v39, %v1014_v25 }
 0x13b   : > { %22683 = vst [vmem:[#allocation27_spill] sm:$0xff] %v18248_v22  ;;  %v15585_v35 = vpop.f32.mrf.mxu0  ;;  %15868 = vmatmul.mubr.msk.f32.gmra.mxu0 %vm387_vm1, %v18246_v4  ;;  %v18266_v22 = vld [vmem:[#allocation2 + $0xa1] sm:$0xff] }
 0x13c   : > { %22684 = vst [vmem:[#allocation28_spill] sm:$0xff] %v18253_v27  ;;  %v18255_v19 = vpop.f32.mrf.mxu1  ;;  %16005 = vmatmul.mubr.msk.f32.gmra.mxu1 %vm387_vm1, %v3444_v47  ;;  %v18262_v49 = vadd.f32 %v18089_v45, %v15585_v35  ;;  %15870 = vmatprep.mubr.msk.f32.mxu0 %vm387_vm1, %v18250_v59  ;;  %v18287_v35 = vld [vmem:[#allocation2 + $0xb1] sm:$0xff] }
 0x13d   : > { %22685 = vst [vmem:[#allocation29_spill] sm:$0xff] %v18255_v19  ;;  %16007 = vmatprep.mubr.msk.f32.mxu1 %vm387_vm1, %v3445_v44  ;;  %v1024_v25 = vpop.f32.mrf.mxu0  ;;  %v18270_v19 = vld [vmem:[#allocation2 + $0xa9] sm:$0xff] }
 0x13e   : > { %22686 = vst [vmem:[#allocation30_spill] sm:$0xff] %v18262_v49  ;;  %v18268_v39 = vpop.f32.mrf.mxu1  ;;  %v18273_v47 = vadd.f32 %v18101_v32, %v1024_v25  ;;  %v18443_v49 = vld [vmem:[#allocation2 + $0x139] sm:$0xff] }
 0x13f   : > { %22687 = vst [vmem:[#allocation31_spill] sm:$0xff] %v18268_v39  ;;  %v15588_v44 = vpop.f32.mrf.mxu0  ;;  %15871 = vmatmul.mubr.msk.f32.gmra.mxu0 %vm387_vm1, %v18266_v22 }
 0x140   : > { %22688 = vst [vmem:[#allocation32_spill] sm:$0xff] %v18273_v47  ;;  %v18275_v27 = vpop.f32.mrf.mxu1  ;;  %16008 = vmatmul.mubr.msk.f32.gmra.mxu1 %vm387_vm1, %v3446_v8  ;;  %v18283_v45 = vadd.f32 %v18106_v36, %v15588_v44  ;;  %15873 = vmatprep.mubr.msk.f32.mxu0 %vm387_vm1, %v18270_v19 }
 0x141   : > { %22689 = vst [vmem:[#allocation33_spill] sm:$0xff] %v18275_v27  ;;  %16095 = vmatprep.mubr.msk.f32.mxu1 %vm387_vm1, %v18124_v46  ;;  %v1034_v25 = vpop.f32.mrf.mxu0  ;;  %v18291_v27 = vld [vmem:[#allocation2 + $0xb9] sm:$0xff]  ;;  %v18306_v46 = vld [vmem:[#allocation2 + $0xc1] sm:$0xff] }
 0x142   : > { %22690 = vst [vmem:[#allocation34_spill] sm:$0xff] %v18283_v45  ;;  %v18289_v32 = vpop.f32.mrf.mxu1  ;;  %v18294_v8 = vadd.f32 %v18126_v50, %v1034_v25  ;;  %v18310_v25 = vld [vmem:[#allocation2 + $0xc9] sm:$0xff] }
 0x143   : > { %22691 = vst [vmem:[#allocation35_spill] sm:$0xff] %v18289_v32  ;;  %v15591_v36 = vpop.f32.mrf.mxu0  ;;  %15874 = vmatmul.mubr.msk.f32.gmra.mxu0 %vm387_vm1, %v18287_v35 }
 0x144   : > { %22692 = vst [vmem:[#allocation36_spill] sm:$0xff] %v18294_v8  ;;  %v18296_v39 = vpop.f32.mrf.mxu1  ;;  %16096 = vmatmul.mubr.msk.f32.vlgmr.msra.gmra.mxu1 %vm387_vm1, %v18128_v21  ;;  %15876 = vmatprep.mubr.msk.f32.mxu0 %vm387_vm1, %v18291_v27 }
 0x145   : > { %22693 = vst [vmem:[#allocation37_spill] sm:$0xff] %v18296_v39  ;;  %16098 = vmatprep.mubr.msk.f32.mxu1 %vm387_vm1, %v18146_v60  ;;  %v1044_v50 = vpop.f32.mrf.mxu0  ;;  %v18325_v60 = vld [vmem:[#allocation2 + $0xd1] sm:$0xff] }
 0x146   : > { %v18308_v44 = vpop.f32.mrf.mxu1  ;;  %v18313_v39 = vadd.f32 %v18148_v58, %v1044_v50  ;;  %v18329_v50 = vld [vmem:[#allocation2 + $0xd9] sm:$0xff] }
 0x147   : > { %22694 = vst [vmem:[#allocation38_spill] sm:$0xff] %v18308_v44  ;;  %v15594_v36 = vpop.f32.mrf.mxu0  ;;  %15877 = vmatmul.mubr.msk.f32.gmra.mxu0 %vm387_vm1, %v18306_v46 }
 0x148   : > { %22695 = vst [vmem:[#allocation39_spill] sm:$0xff] %v18313_v39  ;;  %v18315_v21 = vpop.f32.mrf.mxu1  ;;  %16099 = vmatmul.mubr.msk.f32.gmra.mxu1 %vm387_vm1, %v18150_v31  ;;  %15879 = vmatprep.mubr.msk.f32.mxu0 %vm387_vm1, %v18310_v25 }
 0x149   : > { %22696 = vst [vmem:[#allocation40_spill] sm:$0xff] %v18315_v21  ;;  %16101 = vmatprep.mubr.msk.f32.mxu1 %vm387_vm1, %v18166_v38  ;;  %v1054_v58 = vpop.f32.mrf.mxu0  ;;  %v18341_v38 = vld [vmem:[#allocation2 + $0xe1] sm:$0xff] }
 0x14a   : > { %v18327_v44 = vpop.f32.mrf.mxu1 }
 0x14b   : > { %22697 = vst [vmem:[#allocation41_spill] sm:$0xff] %v18327_v44  ;;  %v15599_v31 = vpop.f32.mrf.mxu0  ;;  %15880 = vmatmul.mubr.msk.f32.gmra.mxu0 %vm387_vm1, %v18325_v60  ;;  %v18345_v44 = vld [vmem:[#allocation2 + $0xe9] sm:$0xff] }
 0x14c   : > { %v18331_v21 = vpop.f32.mrf.mxu1  ;;  %16102 = vmatmul.mubr.msk.f32.gmra.mxu1 %vm387_vm1, %v18168_v52  ;;  %15882 = vmatprep.mubr.msk.f32.mxu0 %vm387_vm1, %v18329_v50 }
 0x14d   : > { %22698 = vst [vmem:[#allocation42_spill] sm:$0xff] %v18331_v21  ;;  %16104 = vmatprep.mubr.msk.f32.mxu1 %vm387_vm1, %v18184_v7  ;;  %v1294_v58 = vpop.f32.mrf.mxu0  ;;  %v18359_v7 = vld [vmem:[#allocation2 + $0xf1] sm:$0xff] }
 0x14e   : > { %v18343_v36 = vpop.f32.mrf.mxu1 }
 0x14f   : > { %22699 = vst [vmem:[#allocation43_spill] sm:$0xff] %v18343_v36  ;;  %v18351_v52 = vpop.f32.mrf.mxu0  ;;  %15883 = vmatmul.mubr.msk.f32.gmra.mxu0 %vm387_vm1, %v18341_v38 }
 0x150   : > { %v18347_v21 = vpop.f32.mrf.mxu1  ;;  %16105 = vmatmul.mubr.msk.f32.gmra.mxu1 %vm387_vm1, %v18186_v9  ;;  %15885 = vmatprep.mubr.msk.f32.mxu0 %vm387_vm1, %v18345_v44 }
 0x151   : > { %22700 = vst [vmem:[#allocation44_spill] sm:$0xff] %v18347_v21  ;;  %16107 = vmatprep.mubr.msk.f32.mxu1 %vm387_vm1, %v18204_v2  ;;  %v1304_v58 = vpop.f32.mrf.mxu0  ;;  %v18363_v21 = vld [vmem:[#allocation2 + $0xf9] sm:$0xff]  ;;  %v18377_v2 = vld [vmem:[#allocation2 + $0x101] sm:$0xff] }
 0x152   : > { %v18361_v31 = vpop.f32.mrf.mxu1 }
 0x153   : > { %22701 = vst [vmem:[#allocation45_spill] sm:$0xff] %v18361_v31  ;;  %v18369_v9 = vpop.f32.mrf.mxu0  ;;  %15886 = vmatmul.mubr.msk.f32.gmra.mxu0 %vm387_vm1, %v18359_v7 }
 0x154   : > { %v18365_v36 = vpop.f32.mrf.mxu1  ;;  %16108 = vmatmul.mubr.msk.f32.gmra.mxu1 %vm387_vm1, %v18206_v0  ;;  %15888 = vmatprep.mubr.msk.f32.mxu0 %vm387_vm1, %v18363_v21 }
 0x155   : > { %22702 = vst [vmem:[#allocation46_spill] sm:$0xff] %v18365_v36  ;;  %16110 = vmatprep.mubr.msk.f32.mxu1 %vm387_vm1, %v18224_v18  ;;  %v18381_v31 = vpop.f32.mrf.mxu0  ;;  %v18383_v36 = vld [vmem:[#allocation2 + $0x109] sm:$0xff]  ;;  %v18397_v18 = vld [vmem:[#allocation2 + $0x111] sm:$0xff] }
 0x156   : > { %v18379_v58 = vpop.f32.mrf.mxu1 }
 0x157   : > { %22703 = vst [vmem:[#allocation47_spill] sm:$0xff] %v18379_v58  ;;  %v18389_v32 = vpop.f32.mrf.mxu0  ;;  %15889 = vmatmul.mubr.msk.f32.gmra.mxu0 %vm387_vm1, %v18377_v2 }
 0x158   : > { %v18385_v0 = vpop.f32.mrf.mxu1  ;;  %16111 = vmatmul.mubr.msk.f32.gmra.mxu1 %vm387_vm1, %v18228_v1  ;;  %15891 = vmatprep.mubr.msk.f32.mxu0 %vm387_vm1, %v18383_v36 }
 0x159   : > { %22704 = vst [vmem:[#allocation48_spill] sm:$0xff] %v18385_v0  ;;  %16113 = vmatprep.mubr.msk.f32.mxu1 %vm387_vm1, %v18246_v4  ;;  %v18401_v39 = vpop.f32.mrf.mxu0  ;;  %v18403_v0 = vld [vmem:[#allocation2 + $0x119] sm:$0xff]  ;;  %v18417_v4 = vld [vmem:[#allocation2 + $0x121] sm:$0xff] }
 0x15a   : > { %v18399_v58 = vpop.f32.mrf.mxu1 }
 0x15b   : > { %22705 = vst [vmem:[#allocation49_spill] sm:$0xff] %v18399_v58  ;;  %v18409_v8 = vpop.f32.mrf.mxu0  ;;  %15892 = vmatmul.mubr.msk.f32.gmra.mxu0 %vm387_vm1, %v18397_v18 }
 0x15c   : > { %v18405_v1 = vpop.f32.mrf.mxu1  ;;  %16114 = vmatmul.mubr.msk.f32.gmra.mxu1 %vm387_vm1, %v18250_v59  ;;  %15894 = vmatprep.mubr.msk.f32.mxu0 %vm387_vm1, %v18403_v0 }
 0x15d   : > { %22706 = vst [vmem:[#allocation50_spill] sm:$0xff] %v18405_v1  ;;  %16116 = vmatprep.mubr.msk.f32.mxu1 %vm387_vm1, %v18266_v22  ;;  %v18421_v45 = vpop.f32.mrf.mxu0  ;;  %v18423_v1 = vld [vmem:[#allocation2 + $0x129] sm:$0xff]  ;;  %v18437_v22 = vld [vmem:[#allocation2 + $0x131] sm:$0xff] }
 0x15e   : > { %v18419_v58 = vpop.f32.mrf.mxu1 }
 0x15f   : > { %22707 = vst [vmem:[#allocation51_spill] sm:$0xff] %v18419_v58  ;;  %v18429_v47 = vpop.f32.mrf.mxu0  ;;  %15895 = vmatmul.mubr.msk.f32.gmra.mxu0 %vm387_vm1, %v18417_v4 }
 0x160   : > { %v18425_v59 = vpop.f32.mrf.mxu1  ;;  %16117 = vmatmul.mubr.msk.f32.gmra.mxu1 %vm387_vm1, %v18270_v19  ;;  %15897 = vmatprep.mubr.msk.f32.mxu0 %vm387_vm1, %v18423_v1 }
 0x161   : > { %22708 = vst [vmem:[#allocation52_spill] sm:$0xff] %v18425_v59  ;;  %16119 = vmatprep.mubr.msk.f32.mxu1 %vm387_vm1, %v18287_v35  ;;  %v18441_v59 = vpop.f32.mrf.mxu0  ;;  %v18457_v35 = vld [vmem:[#allocation2 + $0x141] sm:$0xff] }
 0x162   : > { %v18439_v58 = vpop.f32.mrf.mxu1 }
 0x163   : > { %22709 = vst [vmem:[#allocation53_spill] sm:$0xff] %v18439_v58  ;;  %v18449_v26 = vpop.f32.mrf.mxu0  ;;  %15898 = vmatmul.mubr.msk.f32.gmra.mxu0 %vm387_vm1, %v18437_v22 }
 0x164   : > { %v18445_v19 = vpop.f32.mrf.mxu1  ;;  %16120 = vmatmul.mubr.msk.f32.gmra.mxu1 %vm387_vm1, %v18291_v27  ;;  %15900 = vmatprep.mubr.msk.f32.mxu0 %vm387_vm1, %v18443_v49 }
 0x165   : > { %22710 = vst [vmem:[#allocation54_spill] sm:$0xff] %v18445_v19  ;;  %16122 = vmatprep.mubr.msk.f32.mxu1 %vm387_vm1, %v18306_v46  ;;  %v18461_v12 = vpop.f32.mrf.mxu0  ;;  %v18463_v19 = vld [vmem:[#allocation2 + $0x149] sm:$0xff]  ;;  %v14393_v46 = vunpack.c.l.bf16 %v14427_v43 }
 0x166   : > { %v18459_v58 = vpop.f32.mrf.mxu1 }
 0x167   : > { %22711 = vst [vmem:[#allocation55_spill] sm:$0xff] %v18459_v58  ;;  %v18470_v33 = vpop.f32.mrf.mxu0  ;;  %15901 = vmatmul.mubr.msk.f32.gmra.mxu0 %vm387_vm1, %v18457_v35  ;;  %v18478_v58 = vld [vmem:[#allocation2 + $0x151] sm:$0xff]  ;;  %446 = vst.msk [vmem:[#allocation2 + $0x1d0] sm:$0xff] %vm387_vm1, %v14393_v46  ;;  %v18500_v46 = vld [vmem:[#allocation2 + $0x161] sm:$0xff] }
 0x168   : > { %v18465_v27 = vpop.f32.mrf.mxu1  ;;  %16123 = vmatmul.mubr.msk.f32.gmra.mxu1 %vm387_vm1, %v18310_v25  ;;  %15903 = vmatprep.mubr.msk.f32.mxu0 %vm387_vm1, %v18463_v19  ;;  %v18484_v25 = vld [vmem:[#allocation2 + $0x159] sm:$0xff] }
 0x169   : > { %22712 = vst [vmem:[#allocation56_spill] sm:$0xff] %v18465_v27  ;;  %16125 = vmatprep.mubr.msk.f32.mxu1 %vm387_vm1, %v18325_v60  ;;  %v18482_v27 = vpop.f32.mrf.mxu0 }
 0x16a   : > { %v18480_v16 = vpop.f32.mrf.mxu1 }
 0x16b   : > { %22713 = vst [vmem:[#allocation57_spill] sm:$0xff] %v18480_v16  ;;  %v18491_v60 = vpop.f32.mrf.mxu0  ;;  %15904 = vmatmul.mubr.msk.f32.gmra.mxu0 %vm387_vm1, %v18478_v58 }
 0x16c   : > { %v18487_v3 = vpop.f32.mrf.mxu1  ;;  %16126 = vmatmul.mubr.msk.f32.gmra.mxu1 %vm387_vm1, %v18329_v50  ;;  %15906 = vmatprep.mubr.msk.f32.mxu0 %vm387_vm1, %v18484_v25  ;;  %v18506_v50 = vld [vmem:[#allocation2 + $0x169] sm:$0xff] }
 0x16d   : > { %22714 = vst [vmem:[#allocation58_spill] sm:$0xff] %v18487_v3  ;;  %16128 = vmatprep.mubr.msk.f32.mxu1 %vm387_vm1, %v18341_v38  ;;  %v18504_v3 = vpop.f32.mrf.mxu0 }
 0x16e   : > { %v18502_v43 = vpop.f32.mrf.mxu1 }
 0x16f   : > { %22715 = vst [vmem:[#allocation59_spill] sm:$0xff] %v18502_v43  ;;  %v18512_v28 = vpop.f32.mrf.mxu0  ;;  %15907 = vmatmul.mubr.msk.f32.gmra.mxu0 %vm387_vm1, %v18500_v46 }
 0x170   : > { %v18508_v16 = vpop.f32.mrf.mxu1  ;;  %16129 = vmatmul.mubr.msk.f32.gmra.mxu1 %vm387_vm1, %v18345_v44  ;;  %15909 = vmatprep.mubr.msk.f32.mxu0 %vm387_vm1, %v18506_v50 }
 0x171   : > { %22716 = vst [vmem:[#allocation60_spill] sm:$0xff] %v18508_v16  ;;  %16131 = vmatprep.mubr.msk.f32.mxu1 %vm387_vm1, %v18359_v7  ;;  %v18524_v43 = vpop.f32.mrf.mxu0  ;;  %v18526_v16 = vld [vmem:[#allocation2 + $0x179] sm:$0xff]  ;;  %v18538_v7 = vld [vmem:[#allocation2 + $0x181] sm:$0xff] }
 0x172   : > { %v18522_v38 = vpop.f32.mrf.mxu1 }
 0x173   : > { %22717 = vst [vmem:[#allocation61_spill] sm:$0xff] %v18522_v38  ;;  %v15682_v56 = vpop.f32.mrf.mxu0  ;;  %15910 = vmatmul.mubr.msk.f32.gmra.mxu0 %vm387_vm1, %v18520_v14 }
 0x174   : > { %v18528_v44 = vpop.f32.mrf.mxu1  ;;  %16132 = vmatmul.mubr.msk.f32.gmra.mxu1 %vm387_vm1, %v18363_v21  ;;  %15912 = vmatprep.mubr.msk.f32.mxu0 %vm387_vm1, %v18526_v16  ;;  %v1310_v21 = vadd.f32 %v18351_v52, %v17810_v51 }
 0x175   : > { %22718 = vst [vmem:[#allocation62_spill] sm:$0xff] %v18528_v44  ;;  %16134 = vmatprep.mubr.msk.f32.mxu1 %vm387_vm1, %v18377_v2  ;;  %v1850_v55 = vpop.f32.mrf.mxu0 }
 0x176   : > { %v18540_v38 = vpop.f32.mrf.mxu1  ;;  %v18558_v55 = vld [vmem:[#allocation2 + $0x191] sm:$0xff] }
 0x177   : > { %22719 = vst [vmem:[#allocation63_spill] sm:$0xff] %v18540_v38  ;;  %v15685_v44 = vpop.f32.mrf.mxu0  ;;  %15913 = vmatmul.mubr.msk.f32.gmra.mxu0 %vm387_vm1, %v18538_v7 }
 0x178   : > { %v18546_v56 = vpop.f32.mrf.mxu1  ;;  %16135 = vmatmul.mubr.msk.f32.gmra.mxu1 %vm387_vm1, %v18383_v36  ;;  %v18554_v2 = vadd.f32 %v15685_v44, %v1310_v21  ;;  %15915 = vmatprep.mubr.msk.f32.mxu0 %vm387_vm1, %v18542_v6  ;;  %v1320_v36 = vadd.f32 %v18369_v9, %v17824_v10  ;;  %v1315_v44 = vadd.f32 %v18381_v31, %v17835_v17  ;;  %v18580_v10 = vld [vmem:[#allocation2 + $0x1a1] sm:$0xff] }
 0x179   : > { %22720 = vst [vmem:[#allocation64_spill] sm:$0xff] %v18546_v56  ;;  %16137 = vmatprep.mubr.msk.f32.mxu1 %vm387_vm1, %v18397_v18  ;;  %v1860_v52 = vpop.f32.mrf.mxu0  ;;  %v18562_v56 = vld [vmem:[#allocation2 + $0x199] sm:$0xff]  ;;  %v1325_v31 = vadd.f32 %v18401_v39, %v17853_v29  ;;  %v1335_v39 = vadd.f32 %v18421_v45, %v17872_v53  ;;  %v1345_v45 = vadd.f32 %v18441_v59, %v17892_v62 }
 0x17a   : > { %v18560_v51 = vpop.f32.mrf.mxu1  ;;  %v18584_v52 = vld [vmem:[#allocation2 + $0x1a9] sm:$0xff] }
 0x17b   : > { %22721 = vst [vmem:[#allocation65_spill] sm:$0xff] %v18560_v51  ;;  %v15688_v18 = vpop.f32.mrf.mxu0  ;;  %15916 = vmatmul.mubr.msk.f32.gmra.mxu0 %vm387_vm1, %v18558_v55 }
 0x17c   : > { %v18566_v38 = vpop.f32.mrf.mxu1  ;;  %16138 = vmatmul.mubr.msk.f32.gmra.mxu1 %vm387_vm1, %v18403_v0  ;;  %v18576_v21 = vadd.f32 %v15688_v18, %v1320_v36  ;;  %15918 = vmatprep.mubr.msk.f32.mxu0 %vm387_vm1, %v18562_v56  ;;  %v18608_v18 = vld [vmem:[#allocation2 + $0x1b9] sm:$0xff] }
 0x17d   : > { %22722 = vst [vmem:[#allocation66_spill] sm:$0xff] %v18566_v38  ;;  %16140 = vmatprep.mubr.msk.f32.mxu1 %vm387_vm1, %v18417_v4  ;;  %v1870_v0 = vpop.f32.mrf.mxu0  ;;  %v1330_v38 = vadd.f32 %v18389_v32, %v17842_v23  ;;  %v18604_v23 = vld [vmem:[#allocation2 + $0x1b1] sm:$0xff] }
 0x17e   : > { %v18582_v9 = vpop.f32.mrf.mxu1  ;;  %v18588_v51 = vadd.f32 %v1870_v0, %v1315_v44  ;;  %v1340_v44 = vadd.f32 %v18409_v8, %v17861_v41  ;;  %v18628_v41 = vld [vmem:[#allocation2 + $0x1c1] sm:$0xff] }
 0x17f   : > { %v15691_v17 = vpop.f32.mrf.mxu0  ;;  %15919 = vmatmul.mubr.msk.f32.gmra.mxu0 %vm387_vm1, %v18580_v10 }
 0x180   : > { %v18590_v4 = vpop.f32.mrf.mxu1  ;;  %16141 = vmatmul.mubr.msk.f32.gmra.mxu1 %vm387_vm1, %v18423_v1  ;;  %v18600_v36 = vadd.f32 %v15691_v17, %v1330_v38  ;;  %15921 = vmatprep.mubr.msk.f32.mxu0 %vm387_vm1, %v18584_v52  ;;  %v4003_v17 = vld [vmem:[#allocation2 + $0x30] sm:$0xff] }
 0x181   : > { %16143 = vmatprep.mubr.msk.f32.mxu1 %vm387_vm1, %v18437_v22  ;;  %v1880_v1 = vpop.f32.mrf.mxu0 }
 0x182   : > { %v18606_v32 = vpop.f32.mrf.mxu1  ;;  %v18612_v0 = vadd.f32 %v1880_v1, %v1325_v31  ;;  %v1350_v31 = vadd.f32 %v18429_v47, %v17880_v63  ;;  %v4004_v63 = vld [vmem:[#allocation2 + $0x38] sm:$0xff] }
 0x183   : > { %v15694_v29 = vpop.f32.mrf.mxu0  ;;  %15922 = vmatmul.mubr.msk.f32.gmra.mxu0 %vm387_vm1, %v18604_v23 }
 0x184   : > { %v18614_v22 = vpop.f32.mrf.mxu1  ;;  %16144 = vmatmul.mubr.msk.f32.gmra.mxu1 %vm387_vm1, %v18443_v49  ;;  %v18624_v38 = vadd.f32 %v15694_v29, %v1340_v44  ;;  %15924 = vmatprep.mubr.msk.f32.mxu0 %vm387_vm1, %v18608_v18 }
 0x185   : > { %16146 = vmatprep.mubr.msk.f32.mxu1 %vm387_vm1, %v18457_v35  ;;  %v1890_v49 = vpop.f32.mrf.mxu0 }
 0x186   : > { %v18630_v8 = vpop.f32.mrf.mxu1  ;;  %v18634_v1 = vadd.f32 %v1890_v49, %v1335_v39  ;;  %v4005_v39 = vld [vmem:[#allocation2 + $0x40] sm:$0xff] }
 0x187   : > { %v15697_v53 = vpop.f32.mrf.mxu0  ;;  %15925 = vmatmul.mubr.msk.f32.gmra.mxu0 %vm387_vm1, %v18628_v41 }
 0x188   : > { %v18636_v35 = vpop.f32.mrf.mxu1  ;;  %16147 = vmatmul.mubr.msk.f32.gmra.mxu1 %vm387_vm1, %v18463_v19  ;;  %v18646_v44 = vadd.f32 %v15697_v53, %v1350_v31  ;;  %16012 = vmatprep.mubr.msk.f32.mxu0 %vm387_vm1, %v4003_v17  ;;  %v1360_v19 = vadd.f32 %v18449_v26, %v17900_v13  ;;  %v4006_v13 = vld [vmem:[#allocation2 + $0x48] sm:$0xff]  ;;  %v4007_v17 = vld [vmem:[#allocation2 + $0x50] sm:$0xff]  ;;  %v1370_v31 = vadd.f32 %v18470_v33, %v17920_v42  ;;  %v4008_v42 = vld [vmem:[#allocation2 + $0x58] sm:$0xff] }
 0x189   : > { %22723 = vst [vmem:[#allocation67_spill] sm:$0xff] %v18636_v35  ;;  %16149 = vmatprep.mubr.msk.f32.mxu1 %vm387_vm1, %v18478_v58  ;;  %v1900_v29 = vpop.f32.mrf.mxu0  ;;  %v1355_v58 = vadd.f32 %v18461_v12, %v17912_v34 }
 0x18a   : > { %v18649_v47 = vpop.f32.mrf.mxu1  ;;  %v18653_v49 = vadd.f32 %v1900_v29, %v1345_v45 }
 0x18b   : > { %22724 = vst [vmem:[#allocation68_spill] sm:$0xff] %v18649_v47  ;;  %v15700_v62 = vpop.f32.mrf.mxu0  ;;  %16013 = vmatmul.mubr.msk.f32.vlgmr.msra.gmra.mxu0 %vm387_vm1, %v4004_v63  ;;  %v4009_v63 = vld [vmem:[#allocation2 + $0x60] sm:$0xff] }
 0x18c   : > { %v18655_v35 = vpop.f32.mrf.mxu1  ;;  %16150 = vmatmul.mubr.msk.f32.gmra.mxu1 %vm387_vm1, %v18484_v25  ;;  %v18664_v59 = vadd.f32 %v15700_v62, %v1360_v19  ;;  %16177 = vmatpush3.msk.msra.mxu0 %vm724_vm0, %v18113_v40  ;;  %v1365_v40 = vadd.f32 %v18482_v27, %v17932_v48  ;;  %v1375_v48 = vadd.f32 %v18504_v3, %v17952_v61  ;;  %v4011_v62 = vld [vmem:[#allocation2 + $0x70] sm:$0xff] }
 0x18d   : > { %22725 = vst [vmem:[#allocation69_spill] sm:$0xff] %v18655_v35  ;;  %16152 = vmatprep.mubr.msk.f32.mxu1 %vm387_vm1, %v18500_v46  ;;  %16015 = vmatprep.mubr.msk.f32.mxu0 %vm387_vm1, %v4005_v39  ;;  %v1910_v25 = vpop.f32.mrf.mxu0  ;;  %v1385_v61 = vadd.f32 %v18524_v43, %v17972_v11  ;;  %v4014_v43 = vld [vmem:[#allocation2 + $0x88] sm:$0xff]  ;;  %v22782_v35 = vld [vmem:[#allocation36_spill] sm:$0xff] }
 0x18e   : > { %v18669_v26 = vpop.f32.mrf.mxu1  ;;  %v18673_v53 = vadd.f32 %v1910_v25, %v1355_v58 }
 0x18f   : > { %22726 = vst [vmem:[#allocation70_spill] sm:$0xff] %v18669_v26  ;;  %v15703_v34 = vpop.f32.mrf.mxu0  ;;  %16016 = vmatmul.mubr.msk.f32.gmra.mxu0 %vm387_vm1, %v4006_v13 }
 0x190   : > { %v15840_v46 = vpop.f32.mrf.mxu1  ;;  %16153 = vmatmul.mubr.msk.f32.gmra.mxu1 %vm387_vm1, %v18506_v50  ;;  %v18682_v12 = vadd.f32 %v15703_v34, %v1370_v31  ;;  %16018 = vmatprep.mubr.msk.f32.mxu0 %vm387_vm1, %v4007_v17  ;;  %v1380_v50 = vadd.f32 %v18491_v60, %v17940_v54  ;;  %v4010_v54 = vld [vmem:[#allocation2 + $0x68] sm:$0xff]  ;;  %v4013_v17 = vld [vmem:[#allocation2 + $0x80] sm:$0xff] }
 0x191   : > { %16155 = vmatprep.mubr.msk.f32.mxu1 %vm387_vm1, %v18520_v14  ;;  %v1920_v45 = vpop.f32.mrf.mxu0 }
 0x192   : > { %v18685_v33 = vpop.f32.mrf.mxu1  ;;  %v18689_v29 = vadd.f32 %v1920_v45, %v1365_v40  ;;  %v4015_v40 = vld [vmem:[#allocation2 + $0x90] sm:$0xff] }
 0x193   : > { %22727 = vst [vmem:[#allocation71_spill] sm:$0xff] %v18685_v33  ;;  %v15706_v14 = vpop.f32.mrf.mxu0  ;;  %16019 = vmatmul.mubr.msk.f32.gmra.mxu0 %vm387_vm1, %v4008_v42  ;;  %v22776_v33 = vld [vmem:[#allocation32_spill] sm:$0xff] }
 0x194   : > { %v15843_v39 = vpop.f32.mrf.mxu1  ;;  %16156 = vmatmul.mubr.msk.f32.gmra.mxu1 %vm387_vm1, %v18526_v16  ;;  %v18698_v27 = vadd.f32 %v15706_v14, %v1380_v50  ;;  %16021 = vmatprep.mubr.msk.f32.mxu0 %vm387_vm1, %v4009_v63  ;;  %v1390_v16 = vadd.f32 %v18512_v28, %v17960_v5  ;;  %v4012_v5 = vld [vmem:[#allocation2 + $0x78] sm:$0xff]  ;;  %v4017_v50 = vld [vmem:[#allocation2 + $0xa0] sm:$0xff] }
 0x195   : > { %16158 = vmatprep.mubr.msk.f32.mxu1 %vm387_vm1, %v18538_v7  ;;  %v1930_v19 = vpop.f32.mrf.mxu0 }
 0x196   : > { %v2720_v60 = vpop.f32.mrf.mxu1  ;;  %v18703_v58 = vadd.f32 %v1930_v19, %v1375_v48  ;;  %v4018_v48 = vld [vmem:[#allocation2 + $0xa8] sm:$0xff]  ;;  %v22733_v19 = vld [vmem:[#allocation4_spill] sm:$0xff] }
 0x197   : > { %v15709_v7 = vpop.f32.mrf.mxu0  ;;  %16022 = vmatmul.mubr.msk.f32.gmra.mxu0 %vm387_vm1, %v4010_v54  ;;  %v4019_v60 = vld [vmem:[#allocation2 + $0xb0] sm:$0xff] }
 0x198   : > { %v15931_v13 = vpop.f32.mrf.mxu1  ;;  %16159 = vmatmul.mubr.msk.f32.gmra.mxu1 %vm387_vm1, %v18542_v6  ;;  %v18712_v3 = vadd.f32 %v15709_v7, %v1390_v16  ;;  %16024 = vmatprep.mubr.msk.f32.mxu0 %vm387_vm1, %v4011_v62 }
 0x199   : > { %16161 = vmatprep.mubr.msk.f32.mxu1 %vm387_vm1, %v18558_v55  ;;  %v1940_v25 = vpop.f32.mrf.mxu0  ;;  %v4020_v13 = vld [vmem:[#allocation2 + $0xb8] sm:$0xff] }
 0x19a   : > { %v3680_v28 = vpop.f32.mrf.mxu1  ;;  %v18715_v31 = vadd.f32 %v1940_v25, %v1385_v61 }
 0x19b   : > { %v15712_v46 = vpop.f32.mrf.mxu0  ;;  %16025 = vmatmul.mubr.msk.f32.gmra.mxu0 %vm387_vm1, %v4012_v5  ;;  %v4021_v5 = vld [vmem:[#allocation2 + $0xc0] sm:$0xff]  ;;  %v22737_v28 = vld [vmem:[#allocation6_spill] sm:$0xff] }
 0x19c   : > { %v18717_v6 = vpop.f32.mrf.mxu1  ;;  %16162 = vmatmul.mubr.msk.f32.gmra.mxu1 %vm387_vm1, %v18562_v56  ;;  %v18725_v11 = vadd.f32 %v15712_v46, %v17985_v20  ;;  %16027 = vmatprep.mubr.msk.f32.mxu0 %vm387_vm1, %v4013_v17 }
 0x19d   : > { %22728 = vst [vmem:[#allocation72_spill] sm:$0xff] %v18717_v6  ;;  %16164 = vmatprep.mubr.msk.f32.mxu1 %vm387_vm1, %v18580_v10  ;;  %v1950_v34 = vpop.f32.mrf.mxu0  ;;  %v4016_v10 = vld [vmem:[#allocation2 + $0x98] sm:$0xff] }
 0x19e   : > { %v3690_v55 = vpop.f32.mrf.mxu1  ;;  %v18729_v42 = vadd.f32 %v1950_v34, %v18000_v37  ;;  %v4022_v34 = vld [vmem:[#allocation2 + $0xc8] sm:$0xff] }
 0x19f   : > { %v15715_v56 = vpop.f32.mrf.mxu0  ;;  %16028 = vmatmul.mubr.msk.f32.gmra.mxu0 %vm387_vm1, %v4014_v43  ;;  %v22739_v43 = vld [vmem:[#allocation7_spill] sm:$0xff] }
 0x1a0   : > { %v18731_v45 = vpop.f32.mrf.mxu1  ;;  %16165 = vmatmul.mubr.msk.f32.gmra.mxu1 %vm387_vm1, %v18584_v52  ;;  %v18739_v20 = vadd.f32 %v15715_v56, %v18011_v57  ;;  %16030 = vmatprep.mubr.msk.f32.mxu0 %vm387_vm1, %v4015_v40  ;;  %v4664_v57 = vld [vmem:[#allocation2 + $0x1c9] sm:$0xff] }
 0x1a1   : > { %22729 = vst [vmem:[#allocation73_spill] sm:$0xff] %v18731_v45  ;;  %16167 = vmatprep.mubr.msk.f32.mxu1 %vm387_vm1, %v18604_v23  ;;  %v1960_v37 = vpop.f32.mrf.mxu0  ;;  %v22772_v45 = vld [vmem:[#allocation28_spill] sm:$0xff] }
 0x1a2   : > { %v18742_v63 = vpop.f32.mrf.mxu1  ;;  %v18745_v39 = vadd.f32 %v1960_v37, %v18023_v15  ;;  %v22741_v37 = vld [vmem:[#allocation8_spill] sm:$0xff] }
 0x1a3   : > { %22730 = vst [vmem:[#allocation74_spill] sm:$0xff] %v18742_v63  ;;  %v15718_v14 = vpop.f32.mrf.mxu0  ;;  %16031 = vmatmul.mubr.msk.f32.gmra.mxu0 %vm387_vm1, %v4016_v10  ;;  %v4023_v10 = vld [vmem:[#allocation2 + $0xd0] sm:$0xff] }
 0x1a4   : > { %v18747_v52 = vpop.f32.mrf.mxu1  ;;  %16168 = vmatmul.mubr.msk.f32.gmra.mxu1 %vm387_vm1, %v18608_v18  ;;  %v18755_v23 = vadd.f32 %v15718_v14, %v18034_v24  ;;  %16033 = vmatprep.mubr.msk.f32.mxu0 %vm387_vm1, %v4017_v50 }
 0x1a5   : > { %22731 = vst [vmem:[#allocation75_spill] sm:$0xff] %v18747_v52  ;;  %16170 = vmatprep.mubr.msk.f32.mxu1 %vm387_vm1, %v18628_v41  ;;  %v1970_v54 = vpop.f32.mrf.mxu0  ;;  %v22735_v41 = vld [vmem:[#allocation5_spill] sm:$0xff] }
 0x1a6   : > { %v18758_v15 = vpop.f32.mrf.mxu1  ;;  %v18761_v62 = vadd.f32 %v1970_v54, %v22733_v19  ;;  %v4024_v54 = vld [vmem:[#allocation2 + $0xd8] sm:$0xff] }
 0x1a7   : > { %22732 = vst [vmem:[#allocation76_spill] sm:$0xff] %v18758_v15  ;;  %v15721_v16 = vpop.f32.mrf.mxu0  ;;  %16034 = vmatmul.mubr.msk.f32.gmra.mxu0 %vm387_vm1, %v4018_v48  ;;  %v22756_v15 = vld [vmem:[#allocation15_spill] sm:$0xff] }
 0x1a8   : > { %v18763_v18 = vpop.f32.mrf.mxu1  ;;  %16171 = vmatmul.mubr.msk.f32.gmra.mxu1 %vm387_vm1, %v4664_v57  ;;  %v18768_v24 = vadd.f32 %v15721_v16, %v22735_v41  ;;  %16036 = vmatprep.mubr.msk.f32.mxu0 %vm387_vm1, %v4019_v60  ;;  %v4025_v16 = vld [vmem:[#allocation2 + $0xe0] sm:$0xff]  ;;  %v22744_v41 = vld [vmem:[#allocation9_spill] sm:$0xff] }
 0x1a9   : > { %22734 = vst [vmem:[#allocation4_spill] sm:$0xff] %v18763_v18  ;;  %v1980_v61 = vpop.f32.mrf.mxu0  ;;  %v22768_v18 = vld [vmem:[#allocation24_spill] sm:$0xff] }
 0x1aa   : > { %v18771_v7 = vpop.f32.mrf.mxu1  ;;  %v18774_v25 = vadd.f32 %v1980_v61, %v22737_v28  ;;  %v22746_v28 = vld [vmem:[#allocation10_spill] sm:$0xff] }
 0x1ab   : > { %22736 = vst [vmem:[#allocation5_spill] sm:$0xff] %v18771_v7  ;;  %v15724_v46 = vpop.f32.mrf.mxu0  ;;  %16037 = vmatmul.mubr.msk.f32.gmra.mxu0 %vm387_vm1, %v4020_v13  ;;  %v22754_v7 = vld [vmem:[#allocation14_spill] sm:$0xff] }
 0x1ac   : > { %v18776_v17 = vpop.f32.mrf.mxu1  ;;  %v18780_v55 = vadd.f32 %v15724_v46, %v22739_v43  ;;  %16039 = vmatprep.mubr.msk.f32.mxu0 %vm387_vm1, %v4021_v5 }
 0x1ad   : > { %22738 = vst [vmem:[#allocation6_spill] sm:$0xff] %v18776_v17  ;;  %v1990_v56 = vpop.f32.mrf.mxu0 }
 0x1ae   : > { %v18783_v40 = vpop.f32.mrf.mxu1  ;;  %v18786_v50 = vadd.f32 %v1990_v56, %v22741_v37  ;;  %v4027_v56 = vld [vmem:[#allocation2 + $0xf0] sm:$0xff] }
 0x1af   : > { %22740 = vst [vmem:[#allocation7_spill] sm:$0xff] %v18783_v40  ;;  %v15727_v57 = vpop.f32.mrf.mxu0  ;;  %16040 = vmatmul.mubr.msk.f32.gmra.mxu0 %vm387_vm1, %v4022_v34 }
 0x1b0   : > { %v18788_v14 = vpop.f32.mrf.mxu1  ;;  %v18792_v48 = vadd.f32 %v15727_v57, %v18098_v30  ;;  %16042 = vmatprep.mubr.msk.f32.mxu0 %vm387_vm1, %v4023_v10  ;;  %v4026_v30 = vld [vmem:[#allocation2 + $0xe8] sm:$0xff]  ;;  %v22748_v10 = vld [vmem:[#allocation11_spill] sm:$0xff] }
 0x1b1   : > { %22742 = vst [vmem:[#allocation8_spill] sm:$0xff] %v18788_v14  ;;  %v2000_v19 = vpop.f32.mrf.mxu0  ;;  %v22764_v14 = vld [vmem:[#allocation20_spill] sm:$0xff] }
 0x1b2   : > { %v18795_v60 = vpop.f32.mrf.mxu1  ;;  %v18798_v13 = vadd.f32 %v2000_v19, %v22744_v41  ;;  %v22750_v41 = vld [vmem:[#allocation12_spill] sm:$0xff] }
 0x1b3   : > { %22743 = vst [vmem:[#allocation77_spill] sm:$0xff] %v18795_v60  ;;  %v15730_v5 = vpop.f32.mrf.mxu0  ;;  %16043 = vmatmul.mubr.msk.f32.gmra.mxu0 %vm387_vm1, %v4024_v54  ;;  %v22752_v60 = vld [vmem:[#allocation13_spill] sm:$0xff] }
 0x1b4   : > { %v18800_v61 = vpop.f32.mrf.mxu1  ;;  %v18804_v46 = vadd.f32 %v15730_v5, %v22746_v28  ;;  %16045 = vmatprep.mubr.msk.f32.mxu0 %vm387_vm1, %v4025_v16  ;;  %v4028_v5 = vld [vmem:[#allocation2 + $0xf8] sm:$0xff] }
 0x1b5   : > { %22745 = vst [vmem:[#allocation9_spill] sm:$0xff] %v18800_v61  ;;  %v2010_v34 = vpop.f32.mrf.mxu0 }
 0x1b6   : > { %v18807_v43 = vpop.f32.mrf.mxu1  ;;  %v18810_v37 = vadd.f32 %v2010_v34, %v22748_v10 }
 0x1b7   : > { %22747 = vst [vmem:[#allocation10_spill] sm:$0xff] %v18807_v43  ;;  %v15733_v19 = vpop.f32.mrf.mxu0  ;;  %16046 = vmatmul.mubr.msk.f32.gmra.mxu0 %vm387_vm1, %v4026_v30  ;;  %v4029_v43 = vld [vmem:[#allocation2 + $0x100] sm:$0xff] }
 0x1b8   : > { %v18812_v57 = vpop.f32.mrf.mxu1  ;;  %v18816_v54 = vadd.f32 %v15733_v19, %v22750_v41  ;;  %16048 = vmatprep.mubr.msk.f32.mxu0 %vm387_vm1, %v4027_v56  ;;  %v4030_v19 = vld [vmem:[#allocation2 + $0x108] sm:$0xff] }
 0x1b9   : > { %22749 = vst [vmem:[#allocation11_spill] sm:$0xff] %v18812_v57  ;;  %v2020_v28 = vpop.f32.mrf.mxu0  ;;  %v22760_v57 = vld [vmem:[#allocation17_spill] sm:$0xff] }
 0x1ba   : > { %v18819_v16 = vpop.f32.mrf.mxu1  ;;  %v18822_v40 = vadd.f32 %v2020_v28, %v22752_v60 }
 0x1bb   : > { %22751 = vst [vmem:[#allocation12_spill] sm:$0xff] %v18819_v16  ;;  %v15736_v10 = vpop.f32.mrf.mxu0  ;;  %16049 = vmatmul.mubr.msk.f32.gmra.mxu0 %vm387_vm1, %v4028_v5  ;;  %v4031_v16 = vld [vmem:[#allocation2 + $0x110] sm:$0xff] }
 0x1bc   : > { %v18824_v34 = vpop.f32.mrf.mxu1  ;;  %v18828_v30 = vadd.f32 %v15736_v10, %v22754_v7  ;;  %16051 = vmatprep.mubr.msk.f32.mxu0 %vm387_vm1, %v4029_v43  ;;  %v4032_v7 = vld [vmem:[#allocation2 + $0x118] sm:$0xff] }
 0x1bd   : > { %22753 = vst [vmem:[#allocation13_spill] sm:$0xff] %v18824_v34  ;;  %v2030_v41 = vpop.f32.mrf.mxu0  ;;  %v22758_v34 = vld [vmem:[#allocation16_spill] sm:$0xff] }
 0x1be   : > { %v18831_v56 = vpop.f32.mrf.mxu1  ;;  %v18834_v63 = vadd.f32 %v2030_v41, %v22756_v15 }
 0x1bf   : > { %22755 = vst [vmem:[#allocation14_spill] sm:$0xff] %v18831_v56  ;;  %v15739_v28 = vpop.f32.mrf.mxu0  ;;  %16052 = vmatmul.mubr.msk.f32.gmra.mxu0 %vm387_vm1, %v4030_v19  ;;  %v4033_v56 = vld [vmem:[#allocation2 + $0x120] sm:$0xff] }
 0x1c0   : > { %v18836_v60 = vpop.f32.mrf.mxu1  ;;  %v18840_v5 = vadd.f32 %v15739_v28, %v22758_v34  ;;  %16054 = vmatprep.mubr.msk.f32.mxu0 %vm387_vm1, %v4031_v16  ;;  %v4034_v34 = vld [vmem:[#allocation2 + $0x128] sm:$0xff] }
 0x1c1   : > { %22757 = vst [vmem:[#allocation15_spill] sm:$0xff] %v18836_v60  ;;  %v2040_v10 = vpop.f32.mrf.mxu0  ;;  %v22762_v60 = vld [vmem:[#allocation19_spill] sm:$0xff] }
 0x1c2   : > { %v18843_v43 = vpop.f32.mrf.mxu1  ;;  %v18846_v61 = vadd.f32 %v2040_v10, %v22760_v57 }
 0x1c3   : > { %22759 = vst [vmem:[#allocation16_spill] sm:$0xff] %v18843_v43  ;;  %v15742_v41 = vpop.f32.mrf.mxu0  ;;  %16055 = vmatmul.mubr.msk.f32.gmra.mxu0 %vm387_vm1, %v4032_v7  ;;  %v4035_v43 = vld [vmem:[#allocation2 + $0x130] sm:$0xff] }
 0x1c4   : > { %v18848_v15 = vpop.f32.mrf.mxu1  ;;  %v18852_v19 = vadd.f32 %v15742_v41, %v22762_v60  ;;  %16057 = vmatprep.mubr.msk.f32.mxu0 %vm387_vm1, %v4033_v56  ;;  %v4036_v60 = vld [vmem:[#allocation2 + $0x138] sm:$0xff] }
 0x1c5   : > { %22761 = vst [vmem:[#allocation17_spill] sm:$0xff] %v18848_v15  ;;  %v2050_v28 = vpop.f32.mrf.mxu0  ;;  %v22766_v15 = vld [vmem:[#allocation22_spill] sm:$0xff] }
 0x1c6   : > { %v18855_v16 = vpop.f32.mrf.mxu1  ;;  %v18858_v17 = vadd.f32 %v2050_v28, %v22764_v14 }
 0x1c7   : > { %22763 = vst [vmem:[#allocation19_spill] sm:$0xff] %v18855_v16  ;;  %v15745_v10 = vpop.f32.mrf.mxu0  ;;  %16058 = vmatmul.mubr.msk.f32.gmra.mxu0 %vm387_vm1, %v4034_v34  ;;  %v4037_v16 = vld [vmem:[#allocation2 + $0x140] sm:$0xff] }
 0x1c8   : > { %v18860_v57 = vpop.f32.mrf.mxu1  ;;  %v18864_v7 = vadd.f32 %v15745_v10, %v22766_v15  ;;  %16060 = vmatprep.mubr.msk.f32.mxu0 %vm387_vm1, %v4035_v43  ;;  %v4038_v15 = vld [vmem:[#allocation2 + $0x148] sm:$0xff] }
 0x1c9   : > { %22765 = vst [vmem:[#allocation20_spill] sm:$0xff] %v18860_v57  ;;  %v2060_v41 = vpop.f32.mrf.mxu0  ;;  %v22770_v57 = vld [vmem:[#allocation26_spill] sm:$0xff] }
 0x1ca   : > { %v18867_v56 = vpop.f32.mrf.mxu1  ;;  %v18870_v52 = vadd.f32 %v2060_v41, %v22768_v18 }
 0x1cb   : > { %22767 = vst [vmem:[#allocation22_spill] sm:$0xff] %v18867_v56  ;;  %v15748_v28 = vpop.f32.mrf.mxu0  ;;  %16061 = vmatmul.mubr.msk.f32.gmra.mxu0 %vm387_vm1, %v4036_v60  ;;  %v4039_v56 = vld [vmem:[#allocation2 + $0x150] sm:$0xff] }
 0x1cc   : > { %v18872_v14 = vpop.f32.mrf.mxu1  ;;  %v18876_v34 = vadd.f32 %v15748_v28, %v22770_v57  ;;  %16063 = vmatprep.mubr.msk.f32.mxu0 %vm387_vm1, %v4037_v16  ;;  %v4040_v57 = vld [vmem:[#allocation2 + $0x158] sm:$0xff] }
 0x1cd   : > { %22769 = vst [vmem:[#allocation24_spill] sm:$0xff] %v18872_v14  ;;  %v2070_v10 = vpop.f32.mrf.mxu0  ;;  %v22774_v14 = vld [vmem:[#allocation30_spill] sm:$0xff] }
 0x1ce   : > { %v18879_v43 = vpop.f32.mrf.mxu1  ;;  %v18882_v6 = vadd.f32 %v2070_v10, %v22772_v45 }
 0x1cf   : > { %22771 = vst [vmem:[#allocation26_spill] sm:$0xff] %v18879_v43  ;;  %v15751_v41 = vpop.f32.mrf.mxu0  ;;  %16064 = vmatmul.mubr.msk.f32.gmra.mxu0 %vm387_vm1, %v4038_v15  ;;  %v4041_v43 = vld [vmem:[#allocation2 + $0x160] sm:$0xff] }
 0x1d0   : > { %v18884_v18 = vpop.f32.mrf.mxu1  ;;  %v18888_v60 = vadd.f32 %v15751_v41, %v22774_v14  ;;  %16066 = vmatprep.mubr.msk.f32.mxu0 %vm387_vm1, %v4039_v56  ;;  %v4042_v14 = vld [vmem:[#allocation2 + $0x168] sm:$0xff] }
 0x1d1   : > { %22773 = vst [vmem:[#allocation28_spill] sm:$0xff] %v18884_v18  ;;  %v2080_v28 = vpop.f32.mrf.mxu0  ;;  %v22779_v18 = vld [vmem:[#allocation34_spill] sm:$0xff] }
 0x1d2   : > { %v18891_v16 = vpop.f32.mrf.mxu1  ;;  %v18894_v26 = vadd.f32 %v2080_v28, %v22776_v33 }
 0x1d3   : > { %22775 = vst [vmem:[#allocation30_spill] sm:$0xff] %v18891_v16  ;;  %v15754_v10 = vpop.f32.mrf.mxu0  ;;  %16067 = vmatmul.mubr.msk.f32.gmra.mxu0 %vm387_vm1, %v4040_v57  ;;  %v4043_v16 = vld [vmem:[#allocation2 + $0x170] sm:$0xff]  ;;  %v4044_v57 = vld [vmem:[#allocation2 + $0x178] sm:$0xff] }
 0x1d4   : > { %22777 = vst [vmem:[#allocation32_spill] sm:$0xff] %v18894_v26  ;;  %v18896_v45 = vpop.f32.mrf.mxu1  ;;  %v18900_v15 = vadd.f32 %v15754_v10, %v22779_v18  ;;  %16069 = vmatprep.mubr.msk.f32.mxu0 %vm387_vm1, %v4041_v43  ;;  %v4045_v43 = vld [vmem:[#allocation2 + $0x180] sm:$0xff] }
 0x1d5   : > { %22778 = vst [vmem:[#allocation78_spill] sm:$0xff] %v18896_v45  ;;  %v2090_v41 = vpop.f32.mrf.mxu0  ;;  %v22786_v45 = vld [vmem:[#allocation39_spill] sm:$0xff] }
 0x1d6   : > { %22780 = vst [vmem:[#allocation34_spill] sm:$0xff] %v18900_v15  ;;  %v18903_v56 = vpop.f32.mrf.mxu1  ;;  %v18906_v47 = vadd.f32 %v2090_v41, %v22782_v35  ;;  %v4046_v35 = vld [vmem:[#allocation2 + $0x188] sm:$0xff] }
 0x1d7   : > { %22781 = vst [vmem:[#allocation79_spill] sm:$0xff] %v18903_v56  ;;  %v15757_v28 = vpop.f32.mrf.mxu0  ;;  %16070 = vmatmul.mubr.msk.f32.gmra.mxu0 %vm387_vm1, %v4042_v14 }
 0x1d8   : > { %22783 = vst [vmem:[#allocation36_spill] sm:$0xff] %v18906_v47  ;;  %v18908_v33 = vpop.f32.mrf.mxu1  ;;  %16072 = vmatprep.mubr.msk.f32.mxu0 %vm387_vm1, %v4043_v16  ;;  %v4047_v16 = vld [vmem:[#allocation2 + $0x190] sm:$0xff] }
 0x1d9   : > { %22784 = vst [vmem:[#allocation80_spill] sm:$0xff] %v18908_v33  ;;  %v2100_v10 = vpop.f32.mrf.mxu0  ;;  %v22795_v33 = vld [vmem:[#allocation21_spill] sm:$0xff] }
 0x1da   : > { %v18912_v18 = vpop.f32.mrf.mxu1  ;;  %v18915_v15 = vadd.f32 %v2100_v10, %v22786_v45  ;;  %v4048_v45 = vld [vmem:[#allocation2 + $0x198] sm:$0xff] }
 0x1db   : > { %22785 = vst [vmem:[#allocation81_spill] sm:$0xff] %v18912_v18  ;;  %v15760_v26 = vpop.f32.mrf.mxu0  ;;  %16073 = vmatmul.mubr.msk.f32.gmra.mxu0 %vm387_vm1, %v4044_v57 }
 0x1dc   : > { %22787 = vst [vmem:[#allocation39_spill] sm:$0xff] %v18915_v15  ;;  %v18917_v56 = vpop.f32.mrf.mxu1  ;;  %16075 = vmatprep.mubr.msk.f32.mxu0 %vm387_vm1, %v4045_v43  ;;  %v13636_v26 = vld [vmem:[%s22625_s3 + $0x8] sm:$0xff]  ;;  %v4049_v43 = vld [vmem:[#allocation2 + $0x1a0] sm:$0xff]  ;;  %v2734_v15 = vadd.f32 %v22795_v33, %v18576_v21 }
 0x1dd   : > { %22788 = vst [vmem:[#allocation82_spill] sm:$0xff] %v18917_v56  ;;  %v2110_v14 = vpop.f32.mrf.mxu0  ;;  %16259 = vmatprep.subr.mxu1 %v13636_v26 }
 0x1de   : > { %v18921_v41 = vpop.f32.mrf.mxu1  ;;  %v22792_v14 = vld [vmem:[#allocation18_spill] sm:$0xff]  ;;  %16260 = vmatpush3.msra.mxu1 %v13636_v26  ;;  %v22797_v26 = vld [vmem:[#allocation23_spill] sm:$0xff] }
 0x1df   : > { %22789 = vst [vmem:[#allocation83_spill] sm:$0xff] %v18921_v41  ;;  %v15848_v18 = vpop.f32.mrf.mxu0  ;;  %16076 = vmatmul.mubr.msk.f32.gmra.mxu0 %vm387_vm1, %v4046_v35  ;;  %v2732_v41 = vadd.f32 %v22792_v14, %v18554_v2 }
 0x1e0   : > { %v18923_v28 = vpop.f32.mrf.mxu1  ;;  %16078 = vmatprep.mubr.msk.f32.mxu0 %vm387_vm1, %v4047_v16  ;;  %v4050_v16 = vld [vmem:[#allocation2 + $0x1a8] sm:$0xff] }
 0x1e1   : > { %22790 = vst [vmem:[#allocation84_spill] sm:$0xff] %v18923_v28  ;;  %v3070_v57 = vpop.f32.mrf.mxu0 }
 0x1e2   : > { %v18927_v10 = vpop.f32.mrf.mxu1  ;;  %v4051_v57 = vld [vmem:[#allocation2 + $0x1b0] sm:$0xff] }
 0x1e3   : > { %22791 = vst [vmem:[#allocation85_spill] sm:$0xff] %v18927_v10  ;;  %v15851_v18 = vpop.f32.mrf.mxu0  ;;  %16079 = vmatmul.mubr.msk.f32.gmra.mxu0 %vm387_vm1, %v4048_v45  ;;  %v2733_v45 = vadd.f32 %v22797_v26, %v18588_v51  ;;  %v22801_v51 = vld [vmem:[#allocation27_spill] sm:$0xff] }
 0x1e4   : > { %v18934_v56 = vpop.f32.mrf.mxu1  ;;  %v18937_v35 = vadd.f32 %v15851_v18, %v2732_v41  ;;  %16081 = vmatprep.mubr.msk.f32.mxu0 %vm387_vm1, %v4049_v43  ;;  %v4052_v43 = vld [vmem:[#allocation2 + $0x1b8] sm:$0xff]  ;;  %v4053_v18 = vld [vmem:[#allocation2 + $0x1c0] sm:$0xff] }
 0x1e5   : > { %22793 = vst [vmem:[#allocation18_spill] sm:$0xff] %v18934_v56  ;;  %v3080_v28 = vpop.f32.mrf.mxu0  ;;  %v4055_v56 = vld [vmem:[#allocation2 + $0x1d0] sm:$0xff] }
 0x1e6   : > { %v18940_v10 = vpop.f32.mrf.mxu1 }
 0x1e7   : > { %22794 = vst [vmem:[#allocation86_spill] sm:$0xff] %v18940_v10  ;;  %v15854_v2 = vpop.f32.mrf.mxu0  ;;  %16082 = vmatmul.mubr.msk.f32.gmra.mxu0 %vm387_vm1, %v4050_v16  ;;  %v22799_v10 = vld [vmem:[#allocation25_spill] sm:$0xff] }
 0x1e8   : > { %v18944_v47 = vpop.f32.mrf.mxu1  ;;  %v18949_v41 = vadd.f32 %v15854_v2, %v2734_v15  ;;  %16084 = vmatprep.mubr.msk.f32.mxu0 %vm387_vm1, %v4051_v57  ;;  %v2736_v21 = vadd.f32 %v22799_v10, %v18600_v36  ;;  %v2735_v15 = vadd.f32 %v22801_v51, %v18612_v0  ;;  %v4054_v57 = vld [vmem:[#allocation2 + $0x1c8] sm:$0xff]  ;;  %v22805_v0 = vld [vmem:[#allocation31_spill] sm:$0xff] }
 0x1e9   : > { %22796 = vst [vmem:[#allocation21_spill] sm:$0xff] %v18944_v47  ;;  %v3090_v28 = vpop.f32.mrf.mxu0  ;;  %v22803_v36 = vld [vmem:[#allocation29_spill] sm:$0xff] }
 0x1ea   : > { %v18952_v14 = vpop.f32.mrf.mxu1  ;;  %v18956_v33 = vadd.f32 %v3090_v28, %v2733_v45  ;;  %v2738_v10 = vadd.f32 %v22803_v36, %v18624_v38  ;;  %v22807_v38 = vld [vmem:[#allocation33_spill] sm:$0xff] }
 0x1eb   : > { %22798 = vst [vmem:[#allocation23_spill] sm:$0xff] %v18952_v14  ;;  %v15857_v16 = vpop.f32.mrf.mxu0  ;;  %16085 = vmatmul.mubr.msk.f32.gmra.mxu0 %vm387_vm1, %v4052_v43 }
 0x1ec   : > { %22800 = vst [vmem:[#allocation25_spill] sm:$0xff] %v18956_v33  ;;  %v18958_v47 = vpop.f32.mrf.mxu1  ;;  %v18963_v2 = vadd.f32 %v15857_v16, %v2736_v21  ;;  %16087 = vmatprep.mubr.msk.f32.mxu0 %vm387_vm1, %v4053_v18  ;;  %v2737_v21 = vadd.f32 %v22805_v0, %v18634_v1  ;;  %v4056_v18 = vld [vmem:[#allocation2 + $0x1d8] sm:$0xff] }
 0x1ed   : > { %v3100_v14 = vpop.f32.mrf.mxu0  ;;  %v5223_v33 = vld [vmem:[#allocation2 + $0x32] sm:$0xff] }
 0x1ee   : > { %v18966_v26 = vpop.f32.mrf.mxu1  ;;  %v18970_v45 = vadd.f32 %v3100_v14, %v2735_v15  ;;  %v2740_v14 = vadd.f32 %v22807_v38, %v18646_v44  ;;  %v22809_v1 = vld [vmem:[#allocation35_spill] sm:$0xff]  ;;  %v22811_v44 = vld [vmem:[#allocation37_spill] sm:$0xff] }
 0x1ef   : > { %22802 = vst [vmem:[#allocation27_spill] sm:$0xff] %v18966_v26  ;;  %v15860_v43 = vpop.f32.mrf.mxu0  ;;  %16088 = vmatmul.mubr.msk.f32.gmra.mxu0 %vm387_vm1, %v4054_v57 }
 0x1f0   : > { %22804 = vst [vmem:[#allocation29_spill] sm:$0xff] %v18970_v45  ;;  %v18972_v28 = vpop.f32.mrf.mxu1  ;;  %v18977_v16 = vadd.f32 %v15860_v43, %v2738_v10  ;;  %16090 = vmatprep.mubr.msk.f32.mxu0 %vm387_vm1, %v4055_v56  ;;  %v2739_v10 = vadd.f32 %v22809_v1, %v18653_v49  ;;  %v5224_v56 = vld [vmem:[#allocation2 + $0x3a] sm:$0xff]  ;;  %v5225_v45 = vld [vmem:[#allocation2 + $0x42] sm:$0xff]  ;;  %v22813_v49 = vld [vmem:[#allocation38_spill] sm:$0xff] }
 0x1f1   : > { %v3110_v26 = vpop.f32.mrf.mxu0 }
 0x1f2   : > { %v18980_v51 = vpop.f32.mrf.mxu1  ;;  %v18984_v15 = vadd.f32 %v3110_v26, %v2737_v21  ;;  %v2742_v26 = vadd.f32 %v22811_v44, %v18664_v59  ;;  %v22815_v59 = vld [vmem:[#allocation40_spill] sm:$0xff] }
 0x1f3   : > { %22806 = vst [vmem:[#allocation31_spill] sm:$0xff] %v18980_v51  ;;  %v15863_v57 = vpop.f32.mrf.mxu0  ;;  %16091 = vmatmul.mubr.msk.f32.gmra.mxu0 %vm387_vm1, %v4056_v18 }
 0x1f4   : > { %22808 = vst [vmem:[#allocation33_spill] sm:$0xff] %v18984_v15  ;;  %v18986_v36 = vpop.f32.mrf.mxu1  ;;  %v18991_v43 = vadd.f32 %v15863_v57, %v2740_v14  ;;  %16178 = vmatprep.mubr.msk.f32.mxu0 %vm387_vm1, %v5223_v33  ;;  %v2741_v14 = vadd.f32 %v22813_v49, %v18673_v53  ;;  %v5226_v33 = vld [vmem:[#allocation2 + $0x4a] sm:$0xff]  ;;  %v5227_v15 = vld [vmem:[#allocation2 + $0x52] sm:$0xff] }
 0x1f5   : > { %v3120_v51 = vpop.f32.mrf.mxu0  ;;  %v22817_v53 = vld [vmem:[#allocation41_spill] sm:$0xff] }
 0x1f6   : > { %v18994_v0 = vpop.f32.mrf.mxu1  ;;  %v18998_v21 = vadd.f32 %v3120_v51, %v2739_v10  ;;  %v2744_v51 = vadd.f32 %v22815_v59, %v18682_v12  ;;  %v22819_v12 = vld [vmem:[#allocation42_spill] sm:$0xff] }
 0x1f7   : > { %22810 = vst [vmem:[#allocation35_spill] sm:$0xff] %v18994_v0  ;;  %v15866_v18 = vpop.f32.mrf.mxu0  ;;  %16179 = vmatmul.mubr.msk.f32.vlgmr.msra.gmra.mxu0 %vm387_vm1, %v5224_v56  ;;  %v2743_v56 = vadd.f32 %v22817_v53, %v18689_v29  ;;  %v22821_v29 = vld [vmem:[#allocation43_spill] sm:$0xff] }
 0x1f8   : > { %22812 = vst [vmem:[#allocation37_spill] sm:$0xff] %v18998_v21  ;;  %v19000_v38 = vpop.f32.mrf.mxu1  ;;  %v19005_v57 = vadd.f32 %v15866_v18, %v2742_v26  ;;  %16181 = vmatprep.mubr.msk.f32.mxu0 %vm387_vm1, %v5225_v45  ;;  %v5228_v45 = vld [vmem:[#allocation2 + $0x5a] sm:$0xff] }
 0x1f9   : > { %v3130_v0 = vpop.f32.mrf.mxu0 }
 0x1fa   : > { %v19008_v1 = vpop.f32.mrf.mxu1  ;;  %v19012_v10 = vadd.f32 %v3130_v0, %v2741_v14  ;;  %v2746_v0 = vadd.f32 %v22819_v12, %v18698_v27 }
 0x1fb   : > { %22814 = vst [vmem:[#allocation38_spill] sm:$0xff] %v19008_v1  ;;  %v15869_v21 = vpop.f32.mrf.mxu0  ;;  %16182 = vmatmul.mubr.msk.f32.gmra.mxu0 %vm387_vm1, %v5226_v33  ;;  %v5229_v1 = vld [vmem:[#allocation2 + $0x62] sm:$0xff] }
 0x1fc   : > { %22816 = vst [vmem:[#allocation40_spill] sm:$0xff] %v19012_v10  ;;  %v16006_v44 = vpop.f32.mrf.mxu1  ;;  %v19017_v26 = vadd.f32 %v15869_v21, %v2744_v51  ;;  %16184 = vmatprep.mubr.msk.f32.mxu0 %vm387_vm1, %v5227_v15  ;;  %v2745_v21 = vadd.f32 %v22821_v29, %v18703_v58  ;;  %v5230_v15 = vld [vmem:[#allocation2 + $0x6a] sm:$0xff]  ;;  %v22822_v10 = vld [vmem:[#allocation44_spill] sm:$0xff] }
 0x1fd   : > { %v3140_v49 = vpop.f32.mrf.mxu0  ;;  %v2748_v27 = vadd.f32 %v22822_v10, %v18712_v3  ;;  %v5233_v29 = vld [vmem:[#allocation2 + $0x82] sm:$0xff] }
 0x1fe   : > { %v19020_v18 = vpop.f32.mrf.mxu1  ;;  %v19024_v14 = vadd.f32 %v3140_v49, %v2743_v56 }
 0x1ff   : > { %22818 = vst [vmem:[#allocation41_spill] sm:$0xff] %v19020_v18  ;;  %v15872_v44 = vpop.f32.mrf.mxu0  ;;  %16185 = vmatmul.mubr.msk.f32.gmra.mxu0 %vm387_vm1, %v5228_v45  ;;  %v5231_v18 = vld [vmem:[#allocation2 + $0x72] sm:$0xff]  ;;  %v22824_v45 = vld [vmem:[#allocation45_spill] sm:$0xff] }
 0x200   : > { %22820 = vst [vmem:[#allocation42_spill] sm:$0xff] %v19024_v14  ;;  %v16009_v59 = vpop.f32.mrf.mxu1  ;;  %v19029_v33 = vadd.f32 %v15872_v44, %v2746_v0  ;;  %16187 = vmatprep.mubr.msk.f32.mxu0 %vm387_vm1, %v5229_v1  ;;  %v2747_v58 = vadd.f32 %v22824_v45, %v18715_v31  ;;  %v5232_v1 = vld [vmem:[#allocation2 + $0x7a] sm:$0xff]  ;;  %v5235_v45 = vld [vmem:[#allocation2 + $0x92] sm:$0xff] }
 0x201   : > { %v3150_v53 = vpop.f32.mrf.mxu0  ;;  %v22827_v31 = vld [vmem:[#allocation47_spill] sm:$0xff] }
 0x202   : > { %v3940_v51 = vpop.f32.mrf.mxu1  ;;  %v19034_v56 = vadd.f32 %v3150_v53, %v2745_v21  ;;  %v5243_v14 = vld [vmem:[#allocation2 + $0xd2] sm:$0xff] }
 0x203   : > { %v15875_v12 = vpop.f32.mrf.mxu0  ;;  %16188 = vmatmul.mubr.msk.f32.gmra.mxu0 %vm387_vm1, %v5230_v15  ;;  %v22825_v51 = vld [vmem:[#allocation46_spill] sm:$0xff]  ;;  %v2749_v15 = vadd.f32 %v22827_v31, %v18729_v42  ;;  %v22830_v42 = vld [vmem:[#allocation49_spill] sm:$0xff] }
 0x204   : > { %22823 = vst [vmem:[#allocation43_spill] sm:$0xff] %v19034_v56  ;;  %v16097_v49 = vpop.f32.mrf.mxu1  ;;  %v19039_v0 = vadd.f32 %v15875_v12, %v2748_v27  ;;  %16190 = vmatprep.mubr.msk.f32.mxu0 %vm387_vm1, %v5231_v18  ;;  %v2750_v3 = vadd.f32 %v22825_v51, %v18725_v11  ;;  %v5234_v18 = vld [vmem:[#allocation2 + $0x8a] sm:$0xff]  ;;  %v22828_v11 = vld [vmem:[#allocation48_spill] sm:$0xff] }
 0x205   : > { %v3160_v44 = vpop.f32.mrf.mxu0  ;;  %v5241_v56 = vld [vmem:[#allocation2 + $0xc2] sm:$0xff] }
 0x206   : > { %v4900_v59 = vpop.f32.mrf.mxu1  ;;  %v19044_v10 = vadd.f32 %v3160_v44, %v2747_v58  ;;  %v2752_v58 = vadd.f32 %v22828_v11, %v18739_v20  ;;  %v22831_v20 = vld [vmem:[#allocation50_spill] sm:$0xff] }
 0x207   : > { %v15878_v53 = vpop.f32.mrf.mxu0  ;;  %16191 = vmatmul.mubr.msk.f32.gmra.mxu0 %vm387_vm1, %v5232_v1  ;;  %v2751_v1 = vadd.f32 %v22830_v42, %v18745_v39  ;;  %v22833_v39 = vld [vmem:[#allocation51_spill] sm:$0xff] }
 0x208   : > { %22826 = vst [vmem:[#allocation44_spill] sm:$0xff] %v19044_v10  ;;  %v19046_v21 = vpop.f32.mrf.mxu1  ;;  %v19051_v27 = vadd.f32 %v15878_v53, %v2750_v3  ;;  %16193 = vmatprep.mubr.msk.f32.mxu0 %vm387_vm1, %v5233_v29  ;;  %v5236_v29 = vld [vmem:[#allocation2 + $0x9a] sm:$0xff]  ;;  %v5239_v10 = vld [vmem:[#allocation2 + $0xb2] sm:$0xff] }
 0x209   : > { %v3170_v12 = vpop.f32.mrf.mxu0 }
 0x20a   : > { %v4910_v49 = vpop.f32.mrf.mxu1  ;;  %v19056_v59 = vadd.f32 %v3170_v12, %v2749_v15  ;;  %v2754_v15 = vadd.f32 %v22831_v20, %v18755_v23  ;;  %v22834_v23 = vld [vmem:[#allocation52_spill] sm:$0xff] }
 0x20b   : > { %v15881_v51 = vpop.f32.mrf.mxu0  ;;  %16194 = vmatmul.mubr.msk.f32.gmra.mxu0 %vm387_vm1, %v5234_v18  ;;  %v5237_v49 = vld [vmem:[#allocation2 + $0xa2] sm:$0xff] }
 0x20c   : > { %22829 = vst [vmem:[#allocation45_spill] sm:$0xff] %v19056_v59  ;;  %v19058_v44 = vpop.f32.mrf.mxu1  ;;  %v19063_v3 = vadd.f32 %v15881_v51, %v2752_v58  ;;  %16196 = vmatprep.mubr.msk.f32.mxu0 %vm387_vm1, %v5235_v45  ;;  %v2753_v58 = vadd.f32 %v22833_v39, %v18761_v62  ;;  %v5238_v45 = vld [vmem:[#allocation2 + $0xaa] sm:$0xff] }
 0x20d   : > { %v3180_v31 = vpop.f32.mrf.mxu0  ;;  %v22836_v62 = vld [vmem:[#allocation53_spill] sm:$0xff] }
 0x20e   : > { %v19066_v53 = vpop.f32.mrf.mxu1  ;;  %v19070_v12 = vadd.f32 %v3180_v31, %v2751_v1  ;;  %v2756_v1 = vadd.f32 %v22834_v23, %v18768_v24  ;;  %v22837_v24 = vld [vmem:[#allocation54_spill] sm:$0xff] }
 0x20f   : > { %v15884_v18 = vpop.f32.mrf.mxu0  ;;  %16197 = vmatmul.mubr.msk.f32.gmra.mxu0 %vm387_vm1, %v5236_v29 }
 0x210   : > { %22832 = vst [vmem:[#allocation46_spill] sm:$0xff] %v19070_v12  ;;  %v19072_v11 = vpop.f32.mrf.mxu1  ;;  %v19077_v51 = vadd.f32 %v15884_v18, %v2754_v15  ;;  %16199 = vmatprep.mubr.msk.f32.mxu0 %vm387_vm1, %v5237_v49  ;;  %v2755_v15 = vadd.f32 %v22836_v62, %v18774_v25  ;;  %v5240_v49 = vld [vmem:[#allocation2 + $0xba] sm:$0xff] }
 0x211   : > { %v3190_v59 = vpop.f32.mrf.mxu0  ;;  %v22839_v25 = vld [vmem:[#allocation55_spill] sm:$0xff] }
 0x212   : > { %v19080_v42 = vpop.f32.mrf.mxu1  ;;  %v19084_v31 = vadd.f32 %v3190_v59, %v2753_v58  ;;  %v2758_v59 = vadd.f32 %v22837_v24, %v18780_v55  ;;  %v22841_v55 = vld [vmem:[#allocation56_spill] sm:$0xff] }
 0x213   : > { %v15887_v29 = vpop.f32.mrf.mxu0  ;;  %16200 = vmatmul.mubr.msk.f32.gmra.mxu0 %vm387_vm1, %v5238_v45 }
 0x214   : > { %22835 = vst [vmem:[#allocation47_spill] sm:$0xff] %v19084_v31  ;;  %v19086_v20 = vpop.f32.mrf.mxu1  ;;  %v19091_v18 = vadd.f32 %v15887_v29, %v2756_v1  ;;  %16202 = vmatprep.mubr.msk.f32.mxu0 %vm387_vm1, %v5239_v10  ;;  %v2757_v1 = vadd.f32 %v22839_v25, %v18786_v50  ;;  %v5242_v10 = vld [vmem:[#allocation2 + $0xca] sm:$0xff] }
 0x215   : > { %v3200_v12 = vpop.f32.mrf.mxu0  ;;  %v22843_v50 = vld [vmem:[#allocation57_spill] sm:$0xff] }
 0x216   : > { %v19094_v39 = vpop.f32.mrf.mxu1  ;;  %v19098_v58 = vadd.f32 %v3200_v12, %v2755_v15  ;;  %v2760_v12 = vadd.f32 %v22841_v55, %v18792_v48  ;;  %v22845_v48 = vld [vmem:[#allocation58_spill] sm:$0xff] }
 0x217   : > { %v15890_v45 = vpop.f32.mrf.mxu0  ;;  %16203 = vmatmul.mubr.msk.f32.gmra.mxu0 %vm387_vm1, %v5240_v49 }
 0x218   : > { %22838 = vst [vmem:[#allocation48_spill] sm:$0xff] %v19098_v58  ;;  %v19100_v23 = vpop.f32.mrf.mxu1  ;;  %v19105_v29 = vadd.f32 %v15890_v45, %v2758_v59  ;;  %16205 = vmatprep.mubr.msk.f32.mxu0 %vm387_vm1, %v5241_v56  ;;  %v2759_v59 = vadd.f32 %v22843_v50, %v18798_v13  ;;  %v5244_v56 = vld [vmem:[#allocation2 + $0xda] sm:$0xff] }
 0x219   : > { %v3210_v31 = vpop.f32.mrf.mxu0  ;;  %v22847_v13 = vld [vmem:[#allocation59_spill] sm:$0xff] }
 0x21a   : > { %v19108_v62 = vpop.f32.mrf.mxu1  ;;  %v19112_v15 = vadd.f32 %v3210_v31, %v2757_v1  ;;  %v2762_v31 = vadd.f32 %v22845_v48, %v18804_v46  ;;  %v22849_v46 = vld [vmem:[#allocation60_spill] sm:$0xff] }
 0x21b   : > { %22840 = vst [vmem:[#allocation49_spill] sm:$0xff] %v19108_v62  ;;  %v15893_v49 = vpop.f32.mrf.mxu0  ;;  %16206 = vmatmul.mubr.msk.f32.gmra.mxu0 %vm387_vm1, %v5242_v10  ;;  %v5245_v62 = vld [vmem:[#allocation2 + $0xe2] sm:$0xff] }
 0x21c   : > { %22842 = vst [vmem:[#allocation50_spill] sm:$0xff] %v19112_v15  ;;  %v19114_v24 = vpop.f32.mrf.mxu1  ;;  %v19119_v45 = vadd.f32 %v15893_v49, %v2760_v12  ;;  %16208 = vmatprep.mubr.msk.f32.mxu0 %vm387_vm1, %v5243_v14  ;;  %v2761_v12 = vadd.f32 %v22847_v13, %v18810_v37  ;;  %v5246_v14 = vld [vmem:[#allocation2 + $0xea] sm:$0xff] }
 0x21d   : > { %v3220_v58 = vpop.f32.mrf.mxu0  ;;  %v22851_v37 = vld [vmem:[#allocation61_spill] sm:$0xff] }
 0x21e   : > { %v19122_v25 = vpop.f32.mrf.mxu1  ;;  %v19126_v1 = vadd.f32 %v3220_v58, %v2759_v59  ;;  %v2764_v58 = vadd.f32 %v22849_v46, %v18816_v54  ;;  %v22853_v54 = vld [vmem:[#allocation62_spill] sm:$0xff] }
 0x21f   : > { %22844 = vst [vmem:[#allocation51_spill] sm:$0xff] %v19122_v25  ;;  %v15896_v10 = vpop.f32.mrf.mxu0  ;;  %16209 = vmatmul.mubr.msk.f32.gmra.mxu0 %vm387_vm1, %v5244_v56  ;;  %v5247_v25 = vld [vmem:[#allocation2 + $0xf2] sm:$0xff] }
 0x220   : > { %22846 = vst [vmem:[#allocation52_spill] sm:$0xff] %v19126_v1  ;;  %v19128_v55 = vpop.f32.mrf.mxu1  ;;  %v19133_v49 = vadd.f32 %v15896_v10, %v2762_v31  ;;  %16211 = vmatprep.mubr.msk.f32.mxu0 %vm387_vm1, %v5245_v62  ;;  %v2763_v31 = vadd.f32 %v22851_v37, %v18822_v40  ;;  %v5248_v62 = vld [vmem:[#allocation2 + $0xfa] sm:$0xff] }
 0x221   : > { %v3230_v15 = vpop.f32.mrf.mxu0  ;;  %v22855_v40 = vld [vmem:[#allocation63_spill] sm:$0xff] }
 0x222   : > { %v19136_v50 = vpop.f32.mrf.mxu1  ;;  %v19140_v59 = vadd.f32 %v3230_v15, %v2761_v12  ;;  %v2766_v15 = vadd.f32 %v22853_v54, %v18828_v30  ;;  %v22857_v30 = vld [vmem:[#allocation64_spill] sm:$0xff] }
 0x223   : > { %22848 = vst [vmem:[#allocation53_spill] sm:$0xff] %v19136_v50  ;;  %v15899_v56 = vpop.f32.mrf.mxu0  ;;  %16212 = vmatmul.mubr.msk.f32.gmra.mxu0 %vm387_vm1, %v5246_v14  ;;  %v5249_v50 = vld [vmem:[#allocation2 + $0x102] sm:$0xff] }
 0x224   : > { %22850 = vst [vmem:[#allocation54_spill] sm:$0xff] %v19140_v59  ;;  %v19142_v48 = vpop.f32.mrf.mxu1  ;;  %v19147_v10 = vadd.f32 %v15899_v56, %v2764_v58  ;;  %16214 = vmatprep.mubr.msk.f32.mxu0 %vm387_vm1, %v5247_v25  ;;  %v2765_v58 = vadd.f32 %v22855_v40, %v18834_v63  ;;  %v5250_v25 = vld [vmem:[#allocation2 + $0x10a] sm:$0xff] }
 0x225   : > { %v3240_v1 = vpop.f32.mrf.mxu0  ;;  %v22859_v63 = vld [vmem:[#allocation65_spill] sm:$0xff] }
 0x226   : > { %v19150_v13 = vpop.f32.mrf.mxu1  ;;  %v19154_v12 = vadd.f32 %v3240_v1, %v2763_v31  ;;  %v2768_v1 = vadd.f32 %v22857_v30, %v18840_v5  ;;  %v22861_v5 = vld [vmem:[#allocation66_spill] sm:$0xff] }
 0x227   : > { %22852 = vst [vmem:[#allocation55_spill] sm:$0xff] %v19150_v13  ;;  %v15902_v14 = vpop.f32.mrf.mxu0  ;;  %16215 = vmatmul.mubr.msk.f32.gmra.mxu0 %vm387_vm1, %v5248_v62  ;;  %v5251_v13 = vld [vmem:[#allocation2 + $0x112] sm:$0xff] }
 0x228   : > { %22854 = vst [vmem:[#allocation56_spill] sm:$0xff] %v19154_v12  ;;  %v19156_v46 = vpop.f32.mrf.mxu1  ;;  %v19161_v56 = vadd.f32 %v15902_v14, %v2766_v15  ;;  %16217 = vmatprep.mubr.msk.f32.mxu0 %vm387_vm1, %v5249_v50  ;;  %v2767_v15 = vadd.f32 %v22859_v63, %v18846_v61  ;;  %v5252_v50 = vld [vmem:[#allocation2 + $0x11a] sm:$0xff]  ;;  %v2769_v61 = vadd.f32 %v18582_v9, %v18858_v17 }
 0x229   : > { %v3250_v59 = vpop.f32.mrf.mxu0  ;;  %v2771_v9 = vadd.f32 %v18606_v32, %v18870_v52  ;;  %v2773_v32 = vadd.f32 %v18630_v8, %v18882_v6  ;;  %v14428_v8 = vld [vmem:[%s17273_s29 + $0xf0] sm:$0xff]   ;;  %v22874_v6 = vld [vmem:[#allocation32_spill] sm:$0xff] }
 0x22a   : > { %v19164_v37 = vpop.f32.mrf.mxu1  ;;  %v19168_v31 = vadd.f32 %v3250_v59, %v2765_v58  ;;  %v2770_v59 = vadd.f32 %v22861_v5, %v18852_v19  ;;  %v2772_v19 = vadd.f32 %v18590_v4, %v18864_v7  ;;  %v2774_v4 = vadd.f32 %v18614_v22, %v18876_v34  ;;  %v5259_v22 = vld [vmem:[#allocation2 + $0x152] sm:$0xff] }
 0x22b   : > { %22856 = vst [vmem:[#allocation57_spill] sm:$0xff] %v19164_v37  ;;  %v15905_v62 = vpop.f32.mrf.mxu0  ;;  %16218 = vmatmul.mubr.msk.f32.gmra.mxu0 %vm387_vm1, %v5250_v25  ;;  %v5253_v37 = vld [vmem:[#allocation2 + $0x122] sm:$0xff]  ;;  %v22871_v34 = vld [vmem:[#allocation67_spill] sm:$0xff] }
 0x22c   : > { %22858 = vst [vmem:[#allocation58_spill] sm:$0xff] %v19168_v31  ;;  %v19170_v54 = vpop.f32.mrf.mxu1  ;;  %v19175_v14 = vadd.f32 %v15905_v62, %v2768_v1  ;;  %16220 = vmatprep.mubr.msk.f32.mxu0 %vm387_vm1, %v5251_v13  ;;  %v5254_v13 = vld [vmem:[#allocation2 + $0x12a] sm:$0xff]  ;;  %v5255_v31 = vld [vmem:[#allocation2 + $0x132] sm:$0xff] }
 0x22d   : > { %v3260_v12 = vpop.f32.mrf.mxu0 }
 0x22e   : > { %v19178_v40 = vpop.f32.mrf.mxu1  ;;  %v19182_v58 = vadd.f32 %v3260_v12, %v2767_v15 }
 0x22f   : > { %22860 = vst [vmem:[#allocation59_spill] sm:$0xff] %v19178_v40  ;;  %v15908_v25 = vpop.f32.mrf.mxu0  ;;  %16221 = vmatmul.mubr.msk.f32.gmra.mxu0 %vm387_vm1, %v5252_v50 }
 0x230   : > { %22862 = vst [vmem:[#allocation60_spill] sm:$0xff] %v19182_v58  ;;  %v19184_v30 = vpop.f32.mrf.mxu1  ;;  %v19189_v1 = vadd.f32 %v15908_v25, %v2770_v59  ;;  %16223 = vmatprep.mubr.msk.f32.mxu0 %vm387_vm1, %v5253_v37  ;;  %v5256_v37 = vld [vmem:[#allocation2 + $0x13a] sm:$0xff]  ;;  %v5257_v25 = vld [vmem:[#allocation2 + $0x142] sm:$0xff]  ;;  %v14397_v58 = vunpack.c.l.bf16 %v14428_v8  ;;  %v5262_v8 = vld [vmem:[#allocation2 + $0x16a] sm:$0xff] }
 0x231   : > { %22863 = vst [vmem:[#allocation61_spill] sm:$0xff] %v19184_v30  ;;  %v3270_v63 = vpop.f32.mrf.mxu0 }
 0x232   : > { %v19192_v62 = vpop.f32.mrf.mxu1  ;;  %v19196_v12 = vadd.f32 %v3270_v63, %v2769_v61  ;;  %448 = vst.msk [vmem:[#allocation2 + $0x1e0] sm:$0xff] %vm387_vm1, %v14397_v58 }
 0x233   : > { %22864 = vst [vmem:[#allocation62_spill] sm:$0xff] %v19192_v62  ;;  %v15911_v50 = vpop.f32.mrf.mxu0  ;;  %16224 = vmatmul.mubr.msk.f32.gmra.mxu0 %vm387_vm1, %v5254_v13 }
 0x234   : > { %22865 = vst [vmem:[#allocation63_spill] sm:$0xff] %v19196_v12  ;;  %v19198_v15 = vpop.f32.mrf.mxu1  ;;  %v19203_v17 = vadd.f32 %v15911_v50, %v2772_v19  ;;  %16226 = vmatprep.mubr.msk.f32.mxu0 %vm387_vm1, %v5255_v31  ;;  %v5258_v31 = vld [vmem:[#allocation2 + $0x14a] sm:$0xff]  ;;  %v2776_v50 = vadd.f32 %v22871_v34, %v18888_v60 }
 0x235   : > { %22866 = vst [vmem:[#allocation64_spill] sm:$0xff] %v19198_v15  ;;  %v3280_v59 = vpop.f32.mrf.mxu0  ;;  %v22878_v34 = vld [vmem:[#allocation69_spill] sm:$0xff] }
 0x236   : > { %v19206_v5 = vpop.f32.mrf.mxu1  ;;  %v19210_v7 = vadd.f32 %v3280_v59, %v2771_v9 }
 0x237   : > { %22867 = vst [vmem:[#allocation65_spill] sm:$0xff] %v19206_v5  ;;  %v15914_v13 = vpop.f32.mrf.mxu0  ;;  %16227 = vmatmul.mubr.msk.f32.gmra.mxu0 %vm387_vm1, %v5256_v37 }
 0x238   : > { %22868 = vst [vmem:[#allocation66_spill] sm:$0xff] %v19210_v7  ;;  %v19212_v61 = vpop.f32.mrf.mxu1  ;;  %v19217_v52 = vadd.f32 %v15914_v13, %v2774_v4  ;;  %16229 = vmatprep.mubr.msk.f32.mxu0 %vm387_vm1, %v5257_v25  ;;  %v22875_v4 = vld [vmem:[#allocation68_spill] sm:$0xff] }
 0x239   : > { %22869 = vst [vmem:[#allocation87_spill] sm:$0xff] %v19212_v61  ;;  %v3290_v19 = vpop.f32.mrf.mxu0  ;;  %v2775_v13 = vadd.f32 %v22875_v4, %v22874_v6  ;;  %v5260_v7 = vld [vmem:[#allocation2 + $0x15a] sm:$0xff] }
 0x23a   : > { %v19220_v63 = vpop.f32.mrf.mxu1  ;;  %v19224_v9 = vadd.f32 %v3290_v19, %v2773_v32  ;;  %v5261_v32 = vld [vmem:[#allocation2 + $0x162] sm:$0xff]  ;;  %v22877_v19 = vld [vmem:[#allocation34_spill] sm:$0xff] }
 0x23b   : > { %22870 = vst [vmem:[#allocation88_spill] sm:$0xff] %v19220_v63  ;;  %v15917_v37 = vpop.f32.mrf.mxu0  ;;  %16230 = vmatmul.mubr.msk.f32.gmra.mxu0 %vm387_vm1, %v5258_v31 }
 0x23c   : > { %22872 = vst [vmem:[#allocation67_spill] sm:$0xff] %v19224_v9  ;;  %v19226_v59 = vpop.f32.mrf.mxu1  ;;  %v19232_v25 = vadd.f32 %v15917_v37, %v2776_v50  ;;  %16232 = vmatprep.mubr.msk.f32.mxu0 %vm387_vm1, %v5259_v22  ;;  %v2778_v9 = vadd.f32 %v22878_v34, %v22877_v19  ;;  %v22881_v50 = vld [vmem:[#allocation36_spill] sm:$0xff]  ;;  %v22882_v22 = vld [vmem:[#allocation70_spill] sm:$0xff]  ;;  %v17202_v19 = vmov 0.0   ;;  %v22887_v34 = vld [vmem:[#allocation71_spill] sm:$0xff] }
 0x23d   : > { %22873 = vst [vmem:[#allocation89_spill] sm:$0xff] %v19226_v59  ;;  %v3300_v60 = vpop.f32.mrf.mxu0  ;;  %v2777_v37 = vadd.f32 %v22882_v22, %v22881_v50  ;;  %6302 = vst.msk [vmem:[#allocation3] sm:$0xff] %vm6301_vm2, %v17202_v19  ;;  %v5264_v50 = vld [vmem:[#allocation2 + $0x17a] sm:$0xff] }
 0x23e   : > { %v19235_v12 = vpop.f32.mrf.mxu1  ;;  %v19239_v59 = vadd.f32 %v3300_v60, %v2775_v13  ;;  %v5263_v60 = vld [vmem:[#allocation2 + $0x172] sm:$0xff]  ;;  %6303 = vst.msk [vmem:[#allocation3 + $0x8] sm:$0xff] %vm6301_vm2, %v17202_v19  ;;  %6304 = vst.msk [vmem:[#allocation3 + $0x10] sm:$0xff] %vm6301_vm2, %v17202_v19 }
 0x23f   : > { %22876 = vst [vmem:[#allocation32_spill] sm:$0xff] %v19235_v12  ;;  %v15920_v6 = vpop.f32.mrf.mxu0  ;;  %16233 = vmatmul.mubr.msk.f32.gmra.mxu0 %vm387_vm1, %v5260_v7  ;;  %6353 = vst.msk [vmem:[#allocation3 + $0x198] sm:$0xff] %vm6301_vm2, %v17202_v19 }
 0x240   : > { %22879 = vst [vmem:[#allocation68_spill] sm:$0xff] %v19239_v59  ;;  %v19241_v31 = vpop.f32.mrf.mxu1  ;;  %v19247_v4 = vadd.f32 %v15920_v6, %v2778_v9  ;;  %16235 = vmatprep.mubr.msk.f32.mxu0 %vm387_vm1, %v5261_v32  ;;  %6354 = vst.msk [vmem:[#allocation3 + $0x1a0] sm:$0xff] %vm6301_vm2, %v17202_v19  ;;  %v22886_v32 = vld [vmem:[#allocation39_spill] sm:$0xff] }
 0x241   : > { %22880 = vst [vmem:[#allocation34_spill] sm:$0xff] %v19241_v31  ;;  %v3310_v13 = vpop.f32.mrf.mxu0  ;;  %6355 = vst.msk [vmem:[#allocation3 + $0x1a8] sm:$0xff] %vm6301_vm2, %v17202_v19  ;;  %v2779_v6 = vadd.f32 %v22887_v34, %v22886_v32  ;;  %v4665_v59 = vld [vmem:[#allocation2 + $0x1d1] sm:$0xff]  ;;  %v5265_v31 = vld [vmem:[#allocation2 + $0x182] sm:$0xff] }
 0x242   : > { %v19250_v12 = vpop.f32.mrf.mxu1  ;;  %6356 = vst.msk [vmem:[#allocation3 + $0x1b0] sm:$0xff] %vm6301_vm2, %v17202_v19  ;;  %v19259_v58 = vadd.f32 %v3310_v13, %v2777_v37  ;;  %16173 = vmatprep.mubr.msk.f32.mxu1 %vm387_vm1, %v4665_v59  ;;  %v4666_v37 = vld [vmem:[#allocation2 + $0x1d9] sm:$0xff] }
 0x243   : > { %22883 = vst [vmem:[#allocation69_spill] sm:$0xff] %v19250_v12  ;;  %v15923_v9 = vpop.f32.mrf.mxu0  ;;  %16236 = vmatmul.mubr.msk.f32.gmra.mxu0 %vm387_vm1, %v5262_v8  ;;  %16174 = vmatmul.mubr.msk.f32.gmra.mxu1 %vm387_vm1, %v4666_v37  ;;  %v5267_v34 = vld [vmem:[#allocation2 + $0x192] sm:$0xff] }
 0x244   : > { %22884 = vst [vmem:[#allocation36_spill] sm:$0xff] %v19259_v58  ;;  %v19261_v7 = vpop.f32.mrf.mxu1  ;;  %16238 = vmatprep.mubr.msk.f32.mxu0 %vm387_vm1, %v5263_v60  ;;  %v13733_v60 = vld [vmem:[%s22625_s3 + $0x10] sm:$0xff]  ;;  %v5269_v58 = vld [vmem:[#allocation2 + $0x1a2] sm:$0xff] }
 0x245   : > { %22885 = vst [vmem:[#allocation70_spill] sm:$0xff] %v19261_v7  ;;  %v3320_v12 = vpop.f32.mrf.mxu0  ;;  %v5266_v9 = vld [vmem:[#allocation2 + $0x18a] sm:$0xff]  ;;  %16407 = vmatprep.subr.mxu0 %v13733_v60  ;;  %v6408_v59 = vld [vmem:[#allocation3 + $0x1] sm:$0xff] }
 0x246   : > { %v19267_v22 = vpop.f32.mrf.mxu1  ;;  %v19270_v13 = vadd.f32 %v3320_v12, %v2779_v6  ;;  %16261 = vmatprep.mubr.msk.f32.mxu1 %vm6301_vm2, %v6408_v59  ;;  %16408 = vmatpush3.msra.mxu0 %v13733_v60  ;;  %v6409_v6 = vld [vmem:[#allocation3 + $0x9] sm:$0xff] }
 0x247   : > { %22888 = vst [vmem:[#allocation39_spill] sm:$0xff] %v19267_v22  ;;  %v15926_v8 = vpop.f32.mrf.mxu0  ;;  %16239 = vmatmul.mubr.msk.f32.gmra.mxu0 %vm387_vm1, %v5264_v50  ;;  %16262 = vmatmul.mubr.msk.f32.vlgmr.msra.gmra.mxu1 %vm6301_vm2, %v6409_v6 }
 0x248   : > { %22889 = vst [vmem:[#allocation71_spill] sm:$0xff] %v19270_v13  ;;  %v19272_v19 = vpop.f32.mrf.mxu1  ;;  %16241 = vmatprep.mubr.msk.f32.mxu0 %vm387_vm1, %v5265_v31  ;;  %v5268_v31 = vld [vmem:[#allocation2 + $0x19a] sm:$0xff] }
 0x249   : > { %22890 = vst [vmem:[#allocation90_spill] sm:$0xff] %v19272_v19  ;;  %v3330_v12 = vpop.f32.mrf.mxu0 }
 0x24a   : > { %v19280_v32 = vpop.f32.mrf.mxu1  ;;  %v22894_v12 = vld [vmem:[#allocation72_spill] sm:$0xff] }
 0x24b   : > { %22891 = vst [vmem:[#allocation91_spill] sm:$0xff] %v19280_v32  ;;  %v16014_v50 = vpop.f32.mrf.mxu0  ;;  %16242 = vmatmul.mubr.msk.f32.gmra.mxu0 %vm387_vm1, %v5266_v9  ;;  %v3952_v32 = vadd.f32 %v22894_v12, %v18937_v35  ;;  %v5270_v9 = vld [vmem:[#allocation2 + $0x1aa] sm:$0xff] }
 0x24c   : > { %v19283_v37 = vpop.f32.mrf.mxu1  ;;  %16244 = vmatprep.mubr.msk.f32.mxu0 %vm387_vm1, %v5267_v34  ;;  %v5271_v50 = vld [vmem:[#allocation2 + $0x1b2] sm:$0xff] }
 0x24d   : > { %22892 = vst [vmem:[#allocation92_spill] sm:$0xff] %v19283_v37  ;;  %v4290_v13 = vpop.f32.mrf.mxu0 }
 0x24e   : > { %v19288_v8 = vpop.f32.mrf.mxu1  ;;  %v22897_v13 = vld [vmem:[#allocation73_spill] sm:$0xff] }
 0x24f   : > { %22893 = vst [vmem:[#allocation93_spill] sm:$0xff] %v19288_v8  ;;  %v16017_v60 = vpop.f32.mrf.mxu0  ;;  %16245 = vmatmul.mubr.msk.f32.gmra.mxu0 %vm387_vm1, %v5268_v31  ;;  %v3954_v8 = vadd.f32 %v22897_v13, %v18949_v41  ;;  %v5273_v41 = vld [vmem:[#allocation2 + $0x1c2] sm:$0xff] }
 0x250   : > { %v19292_v59 = vpop.f32.mrf.mxu1  ;;  %v19295_v37 = vadd.f32 %v16017_v60, %v3952_v32  ;;  %16247 = vmatprep.mubr.msk.f32.mxu0 %vm387_vm1, %v5269_v58  ;;  %v6407_v32 = vld [vmem:[%s22625_s3] sm:$0xff] }
 0x251   : > { %22895 = vst [vmem:[#allocation72_spill] sm:$0xff] %v19292_v59  ;;  %v4300_v34 = vpop.f32.mrf.mxu0  ;;  %v5272_v58 = vld [vmem:[#allocation2 + $0x1ba] sm:$0xff]  ;;  %16333 = vmatprep.subr.mxu1 %v6407_v32 }
 0x252   : > { %v19298_v6 = vpop.f32.mrf.mxu1  ;;  %16334 = vmatpush3.msra.mxu1 %v6407_v32  ;;  %v22900_v34 = vld [vmem:[#allocation75_spill] sm:$0xff]  ;;  %v22903_v32 = vld [vmem:[#allocation4_spill] sm:$0xff] }
 0x253   : > { %22896 = vst [vmem:[#allocation94_spill] sm:$0xff] %v19298_v6  ;;  %v16020_v35 = vpop.f32.mrf.mxu0  ;;  %16248 = vmatmul.mubr.msk.f32.gmra.mxu0 %vm387_vm1, %v5270_v9  ;;  %v3956_v13 = vadd.f32 %v22900_v34, %v18963_v2  ;;  %v5275_v6 = vld [vmem:[#allocation2 + $0x1d2] sm:$0xff]  ;;  %v3958_v59 = vadd.f32 %v22903_v32, %v18977_v16 }
 0x254   : > { %v19302_v19 = vpop.f32.mrf.mxu1  ;;  %v19308_v31 = vadd.f32 %v16020_v35, %v3954_v8  ;;  %16250 = vmatprep.mubr.msk.f32.mxu0 %vm387_vm1, %v5271_v50  ;;  %v5274_v50 = vld [vmem:[#allocation2 + $0x1ca] sm:$0xff] }
 0x255   : > { %22898 = vst [vmem:[#allocation73_spill] sm:$0xff] %v19302_v19  ;;  %v19313_v60 = vpop.f32.mrf.mxu0 }
 0x256   : > { %v19311_v12 = vpop.f32.mrf.mxu1 }
 0x257   : > { %22899 = vst [vmem:[#allocation95_spill] sm:$0xff] %v19311_v12  ;;  %v16023_v19 = vpop.f32.mrf.mxu0  ;;  %16251 = vmatmul.mubr.msk.f32.gmra.mxu0 %vm387_vm1, %v5272_v58  ;;  %v5276_v58 = vld [vmem:[#allocation2 + $0x1da] sm:$0xff] }
 0x258   : > { %v19317_v9 = vpop.f32.mrf.mxu1  ;;  %v19320_v8 = vadd.f32 %v16023_v19, %v3956_v13  ;;  %16253 = vmatprep.mubr.msk.f32.mxu0 %vm387_vm1, %v5273_v41  ;;  %v7356_v13 = vld [vmem:[#allocation3 + $0x2] sm:$0xff] }
 0x259   : > { %22901 = vst [vmem:[#allocation75_spill] sm:$0xff] %v19317_v9  ;;  %v19325_v12 = vpop.f32.mrf.mxu0 }
 0x25a   : > { %v19323_v35 = vpop.f32.mrf.mxu1 }
 0x25b   : > { %22902 = vst [vmem:[#allocation96_spill] sm:$0xff] %v19323_v35  ;;  %v16026_v2 = vpop.f32.mrf.mxu0  ;;  %16254 = vmatmul.mubr.msk.f32.gmra.mxu0 %vm387_vm1, %v5274_v50  ;;  %v22906_v35 = vld [vmem:[#allocation6_spill] sm:$0xff]  ;;  %v7357_v50 = vld [vmem:[#allocation3 + $0xa] sm:$0xff] }
 0x25c   : > { %v19329_v22 = vpop.f32.mrf.mxu1  ;;  %v19332_v34 = vadd.f32 %v16026_v2, %v3958_v59  ;;  %16256 = vmatprep.mubr.msk.f32.mxu0 %vm387_vm1, %v5275_v6  ;;  %v3960_v9 = vadd.f32 %v22906_v35, %v18991_v43  ;;  %v22909_v2 = vld [vmem:[#allocation8_spill] sm:$0xff] }
 0x25d   : > { %22904 = vst [vmem:[#allocation4_spill] sm:$0xff] %v19329_v22  ;;  %v19337_v41 = vpop.f32.mrf.mxu0 }
 0x25e   : > { %v19334_v19 = vpop.f32.mrf.mxu1 }
 0x25f   : > { %22905 = vst [vmem:[#allocation97_spill] sm:$0xff] %v19334_v19  ;;  %v16029_v16 = vpop.f32.mrf.mxu0  ;;  %16257 = vmatmul.mubr.msk.f32.gmra.mxu0 %vm387_vm1, %v5276_v58  ;;  %v3962_v19 = vadd.f32 %v22909_v2, %v19005_v57  ;;  %v22913_v57 = vld [vmem:[#allocation11_spill] sm:$0xff] }
 0x260   : > { %v19341_v7 = vpop.f32.mrf.mxu1  ;;  %v19344_v32 = vadd.f32 %v16029_v16, %v3960_v9  ;;  %16409 = vmatprep.mubr.msk.f32.mxu0 %vm6301_vm2, %v7356_v13  ;;  %v22912_v16 = vld [vmem:[#allocation9_spill] sm:$0xff]  ;;  %v3966_v2 = vadd.f32 %v22913_v57, %v19029_v33 }
 0x261   : > { %22907 = vst [vmem:[#allocation6_spill] sm:$0xff] %v19341_v7  ;;  %v19349_v6 = vpop.f32.mrf.mxu0  ;;  %v3964_v13 = vadd.f32 %v22912_v16, %v19017_v26 }
 0x262   : > { %v19346_v59 = vpop.f32.mrf.mxu1 }
 0x263   : > { %22908 = vst [vmem:[#allocation98_spill] sm:$0xff] %v19346_v59  ;;  %v16032_v43 = vpop.f32.mrf.mxu0  ;;  %16410 = vmatmul.mubr.msk.f32.vlgmr.msra.gmra.mxu0 %vm6301_vm2, %v7357_v50 }
 0x264   : > { %v19353_v22 = vpop.f32.mrf.mxu1  ;;  %v19356_v35 = vadd.f32 %v16032_v43, %v3962_v19  ;;  %v22914_v43 = vld [vmem:[#allocation13_spill] sm:$0xff] }
 0x265   : > { %22910 = vst [vmem:[#allocation8_spill] sm:$0xff] %v19353_v22  ;;  %v19360_v9 = vpop.f32.mrf.mxu0 }
 0x266   : > { %v19358_v58 = vpop.f32.mrf.mxu1 }
 0x267   : > { %22911 = vst [vmem:[#allocation99_spill] sm:$0xff] %v19358_v58  ;;  %v16035_v7 = vpop.f32.mrf.mxu0  ;;  %v3968_v58 = vadd.f32 %v22914_v43, %v19039_v0 }
 0x268   : > { %v16172_v59 = vpop.f32.mrf.mxu1  ;;  %v19364_v63 = vadd.f32 %v16035_v7, %v3964_v13  ;;  %v22915_v7 = vld [vmem:[#allocation15_spill] sm:$0xff] }
 0x269   : > { %v19366_v61 = vpop.f32.mrf.mxu0  ;;  %v3970_v59 = vadd.f32 %v22915_v7, %v19051_v27  ;;  %v22920_v7 = vld [vmem:[#allocation24_spill] sm:$0xff] }
 0x26b   : > { %v16038_v22 = vpop.f32.mrf.mxu0 }
 0x26c   : > { %v19370_v50 = vadd.f32 %v16038_v22, %v3966_v2  ;;  %v22916_v22 = vld [vmem:[#allocation17_spill] sm:$0xff] }
 0x26d   : > { %v19372_v19 = vpop.f32.mrf.mxu0  ;;  %v3972_v57 = vadd.f32 %v22916_v22, %v19063_v3  ;;  %v22922_v22 = vld [vmem:[#allocation28_spill] sm:$0xff] }
 0x26f   : > { %v16041_v5 = vpop.f32.mrf.mxu0 }
 0x270   : > { %v19376_v15 = vadd.f32 %v16041_v5, %v3968_v58  ;;  %v22918_v5 = vld [vmem:[#allocation20_spill] sm:$0xff] }
 0x271   : > { %v19378_v26 = vpop.f32.mrf.mxu0  ;;  %v3974_v58 = vadd.f32 %v22918_v5, %v19077_v51  ;;  %v22924_v5 = vld [vmem:[#allocation78_spill] sm:$0xff] }
 0x273   : > { %v16044_v16 = vpop.f32.mrf.mxu0 }
 0x274   : > { %v19382_v13 = vadd.f32 %v16044_v16, %v3970_v59  ;;  %v3976_v59 = vadd.f32 %v22920_v7, %v19091_v18  ;;  %v22926_v7 = vld [vmem:[#allocation80_spill] sm:$0xff] }
 0x275   : > { %v19384_v33 = vpop.f32.mrf.mxu0 }
 0x277   : > { %v16047_v2 = vpop.f32.mrf.mxu0 }
 0x278   : > { %v19388_v62 = vadd.f32 %v16047_v2, %v3972_v57  ;;  %v3978_v57 = vadd.f32 %v22922_v22, %v19105_v29  ;;  %v22928_v22 = vld [vmem:[#allocation82_spill] sm:$0xff] }
 0x279   : > { %v19390_v0 = vpop.f32.mrf.mxu0 }
 0x27a   : > { %22917 = vst [vmem:[#allocation9_spill] sm:$0xff] %v19388_v62 }
 0x27b   : > { %v16050_v43 = vpop.f32.mrf.mxu0 }
 0x27c   : > { %v19394_v30 = vadd.f32 %v16050_v43, %v3974_v58  ;;  %v3980_v58 = vadd.f32 %v22924_v5, %v19119_v45  ;;  %v22930_v5 = vld [vmem:[#allocation84_spill] sm:$0xff] }
 0x27d   : > { %v19396_v27 = vpop.f32.mrf.mxu0 }
 0x27e   : > { %22919 = vst [vmem:[#allocation11_spill] sm:$0xff] %v19394_v30 }
 0x27f   : > { %v16053_v16 = vpop.f32.mrf.mxu0 }
 0x280   : > { %v19400_v40 = vadd.f32 %v16053_v16, %v3976_v59  ;;  %v3982_v59 = vadd.f32 %v22926_v7, %v19133_v49  ;;  %v22931_v7 = vld [vmem:[#allocation18_spill] sm:$0xff] }
 0x281   : > { %v19402_v3 = vpop.f32.mrf.mxu0 }
 0x282   : > { %22921 = vst [vmem:[#allocation13_spill] sm:$0xff] %v19400_v40 }
 0x283   : > { %v16056_v2 = vpop.f32.mrf.mxu0 }
 0x284   : > { %v19406_v62 = vadd.f32 %v16056_v2, %v3978_v57  ;;  %v3984_v57 = vadd.f32 %v22928_v22, %v19147_v10  ;;  %v22932_v22 = vld [vmem:[#allocation21_spill] sm:$0xff] }
 0x285   : > { %v19408_v51 = vpop.f32.mrf.mxu0 }
 0x286   : > { %22923 = vst [vmem:[#allocation15_spill] sm:$0xff] %v19406_v62 }
 0x287   : > { %v16059_v43 = vpop.f32.mrf.mxu0 }
 0x288   : > { %v19412_v30 = vadd.f32 %v16059_v43, %v3980_v58  ;;  %v3986_v58 = vadd.f32 %v22930_v5, %v19161_v56  ;;  %v3992_v5 = vadd.f32 %v18958_v47, %v19203_v17  ;;  %v3998_v17 = vadd.f32 %v19000_v38, %v19247_v4 }
 0x289   : > { %v19414_v18 = vpop.f32.mrf.mxu0 }
 0x28a   : > { %22925 = vst [vmem:[#allocation17_spill] sm:$0xff] %v19412_v30 }
 0x28b   : > { %v16062_v16 = vpop.f32.mrf.mxu0 }
 0x28c   : > { %v19418_v40 = vadd.f32 %v16062_v16, %v3982_v59  ;;  %v3988_v59 = vadd.f32 %v22931_v7, %v19175_v14  ;;  %v3994_v7 = vadd.f32 %v18972_v28, %v19217_v52  ;;  %v13831_v28 = vld [vmem:[%s22625_s3 + $0x20] sm:$0xff]  ;;  %v13782_v52 = vld [vmem:[%s22625_s3 + $0x18] sm:$0xff] }
 0x28d   : > { %v19420_v29 = vpop.f32.mrf.mxu0  ;;  %16555 = vmatprep.subr.mxu0 %v13831_v28  ;;  %16481 = vmatprep.subr.mxu1 %v13782_v52 }
 0x28e   : > { %22927 = vst [vmem:[#allocation20_spill] sm:$0xff] %v19418_v40  ;;  %16556 = vmatpush3.msra.mxu0 %v13831_v28 }
 0x28f   : > { %v16065_v2 = vpop.f32.mrf.mxu0 }
 0x290   : > { %v19424_v62 = vadd.f32 %v16065_v2, %v3984_v57  ;;  %v3990_v57 = vadd.f32 %v22932_v22, %v19189_v1  ;;  %v3996_v22 = vadd.f32 %v18986_v36, %v19232_v25 }
 0x291   : > { %v19426_v45 = vpop.f32.mrf.mxu0 }
 0x292   : > { %22929 = vst [vmem:[#allocation24_spill] sm:$0xff] %v19424_v62 }
 0x293   : > { %v16068_v43 = vpop.f32.mrf.mxu0 }
 0x294   : > { %v19430_v30 = vadd.f32 %v16068_v43, %v3986_v58 }
 0x295   : > { %v19432_v49 = vpop.f32.mrf.mxu0 }
 0x297   : > { %v16071_v16 = vpop.f32.mrf.mxu0 }
 0x298   : > { %v19436_v40 = vadd.f32 %v16071_v16, %v3988_v59 }
 0x299   : > { %v19438_v10 = vpop.f32.mrf.mxu0 }
 0x29b   : > { %v16074_v2 = vpop.f32.mrf.mxu0 }
 0x29c   : > { %v19442_v62 = vadd.f32 %v16074_v2, %v3990_v57 }
 0x29d   : > { %v19444_v56 = vpop.f32.mrf.mxu0 }
 0x29f   : > { %v16077_v58 = vpop.f32.mrf.mxu0 }
 0x2a0   : > { %v19448_v43 = vadd.f32 %v16077_v58, %v3992_v5 }
 0x2a1   : > { %v19450_v14 = vpop.f32.mrf.mxu0 }
 0x2a3   : > { %v16080_v59 = vpop.f32.mrf.mxu0 }
 0x2a4   : > { %v19454_v16 = vadd.f32 %v16080_v59, %v3994_v7 }
 0x2a5   : > { %v19456_v1 = vpop.f32.mrf.mxu0 }
 0x2a6   : > { %22933 = vst [vmem:[#allocation28_spill] sm:$0xff] %v19454_v16  ;;  %22934 = vst [vmem:[#allocation78_spill] sm:$0xff] %v19456_v1  ;;  %v5172_v1 = vadd.f32 %v19046_v21, %v19295_v37 }
 0x2a7   : > { %v16083_v57 = vpop.f32.mrf.mxu0 }
 0x2a8   : > { %v19460_v2 = vadd.f32 %v16083_v57, %v3996_v22  ;;  %v5967_v22 = vlaneseq }
 0x2a9   : > { %v19462_v47 = vpop.f32.mrf.mxu0 }
 0x2aa   : > { %22935 = vst [vmem:[#allocation80_spill] sm:$0xff] %v19460_v2  ;;  %22936 = vst [vmem:[#allocation82_spill] sm:$0xff] %v19462_v47  ;;  %v22937_v2 = vld [vmem:[#allocation25_spill] sm:$0xff]  ;;  %v22938_v47 = vld [vmem:[#allocation74_spill] sm:$0xff]  ;;  %v19487_v28 = vshrl.u32 %v5967_v22, 7 }
 0x2ab   : > { %v16086_v5 = vpop.f32.mrf.mxu0  ;;  %v3953_v16 = vadd.f32 %v22938_v47, %v22937_v2  ;;  %v5174_v2 = vadd.f32 %v19058_v44, %v19308_v31  ;;  %v5176_v44 = vadd.f32 %v19072_v11, %v19320_v8  ;;  %v22943_v11 = vld [vmem:[#allocation37_spill] sm:$0xff]  ;;  %v22944_v8 = vld [vmem:[#allocation7_spill] sm:$0xff] }
 0x2ac   : > { %v19472_v36 = vadd.f32 %v16086_v5, %v3998_v17  ;;  %v19485_v17 = vld [vmem:[%s22624_s2] ss:$0 sm:$0xff]  ;;  %vm6025_vm3 = vcmp.ge.s32.totalorder %v19487_v28, 1  ;;  %v19498_v22 = vadd.s32 16, %v19487_v28 }
 0x2ad   : > { %v19474_v25 = vpop.f32.mrf.mxu0  ;;  %v4563_v5 = vadd.f32 %v19313_v60, %v3953_v16 }
 0x2ae   : > { %vm6084_vm4 = vcmp.le.s32.totalorder %v19498_v22, 16 }
 0x2af   : > { %v16089_v58 = vpop.f32.mrf.mxu0  ;;  %v5173_v60 = vadd.f32 %v19066_v53, %v4563_v5 }
 0x2b1   : > { %v19476_v7 = vpop.f32.mrf.mxu0 }
 0x2b3   : > { %v16092_v38 = vpop.f32.mrf.mxu0 }
 0x2b4   : > { %v22939_v38 = vld [vmem:[#allocation29_spill] sm:$0xff] }
 0x2b5   : > { %v4550_v4 = vpop.f32.mrf.mxu0 }
 0x2b6   : > { %v22940_v4 = vld [vmem:[#allocation76_spill] sm:$0xff] }
 0x2b7   : > { %v16180_v59 = vpop.f32.mrf.mxu0 }
 0x2b8   : > { %v3955_v59 = vadd.f32 %v22940_v4, %v22939_v38  ;;  %v22942_v38 = vld [vmem:[#allocation5_spill] sm:$0xff] }
 0x2b9   : > { %v5510_v57 = vpop.f32.mrf.mxu0 }
 0x2ba   : > { %v4565_v37 = vadd.f32 %v19325_v12, %v3955_v59 }
 0x2bb   : > { %v16183_v52 = vpop.f32.mrf.mxu0 }
 0x2bc   : > { %v5782_v58 = vadd.f32 %v16183_v52, %v5172_v1  ;;  %v22941_v52 = vld [vmem:[#allocation33_spill] sm:$0xff]  ;;  %v5175_v59 = vadd.f32 %v19080_v42, %v4565_v37 }
 0x2bd   : > { %v5520_v57 = vpop.f32.mrf.mxu0  ;;  %v3957_v4 = vadd.f32 %v22942_v38, %v22941_v52  ;;  %v3959_v52 = vadd.f32 %v22944_v8, %v22943_v11 }
 0x2be   : > { %v5843_v21 = vadd.f32 %v19485_v17, %v5782_v58 }
 0x2bf   : > { %v16186_v47 = vpop.f32.mrf.mxu0  ;;  %v4567_v5 = vadd.f32 %v19337_v41, %v3957_v4  ;;  %v4569_v41 = vadd.f32 %v19349_v6, %v3959_v52 }
 0x2c0   : > { %v5897_v16 = vmax.f32 %v5843_v21, 0.0  ;;  %v5784_v1 = vadd.f32 %v16186_v47, %v5174_v2 }
 0x2c1   : > { %v5530_v57 = vpop.f32.mrf.mxu0 }
 0x2c2   : > { %v6250_v31 = vsel %vm6025_vm3, %v5897_v16, 0.0  ;;  %v5845_v12 = vadd.f32 %v19485_v17, %v5784_v1  ;;  %v5783_v58 = vadd.f32 %v5530_v57, %v5173_v60  ;;  %v5178_v16 = vadd.f32 %v19086_v20, %v19332_v34 }
 0x2c3   : > { %6305 = vst.msk [vmem:[#allocation3 + $0x18] sm:$0xff] %vm6301_vm2, %v6250_v31  ;;  %v16189_v53 = vpop.f32.mrf.mxu0  ;;  %v5177_v57 = vadd.f32 %v19094_v39, %v4567_v5  ;;  %v22945_v31 = vld [vmem:[#allocation40_spill] sm:$0xff] }
 0x2c4   : > { %v5899_v2 = vmax.f32 %v5845_v12, 0.0  ;;  %v5844_v21 = vadd.f32 %v19485_v17, %v5783_v58  ;;  %v5786_v47 = vadd.f32 %v16189_v53, %v5176_v44  ;;  %v22946_v12 = vld [vmem:[#allocation77_spill] sm:$0xff] }
 0x2c5   : > { %v5540_v60 = vpop.f32.mrf.mxu0  ;;  %v3961_v58 = vadd.f32 %v22946_v12, %v22945_v31 }
 0x2c6   : > { %v6252_v42 = vsel %vm6084_vm4, %v5899_v2, 0.0  ;;  %v5898_v37 = vmax.f32 %v5844_v21, 0.0  ;;  %v5847_v1 = vadd.f32 %v19485_v17, %v5786_v47  ;;  %v5785_v38 = vadd.f32 %v5540_v60, %v5175_v59  ;;  %v22947_v47 = vld [vmem:[#allocation49_spill] sm:$0xff] }
 0x2c7   : > { %6307 = vst.msk [vmem:[#allocation3 + $0x28] sm:$0xff] %vm6301_vm2, %v6252_v42  ;;  %v16192_v4 = vpop.f32.mrf.mxu0  ;;  %v5180_v59 = vadd.f32 %v19100_v23, %v19344_v32  ;;  %v5179_v11 = vadd.f32 %v22947_v47, %v4569_v41  ;;  %v4571_v8 = vadd.f32 %v19360_v9, %v3961_v58  ;;  %v22948_v42 = vld [vmem:[#allocation42_spill] sm:$0xff]  ;;  %v5184_v47 = vadd.f32 %v19128_v55, %v19364_v63  ;;  %v22953_v63 = vld [vmem:[#allocation53_spill] sm:$0xff] }
 0x2c8   : > { %6306 = vst.msk [vmem:[#allocation3 + $0x20] sm:$0xff] %vm6301_vm2, %v5898_v37  ;;  %v5901_v44 = vmax.f32 %v5847_v1, 0.0  ;;  %v5846_v20 = vadd.f32 %v19485_v17, %v5785_v38  ;;  %v5788_v34 = vadd.f32 %v16192_v4, %v5178_v16  ;;  %v22949_v37 = vld [vmem:[#allocation10_spill] sm:$0xff]  ;;  %v5182_v38 = vadd.f32 %v19114_v24, %v19356_v35 }
 0x2c9   : > { %v5550_v53 = vpop.f32.mrf.mxu0  ;;  %v3963_v1 = vadd.f32 %v22949_v37, %v22948_v42 }
 0x2ca   : > { %6309 = vst.msk [vmem:[#allocation3 + $0x38] sm:$0xff] %vm6301_vm2, %v5901_v44  ;;  %v5900_v6 = vmax.f32 %v5846_v20, 0.0  ;;  %v5849_v2 = vadd.f32 %v19485_v17, %v5788_v34  ;;  %v5787_v21 = vadd.f32 %v5550_v53, %v5177_v57  ;;  %v6410_v39 = vld [vmem:[#allocation3 + $0x11] sm:$0xff]  ;;  %v22950_v20 = vld [vmem:[#allocation51_spill] sm:$0xff] }
 0x2cb   : > { %v7358_v5 = vld [vmem:[#allocation3 + $0x12] sm:$0xff]  ;;  %v16195_v52 = vpop.f32.mrf.mxu0  ;;  %16264 = vmatprep.mubr.msk.f32.mxu1 %vm6301_vm2, %v6410_v39  ;;  %v5181_v34 = vadd.f32 %v22950_v20, %v4571_v8  ;;  %v4573_v31 = vadd.f32 %v19366_v61, %v3963_v1  ;;  %v22952_v39 = vld [vmem:[#allocation12_spill] sm:$0xff] }
 0x2cc   : > { %16412 = vmatprep.mubr.msk.f32.mxu0 %vm6301_vm2, %v7358_v5  ;;  %v6253_v23 = vsel %vm6025_vm3, %v5900_v6, 0.0  ;;  %v5903_v32 = vmax.f32 %v5849_v2, 0.0  ;;  %v5848_v16 = vadd.f32 %v19485_v17, %v5787_v21  ;;  %v5790_v60 = vadd.f32 %v16195_v52, %v5180_v59  ;;  %v22951_v21 = vld [vmem:[#allocation43_spill] sm:$0xff] }
 0x2cd   : > { %6308 = vst.msk [vmem:[#allocation3 + $0x30] sm:$0xff] %vm6301_vm2, %v6253_v23  ;;  %v5560_v9 = vpop.f32.mrf.mxu0  ;;  %v3965_v5 = vadd.f32 %v22952_v39, %v22951_v21 }
 0x2ce   : > { %v6256_v41 = vsel %vm6025_vm3, %v5903_v32, 0.0  ;;  %v5902_v4 = vmax.f32 %v5848_v16, 0.0  ;;  %v5851_v57 = vadd.f32 %v19485_v17, %v5790_v60  ;;  %v5789_v44 = vadd.f32 %v5560_v9, %v5179_v11 }
 0x2cf   : > { %6311 = vst.msk [vmem:[#allocation3 + $0x48] sm:$0xff] %vm6301_vm2, %v6256_v41  ;;  %v16198_v12 = vpop.f32.mrf.mxu0  ;;  %v19549_v58 = vld [vmem:[#allocation3 + $0x19] sm:$0xff]  ;;  %v19551_v35 = vld [vmem:[#allocation3 + $0x21] sm:$0xff]  ;;  %v4575_v16 = vadd.f32 %v19372_v19, %v3965_v5  ;;  %v5183_v60 = vadd.f32 %v22953_v63, %v4573_v31 }
 0x2d0   : > { %v7359_v24 = vld [vmem:[#allocation3 + $0x1a] sm:$0xff]  ;;  %v6255_v53 = vsel %vm6084_vm4, %v5902_v4, 0.0  ;;  %v5905_v59 = vmax.f32 %v5851_v57, 0.0  ;;  %v5850_v6 = vadd.f32 %v19485_v17, %v5789_v44  ;;  %v5792_v2 = vadd.f32 %v16198_v12, %v5182_v38  ;;  %16265 = vmatmul.mubr.msk.f32.gmra.mxu1 %vm6301_vm2, %v19549_v58  ;;  %v7360_v61 = vld [vmem:[#allocation3 + $0x22] sm:$0xff] }
 0x2d1   : > { %16413 = vmatmul.mubr.msk.f32.gmra.mxu0 %vm6301_vm2, %v7359_v24  ;;  %6310 = vst.msk [vmem:[#allocation3 + $0x40] sm:$0xff] %vm6301_vm2, %v6255_v53  ;;  %v5570_v11 = vpop.f32.mrf.mxu0  ;;  %16267 = vmatprep.mubr.msk.f32.mxu1 %vm6301_vm2, %v19551_v35  ;;  %v22954_v4 = vld [vmem:[#allocation44_spill] sm:$0xff]  ;;  %v22955_v57 = vld [vmem:[#allocation14_spill] sm:$0xff]  ;;  %v22956_v53 = vld [vmem:[#allocation55_spill] sm:$0xff] }
 0x2d2   : > { %16415 = vmatprep.mubr.msk.f32.mxu0 %vm6301_vm2, %v7360_v61  ;;  %v6258_v8 = vsel %vm6084_vm4, %v5905_v59, 0.0  ;;  %v5904_v52 = vmax.f32 %v5850_v6, 0.0  ;;  %v5853_v23 = vadd.f32 %v19485_v17, %v5792_v2  ;;  %v5791_v32 = vadd.f32 %v5570_v11, %v5181_v34  ;;  %v22957_v11 = vld [vmem:[#allocation45_spill] sm:$0xff] }
 0x2d3   : > { %6313 = vst.msk [vmem:[#allocation3 + $0x58] sm:$0xff] %vm6301_vm2, %v6258_v8  ;;  %v16201_v55 = vpop.f32.mrf.mxu0  ;;  %v3967_v44 = vadd.f32 %v22955_v57, %v22954_v4  ;;  %v5186_v34 = vadd.f32 %v19142_v48, %v19370_v50  ;;  %v5185_v59 = vadd.f32 %v22956_v53, %v4575_v16  ;;  %v22958_v8 = vld [vmem:[#allocation16_spill] sm:$0xff] }
 0x2d4   : > { %6312 = vst.msk [vmem:[#allocation3 + $0x50] sm:$0xff] %vm6301_vm2, %v5904_v52  ;;  %v5907_v42 = vmax.f32 %v5853_v23, 0.0  ;;  %v5852_v37 = vadd.f32 %v19485_v17, %v5791_v32  ;;  %v5794_v1 = vadd.f32 %v16201_v55, %v5184_v47  ;;  %v19575_v38 = vld [vmem:[#allocation3 + $0x29] sm:$0xff]  ;;  %v19577_v41 = vld [vmem:[#allocation3 + $0x31] sm:$0xff]  ;;  %v3969_v52 = vadd.f32 %v22958_v8, %v22957_v11 }
 0x2d5   : > { %v7361_v9 = vld [vmem:[#allocation3 + $0x2a] sm:$0xff]  ;;  %v5580_v19 = vpop.f32.mrf.mxu0  ;;  %16268 = vmatmul.mubr.msk.f32.gmra.mxu1 %vm6301_vm2, %v19575_v38  ;;  %v7362_v20 = vld [vmem:[#allocation3 + $0x32] sm:$0xff]  ;;  %v4577_v6 = vadd.f32 %v19378_v26, %v3967_v44  ;;  %v5188_v23 = vadd.f32 %v19156_v46, %v19376_v15 }
 0x2d6   : > { %16416 = vmatmul.mubr.msk.f32.gmra.mxu0 %vm6301_vm2, %v7361_v9  ;;  %6315 = vst.msk [vmem:[#allocation3 + $0x68] sm:$0xff] %vm6301_vm2, %v5907_v42  ;;  %v5906_v31 = vmax.f32 %v5852_v37, 0.0  ;;  %v5855_v12 = vadd.f32 %v19485_v17, %v5794_v1  ;;  %v5793_v24 = vadd.f32 %v5580_v19, %v5183_v60  ;;  %16270 = vmatprep.mubr.msk.f32.mxu1 %vm6301_vm2, %v19577_v41  ;;  %v22959_v46 = vld [vmem:[#allocation57_spill] sm:$0xff] }
 0x2d7   : > { %16418 = vmatprep.mubr.msk.f32.mxu0 %vm6301_vm2, %v7362_v20  ;;  %v16204_v2 = vpop.f32.mrf.mxu0  ;;  %v5187_v15 = vadd.f32 %v22959_v46, %v4577_v6  ;;  %v4579_v42 = vadd.f32 %v19384_v33, %v3969_v52  ;;  %v22960_v20 = vld [vmem:[#allocation46_spill] sm:$0xff] }
 0x2d8   : > { %v6259_v61 = vsel %vm6025_vm3, %v5906_v31, 0.0  ;;  %v5909_v48 = vmax.f32 %v5855_v12, 0.0  ;;  %v5854_v50 = vadd.f32 %v19485_v17, %v5793_v24  ;;  %v5796_v21 = vadd.f32 %v16204_v2, %v5186_v34  ;;  %v19596_v39 = vld [vmem:[#allocation3 + $0x39] sm:$0xff]  ;;  %v19598_v47 = vld [vmem:[#allocation3 + $0x41] sm:$0xff] }
 0x2d9   : > { %v7363_v5 = vld [vmem:[#allocation3 + $0x3a] sm:$0xff]  ;;  %6314 = vst.msk [vmem:[#allocation3 + $0x60] sm:$0xff] %vm6301_vm2, %v6259_v61  ;;  %v5590_v26 = vpop.f32.mrf.mxu0  ;;  %16271 = vmatmul.mubr.msk.f32.gmra.mxu1 %vm6301_vm2, %v19596_v39  ;;  %v7364_v32 = vld [vmem:[#allocation3 + $0x42] sm:$0xff]  ;;  %v5190_v12 = vadd.f32 %v19170_v54, %v19382_v13 }
 0x2da   : > { %16419 = vmatmul.mubr.msk.f32.gmra.mxu0 %vm6301_vm2, %v7363_v5  ;;  %v6262_v16 = vsel %vm6025_vm3, %v5909_v48, 0.0  ;;  %v5908_v55 = vmax.f32 %v5854_v50, 0.0  ;;  %v5857_v63 = vadd.f32 %v19485_v17, %v5796_v21  ;;  %v5795_v60 = vadd.f32 %v5590_v26, %v5185_v59  ;;  %16273 = vmatprep.mubr.msk.f32.mxu1 %vm6301_vm2, %v19598_v47  ;;  %v22961_v34 = vld [vmem:[#allocation19_spill] sm:$0xff] }
 0x2db   : > { %16421 = vmatprep.mubr.msk.f32.mxu0 %vm6301_vm2, %v7364_v32  ;;  %6317 = vst.msk [vmem:[#allocation3 + $0x78] sm:$0xff] %vm6301_vm2, %v6262_v16  ;;  %v16207_v37 = vpop.f32.mrf.mxu0  ;;  %v19617_v1 = vld [vmem:[#allocation3 + $0x49] sm:$0xff]  ;;  %v3971_v31 = vadd.f32 %v22961_v34, %v22960_v20  ;;  %v19630_v24 = vld [vmem:[#allocation3 + $0x51] sm:$0xff]  ;;  %v22962_v48 = vld [vmem:[#allocation59_spill] sm:$0xff] }
 0x2dc   : > { %v7365_v9 = vld [vmem:[#allocation3 + $0x4a] sm:$0xff]  ;;  %v6261_v4 = vsel %vm6084_vm4, %v5908_v55, 0.0  ;;  %v5911_v57 = vmax.f32 %v5857_v63, 0.0  ;;  %v5856_v44 = vadd.f32 %v19485_v17, %v5795_v60  ;;  %v5798_v19 = vadd.f32 %v16207_v37, %v5188_v23  ;;  %v7366_v53 = vld [vmem:[#allocation3 + $0x52] sm:$0xff]  ;;  %v22963_v26 = vld [vmem:[#allocation47_spill] sm:$0xff] }
 0x2dd   : > { %6316 = vst.msk [vmem:[#allocation3 + $0x70] sm:$0xff] %vm6301_vm2, %v6261_v4  ;;  %v5600_v33 = vpop.f32.mrf.mxu0  ;;  %16274 = vmatmul.mubr.msk.f32.gmra.mxu1 %vm6301_vm2, %v19617_v1  ;;  %v4581_v54 = vadd.f32 %v19390_v0, %v3971_v31  ;;  %v5189_v50 = vadd.f32 %v22962_v48, %v4579_v42  ;;  %v22964_v32 = vld [vmem:[#allocation22_spill] sm:$0xff]  ;;  %v22965_v63 = vld [vmem:[#allocation9_spill] sm:$0xff] }
 0x2de   : > { %16422 = vmatmul.mubr.msk.f32.gmra.mxu0 %vm6301_vm2, %v7365_v9  ;;  %v6264_v59 = vsel %vm6084_vm4, %v5911_v57, 0.0  ;;  %v5910_v6 = vmax.f32 %v5856_v44, 0.0  ;;  %v5859_v2 = vadd.f32 %v19485_v17, %v5798_v19  ;;  %v5797_v61 = vadd.f32 %v5600_v33, %v5187_v15  ;;  %16276 = vmatprep.mubr.msk.f32.mxu1 %vm6301_vm2, %v19630_v24  ;;  %v22966_v60 = vld [vmem:[#allocation61_spill] sm:$0xff]  ;;  %v22967_v9 = vld [vmem:[#allocation62_spill] sm:$0xff] }
 0x2df   : > { %16424 = vmatprep.mubr.msk.f32.mxu0 %vm6301_vm2, %v7366_v53  ;;  %6319 = vst.msk [vmem:[#allocation3 + $0x88] sm:$0xff] %vm6301_vm2, %v6264_v59  ;;  %v16210_v13 = vpop.f32.mrf.mxu0  ;;  %v3973_v16 = vadd.f32 %v22964_v32, %v22963_v26  ;;  %v5192_v46 = vadd.f32 %v22966_v60, %v22965_v63  ;;  %v5191_v4 = vadd.f32 %v22967_v9, %v4581_v54  ;;  %v22968_v59 = vld [vmem:[#allocation48_spill] sm:$0xff] }
 0x2e0   : > { %6318 = vst.msk [vmem:[#allocation3 + $0x80] sm:$0xff] %vm6301_vm2, %v5910_v6  ;;  %v5913_v21 = vmax.f32 %v5859_v2, 0.0  ;;  %v5858_v5 = vadd.f32 %v19485_v17, %v5797_v61  ;;  %v5800_v11 = vadd.f32 %v16210_v13, %v5190_v12  ;;  %v19643_v8 = vld [vmem:[#allocation3 + $0x59] sm:$0xff]  ;;  %v19645_v23 = vld [vmem:[#allocation3 + $0x61] sm:$0xff] }
 0x2e1   : > { %v7367_v52 = vld [vmem:[#allocation3 + $0x5a] sm:$0xff]  ;;  %v5610_v0 = vpop.f32.mrf.mxu0  ;;  %16277 = vmatmul.mubr.msk.f32.gmra.mxu1 %vm6301_vm2, %v19643_v8  ;;  %v7368_v55 = vld [vmem:[#allocation3 + $0x62] sm:$0xff]  ;;  %v4583_v57 = vadd.f32 %v19396_v27, %v3973_v16 }
 0x2e2   : > { %16425 = vmatmul.mubr.msk.f32.gmra.mxu0 %vm6301_vm2, %v7367_v52  ;;  %6321 = vst.msk [vmem:[#allocation3 + $0x98] sm:$0xff] %vm6301_vm2, %v5913_v21  ;;  %v5912_v15 = vmax.f32 %v5858_v5, 0.0  ;;  %v5861_v42 = vadd.f32 %v19485_v17, %v5800_v11  ;;  %v5799_v37 = vadd.f32 %v5610_v0, %v5189_v50  ;;  %16279 = vmatprep.mubr.msk.f32.mxu1 %vm6301_vm2, %v19645_v23  ;;  %v22969_v6 = vld [vmem:[#allocation26_spill] sm:$0xff]  ;;  %v22970_v61 = vld [vmem:[#allocation11_spill] sm:$0xff]  ;;  %v22971_v54 = vld [vmem:[#allocation64_spill] sm:$0xff] }
 0x2e3   : > { %16427 = vmatprep.mubr.msk.f32.mxu0 %vm6301_vm2, %v7368_v55  ;;  %v16213_v44 = vpop.f32.mrf.mxu0  ;;  %v3975_v2 = vadd.f32 %v22969_v6, %v22968_v59  ;;  %v5194_v13 = vadd.f32 %v22971_v54, %v22970_v61  ;;  %v22972_v52 = vld [vmem:[#allocation65_spill] sm:$0xff]  ;;  %v22977_v61 = vld [vmem:[#allocation88_spill] sm:$0xff] }
 0x2e4   : > { %v6265_v19 = vsel %vm6025_vm3, %v5912_v15, 0.0  ;;  %v5915_v20 = vmax.f32 %v5861_v42, 0.0  ;;  %v5860_v34 = vadd.f32 %v19485_v17, %v5799_v37  ;;  %v5802_v31 = vadd.f32 %v16213_v44, %v5192_v46  ;;  %v19664_v12 = vld [vmem:[#allocation3 + $0x69] sm:$0xff]  ;;  %v19666_v53 = vld [vmem:[#allocation3 + $0x71] sm:$0xff] }
 0x2e5   : > { %v7369_v33 = vld [vmem:[#allocation3 + $0x6a] sm:$0xff]  ;;  %6320 = vst.msk [vmem:[#allocation3 + $0x90] sm:$0xff] %vm6301_vm2, %v6265_v19  ;;  %v5620_v27 = vpop.f32.mrf.mxu0  ;;  %16280 = vmatmul.mubr.msk.f32.gmra.mxu1 %vm6301_vm2, %v19664_v12  ;;  %v7370_v48 = vld [vmem:[#allocation3 + $0x72] sm:$0xff]  ;;  %v5193_v26 = vadd.f32 %v22972_v52, %v4583_v57  ;;  %v4585_v32 = vadd.f32 %v19402_v3, %v3975_v2  ;;  %v22976_v57 = vld [vmem:[#allocation87_spill] sm:$0xff] }
 0x2e6   : > { %16428 = vmatmul.mubr.msk.f32.gmra.mxu0 %vm6301_vm2, %v7369_v33  ;;  %v6268_v50 = vsel %vm6025_vm3, %v5915_v20, 0.0  ;;  %v5914_v21 = vmax.f32 %v5860_v34, 0.0  ;;  %v5863_v5 = vadd.f32 %v19485_v17, %v5802_v31  ;;  %v5801_v11 = vadd.f32 %v5620_v27, %v5191_v4  ;;  %16282 = vmatprep.mubr.msk.f32.mxu1 %vm6301_vm2, %v19666_v53  ;;  %v22973_v42 = vld [vmem:[#allocation50_spill] sm:$0xff]  ;;  %v22975_v4 = vld [vmem:[#allocation13_spill] sm:$0xff]  ;;  %v22979_v52 = vld [vmem:[#allocation79_spill] sm:$0xff] }
 0x2e7   : > { %16430 = vmatprep.mubr.msk.f32.mxu0 %vm6301_vm2, %v7370_v48  ;;  %6323 = vst.msk [vmem:[#allocation3 + $0xa8] sm:$0xff] %vm6301_vm2, %v6268_v50  ;;  %v16216_v16 = vpop.f32.mrf.mxu0  ;;  %v19685_v0 = vld [vmem:[#allocation3 + $0x79] sm:$0xff]  ;;  %v5196_v44 = vadd.f32 %v22976_v57, %v22975_v4  ;;  %v19698_v19 = vld [vmem:[#allocation3 + $0x81] sm:$0xff]  ;;  %v5195_v54 = vadd.f32 %v22977_v61, %v4585_v32 }
 0x2e8   : > { %v7371_v55 = vld [vmem:[#allocation3 + $0x7a] sm:$0xff]  ;;  %v6267_v63 = vsel %vm6084_vm4, %v5914_v21, 0.0  ;;  %v5917_v60 = vmax.f32 %v5863_v5, 0.0  ;;  %v5862_v46 = vadd.f32 %v19485_v17, %v5801_v11  ;;  %v5804_v15 = vadd.f32 %v16216_v16, %v5194_v13  ;;  %v7372_v20 = vld [vmem:[#allocation3 + $0x82] sm:$0xff] }
 0x2e9   : > { %v22974_v37 = vld [vmem:[#allocation30_spill] sm:$0xff]  ;;  %6322 = vst.msk [vmem:[#allocation3 + $0xa0] sm:$0xff] %vm6301_vm2, %v6267_v63  ;;  %v5630_v3 = vpop.f32.mrf.mxu0  ;;  %16283 = vmatmul.mubr.msk.f32.gmra.mxu1 %vm6301_vm2, %v19685_v0  ;;  %v22978_v11 = vld [vmem:[#allocation52_spill] sm:$0xff]  ;;  %v22980_v16 = vld [vmem:[#allocation15_spill] sm:$0xff] }
 0x2ea   : > { %v3977_v9 = vadd.f32 %v22974_v37, %v22973_v42  ;;  %16431 = vmatmul.mubr.msk.f32.gmra.mxu0 %vm6301_vm2, %v7371_v55  ;;  %v6270_v34 = vsel %vm6084_vm4, %v5917_v60, 0.0  ;;  %v5916_v31 = vmax.f32 %v5862_v46, 0.0  ;;  %v5865_v33 = vadd.f32 %v19485_v17, %v5804_v15  ;;  %16285 = vmatprep.mubr.msk.f32.mxu1 %vm6301_vm2, %v19698_v19  ;;  %v22981_v55 = vld [vmem:[#allocation89_spill] sm:$0xff]  ;;  %v22982_v42 = vld [vmem:[#allocation32_spill] sm:$0xff] }
 0x2eb   : > { %v5803_v59 = vadd.f32 %v5630_v3, %v5193_v26  ;;  %16433 = vmatprep.mubr.msk.f32.mxu0 %vm6301_vm2, %v7372_v20  ;;  %6325 = vst.msk [vmem:[#allocation3 + $0xb8] sm:$0xff] %vm6301_vm2, %v6270_v34  ;;  %v16219_v2 = vpop.f32.mrf.mxu0  ;;  %v3979_v26 = vadd.f32 %v22979_v52, %v22978_v11  ;;  %v5198_v63 = vadd.f32 %v22981_v55, %v22980_v16 }
 0x2ec   : > { %v4587_v6 = vadd.f32 %v19408_v51, %v3977_v9  ;;  %6324 = vst.msk [vmem:[#allocation3 + $0xb0] sm:$0xff] %vm6301_vm2, %v5916_v31  ;;  %v5919_v13 = vmax.f32 %v5865_v33, 0.0  ;;  %v5806_v48 = vadd.f32 %v16219_v2, %v5196_v44  ;;  %v19711_v50 = vld [vmem:[#allocation3 + $0x89] sm:$0xff]  ;;  %v19713_v5 = vld [vmem:[#allocation3 + $0x91] sm:$0xff] }
 0x2ed   : > { %v5864_v27 = vadd.f32 %v19485_v17, %v5803_v59  ;;  %v7373_v21 = vld [vmem:[#allocation3 + $0x8a] sm:$0xff]  ;;  %v5640_v51 = vpop.f32.mrf.mxu0  ;;  %16286 = vmatmul.mubr.msk.f32.gmra.mxu1 %vm6301_vm2, %v19711_v50  ;;  %v7374_v32 = vld [vmem:[#allocation3 + $0x92] sm:$0xff]  ;;  %v4589_v9 = vadd.f32 %v19414_v18, %v3979_v26 }
 0x2ee   : > { %16434 = vmatmul.mubr.msk.f32.gmra.mxu0 %vm6301_vm2, %v7373_v21  ;;  %6327 = vst.msk [vmem:[#allocation3 + $0xc8] sm:$0xff] %vm6301_vm2, %v5919_v13  ;;  %v5867_v46 = vadd.f32 %v19485_v17, %v5806_v48  ;;  %v5805_v15 = vadd.f32 %v5640_v51, %v5195_v54  ;;  %16288 = vmatprep.mubr.msk.f32.mxu1 %vm6301_vm2, %v19713_v5  ;;  %v22983_v59 = vld [vmem:[#allocation54_spill] sm:$0xff]  ;;  %v22984_v2 = vld [vmem:[#allocation81_spill] sm:$0xff] }
 0x2ef   : > { %v5918_v60 = vmax.f32 %v5864_v27, 0.0  ;;  %16436 = vmatprep.mubr.msk.f32.mxu0 %vm6301_vm2, %v7374_v32  ;;  %v5197_v37 = vadd.f32 %v22982_v42, %v4587_v6  ;;  %v16222_v4 = vpop.f32.mrf.mxu0  ;;  %v3981_v61 = vadd.f32 %v22984_v2, %v22983_v59  ;;  %v22985_v54 = vld [vmem:[#allocation17_spill] sm:$0xff]  ;;  %v22986_v6 = vld [vmem:[#allocation34_spill] sm:$0xff] }
 0x2f0   : > { %v5921_v44 = vmax.f32 %v5867_v46, 0.0  ;;  %v5866_v3 = vadd.f32 %v19485_v17, %v5805_v15  ;;  %v5808_v20 = vadd.f32 %v16222_v4, %v5198_v63  ;;  %v19732_v34 = vld [vmem:[#allocation3 + $0x99] sm:$0xff]  ;;  %v19734_v33 = vld [vmem:[#allocation3 + $0xa1] sm:$0xff]  ;;  %v5200_v13 = vadd.f32 %v22986_v6, %v22985_v54  ;;  %v22987_v26 = vld [vmem:[#allocation69_spill] sm:$0xff] }
 0x2f1   : > { %v6271_v57 = vsel %vm6025_vm3, %v5918_v60, 0.0  ;;  %v7375_v31 = vld [vmem:[#allocation3 + $0x9a] sm:$0xff]  ;;  %v5650_v18 = vpop.f32.mrf.mxu0  ;;  %16289 = vmatmul.mubr.msk.f32.gmra.mxu1 %vm6301_vm2, %v19732_v34  ;;  %v7376_v27 = vld [vmem:[#allocation3 + $0xa2] sm:$0xff]  ;;  %v5199_v51 = vadd.f32 %v22987_v26, %v4589_v9  ;;  %v4591_v32 = vadd.f32 %v19420_v29, %v3981_v61 }
 0x2f2   : > { %6326 = vst.msk [vmem:[#allocation3 + $0xc0] sm:$0xff] %vm6301_vm2, %v6271_v57  ;;  %16437 = vmatmul.mubr.msk.f32.gmra.mxu0 %vm6301_vm2, %v7375_v31  ;;  %v6274_v48 = vsel %vm6025_vm3, %v5921_v44, 0.0  ;;  %v5920_v21 = vmax.f32 %v5866_v3, 0.0  ;;  %v5869_v11 = vadd.f32 %v19485_v17, %v5808_v20  ;;  %v5807_v52 = vadd.f32 %v5650_v18, %v5197_v37  ;;  %16291 = vmatprep.mubr.msk.f32.mxu1 %vm6301_vm2, %v19734_v33  ;;  %v22988_v37 = vld [vmem:[#allocation56_spill] sm:$0xff]  ;;  %v22989_v4 = vld [vmem:[#allocation83_spill] sm:$0xff]  ;;  %v22991_v9 = vld [vmem:[#allocation70_spill] sm:$0xff] }
 0x2f3   : > { %16439 = vmatprep.mubr.msk.f32.mxu0 %vm6301_vm2, %v7376_v27  ;;  %6329 = vst.msk [vmem:[#allocation3 + $0xd8] sm:$0xff] %vm6301_vm2, %v6274_v48  ;;  %v16225_v16 = vpop.f32.mrf.mxu0  ;;  %v19753_v55 = vld [vmem:[#allocation3 + $0xa9] sm:$0xff]  ;;  %v3983_v57 = vadd.f32 %v22989_v4, %v22988_v37  ;;  %v19766_v20 = vld [vmem:[#allocation3 + $0xb1] sm:$0xff]  ;;  %v22992_v18 = vld [vmem:[#allocation39_spill] sm:$0xff] }
 0x2f4   : > { %v7377_v63 = vld [vmem:[#allocation3 + $0xaa] sm:$0xff]  ;;  %v6273_v60 = vsel %vm6084_vm4, %v5920_v21, 0.0  ;;  %v5923_v46 = vmax.f32 %v5869_v11, 0.0  ;;  %v5868_v15 = vadd.f32 %v19485_v17, %v5807_v52  ;;  %v5810_v42 = vadd.f32 %v16225_v16, %v5200_v13  ;;  %v7378_v31 = vld [vmem:[#allocation3 + $0xb2] sm:$0xff] }
 0x2f5   : > { %v22990_v44 = vld [vmem:[#allocation20_spill] sm:$0xff]  ;;  %6328 = vst.msk [vmem:[#allocation3 + $0xd0] sm:$0xff] %vm6301_vm2, %v6273_v60  ;;  %v5660_v29 = vpop.f32.mrf.mxu0  ;;  %16292 = vmatmul.mubr.msk.f32.gmra.mxu1 %vm6301_vm2, %v19753_v55  ;;  %v4593_v6 = vadd.f32 %v19426_v45, %v3983_v57  ;;  %v5201_v27 = vadd.f32 %v22992_v18, %v4591_v32  ;;  %v22993_v16 = vld [vmem:[#allocation58_spill] sm:$0xff] }
 0x2f6   : > { %v5202_v3 = vadd.f32 %v22991_v9, %v22990_v44  ;;  %16440 = vmatmul.mubr.msk.f32.gmra.mxu0 %vm6301_vm2, %v7377_v63  ;;  %v6276_v59 = vsel %vm6084_vm4, %v5923_v46, 0.0  ;;  %v5922_v2 = vmax.f32 %v5868_v15, 0.0  ;;  %v5871_v61 = vadd.f32 %v19485_v17, %v5810_v42  ;;  %16294 = vmatprep.mubr.msk.f32.mxu1 %vm6301_vm2, %v19766_v20  ;;  %v22994_v63 = vld [vmem:[#allocation85_spill] sm:$0xff]  ;;  %v22995_v46 = vld [vmem:[#allocation24_spill] sm:$0xff]  ;;  %v22996_v15 = vld [vmem:[#allocation90_spill] sm:$0xff] }
 0x2f7   : > { %v5809_v54 = vadd.f32 %v5660_v29, %v5199_v51  ;;  %16442 = vmatprep.mubr.msk.f32.mxu0 %vm6301_vm2, %v7378_v31  ;;  %6331 = vst.msk [vmem:[#allocation3 + $0xe8] sm:$0xff] %vm6301_vm2, %v6276_v59  ;;  %v16228_v13 = vpop.f32.mrf.mxu0  ;;  %v3985_v60 = vadd.f32 %v22994_v63, %v22993_v16  ;;  %v5204_v42 = vadd.f32 %v22996_v15, %v22995_v46  ;;  %v22997_v44 = vld [vmem:[#allocation91_spill] sm:$0xff] }
 0x2f8   : > { %6330 = vst.msk [vmem:[#allocation3 + $0xe0] sm:$0xff] %vm6301_vm2, %v5922_v2  ;;  %v5925_v48 = vmax.f32 %v5871_v61, 0.0  ;;  %v5812_v11 = vadd.f32 %v16228_v13, %v5202_v3  ;;  %v5203_v9 = vadd.f32 %v22997_v44, %v4593_v6  ;;  %v23000_v6 = vld [vmem:[#allocation92_spill] sm:$0xff] }
 0x2f9   : > { %v5870_v21 = vadd.f32 %v19485_v17, %v5809_v54  ;;  %v19779_v52 = vld [vmem:[#allocation3 + $0xb9] sm:$0xff]  ;;  %v19781_v51 = vld [vmem:[#allocation3 + $0xc1] sm:$0xff]  ;;  %v5670_v45 = vpop.f32.mrf.mxu0  ;;  %v4595_v3 = vadd.f32 %v19432_v49, %v3985_v60 }
 0x2fa   : > { %v7379_v26 = vld [vmem:[#allocation3 + $0xba] sm:$0xff]  ;;  %16295 = vmatmul.mubr.msk.f32.gmra.mxu1 %vm6301_vm2, %v19779_v52  ;;  %v7380_v32 = vld [vmem:[#allocation3 + $0xc2] sm:$0xff]  ;;  %6333 = vst.msk [vmem:[#allocation3 + $0xf8] sm:$0xff] %vm6301_vm2, %v5925_v48  ;;  %v5873_v4 = vadd.f32 %v19485_v17, %v5812_v11  ;;  %v5811_v57 = vadd.f32 %v5670_v45, %v5201_v27  ;;  %v5206_v11 = vadd.f32 %v23000_v6, %v19430_v30  ;;  %v23001_v30 = vld [vmem:[#allocation93_spill] sm:$0xff] }
 0x2fb   : > { %16443 = vmatmul.mubr.msk.f32.gmra.mxu0 %vm6301_vm2, %v7379_v26  ;;  %v5924_v37 = vmax.f32 %v5870_v21, 0.0  ;;  %16297 = vmatprep.mubr.msk.f32.mxu1 %vm6301_vm2, %v19781_v51  ;;  %v16231_v29 = vpop.f32.mrf.mxu0  ;;  %v22998_v27 = vld [vmem:[#allocation60_spill] sm:$0xff]  ;;  %v22999_v48 = vld [vmem:[#allocation86_spill] sm:$0xff] }
 0x2fc   : > { %16445 = vmatprep.mubr.msk.f32.mxu0 %vm6301_vm2, %v7380_v32  ;;  %v5927_v59 = vmax.f32 %v5873_v4, 0.0  ;;  %v5872_v2 = vadd.f32 %v19485_v17, %v5811_v57  ;;  %v5814_v61 = vadd.f32 %v16231_v29, %v5204_v42  ;;  %v19800_v54 = vld [vmem:[#allocation3 + $0xc9] sm:$0xff]  ;;  %v19802_v18 = vld [vmem:[#allocation3 + $0xd1] sm:$0xff]  ;;  %v3987_v21 = vadd.f32 %v22999_v48, %v22998_v27  ;;  %v23002_v29 = vld [vmem:[#allocation63_spill] sm:$0xff] }
 0x2fd   : > { %v6277_v31 = vsel %vm6025_vm3, %v5924_v37, 0.0  ;;  %v7381_v13 = vld [vmem:[#allocation3 + $0xca] sm:$0xff]  ;;  %v5680_v49 = vpop.f32.mrf.mxu0  ;;  %v7382_v26 = vld [vmem:[#allocation3 + $0xd2] sm:$0xff]  ;;  %v5205_v32 = vadd.f32 %v23001_v30, %v4595_v3 }
 0x2fe   : > { %6332 = vst.msk [vmem:[#allocation3 + $0xf0] sm:$0xff] %vm6301_vm2, %v6277_v31  ;;  %16298 = vmatmul.mubr.msk.f32.gmra.mxu1 %vm6301_vm2, %v19800_v54  ;;  %v6280_v16 = vsel %vm6025_vm3, %v5927_v59, 0.0  ;;  %v5926_v63 = vmax.f32 %v5872_v2, 0.0  ;;  %v5875_v60 = vadd.f32 %v19485_v17, %v5814_v61  ;;  %v5813_v45 = vadd.f32 %v5680_v49, %v5203_v9  ;;  %v23003_v31 = vld [vmem:[#allocation23_spill] sm:$0xff]  ;;  %v23004_v3 = vld [vmem:[#allocation72_spill] sm:$0xff]  ;;  %v23005_v49 = vld [vmem:[#allocation94_spill] sm:$0xff] }
 0x2ff   : > { %16446 = vmatmul.mubr.msk.f32.gmra.mxu0 %vm6301_vm2, %v7381_v13  ;;  %16300 = vmatprep.mubr.msk.f32.mxu1 %vm6301_vm2, %v19802_v18  ;;  %v4597_v46 = vadd.f32 %v19438_v10, %v3987_v21  ;;  %6335 = vst.msk [vmem:[#allocation3 + $0x108] sm:$0xff] %vm6301_vm2, %v6280_v16  ;;  %v16234_v15 = vpop.f32.mrf.mxu0  ;;  %v19821_v42 = vld [vmem:[#allocation3 + $0xd9] sm:$0xff]  ;;  %v3989_v59 = vadd.f32 %v23003_v31, %v23002_v29  ;;  %v19834_v61 = vld [vmem:[#allocation3 + $0xe1] sm:$0xff]  ;;  %v19845_v16 = vpop.f32.mrf.mxu1 }
 0x300   : > { %16448 = vmatprep.mubr.msk.f32.mxu0 %vm6301_vm2, %v7382_v26  ;;  %v7383_v37 = vld [vmem:[#allocation3 + $0xda] sm:$0xff]  ;;  %v6279_v4 = vsel %vm6084_vm4, %v5926_v63, 0.0  ;;  %v5929_v57 = vmax.f32 %v5875_v60, 0.0  ;;  %v5874_v44 = vadd.f32 %v19485_v17, %v5813_v45  ;;  %v5816_v9 = vadd.f32 %v16234_v15, %v5206_v11  ;;  %v7384_v13 = vld [vmem:[#allocation3 + $0xe2] sm:$0xff] }
 0x301   : > { %v5208_v2 = vadd.f32 %v23004_v3, %v19436_v40  ;;  %6334 = vst.msk [vmem:[#allocation3 + $0x100] sm:$0xff] %vm6301_vm2, %v6279_v4  ;;  %v5690_v10 = vpop.f32.mrf.mxu0  ;;  %v4599_v40 = vadd.f32 %v19444_v56, %v3989_v59  ;;  %v5207_v26 = vadd.f32 %v23005_v49, %v4597_v46  ;;  %v23007_v56 = vld [vmem:[#allocation27_spill] sm:$0xff] }
 0x302   : > { %16301 = vmatmul.mubr.msk.f32.gmra.mxu1 %vm6301_vm2, %v19821_v42  ;;  %v6282_v27 = vsel %vm6084_vm4, %v5929_v57, 0.0  ;;  %v5928_v48 = vmax.f32 %v5874_v44, 0.0  ;;  %v5877_v21 = vadd.f32 %v19485_v17, %v5816_v9  ;;  %v5815_v6 = vadd.f32 %v5690_v10, %v5205_v32  ;;  %v23008_v44 = vld [vmem:[#allocation73_spill] sm:$0xff] }
 0x303   : > { %16449 = vmatmul.mubr.msk.f32.gmra.mxu0 %vm6301_vm2, %v7383_v37  ;;  %16303 = vmatprep.mubr.msk.f32.mxu1 %vm6301_vm2, %v19834_v61  ;;  %6337 = vst.msk [vmem:[#allocation3 + $0x118] sm:$0xff] %vm6301_vm2, %v6282_v27  ;;  %v16237_v11 = vpop.f32.mrf.mxu0  ;;  %v23006_v37 = vld [vmem:[#allocation66_spill] sm:$0xff]  ;;  %v5210_v9 = vadd.f32 %v23008_v44, %v19442_v62  ;;  %v16175_v3 = vpop.f32.mrf.mxu1 }
 0x304   : > { %16451 = vmatprep.mubr.msk.f32.mxu0 %vm6301_vm2, %v7384_v13  ;;  %6336 = vst.msk [vmem:[#allocation3 + $0x110] sm:$0xff] %vm6301_vm2, %v5928_v48  ;;  %v5931_v63 = vmax.f32 %v5877_v21, 0.0  ;;  %v5876_v60 = vadd.f32 %v19485_v17, %v5815_v6  ;;  %v5818_v45 = vadd.f32 %v16237_v11, %v5208_v2  ;;  %v3991_v4 = vadd.f32 %v23007_v56, %v23006_v37  ;;  %v23009_v2 = vld [vmem:[#allocation95_spill] sm:$0xff] }
 0x305   : > { %v19849_v30 = vld [vmem:[#allocation3 + $0xe9] sm:$0xff]  ;;  %v19851_v15 = vld [vmem:[#allocation3 + $0xf1] sm:$0xff]  ;;  %v5700_v57 = vpop.f32.mrf.mxu0  ;;  %v5209_v10 = vadd.f32 %v23009_v2, %v4599_v40  ;;  %v23012_v40 = vld [vmem:[#allocation75_spill] sm:$0xff] }
 0x306   : > { %v7385_v32 = vld [vmem:[#allocation3 + $0xea] sm:$0xff]  ;;  %16304 = vmatmul.mubr.msk.f32.gmra.mxu1 %vm6301_vm2, %v19849_v30  ;;  %v7386_v46 = vld [vmem:[#allocation3 + $0xf2] sm:$0xff]  ;;  %6339 = vst.msk [vmem:[#allocation3 + $0x128] sm:$0xff] %vm6301_vm2, %v5931_v63  ;;  %v5930_v29 = vmax.f32 %v5876_v60, 0.0  ;;  %v5879_v31 = vadd.f32 %v19485_v17, %v5818_v45  ;;  %v5817_v59 = vadd.f32 %v5700_v57, %v5207_v26  ;;  %v4601_v13 = vadd.f32 %v19450_v14, %v3991_v4  ;;  %v5160_v63 = vpop.f32.mrf.mxu1  ;;  %v23010_v60 = vld [vmem:[#allocation67_spill] sm:$0xff] }
 0x307   : > { %16452 = vmatmul.mubr.msk.f32.gmra.mxu0 %vm6301_vm2, %v7385_v32  ;;  %16306 = vmatprep.mubr.msk.f32.mxu1 %vm6301_vm2, %v19851_v15  ;;  %v16240_v27 = vpop.f32.mrf.mxu0  ;;  %v23011_v45 = vld [vmem:[#allocation31_spill] sm:$0xff]  ;;  %v5212_v14 = vadd.f32 %v23012_v40, %v19448_v43  ;;  %v23017_v63 = vld [vmem:[#allocation28_spill] sm:$0xff] }
 0x308   : > { %16454 = vmatprep.mubr.msk.f32.mxu0 %vm6301_vm2, %v7386_v46  ;;  %v6283_v62 = vsel %vm6025_vm3, %v5930_v29, 0.0  ;;  %v5933_v48 = vmax.f32 %v5879_v31, 0.0  ;;  %v5878_v21 = vadd.f32 %v19485_v17, %v5817_v59  ;;  %v5820_v6 = vadd.f32 %v16240_v27, %v5210_v9  ;;  %v19870_v11 = vld [vmem:[#allocation3 + $0xf9] sm:$0xff]  ;;  %v19872_v26 = vld [vmem:[#allocation3 + $0x101] sm:$0xff] }
 0x309   : > { %v7387_v49 = vld [vmem:[#allocation3 + $0xfa] sm:$0xff]  ;;  %v3993_v32 = vadd.f32 %v23011_v45, %v23010_v60  ;;  %6338 = vst.msk [vmem:[#allocation3 + $0x120] sm:$0xff] %vm6301_vm2, %v6283_v62  ;;  %v5710_v37 = vpop.f32.mrf.mxu0  ;;  %v7388_v56 = vld [vmem:[#allocation3 + $0x102] sm:$0xff] }
 0x30a   : > { %16307 = vmatmul.mubr.msk.f32.gmra.mxu1 %vm6301_vm2, %v19870_v11  ;;  %v6286_v4 = vsel %vm6025_vm3, %v5933_v48, 0.0  ;;  %v5932_v57 = vmax.f32 %v5878_v21, 0.0  ;;  %v5881_v46 = vadd.f32 %v19485_v17, %v5820_v6  ;;  %v5819_v44 = vadd.f32 %v5710_v37, %v5209_v10  ;;  %v19891_v43 = vld [vmem:[%s22625_s3 + $0x38] sm:$0xff]  ;;  %v23013_v9 = vld [vmem:[#allocation96_spill] sm:$0xff]  ;;  %v23014_v31 = vld [vmem:[#allocation78_spill] sm:$0xff] }
 0x30b   : > { %16455 = vmatmul.mubr.msk.f32.gmra.mxu0 %vm6301_vm2, %v7387_v49  ;;  %16309 = vmatprep.mubr.msk.f32.mxu1 %vm6301_vm2, %v19872_v26  ;;  %v5211_v29 = vadd.f32 %v23013_v9, %v4601_v13  ;;  %v4603_v59 = vadd.f32 %v23014_v31, %v3993_v32  ;;  %6341 = vst.msk [vmem:[#allocation3 + $0x138] sm:$0xff] %vm6301_vm2, %v6286_v4  ;;  %v16243_v3 = vpop.f32.mrf.mxu0  ;;  %v19896_v2 = vld [vmem:[#allocation3 + $0x109] sm:$0xff]  ;;  %v23016_v49 = vld [vmem:[#allocation35_spill] sm:$0xff]  ;;  %v19910_v40 = vld [vmem:[#allocation3 + $0x111] sm:$0xff] }
 0x30c   : > { %16457 = vmatprep.mubr.msk.f32.mxu0 %vm6301_vm2, %v7388_v56  ;;  %v7389_v10 = vld [vmem:[#allocation3 + $0x10a] sm:$0xff]  ;;  %16703 = vmatprep.subr.mxu0 %v19891_v43  ;;  %v6285_v27 = vsel %vm6084_vm4, %v5932_v57, 0.0  ;;  %v5935_v62 = vmax.f32 %v5881_v46, 0.0  ;;  %v5880_v48 = vadd.f32 %v19485_v17, %v5819_v44  ;;  %v5822_v21 = vadd.f32 %v16243_v3, %v5212_v14  ;;  %v7390_v37 = vld [vmem:[#allocation3 + $0x112] sm:$0xff] }
 0x30d   : > { %v23015_v6 = vld [vmem:[#allocation68_spill] sm:$0xff]  ;;  %6340 = vst.msk [vmem:[#allocation3 + $0x130] sm:$0xff] %vm6301_vm2, %v6285_v27  ;;  %v5720_v32 = vpop.f32.mrf.mxu0  ;;  %v23019_v46 = vld [vmem:[#allocation82_spill] sm:$0xff]  ;;  %v23020_v31 = vld [vmem:[#allocation97_spill] sm:$0xff] }
 0x30e   : > { %v3995_v13 = vadd.f32 %v23016_v49, %v23015_v6  ;;  %v23018_v60 = vld [vmem:[#allocation4_spill] sm:$0xff]  ;;  %16310 = vmatmul.mubr.msk.f32.gmra.mxu1 %vm6301_vm2, %v19896_v2  ;;  %v6288_v14 = vsel %vm6084_vm4, %v5935_v62, 0.0  ;;  %v5934_v56 = vmax.f32 %v5880_v48, 0.0  ;;  %v5883_v4 = vadd.f32 %v19485_v17, %v5822_v21  ;;  %v23022_v49 = vld [vmem:[#allocation38_spill] sm:$0xff] }
 0x30f   : > { %v5214_v45 = vadd.f32 %v23018_v60, %v23017_v63  ;;  %16458 = vmatmul.mubr.msk.f32.gmra.mxu0 %vm6301_vm2, %v7389_v10  ;;  %v5821_v57 = vadd.f32 %v5720_v32, %v5211_v29  ;;  %16312 = vmatprep.mubr.msk.f32.mxu1 %vm6301_vm2, %v19910_v40  ;;  %6343 = vst.msk [vmem:[#allocation3 + $0x148] sm:$0xff] %vm6301_vm2, %v6288_v14  ;;  %v16246_v9 = vpop.f32.mrf.mxu0  ;;  %v23021_v6 = vld [vmem:[#allocation36_spill] sm:$0xff]  ;;  %v23024_v32 = vld [vmem:[#allocation6_spill] sm:$0xff] }
 0x310   : > { %16460 = vmatprep.mubr.msk.f32.mxu0 %vm6301_vm2, %v7390_v37  ;;  %v4605_v44 = vadd.f32 %v23019_v46, %v3995_v13  ;;  %v5213_v3 = vadd.f32 %v23020_v31, %v4603_v59  ;;  %6342 = vst.msk [vmem:[#allocation3 + $0x140] sm:$0xff] %vm6301_vm2, %v5934_v56  ;;  %v5937_v10 = vmax.f32 %v5883_v4, 0.0  ;;  %v19923_v48 = vld [vmem:[#allocation3 + $0x119] sm:$0xff]  ;;  %v19925_v21 = vld [vmem:[#allocation3 + $0x121] sm:$0xff]  ;;  %v3997_v63 = vadd.f32 %v23022_v49, %v23021_v6 }
 0x311   : > { %v5882_v27 = vadd.f32 %v19485_v17, %v5821_v57  ;;  %v5824_v62 = vadd.f32 %v16246_v9, %v5214_v45  ;;  %v7391_v29 = vld [vmem:[#allocation3 + $0x11a] sm:$0xff]  ;;  %v5730_v13 = vpop.f32.mrf.mxu0  ;;  %v7392_v59 = vld [vmem:[#allocation3 + $0x122] sm:$0xff] }
 0x312   : > { %16313 = vmatmul.mubr.msk.f32.gmra.mxu1 %vm6301_vm2, %v19923_v48  ;;  %v23023_v60 = vld [vmem:[#allocation80_spill] sm:$0xff]  ;;  %6345 = vst.msk [vmem:[#allocation3 + $0x158] sm:$0xff] %vm6301_vm2, %v5937_v10  ;;  %v5823_v56 = vadd.f32 %v5730_v13, %v5213_v3  ;;  %v23025_v4 = vld [vmem:[#allocation98_spill] sm:$0xff]  ;;  %v4607_v46 = vadd.f32 %v19474_v25, %v3997_v63  ;;  %v23026_v49 = vld [vmem:[#allocation71_spill] sm:$0xff] }
 0x313   : > { %16461 = vmatmul.mubr.msk.f32.gmra.mxu0 %vm6301_vm2, %v7391_v29  ;;  %v5216_v37 = vadd.f32 %v23024_v32, %v23023_v60  ;;  %v5936_v45 = vmax.f32 %v5882_v27, 0.0  ;;  %v5885_v14 = vadd.f32 %v19485_v17, %v5824_v62  ;;  %16315 = vmatprep.mubr.msk.f32.mxu1 %vm6301_vm2, %v19925_v21  ;;  %v5215_v57 = vadd.f32 %v23025_v4, %v4605_v44  ;;  %v16249_v9 = vpop.f32.mrf.mxu0  ;;  %v23027_v13 = vld [vmem:[#allocation41_spill] sm:$0xff]  ;;  %v23028_v44 = vld [vmem:[#allocation8_spill] sm:$0xff] }
 0x314   : > { %16463 = vmatprep.mubr.msk.f32.mxu0 %vm6301_vm2, %v7392_v59  ;;  %v5884_v10 = vadd.f32 %v19485_v17, %v5823_v56  ;;  %v19944_v6 = vld [vmem:[#allocation3 + $0x129] sm:$0xff]  ;;  %v19946_v62 = vld [vmem:[#allocation3 + $0x131] sm:$0xff]  ;;  %v3999_v59 = vadd.f32 %v23027_v13, %v23026_v49  ;;  %v5218_v60 = vadd.f32 %v23028_v44, %v19472_v36  ;;  %v23029_v36 = vld [vmem:[#allocation99_spill] sm:$0xff] }
 0x315   : > { %v6289_v31 = vsel %vm6025_vm3, %v5936_v45, 0.0  ;;  %v5939_v29 = vmax.f32 %v5885_v14, 0.0  ;;  %v5826_v27 = vadd.f32 %v16249_v9, %v5216_v37  ;;  %v7393_v3 = vld [vmem:[#allocation3 + $0x12a] sm:$0xff]  ;;  %v5740_v25 = vpop.f32.mrf.mxu0  ;;  %v7394_v63 = vld [vmem:[#allocation3 + $0x132] sm:$0xff]  ;;  %v5217_v56 = vadd.f32 %v23029_v36, %v4607_v46 }
 0x316   : > { %6344 = vst.msk [vmem:[#allocation3 + $0x150] sm:$0xff] %vm6301_vm2, %v6289_v31  ;;  %16316 = vmatmul.mubr.msk.f32.gmra.mxu1 %vm6301_vm2, %v19944_v6  ;;  %v5938_v37 = vmax.f32 %v5884_v10, 0.0  ;;  %v5825_v14 = vadd.f32 %v5740_v25, %v5215_v57  ;;  %v4609_v4 = vadd.f32 %v19476_v7, %v3999_v59 }
 0x317   : > { %16464 = vmatmul.mubr.msk.f32.gmra.mxu0 %vm6301_vm2, %v7393_v3  ;;  %v6292_v32 = vsel %vm6025_vm3, %v5939_v29, 0.0  ;;  %v5887_v45 = vadd.f32 %v19485_v17, %v5826_v27  ;;  %16318 = vmatprep.mubr.msk.f32.mxu1 %vm6301_vm2, %v19946_v62  ;;  %v16252_v9 = vpop.f32.mrf.mxu0  ;;  %v19965_v31 = vld [vmem:[#allocation3 + $0x139] sm:$0xff]  ;;  %v19974_v7 = vld [vmem:[#allocation3 + $0x141] sm:$0xff] }
 0x318   : > { %16466 = vmatprep.mubr.msk.f32.mxu0 %vm6301_vm2, %v7394_v63  ;;  %6347 = vst.msk [vmem:[#allocation3 + $0x168] sm:$0xff] %vm6301_vm2, %v6292_v32  ;;  %v7395_v3 = vld [vmem:[#allocation3 + $0x13a] sm:$0xff]  ;;  %v6291_v29 = vsel %vm6084_vm4, %v5938_v37, 0.0  ;;  %v5886_v57 = vadd.f32 %v19485_v17, %v5825_v14  ;;  %v5828_v27 = vadd.f32 %v16252_v9, %v5218_v60  ;;  %v7396_v46 = vld [vmem:[#allocation3 + $0x142] sm:$0xff]  ;;  %v5219_v63 = vadd.f32 %v19845_v16, %v4609_v4 }
 0x319   : > { %v5941_v10 = vmax.f32 %v5887_v45, 0.0  ;;  %6346 = vst.msk [vmem:[#allocation3 + $0x160] sm:$0xff] %vm6301_vm2, %v6291_v29  ;;  %v5750_v49 = vpop.f32.mrf.mxu0  ;;  %v17176_v17 = vld [vmem:[%s22624_s2] ss:$0 sm:$0xff] }
 0x31a   : > { %16319 = vmatmul.mubr.msk.f32.gmra.mxu1 %vm6301_vm2, %v19965_v31  ;;  %v5940_v59 = vmax.f32 %v5886_v57, 0.0  ;;  %v5889_v44 = vadd.f32 %v17176_v17, %v5828_v27  ;;  %v5827_v60 = vadd.f32 %v5750_v49, %v5217_v56 }
 0x31b   : > { %16467 = vmatmul.mubr.msk.f32.gmra.mxu0 %vm6301_vm2, %v7395_v3  ;;  %v6294_v13 = vsel %vm6084_vm4, %v5941_v10, 0.0  ;;  %16321 = vmatprep.mubr.msk.f32.mxu1 %vm6301_vm2, %v19974_v7  ;;  %v16255_v25 = vpop.f32.mrf.mxu0 }
 0x31c   : > { %16469 = vmatprep.mubr.msk.f32.mxu0 %vm6301_vm2, %v7396_v46  ;;  %6349 = vst.msk [vmem:[#allocation3 + $0x178] sm:$0xff] %vm6301_vm2, %v6294_v13  ;;  %6348 = vst.msk [vmem:[#allocation3 + $0x170] sm:$0xff] %vm6301_vm2, %v5940_v59  ;;  %v5943_v32 = vmax.f32 %v5889_v44, 0.0  ;;  %v5888_v37 = vadd.f32 %v17176_v17, %v5827_v60 }
 0x31d   : > { %v19987_v45 = vld [vmem:[#allocation3 + $0x149] sm:$0xff]  ;;  %v19989_v36 = vld [vmem:[#allocation3 + $0x151] sm:$0xff]  ;;  %v5760_v56 = vpop.f32.mrf.mxu0 }
 0x31e   : > { %v7397_v14 = vld [vmem:[#allocation3 + $0x14a] sm:$0xff]  ;;  %23030 = vst [vmem:[#allocation84_spill] sm:$0xff] %v19989_v36  ;;  %16322 = vmatmul.mubr.msk.f32.gmra.mxu1 %vm6301_vm2, %v19987_v45  ;;  %v7398_v9 = vld [vmem:[#allocation3 + $0x152] sm:$0xff]  ;;  %6351 = vst.msk [vmem:[#allocation3 + $0x188] sm:$0xff] %vm6301_vm2, %v5943_v32  ;;  %v5942_v3 = vmax.f32 %v5888_v37, 0.0  ;;  %v5829_v16 = vadd.f32 %v5760_v56, %v5219_v63 }
 0x31f   : > { %16470 = vmatmul.mubr.msk.f32.gmra.mxu0 %vm6301_vm2, %v7397_v14  ;;  %16324 = vmatprep.mubr.msk.f32.mxu1 %vm6301_vm2, %v19989_v36  ;;  %v16258_v4 = vpop.f32.mrf.mxu0  ;;  %v6359_v63 = vld [vmem:[#allocation3] sm:$0xff]  ;;  %v6360_v37 = vld [vmem:[#allocation3 + $0x8] sm:$0xff]  ;;  %v6361_v14 = vld [vmem:[#allocation3 + $0x10] sm:$0xff] }
 0x320   : > { %16472 = vmatprep.mubr.msk.f32.mxu0 %vm6301_vm2, %v7398_v9  ;;  %v6295_v29 = vsel %vm6025_vm3, %v5942_v3, 0.0  ;;  %v5890_v10 = vadd.f32 %v17176_v17, %v5829_v16  ;;  %v20000_v57 = vld [vmem:[#allocation3 + $0x159] sm:$0xff]  ;;  %v20002_v49 = vld [vmem:[#allocation3 + $0x161] sm:$0xff]  ;;  %v20035_v56 = vld [vmem:[%s22625_s3 + $0x28] sm:$0xff] }
 0x321   : > { %23031 = vst [vmem:[#allocation18_spill] sm:$0xff] %v20000_v57  ;;  %v7399_v27 = vld [vmem:[#allocation3 + $0x15a] sm:$0xff]  ;;  %23032 = vst [vmem:[#allocation21_spill] sm:$0xff] %v20002_v49  ;;  %v7400_v46 = vld [vmem:[#allocation3 + $0x162] sm:$0xff]  ;;  %v5770_v13 = vpop.f32.mrf.mxu0 }
 0x322   : > { %6350 = vst.msk [vmem:[#allocation3 + $0x180] sm:$0xff] %vm6301_vm2, %v6295_v29  ;;  %16325 = vmatmul.mubr.msk.f32.gmra.mxu1 %vm6301_vm2, %v20000_v57  ;;  %v5944_v59 = vmax.f32 %v5890_v10, 0.0  ;;  %v17177_v9 = vld [vmem:[%s22625_s3 + $0x18] sm:$0xff]  ;;  %v20210_v16 = vld [vmem:[#allocation3 + $0xf0] sm:$0xff]  ;;  %v20216_v4 = vld [vmem:[#allocation3 + $0xf8] sm:$0xff] }
 0x323   : > { %16473 = vmatmul.mubr.msk.f32.gmra.mxu0 %vm6301_vm2, %v7399_v27  ;;  %16327 = vmatprep.mubr.msk.f32.mxu1 %vm6301_vm2, %v20002_v49  ;;  %v20011_v28 = vld [vmem:[#allocation3 + $0x169] sm:$0xff]  ;;  %v20019_v60 = vld [vmem:[#allocation3 + $0x171] sm:$0xff]  ;;  %v20198_v3 = vld [vmem:[#allocation3 + $0xe0] sm:$0xff] }
 0x324   : > { %16475 = vmatprep.mubr.msk.f32.mxu0 %vm6301_vm2, %v7400_v46  ;;  %23033 = vst [vmem:[#allocation25_spill] sm:$0xff] %v20011_v28  ;;  %v7401_v17 = vld [vmem:[#allocation3 + $0x16a] sm:$0xff]  ;;  %v6297_v44 = vsel %vm6084_vm4, %v5944_v59, 0.0  ;;  %23034 = vst [vmem:[#allocation74_spill] sm:$0xff] %v20019_v60  ;;  %v7402_v25 = vld [vmem:[#allocation3 + $0x172] sm:$0xff] }
 0x325   : > { %6352 = vst.msk [vmem:[#allocation3 + $0x190] sm:$0xff] %vm6301_vm2, %v6297_v44  ;;  %v20222_v29 = vld [vmem:[#allocation3 + $0x100] sm:$0xff]  ;;  %v20231_v10 = vld [vmem:[%s22625_s3 + $0x40] sm:$0xff]  ;;  %v20240_v46 = vld [vmem:[#allocation3 + $0x110] sm:$0xff] }
 0x326   : > { %16328 = vmatmul.mubr.msk.f32.gmra.mxu1 %vm6301_vm2, %v20011_v28  ;;  %v20233_v27 = vld [vmem:[#allocation3 + $0x108] sm:$0xff]  ;;  %v20246_v13 = vld [vmem:[#allocation3 + $0x118] sm:$0xff]  ;;  %v20252_v59 = vld [vmem:[#allocation3 + $0x120] sm:$0xff] }
 0x327   : > { %16476 = vmatmul.mubr.msk.f32.gmra.mxu0 %vm6301_vm2, %v7401_v17  ;;  %16330 = vmatprep.mubr.msk.f32.mxu1 %vm6301_vm2, %v20019_v60  ;;  %v20258_v17 = vld [vmem:[#allocation3 + $0x128] sm:$0xff]  ;;  %v20264_v44 = vld [vmem:[#allocation3 + $0x130] sm:$0xff] }
 0x328   : > { %16478 = vmatprep.mubr.msk.f32.mxu0 %vm6301_vm2, %v7402_v25  ;;  %v20270_v25 = vld [vmem:[#allocation3 + $0x138] sm:$0xff] }
 0x329   : > { %v20024_v32 = vld [vmem:[#allocation3 + $0x179] sm:$0xff] }
 0x32a   : > { %23035 = vst [vmem:[#allocation29_spill] sm:$0xff] %v20024_v32  ;;  %v7403_v22 = vld [vmem:[#allocation3 + $0x17a] sm:$0xff]  ;;  %16331 = vmatmul.mubr.msk.f32.gmra.mxu1 %vm6301_vm2, %v20024_v32 }
 0x32b   : > { %16479 = vmatmul.mubr.msk.f32.gmra.mxu0 %vm6301_vm2, %v7403_v22  ;;  %16335 = vmatprep.mubr.msk.f32.mxu1 %vm6301_vm2, %v6359_v63  ;;  %v20276_v63 = vld [vmem:[#allocation3 + $0x140] sm:$0xff]  ;;  %v20282_v22 = vld [vmem:[#allocation3 + $0x148] sm:$0xff] }
 0x32c   : > { %16557 = vmatprep.mubr.msk.f32.mxu0 %vm6301_vm2, %v19549_v58  ;;  %v20047_v58 = vld [vmem:[#allocation3 + $0x18] sm:$0xff] }
 0x32e   : > { %16336 = vmatmul.mubr.msk.f32.vlgmr.msra.gmra.mxu1 %vm6301_vm2, %v6360_v37  ;;  %v20288_v37 = vld [vmem:[#allocation3 + $0x150] sm:$0xff] }
 0x32f   : > { %16558 = vmatmul.mubr.msk.f32.vlgmr.msra.gmra.mxu0 %vm6301_vm2, %v19551_v35  ;;  %16482 = vmatpush3.msra.mxu1 %v17177_v9  ;;  %v20054_v35 = vld [vmem:[#allocation3 + $0x20] sm:$0xff] }
 0x330   : > { %16560 = vmatprep.mubr.msk.f32.mxu0 %vm6301_vm2, %v19575_v38  ;;  %16338 = vmatprep.mubr.msk.f32.mxu1 %vm6301_vm2, %v6361_v14  ;;  %v20060_v38 = vld [vmem:[#allocation3 + $0x28] sm:$0xff]  ;;  %v20294_v14 = vld [vmem:[#allocation3 + $0x158] sm:$0xff]  ;;  %v20300_v9 = vld [vmem:[#allocation3 + $0x160] sm:$0xff] }
 0x331   : > { %16629 = vmatprep.subr.mxu1 %v20035_v56  ;;  %16704 = vmatpush3.msra.mxu0 %v19891_v43  ;;  %v20066_v43 = vld [vmem:[#allocation3 + $0x30] sm:$0xff]  ;;  %23036 = vst [vmem:[#allocation76_spill] sm:$0xff] %v20294_v14  ;;  %23037 = vst [vmem:[#allocation33_spill] sm:$0xff] %v20300_v9 }
 0x332   : > { %16339 = vmatmul.mubr.msk.f32.gmra.mxu1 %vm6301_vm2, %v20047_v58  ;;  %16851 = vmatprep.subr.mxu0 %v20231_v10 }
 0x333   : > { %16561 = vmatmul.mubr.msk.f32.gmra.mxu0 %vm6301_vm2, %v19577_v41  ;;  %16341 = vmatprep.mubr.msk.f32.mxu1 %vm6301_vm2, %v20054_v35  ;;  %v20072_v41 = vld [vmem:[#allocation3 + $0x38] sm:$0xff] }
 0x334   : > { %16563 = vmatprep.mubr.msk.f32.mxu0 %vm6301_vm2, %v19596_v39  ;;  %v20078_v39 = vld [vmem:[#allocation3 + $0x40] sm:$0xff] }
 0x336   : > { %16342 = vmatmul.mubr.msk.f32.gmra.mxu1 %vm6301_vm2, %v20060_v38 }
 0x337   : > { %16564 = vmatmul.mubr.msk.f32.gmra.mxu0 %vm6301_vm2, %v19598_v47  ;;  %16344 = vmatprep.mubr.msk.f32.mxu1 %vm6301_vm2, %v20066_v43  ;;  %v20084_v47 = vld [vmem:[#allocation3 + $0x48] sm:$0xff] }
 0x338   : > { %16566 = vmatprep.mubr.msk.f32.mxu0 %vm6301_vm2, %v19617_v1  ;;  %v20090_v1 = vld [vmem:[#allocation3 + $0x50] sm:$0xff] }
 0x33a   : > { %16345 = vmatmul.mubr.msk.f32.gmra.mxu1 %vm6301_vm2, %v20072_v41 }
 0x33b   : > { %16567 = vmatmul.mubr.msk.f32.gmra.mxu0 %vm6301_vm2, %v19630_v24  ;;  %16347 = vmatprep.mubr.msk.f32.mxu1 %vm6301_vm2, %v20078_v39  ;;  %v20096_v24 = vld [vmem:[#allocation3 + $0x58] sm:$0xff] }
 0x33c   : > { %16569 = vmatprep.mubr.msk.f32.mxu0 %vm6301_vm2, %v19643_v8  ;;  %v20102_v8 = vld [vmem:[#allocation3 + $0x60] sm:$0xff] }
 0x33e   : > { %16348 = vmatmul.mubr.msk.f32.gmra.mxu1 %vm6301_vm2, %v20084_v47 }
 0x33f   : > { %16570 = vmatmul.mubr.msk.f32.gmra.mxu0 %vm6301_vm2, %v19645_v23  ;;  %16350 = vmatprep.mubr.msk.f32.mxu1 %vm6301_vm2, %v20090_v1  ;;  %v20108_v23 = vld [vmem:[#allocation3 + $0x68] sm:$0xff] }
 0x340   : > { %16572 = vmatprep.mubr.msk.f32.mxu0 %vm6301_vm2, %v19664_v12  ;;  %v20114_v12 = vld [vmem:[#allocation3 + $0x70] sm:$0xff] }
 0x342   : > { %16351 = vmatmul.mubr.msk.f32.gmra.mxu1 %vm6301_vm2, %v20096_v24 }
 0x343   : > { %16573 = vmatmul.mubr.msk.f32.gmra.mxu0 %vm6301_vm2, %v19666_v53  ;;  %16353 = vmatprep.mubr.msk.f32.mxu1 %vm6301_vm2, %v20102_v8  ;;  %v20120_v53 = vld [vmem:[#allocation3 + $0x78] sm:$0xff] }
 0x344   : > { %16575 = vmatprep.mubr.msk.f32.mxu0 %vm6301_vm2, %v19685_v0  ;;  %v20126_v0 = vld [vmem:[#allocation3 + $0x80] sm:$0xff] }
 0x346   : > { %16354 = vmatmul.mubr.msk.f32.gmra.mxu1 %vm6301_vm2, %v20108_v23 }
 0x347   : > { %16576 = vmatmul.mubr.msk.f32.gmra.mxu0 %vm6301_vm2, %v19698_v19  ;;  %16356 = vmatprep.mubr.msk.f32.mxu1 %vm6301_vm2, %v20114_v12  ;;  %v20132_v19 = vld [vmem:[#allocation3 + $0x88] sm:$0xff] }
 0x348   : > { %16578 = vmatprep.mubr.msk.f32.mxu0 %vm6301_vm2, %v19711_v50  ;;  %v20138_v50 = vld [vmem:[#allocation3 + $0x90] sm:$0xff] }
 0x34a   : > { %16357 = vmatmul.mubr.msk.f32.gmra.mxu1 %vm6301_vm2, %v20120_v53 }
 0x34b   : > { %16579 = vmatmul.mubr.msk.f32.gmra.mxu0 %vm6301_vm2, %v19713_v5  ;;  %16359 = vmatprep.mubr.msk.f32.mxu1 %vm6301_vm2, %v20126_v0  ;;  %v20144_v5 = vld [vmem:[#allocation3 + $0x98] sm:$0xff] }
 0x34c   : > { %16581 = vmatprep.mubr.msk.f32.mxu0 %vm6301_vm2, %v19732_v34  ;;  %v20150_v34 = vld [vmem:[#allocation3 + $0xa0] sm:$0xff] }
 0x34e   : > { %16360 = vmatmul.mubr.msk.f32.gmra.mxu1 %vm6301_vm2, %v20132_v19 }
 0x34f   : > { %16582 = vmatmul.mubr.msk.f32.gmra.mxu0 %vm6301_vm2, %v19734_v33  ;;  %16362 = vmatprep.mubr.msk.f32.mxu1 %vm6301_vm2, %v20138_v50  ;;  %v20156_v33 = vld [vmem:[#allocation3 + $0xa8] sm:$0xff] }
 0x350   : > { %16584 = vmatprep.mubr.msk.f32.mxu0 %vm6301_vm2, %v19753_v55  ;;  %v20162_v55 = vld [vmem:[#allocation3 + $0xb0] sm:$0xff] }
 0x352   : > { %16363 = vmatmul.mubr.msk.f32.gmra.mxu1 %vm6301_vm2, %v20144_v5 }
 0x353   : > { %16585 = vmatmul.mubr.msk.f32.gmra.mxu0 %vm6301_vm2, %v19766_v20  ;;  %16365 = vmatprep.mubr.msk.f32.mxu1 %vm6301_vm2, %v20150_v34  ;;  %v20168_v20 = vld [vmem:[#allocation3 + $0xb8] sm:$0xff] }
 0x354   : > { %16587 = vmatprep.mubr.msk.f32.mxu0 %vm6301_vm2, %v19779_v52  ;;  %v20174_v52 = vld [vmem:[#allocation3 + $0xc0] sm:$0xff] }
 0x356   : > { %16366 = vmatmul.mubr.msk.f32.gmra.mxu1 %vm6301_vm2, %v20156_v33 }
 0x357   : > { %16588 = vmatmul.mubr.msk.f32.gmra.mxu0 %vm6301_vm2, %v19781_v51  ;;  %16368 = vmatprep.mubr.msk.f32.mxu1 %vm6301_vm2, %v20162_v55  ;;  %v20180_v51 = vld [vmem:[#allocation3 + $0xc8] sm:$0xff] }
 0x358   : > { %16590 = vmatprep.mubr.msk.f32.mxu0 %vm6301_vm2, %v19800_v54  ;;  %v20186_v54 = vld [vmem:[#allocation3 + $0xd0] sm:$0xff] }
 0x35a   : > { %16369 = vmatmul.mubr.msk.f32.gmra.mxu1 %vm6301_vm2, %v20168_v20 }
 0x35b   : > { %16591 = vmatmul.mubr.msk.f32.gmra.mxu0 %vm6301_vm2, %v19802_v18  ;;  %16371 = vmatprep.mubr.msk.f32.mxu1 %vm6301_vm2, %v20174_v52  ;;  %v20192_v18 = vld [vmem:[#allocation3 + $0xd8] sm:$0xff] }
 0x35c   : > { %16593 = vmatprep.mubr.msk.f32.mxu0 %vm6301_vm2, %v19821_v42 }
 0x35e   : > { %16372 = vmatmul.mubr.msk.f32.gmra.mxu1 %vm6301_vm2, %v20180_v51 }
 0x35f   : > { %16594 = vmatmul.mubr.msk.f32.gmra.mxu0 %vm6301_vm2, %v19834_v61  ;;  %16374 = vmatprep.mubr.msk.f32.mxu1 %vm6301_vm2, %v20186_v54  ;;  %v20204_v61 = vld [vmem:[#allocation3 + $0xe8] sm:$0xff] }
 0x360   : > { %16596 = vmatprep.mubr.msk.f32.mxu0 %vm6301_vm2, %v19849_v30 }
 0x362   : > { %16375 = vmatmul.mubr.msk.f32.gmra.mxu1 %vm6301_vm2, %v20192_v18 }
 0x363   : > { %16597 = vmatmul.mubr.msk.f32.gmra.mxu0 %vm6301_vm2, %v19851_v15  ;;  %16377 = vmatprep.mubr.msk.f32.mxu1 %vm6301_vm2, %v20198_v3 }
 0x364   : > { %16599 = vmatprep.mubr.msk.f32.mxu0 %vm6301_vm2, %v19870_v11 }
 0x366   : > { %16378 = vmatmul.mubr.msk.f32.gmra.mxu1 %vm6301_vm2, %v20204_v61 }
 0x367   : > { %16600 = vmatmul.mubr.msk.f32.gmra.mxu0 %vm6301_vm2, %v19872_v26  ;;  %16380 = vmatprep.mubr.msk.f32.mxu1 %vm6301_vm2, %v20210_v16 }
 0x368   : > { %16602 = vmatprep.mubr.msk.f32.mxu0 %vm6301_vm2, %v19896_v2 }
 0x36a   : > { %16381 = vmatmul.mubr.msk.f32.gmra.mxu1 %vm6301_vm2, %v20216_v4 }
 0x36b   : > { %16603 = vmatmul.mubr.msk.f32.gmra.mxu0 %vm6301_vm2, %v19910_v40  ;;  %16383 = vmatprep.mubr.msk.f32.mxu1 %vm6301_vm2, %v20222_v29 }
 0x36c   : > { %16605 = vmatprep.mubr.msk.f32.mxu0 %vm6301_vm2, %v19923_v48 }
 0x36e   : > { %16384 = vmatmul.mubr.msk.f32.gmra.mxu1 %vm6301_vm2, %v20233_v27 }
 0x36f   : > { %16606 = vmatmul.mubr.msk.f32.gmra.mxu0 %vm6301_vm2, %v19925_v21  ;;  %16386 = vmatprep.mubr.msk.f32.mxu1 %vm6301_vm2, %v20240_v46 }
 0x370   : > { %16608 = vmatprep.mubr.msk.f32.mxu0 %vm6301_vm2, %v19944_v6 }
 0x372   : > { %16387 = vmatmul.mubr.msk.f32.gmra.mxu1 %vm6301_vm2, %v20246_v13 }
 0x373   : > { %16609 = vmatmul.mubr.msk.f32.gmra.mxu0 %vm6301_vm2, %v19946_v62  ;;  %16389 = vmatprep.mubr.msk.f32.mxu1 %vm6301_vm2, %v20252_v59 }
 0x374   : > { %16611 = vmatprep.mubr.msk.f32.mxu0 %vm6301_vm2, %v19965_v31 }
 0x376   : > { %16390 = vmatmul.mubr.msk.f32.gmra.mxu1 %vm6301_vm2, %v20258_v17 }
 0x377   : > { %16612 = vmatmul.mubr.msk.f32.gmra.mxu0 %vm6301_vm2, %v19974_v7  ;;  %16392 = vmatprep.mubr.msk.f32.mxu1 %vm6301_vm2, %v20264_v44 }
 0x378   : > { %16614 = vmatprep.mubr.msk.f32.mxu0 %vm6301_vm2, %v19987_v45 }
 0x37a   : > { %16393 = vmatmul.mubr.msk.f32.gmra.mxu1 %vm6301_vm2, %v20270_v25 }
 0x37b   : > { %16615 = vmatmul.mubr.msk.f32.gmra.mxu0 %vm6301_vm2, %v19989_v36  ;;  %16395 = vmatprep.mubr.msk.f32.mxu1 %vm6301_vm2, %v20276_v63 }
 0x37c   : > { %16617 = vmatprep.mubr.msk.f32.mxu0 %vm6301_vm2, %v20000_v57  ;;  %v20308_v57 = vld [vmem:[#allocation3 + $0x181] sm:$0xff] }
 0x37d   : > { %23039 = vst [vmem:[#allocation37_spill] sm:$0xff] %v20308_v57 }
 0x37e   : > { %16396 = vmatmul.mubr.msk.f32.gmra.mxu1 %vm6301_vm2, %v20282_v22 }
 0x37f   : > { %16618 = vmatmul.mubr.msk.f32.gmra.mxu0 %vm6301_vm2, %v20002_v49  ;;  %16398 = vmatprep.mubr.msk.f32.mxu1 %vm6301_vm2, %v20288_v37  ;;  %v20306_v49 = vld [vmem:[#allocation3 + $0x168] sm:$0xff] }
 0x380   : > { %16620 = vmatprep.mubr.msk.f32.mxu0 %vm6301_vm2, %v20011_v28  ;;  %23038 = vst [vmem:[#allocation5_spill] sm:$0xff] %v20306_v49  ;;  %v20314_v28 = vld [vmem:[#allocation3 + $0x170] sm:$0xff] }
 0x381   : > { %23040 = vst [vmem:[#allocation7_spill] sm:$0xff] %v20314_v28 }
 0x382   : > { %16399 = vmatmul.mubr.msk.f32.gmra.mxu1 %vm6301_vm2, %v20294_v14  ;;  %v20326_v14 = vpop.f32.mrf.mxu1 }
 0x383   : > { %16621 = vmatmul.mubr.msk.f32.gmra.mxu0 %vm6301_vm2, %v20019_v60  ;;  %16401 = vmatprep.mubr.msk.f32.mxu1 %vm6301_vm2, %v20300_v9  ;;  %v20316_v60 = vld [vmem:[#allocation3 + $0x189] sm:$0xff]  ;;  %v20324_v9 = vld [vmem:[#allocation3 + $0x191] sm:$0xff] }
 0x384   : > { %16623 = vmatprep.mubr.msk.f32.mxu0 %vm6301_vm2, %v20024_v32  ;;  %23041 = vst [vmem:[#allocation40_spill] sm:$0xff] %v20316_v60  ;;  %v20322_v32 = vld [vmem:[#allocation3 + $0x178] sm:$0xff] }
 0x386   : > { %16402 = vmatmul.mubr.msk.f32.gmra.mxu1 %vm6301_vm2, %v20306_v49  ;;  %v20328_v49 = vpop.f32.mrf.mxu0 }
 0x387   : > { %16624 = vmatmul.mubr.msk.f32.gmra.mxu0 %vm6301_vm2, %v20308_v57  ;;  %16404 = vmatprep.mubr.msk.f32.mxu1 %vm6301_vm2, %v20314_v28  ;;  %23042 = vst [vmem:[#allocation77_spill] sm:$0xff] %v20328_v49  ;;  %v9745_v57 = vld [vmem:[#allocation3 + $0x19] sm:$0xff]  ;;  %v9746_v28 = vld [vmem:[#allocation3 + $0x21] sm:$0xff] }
 0x388   : > { %16626 = vmatprep.mubr.msk.f32.mxu0 %vm6301_vm2, %v20316_v60  ;;  %v20337_v60 = vpop.f32.mrf.mxu1  ;;  %v20339_v36 = vpop.f32.mrf.mxu0  ;;  %v20344_v49 = vld [vmem:[%s22625_s3 + $0x30] sm:$0xff] }
 0x389   : > { %23043 = vst [vmem:[#allocation49_spill] sm:$0xff] %v20337_v60  ;;  %23044 = vst [vmem:[#allocation42_spill] sm:$0xff] %v20339_v36  ;;  %v9748_v60 = vld [vmem:[#allocation3 + $0x31] sm:$0xff] }
 0x38a   : > { %16405 = vmatmul.mubr.msk.f32.gmra.mxu1 %vm6301_vm2, %v20322_v32 }
 0x38b   : > { %16627 = vmatmul.mubr.msk.f32.gmra.mxu0 %vm6301_vm2, %v20324_v9  ;;  %16483 = vmatprep.mubr.msk.f32.mxu1 %vm6301_vm2, %v20047_v58 }
 0x38c   : > { %16705 = vmatprep.mubr.msk.f32.mxu0 %vm6301_vm2, %v9745_v57  ;;  %v9747_v57 = vld [vmem:[#allocation3 + $0x29] sm:$0xff] }
 0x38e   : > { %16484 = vmatmul.mubr.msk.f32.vlgmr.msra.gmra.mxu1 %vm6301_vm2, %v20054_v35 }
 0x38f   : > { %16706 = vmatmul.mubr.msk.f32.vlgmr.msra.gmra.mxu0 %vm6301_vm2, %v9746_v28  ;;  %16630 = vmatpush3.msra.mxu1 %v20035_v56  ;;  %v9749_v28 = vld [vmem:[#allocation3 + $0x39] sm:$0xff] }
 0x390   : > { %16486 = vmatprep.mubr.msk.f32.mxu1 %vm6301_vm2, %v20060_v38  ;;  %16708 = vmatprep.mubr.msk.f32.mxu0 %vm6301_vm2, %v9747_v57  ;;  %v20354_v58 = vpop.f32.mrf.mxu1  ;;  %v9750_v38 = vld [vmem:[#allocation3 + $0x41] sm:$0xff] }
 0x391   : > { %16777 = vmatprep.subr.mxu1 %v20344_v49  ;;  %v20356_v36 = vpop.f32.mrf.mxu0  ;;  %16852 = vmatpush3.msra.mxu0 %v20231_v10  ;;  %v9752_v10 = vld [vmem:[#allocation3 + $0x51] sm:$0xff] }
 0x392   : > { %23045 = vst [vmem:[#allocation10_spill] sm:$0xff] %v20356_v36  ;;  %16487 = vmatmul.mubr.msk.f32.gmra.mxu1 %vm6301_vm2, %v20066_v43  ;;  %v20362_v56 = vpop.f32.mrf.mxu1 }
 0x393   : > { %16709 = vmatmul.mubr.msk.f32.gmra.mxu0 %vm6301_vm2, %v9748_v60  ;;  %v20364_v35 = vpop.f32.mrf.mxu0  ;;  %16489 = vmatprep.mubr.msk.f32.mxu1 %vm6301_vm2, %v20072_v41  ;;  %v9751_v60 = vld [vmem:[#allocation3 + $0x49] sm:$0xff] }
 0x394   : > { %23046 = vst [vmem:[#allocation51_spill] sm:$0xff] %v20364_v35  ;;  %16711 = vmatprep.mubr.msk.f32.mxu0 %vm6301_vm2, %v9749_v28 }
 0x395   : > { %v20369_v57 = vpop.f32.mrf.mxu1 }
 0x396   : > { %v20371_v36 = vpop.f32.mrf.mxu0  ;;  %16490 = vmatmul.mubr.msk.f32.gmra.mxu1 %vm6301_vm2, %v20078_v39  ;;  %v9753_v39 = vld [vmem:[#allocation3 + $0x59] sm:$0xff] }
 0x397   : > { %23047 = vst [vmem:[#allocation43_spill] sm:$0xff] %v20371_v36  ;;  %16712 = vmatmul.mubr.msk.f32.gmra.mxu0 %vm6301_vm2, %v9750_v38  ;;  %16492 = vmatprep.mubr.msk.f32.mxu1 %vm6301_vm2, %v20084_v47  ;;  %v20379_v43 = vpop.f32.mrf.mxu1 }
 0x398   : > { %16714 = vmatprep.mubr.msk.f32.mxu0 %vm6301_vm2, %v9751_v60  ;;  %v20381_v41 = vpop.f32.mrf.mxu0  ;;  %v9754_v60 = vld [vmem:[#allocation3 + $0x61] sm:$0xff] }
 0x399   : > { %23048 = vst [vmem:[#allocation12_spill] sm:$0xff] %v20381_v41  ;;  %v20383_v28 = vpop.f32.mrf.mxu1 }
 0x39a   : > { %v20385_v35 = vpop.f32.mrf.mxu0  ;;  %16493 = vmatmul.mubr.msk.f32.gmra.mxu1 %vm6301_vm2, %v20090_v1  ;;  %v9755_v1 = vld [vmem:[#allocation3 + $0x69] sm:$0xff] }
 0x39b   : > { %23049 = vst [vmem:[#allocation53_spill] sm:$0xff] %v20385_v35  ;;  %16715 = vmatmul.mubr.msk.f32.gmra.mxu0 %vm6301_vm2, %v9752_v10  ;;  %16495 = vmatprep.mubr.msk.f32.mxu1 %vm6301_vm2, %v20096_v24  ;;  %v20393_v47 = vpop.f32.mrf.mxu1 }
 0x39c   : > { %16717 = vmatprep.mubr.msk.f32.mxu0 %vm6301_vm2, %v9753_v39  ;;  %v20395_v38 = vpop.f32.mrf.mxu0  ;;  %v9756_v39 = vld [vmem:[#allocation3 + $0x71] sm:$0xff] }
 0x39d   : > { %23050 = vst [vmem:[#allocation44_spill] sm:$0xff] %v20395_v38  ;;  %v20397_v41 = vpop.f32.mrf.mxu1 }
 0x39e   : > { %v20399_v36 = vpop.f32.mrf.mxu0  ;;  %16496 = vmatmul.mubr.msk.f32.gmra.mxu1 %vm6301_vm2, %v20102_v8  ;;  %v9757_v8 = vld [vmem:[#allocation3 + $0x79] sm:$0xff] }
 0x39f   : > { %23051 = vst [vmem:[#allocation14_spill] sm:$0xff] %v20399_v36  ;;  %16718 = vmatmul.mubr.msk.f32.gmra.mxu0 %vm6301_vm2, %v9754_v60  ;;  %16498 = vmatprep.mubr.msk.f32.mxu1 %vm6301_vm2, %v20108_v23  ;;  %v20407_v24 = vpop.f32.mrf.mxu1 }
 0x3a0   : > { %16720 = vmatprep.mubr.msk.f32.mxu0 %vm6301_vm2, %v9755_v1  ;;  %v20409_v10 = vpop.f32.mrf.mxu0  ;;  %v9758_v1 = vld [vmem:[#allocation3 + $0x81] sm:$0xff] }
 0x3a1   : > { %23052 = vst [vmem:[#allocation55_spill] sm:$0xff] %v20409_v10  ;;  %v20411_v38 = vpop.f32.mrf.mxu1 }
 0x3a2   : > { %v20413_v35 = vpop.f32.mrf.mxu0  ;;  %16499 = vmatmul.mubr.msk.f32.gmra.mxu1 %vm6301_vm2, %v20114_v12  ;;  %v9759_v12 = vld [vmem:[#allocation3 + $0x89] sm:$0xff] }
 0x3a3   : > { %23053 = vst [vmem:[#allocation45_spill] sm:$0xff] %v20413_v35  ;;  %16721 = vmatmul.mubr.msk.f32.gmra.mxu0 %vm6301_vm2, %v9756_v39  ;;  %16501 = vmatprep.mubr.msk.f32.mxu1 %vm6301_vm2, %v20120_v53  ;;  %v20421_v23 = vpop.f32.mrf.mxu1 }
 0x3a4   : > { %16723 = vmatprep.mubr.msk.f32.mxu0 %vm6301_vm2, %v9757_v8  ;;  %v20423_v60 = vpop.f32.mrf.mxu0  ;;  %v9760_v8 = vld [vmem:[#allocation3 + $0x91] sm:$0xff] }
 0x3a5   : > { %23054 = vst [vmem:[#allocation16_spill] sm:$0xff] %v20423_v60  ;;  %v20425_v10 = vpop.f32.mrf.mxu1 }
 0x3a6   : > { %v20427_v36 = vpop.f32.mrf.mxu0  ;;  %16502 = vmatmul.mubr.msk.f32.gmra.mxu1 %vm6301_vm2, %v20126_v0  ;;  %v9761_v0 = vld [vmem:[#allocation3 + $0x99] sm:$0xff] }
 0x3a7   : > { %23055 = vst [vmem:[#allocation57_spill] sm:$0xff] %v20427_v36  ;;  %16724 = vmatmul.mubr.msk.f32.gmra.mxu0 %vm6301_vm2, %v9758_v1  ;;  %16504 = vmatprep.mubr.msk.f32.mxu1 %vm6301_vm2, %v20132_v19  ;;  %v20435_v53 = vpop.f32.mrf.mxu1 }
 0x3a8   : > { %16726 = vmatprep.mubr.msk.f32.mxu0 %vm6301_vm2, %v9759_v12  ;;  %v20437_v39 = vpop.f32.mrf.mxu0  ;;  %v9762_v12 = vld [vmem:[#allocation3 + $0xa1] sm:$0xff] }
 0x3a9   : > { %23056 = vst [vmem:[#allocation46_spill] sm:$0xff] %v20437_v39  ;;  %v20439_v60 = vpop.f32.mrf.mxu1 }
 0x3aa   : > { %v20441_v35 = vpop.f32.mrf.mxu0  ;;  %16505 = vmatmul.mubr.msk.f32.gmra.mxu1 %vm6301_vm2, %v20138_v50  ;;  %v9763_v50 = vld [vmem:[#allocation3 + $0xa9] sm:$0xff] }
 0x3ab   : > { %23057 = vst [vmem:[#allocation19_spill] sm:$0xff] %v20441_v35  ;;  %16727 = vmatmul.mubr.msk.f32.gmra.mxu0 %vm6301_vm2, %v9760_v8  ;;  %16507 = vmatprep.mubr.msk.f32.mxu1 %vm6301_vm2, %v20144_v5  ;;  %v20449_v19 = vpop.f32.mrf.mxu1 }
 0x3ac   : > { %16729 = vmatprep.mubr.msk.f32.mxu0 %vm6301_vm2, %v9761_v0  ;;  %v20451_v1 = vpop.f32.mrf.mxu0  ;;  %v9764_v0 = vld [vmem:[#allocation3 + $0xb1] sm:$0xff] }
 0x3ad   : > { %23058 = vst [vmem:[#allocation59_spill] sm:$0xff] %v20451_v1  ;;  %v20453_v39 = vpop.f32.mrf.mxu1 }
 0x3ae   : > { %v20455_v36 = vpop.f32.mrf.mxu0  ;;  %16508 = vmatmul.mubr.msk.f32.gmra.mxu1 %vm6301_vm2, %v20150_v34  ;;  %v9765_v34 = vld [vmem:[#allocation3 + $0xb9] sm:$0xff] }
 0x3af   : > { %23059 = vst [vmem:[#allocation47_spill] sm:$0xff] %v20455_v36  ;;  %16730 = vmatmul.mubr.msk.f32.gmra.mxu0 %vm6301_vm2, %v9762_v12  ;;  %16510 = vmatprep.mubr.msk.f32.mxu1 %vm6301_vm2, %v20156_v33  ;;  %v20463_v5 = vpop.f32.mrf.mxu1 }
 0x3b0   : > { %16732 = vmatprep.mubr.msk.f32.mxu0 %vm6301_vm2, %v9763_v50  ;;  %v20465_v8 = vpop.f32.mrf.mxu0  ;;  %v9766_v50 = vld [vmem:[#allocation3 + $0xc1] sm:$0xff] }
 0x3b1   : > { %23060 = vst [vmem:[#allocation22_spill] sm:$0xff] %v20465_v8  ;;  %v20467_v1 = vpop.f32.mrf.mxu1 }
 0x3b2   : > { %v20469_v35 = vpop.f32.mrf.mxu0  ;;  %16511 = vmatmul.mubr.msk.f32.gmra.mxu1 %vm6301_vm2, %v20162_v55  ;;  %v9767_v55 = vld [vmem:[#allocation3 + $0xc9] sm:$0xff] }
 0x3b3   : > { %23061 = vst [vmem:[#allocation9_spill] sm:$0xff] %v20469_v35  ;;  %16733 = vmatmul.mubr.msk.f32.gmra.mxu0 %vm6301_vm2, %v9764_v0  ;;  %16513 = vmatprep.mubr.msk.f32.mxu1 %vm6301_vm2, %v20168_v20  ;;  %v20477_v33 = vpop.f32.mrf.mxu1 }
 0x3b4   : > { %16735 = vmatprep.mubr.msk.f32.mxu0 %vm6301_vm2, %v9765_v34  ;;  %v20479_v12 = vpop.f32.mrf.mxu0  ;;  %v9768_v34 = vld [vmem:[#allocation3 + $0xd1] sm:$0xff] }
 0x3b5   : > { %23062 = vst [vmem:[#allocation61_spill] sm:$0xff] %v20479_v12  ;;  %v20481_v8 = vpop.f32.mrf.mxu1 }
 0x3b6   : > { %v20483_v36 = vpop.f32.mrf.mxu0  ;;  %16514 = vmatmul.mubr.msk.f32.gmra.mxu1 %vm6301_vm2, %v20174_v52 }
 0x3b7   : > { %16736 = vmatmul.mubr.msk.f32.gmra.mxu0 %vm6301_vm2, %v9766_v50  ;;  %16516 = vmatprep.mubr.msk.f32.mxu1 %vm6301_vm2, %v20180_v51  ;;  %v20491_v20 = vpop.f32.mrf.mxu1  ;;  %v9770_v50 = vld [vmem:[#allocation3 + $0xe1] sm:$0xff] }
 0x3b8   : > { %16738 = vmatprep.mubr.msk.f32.mxu0 %vm6301_vm2, %v9767_v55  ;;  %v20493_v0 = vpop.f32.mrf.mxu0 }
 0x3b9   : > { %23063 = vst [vmem:[#allocation62_spill] sm:$0xff] %v20493_v0 }
 0x3ba   : > { %v20495_v12 = vpop.f32.mrf.mxu1  ;;  %16517 = vmatmul.mubr.msk.f32.gmra.mxu1 %vm6301_vm2, %v20186_v54 }
 0x3bb   : > { %v20497_v35 = vpop.f32.mrf.mxu0  ;;  %16739 = vmatmul.mubr.msk.f32.gmra.mxu0 %vm6301_vm2, %v9768_v34  ;;  %16519 = vmatprep.mubr.msk.f32.mxu1 %vm6301_vm2, %v20192_v18 }
 0x3bc   : > { %16741 = vmatprep.mubr.msk.f32.mxu0 %vm6301_vm2, %v19821_v42  ;;  %v20506_v52 = vpop.f32.mrf.mxu1 }
 0x3bd   : > { %v20508_v51 = vpop.f32.mrf.mxu0 }
 0x3be   : > { %23064 = vst [vmem:[#allocation48_spill] sm:$0xff] %v20508_v51  ;;  %v20510_v55 = vpop.f32.mrf.mxu1  ;;  %16520 = vmatmul.mubr.msk.f32.gmra.mxu1 %vm6301_vm2, %v20198_v3  ;;  %v23192_v51 = vld [vmem:[#allocation49_spill] sm:$0xff] }
 0x3bf   : > { %v20512_v0 = vpop.f32.mrf.mxu0  ;;  %16742 = vmatmul.mubr.msk.f32.gmra.mxu0 %vm6301_vm2, %v9770_v50  ;;  %16522 = vmatprep.mubr.msk.f32.mxu1 %vm6301_vm2, %v20204_v61 }
 0x3c0   : > { %23065 = vst [vmem:[#allocation26_spill] sm:$0xff] %v20512_v0  ;;  %16744 = vmatprep.mubr.msk.f32.mxu0 %vm6301_vm2, %v19849_v30  ;;  %v20521_v42 = vpop.f32.mrf.mxu1  ;;  %v9026_v0 = vld [vmem:[#allocation3 + $0x102] sm:$0xff] }
 0x3c1   : > { %v20523_v54 = vpop.f32.mrf.mxu0 }
 0x3c2   : > { %23066 = vst [vmem:[#allocation11_spill] sm:$0xff] %v20523_v54  ;;  %v20525_v18 = vpop.f32.mrf.mxu1  ;;  %16523 = vmatmul.mubr.msk.f32.gmra.mxu1 %vm6301_vm2, %v20210_v16  ;;  %v9024_v54 = vld [vmem:[#allocation3 + $0xf2] sm:$0xff] }
 0x3c3   : > { %23067 = vst [vmem:[#allocation64_spill] sm:$0xff] %v20525_v18  ;;  %v20527_v34 = vpop.f32.mrf.mxu0  ;;  %16745 = vmatmul.mubr.msk.f32.gmra.mxu0 %vm6301_vm2, %v19851_v15  ;;  %16525 = vmatprep.mubr.msk.f32.mxu1 %vm6301_vm2, %v20216_v4 }
 0x3c4   : > { %23068 = vst [vmem:[#allocation65_spill] sm:$0xff] %v20527_v34  ;;  %16747 = vmatprep.mubr.msk.f32.mxu0 %vm6301_vm2, %v19870_v11  ;;  %v20537_v30 = vpop.f32.mrf.mxu1  ;;  %v9022_v34 = vld [vmem:[#allocation3 + $0xe2] sm:$0xff] }
 0x3c5   : > { %23069 = vst [vmem:[#allocation50_spill] sm:$0xff] %v20537_v30  ;;  %v20539_v3 = vpop.f32.mrf.mxu0 }
 0x3c6   : > { %23070 = vst [vmem:[#allocation30_spill] sm:$0xff] %v20539_v3  ;;  %v20541_v61 = vpop.f32.mrf.mxu1  ;;  %16526 = vmatmul.mubr.msk.f32.gmra.mxu1 %vm6301_vm2, %v20222_v29  ;;  %v20576_v29 = vld [vmem:[%s22625_s3 + $0x50] sm:$0xff] }
 0x3c7   : > { %23071 = vst [vmem:[#allocation13_spill] sm:$0xff] %v20541_v61  ;;  %v20543_v50 = vpop.f32.mrf.mxu0  ;;  %16748 = vmatmul.mubr.msk.f32.gmra.mxu0 %vm6301_vm2, %v19872_v26  ;;  %16528 = vmatprep.mubr.msk.f32.mxu1 %vm6301_vm2, %v20233_v27  ;;  %v9020_v3 = vld [vmem:[#allocation3 + $0xd2] sm:$0xff] }
 0x3c8   : > { %23072 = vst [vmem:[#allocation87_spill] sm:$0xff] %v20543_v50  ;;  %16750 = vmatprep.mubr.msk.f32.mxu0 %vm6301_vm2, %v19896_v2  ;;  %v20553_v15 = vpop.f32.mrf.mxu1  ;;  %16999 = vmatprep.subr.mxu0 %v20576_v29  ;;  %v9018_v50 = vld [vmem:[#allocation3 + $0xc2] sm:$0xff] }
 0x3c9   : > { %23073 = vst [vmem:[#allocation88_spill] sm:$0xff] %v20553_v15  ;;  %v20555_v11 = vpop.f32.mrf.mxu0 }
 0x3ca   : > { %23074 = vst [vmem:[#allocation52_spill] sm:$0xff] %v20555_v11  ;;  %v20557_v16 = vpop.f32.mrf.mxu1  ;;  %16529 = vmatmul.mubr.msk.f32.gmra.mxu1 %vm6301_vm2, %v20240_v46  ;;  %v9016_v11 = vld [vmem:[#allocation3 + $0xb2] sm:$0xff] }
 0x3cb   : > { %23075 = vst [vmem:[#allocation79_spill] sm:$0xff] %v20557_v16  ;;  %v20559_v4 = vpop.f32.mrf.mxu0  ;;  %16751 = vmatmul.mubr.msk.f32.gmra.mxu0 %vm6301_vm2, %v19910_v40  ;;  %16531 = vmatprep.mubr.msk.f32.mxu1 %vm6301_vm2, %v20246_v13 }
 0x3cc   : > { %23076 = vst [vmem:[#allocation15_spill] sm:$0xff] %v20559_v4  ;;  %16753 = vmatprep.mubr.msk.f32.mxu0 %vm6301_vm2, %v19923_v48  ;;  %v20569_v26 = vpop.f32.mrf.mxu1  ;;  %v9014_v4 = vld [vmem:[#allocation3 + $0xa2] sm:$0xff] }
 0x3cd   : > { %23077 = vst [vmem:[#allocation89_spill] sm:$0xff] %v20569_v26  ;;  %v20571_v2 = vpop.f32.mrf.mxu0 }
 0x3ce   : > { %23078 = vst [vmem:[#allocation32_spill] sm:$0xff] %v20571_v2  ;;  %v20578_v27 = vpop.f32.mrf.mxu1  ;;  %16532 = vmatmul.mubr.msk.f32.gmra.mxu1 %vm6301_vm2, %v20252_v59  ;;  %v9012_v2 = vld [vmem:[#allocation3 + $0x92] sm:$0xff] }
 0x3cf   : > { %23079 = vst [vmem:[#allocation54_spill] sm:$0xff] %v20578_v27  ;;  %v20580_v46 = vpop.f32.mrf.mxu0  ;;  %16754 = vmatmul.mubr.msk.f32.gmra.mxu0 %vm6301_vm2, %v19925_v21  ;;  %16534 = vmatprep.mubr.msk.f32.mxu1 %vm6301_vm2, %v20258_v17 }
 0x3d0   : > { %23080 = vst [vmem:[#allocation81_spill] sm:$0xff] %v20580_v46  ;;  %16756 = vmatprep.mubr.msk.f32.mxu0 %vm6301_vm2, %v19944_v6  ;;  %v20590_v40 = vpop.f32.mrf.mxu1 }
 0x3d1   : > { %23081 = vst [vmem:[#allocation17_spill] sm:$0xff] %v20590_v40  ;;  %v20592_v48 = vpop.f32.mrf.mxu0 }
 0x3d2   : > { %23082 = vst [vmem:[#allocation34_spill] sm:$0xff] %v20592_v48  ;;  %v20595_v13 = vpop.f32.mrf.mxu1  ;;  %16535 = vmatmul.mubr.msk.f32.gmra.mxu1 %vm6301_vm2, %v20264_v44 }
 0x3d3   : > { %23083 = vst [vmem:[#allocation69_spill] sm:$0xff] %v20595_v13  ;;  %v20597_v46 = vpop.f32.mrf.mxu0  ;;  %16757 = vmatmul.mubr.msk.f32.gmra.mxu0 %vm6301_vm2, %v19946_v62  ;;  %16537 = vmatprep.mubr.msk.f32.mxu1 %vm6301_vm2, %v20270_v25 }
 0x3d4   : > { %23084 = vst [vmem:[#allocation56_spill] sm:$0xff] %v20597_v46  ;;  %16759 = vmatprep.mubr.msk.f32.mxu0 %vm6301_vm2, %v19965_v31  ;;  %v20607_v21 = vpop.f32.mrf.mxu1 }
 0x3d5   : > { %23085 = vst [vmem:[#allocation83_spill] sm:$0xff] %v20607_v21  ;;  %v20609_v6 = vpop.f32.mrf.mxu0  ;;  %v9010_v21 = vld [vmem:[#allocation3 + $0x82] sm:$0xff] }
 0x3d6   : > { %23086 = vst [vmem:[#allocation20_spill] sm:$0xff] %v20609_v6  ;;  %v20611_v59 = vpop.f32.mrf.mxu1  ;;  %16538 = vmatmul.mubr.msk.f32.gmra.mxu1 %vm6301_vm2, %v20276_v63  ;;  %v23093_v63 = vld [vmem:[#allocation84_spill] sm:$0xff] }
 0x3d7   : > { %23087 = vst [vmem:[#allocation70_spill] sm:$0xff] %v20611_v59  ;;  %v20613_v17 = vpop.f32.mrf.mxu0  ;;  %16760 = vmatmul.mubr.msk.f32.gmra.mxu0 %vm6301_vm2, %v19974_v7  ;;  %16540 = vmatprep.mubr.msk.f32.mxu1 %vm6301_vm2, %v20282_v22  ;;  %v23094_v7 = vld [vmem:[#allocation76_spill] sm:$0xff]  ;;  %v23095_v22 = vld [vmem:[#allocation18_spill] sm:$0xff] }
 0x3d8   : > { %23088 = vst [vmem:[#allocation39_spill] sm:$0xff] %v20613_v17  ;;  %16762 = vmatprep.mubr.msk.f32.mxu0 %vm6301_vm2, %v19987_v45  ;;  %v20623_v62 = vpop.f32.mrf.mxu1  ;;  %v9008_v59 = vld [vmem:[#allocation3 + $0x72] sm:$0xff] }
 0x3d9   : > { %23089 = vst [vmem:[#allocation58_spill] sm:$0xff] %v20623_v62  ;;  %v20625_v31 = vpop.f32.mrf.mxu0  ;;  %v9006_v62 = vld [vmem:[#allocation3 + $0x62] sm:$0xff] }
 0x3da   : > { %23090 = vst [vmem:[#allocation85_spill] sm:$0xff] %v20625_v31  ;;  %v20627_v44 = vpop.f32.mrf.mxu1  ;;  %16541 = vmatmul.mubr.msk.f32.gmra.mxu1 %vm6301_vm2, %v20288_v37  ;;  %v23101_v37 = vld [vmem:[#allocation21_spill] sm:$0xff] }
 0x3db   : > { %23091 = vst [vmem:[#allocation24_spill] sm:$0xff] %v20627_v44  ;;  %v20629_v25 = vpop.f32.mrf.mxu0  ;;  %16763 = vmatmul.mubr.msk.f32.gmra.mxu0 %vm6301_vm2, %v23093_v63  ;;  %16543 = vmatprep.mubr.msk.f32.mxu1 %vm6301_vm2, %v23094_v7  ;;  %v23102_v63 = vld [vmem:[#allocation5_spill] sm:$0xff] }
 0x3dc   : > { %23092 = vst [vmem:[#allocation90_spill] sm:$0xff] %v20629_v25  ;;  %16765 = vmatprep.mubr.msk.f32.mxu0 %vm6301_vm2, %v23095_v22  ;;  %v20639_v45 = vpop.f32.mrf.mxu1  ;;  %v23100_v25 = vld [vmem:[#allocation33_spill] sm:$0xff] }
 0x3dd   : > { %23096 = vst [vmem:[#allocation91_spill] sm:$0xff] %v20639_v45  ;;  %v20641_v17 = vpop.f32.mrf.mxu0  ;;  %v23103_v7 = vld [vmem:[#allocation25_spill] sm:$0xff] }
 0x3de   : > { %23097 = vst [vmem:[#allocation60_spill] sm:$0xff] %v20641_v17  ;;  %v20643_v31 = vpop.f32.mrf.mxu1  ;;  %16544 = vmatmul.mubr.msk.f32.gmra.mxu1 %vm6301_vm2, %v23100_v25  ;;  %v23109_v25 = vld [vmem:[#allocation74_spill] sm:$0xff] }
 0x3df   : > { %23098 = vst [vmem:[#allocation86_spill] sm:$0xff] %v20643_v31  ;;  %v20645_v44 = vpop.f32.mrf.mxu0  ;;  %16766 = vmatmul.mubr.msk.f32.gmra.mxu0 %vm6301_vm2, %v23101_v37  ;;  %16546 = vmatprep.mubr.msk.f32.mxu1 %vm6301_vm2, %v23102_v63  ;;  %v23110_v37 = vld [vmem:[#allocation29_spill] sm:$0xff] }
 0x3e0   : > { %23099 = vst [vmem:[#allocation92_spill] sm:$0xff] %v20645_v44  ;;  %16768 = vmatprep.mubr.msk.f32.mxu0 %vm6301_vm2, %v23103_v7  ;;  %v20655_v22 = vpop.f32.mrf.mxu1  ;;  %v23108_v44 = vld [vmem:[#allocation7_spill] sm:$0xff] }
 0x3e1   : > { %23104 = vst [vmem:[#allocation93_spill] sm:$0xff] %v20655_v22  ;;  %v20657_v45 = vpop.f32.mrf.mxu0 }
 0x3e2   : > { %23105 = vst [vmem:[#allocation63_spill] sm:$0xff] %v20657_v45  ;;  %v20659_v17 = vpop.f32.mrf.mxu1  ;;  %16547 = vmatmul.mubr.msk.f32.gmra.mxu1 %vm6301_vm2, %v23108_v44  ;;  %v7948_v45 = vld [vmem:[#allocation3 + $0x180] sm:$0xff]  ;;  %v23115_v44 = vld [vmem:[#allocation37_spill] sm:$0xff] }
 0x3e3   : > { %23106 = vst [vmem:[#allocation23_spill] sm:$0xff] %v20659_v17  ;;  %v20661_v31 = vpop.f32.mrf.mxu0  ;;  %16769 = vmatmul.mubr.msk.f32.gmra.mxu0 %vm6301_vm2, %v23109_v25  ;;  %16549 = vmatprep.mubr.msk.f32.mxu1 %vm6301_vm2, %v20322_v32  ;;  %v7949_v25 = vld [vmem:[#allocation3 + $0x188] sm:$0xff] }
 0x3e4   : > { %23107 = vst [vmem:[#allocation72_spill] sm:$0xff] %v20661_v31  ;;  %16771 = vmatprep.mubr.msk.f32.mxu0 %vm6301_vm2, %v23110_v37  ;;  %v20671_v63 = vpop.f32.mrf.mxu1  ;;  %v23116_v32 = vld [vmem:[#allocation40_spill] sm:$0xff] }
 0x3e5   : > { %23111 = vst [vmem:[#allocation94_spill] sm:$0xff] %v20671_v63  ;;  %v20673_v7 = vpop.f32.mrf.mxu0 }
 0x3e6   : > { %23112 = vst [vmem:[#allocation66_spill] sm:$0xff] %v20673_v7  ;;  %v20675_v17 = vpop.f32.mrf.mxu1  ;;  %16550 = vmatmul.mubr.msk.f32.gmra.mxu1 %vm6301_vm2, %v7948_v45  ;;  %v7950_v7 = vld [vmem:[#allocation3 + $0x190] sm:$0xff]  ;;  %v8997_v45 = vld [vmem:[#allocation3 + $0x1a] sm:$0xff] }
 0x3e7   : > { %23113 = vst [vmem:[#allocation27_spill] sm:$0xff] %v20675_v17  ;;  %v20677_v31 = vpop.f32.mrf.mxu0  ;;  %16772 = vmatmul.mubr.msk.f32.gmra.mxu0 %vm6301_vm2, %v23115_v44  ;;  %16552 = vmatprep.mubr.msk.f32.mxu1 %vm6301_vm2, %v7949_v25 }
 0x3e8   : > { %23114 = vst [vmem:[#allocation73_spill] sm:$0xff] %v20677_v31  ;;  %16774 = vmatprep.mubr.msk.f32.mxu0 %vm6301_vm2, %v23116_v32  ;;  %v20685_v37 = vpop.f32.mrf.mxu1  ;;  %v8998_v32 = vld [vmem:[#allocation3 + $0x22] sm:$0xff] }
 0x3e9   : > { %23117 = vst [vmem:[#allocation95_spill] sm:$0xff] %v20685_v37  ;;  %v20687_v63 = vpop.f32.mrf.mxu0  ;;  %v9004_v37 = vld [vmem:[#allocation3 + $0x52] sm:$0xff] }
 0x3ea   : > { %23118 = vst [vmem:[#allocation67_spill] sm:$0xff] %v20687_v63  ;;  %v20689_v22 = vpop.f32.mrf.mxu1  ;;  %16553 = vmatmul.mubr.msk.f32.gmra.mxu1 %vm6301_vm2, %v7950_v7  ;;  %v20705_v63 = vld [vmem:[%s22625_s3 + $0x48] sm:$0xff] }
 0x3eb   : > { %23119 = vst [vmem:[#allocation31_spill] sm:$0xff] %v20689_v22  ;;  %v20691_v17 = vpop.f32.mrf.mxu0  ;;  %16775 = vmatmul.mubr.msk.f32.gmra.mxu0 %vm6301_vm2, %v20324_v9  ;;  %16631 = vmatprep.mubr.msk.f32.mxu1 %vm6301_vm2, %v8997_v45  ;;  %v8999_v9 = vld [vmem:[#allocation3 + $0x2a] sm:$0xff] }
 0x3ec   : > { %23120 = vst [vmem:[#allocation75_spill] sm:$0xff] %v20691_v17  ;;  %16853 = vmatprep.mubr.msk.f32.mxu0 %vm6301_vm2, %v8997_v45  ;;  %v20698_v44 = vpop.f32.mrf.mxu1 }
 0x3ed   : > { %23121 = vst [vmem:[#allocation96_spill] sm:$0xff] %v20698_v44  ;;  %v20700_v25 = vpop.f32.mrf.mxu0  ;;  %v9000_v44 = vld [vmem:[#allocation3 + $0x32] sm:$0xff] }
 0x3ee   : > { %23122 = vst [vmem:[#allocation78_spill] sm:$0xff] %v20700_v25  ;;  %v20707_v17 = vpop.f32.mrf.mxu1  ;;  %16632 = vmatmul.mubr.msk.f32.vlgmr.msra.gmra.mxu1 %vm6301_vm2, %v8998_v32 }
 0x3ef   : > { %v20709_v7 = vpop.f32.mrf.mxu0  ;;  %16854 = vmatmul.mubr.msk.f32.vlgmr.msra.gmra.mxu0 %vm6301_vm2, %v8998_v32  ;;  %16778 = vmatpush3.msra.mxu1 %v20344_v49  ;;  %v9001_v49 = vld [vmem:[#allocation3 + $0x3a] sm:$0xff] }
 0x3f0   : > { %23123 = vst [vmem:[#allocation68_spill] sm:$0xff] %v20709_v7  ;;  %16634 = vmatprep.mubr.msk.f32.mxu1 %vm6301_vm2, %v8999_v9  ;;  %16856 = vmatprep.mubr.msk.f32.mxu0 %vm6301_vm2, %v8999_v9  ;;  %v20716_v45 = vpop.f32.mrf.mxu1 }
 0x3f1   : > { %v20718_v25 = vpop.f32.mrf.mxu0  ;;  %16925 = vmatprep.subr.mxu1 %v20705_v63  ;;  %17000 = vmatpush3.msra.mxu0 %v20576_v29 }
 0x3f2   : > { %23124 = vst [vmem:[#allocation35_spill] sm:$0xff] %v20718_v25  ;;  %v20722_v7 = vpop.f32.mrf.mxu1  ;;  %16635 = vmatmul.mubr.msk.f32.gmra.mxu1 %vm6301_vm2, %v9000_v44  ;;  %v9002_v25 = vld [vmem:[#allocation3 + $0x42] sm:$0xff] }
 0x3f3   : > { %v20724_v31 = vpop.f32.mrf.mxu0  ;;  %16857 = vmatmul.mubr.msk.f32.gmra.mxu0 %vm6301_vm2, %v9000_v44  ;;  %16637 = vmatprep.mubr.msk.f32.mxu1 %vm6301_vm2, %v9001_v49 }
 0x3f4   : > { %23125 = vst [vmem:[#allocation28_spill] sm:$0xff] %v20724_v31  ;;  %16859 = vmatprep.mubr.msk.f32.mxu0 %vm6301_vm2, %v9001_v49  ;;  %v20730_v32 = vpop.f32.mrf.mxu1  ;;  %v9003_v31 = vld [vmem:[#allocation3 + $0x4a] sm:$0xff] }
 0x3f5   : > { %v20732_v9 = vpop.f32.mrf.mxu0 }
 0x3f6   : > { %23126 = vst [vmem:[#allocation4_spill] sm:$0xff] %v20732_v9  ;;  %v20734_v22 = vpop.f32.mrf.mxu1  ;;  %16638 = vmatmul.mubr.msk.f32.gmra.mxu1 %vm6301_vm2, %v9002_v25 }
 0x3f7   : > { %v20736_v29 = vpop.f32.mrf.mxu0  ;;  %16860 = vmatmul.mubr.msk.f32.gmra.mxu0 %vm6301_vm2, %v9002_v25  ;;  %16640 = vmatprep.mubr.msk.f32.mxu1 %vm6301_vm2, %v9003_v31 }
 0x3f8   : > { %23127 = vst [vmem:[#allocation82_spill] sm:$0xff] %v20736_v29  ;;  %16862 = vmatprep.mubr.msk.f32.mxu0 %vm6301_vm2, %v9003_v31  ;;  %v20742_v44 = vpop.f32.mrf.mxu1  ;;  %v9005_v29 = vld [vmem:[#allocation3 + $0x5a] sm:$0xff] }
 0x3f9   : > { %v20744_v49 = vpop.f32.mrf.mxu0 }
 0x3fa   : > { %23128 = vst [vmem:[#allocation97_spill] sm:$0xff] %v20744_v49  ;;  %v20746_v9 = vpop.f32.mrf.mxu1  ;;  %16641 = vmatmul.mubr.msk.f32.gmra.mxu1 %vm6301_vm2, %v9004_v37 }
 0x3fb   : > { %v20748_v6 = vpop.f32.mrf.mxu0  ;;  %16863 = vmatmul.mubr.msk.f32.gmra.mxu0 %vm6301_vm2, %v9004_v37  ;;  %16643 = vmatprep.mubr.msk.f32.mxu1 %vm6301_vm2, %v9005_v29 }
 0x3fc   : > { %23129 = vst [vmem:[#allocation36_spill] sm:$0xff] %v20748_v6  ;;  %16865 = vmatprep.mubr.msk.f32.mxu0 %vm6301_vm2, %v9005_v29  ;;  %v20754_v25 = vpop.f32.mrf.mxu1  ;;  %v9007_v6 = vld [vmem:[#allocation3 + $0x6a] sm:$0xff] }
 0x3fd   : > { %v20756_v31 = vpop.f32.mrf.mxu0 }
 0x3fe   : > { %23130 = vst [vmem:[#allocation38_spill] sm:$0xff] %v20756_v31  ;;  %v20758_v49 = vpop.f32.mrf.mxu1  ;;  %16644 = vmatmul.mubr.msk.f32.gmra.mxu1 %vm6301_vm2, %v9006_v62 }
 0x3ff   : > { %v20760_v46 = vpop.f32.mrf.mxu0  ;;  %16866 = vmatmul.mubr.msk.f32.gmra.mxu0 %vm6301_vm2, %v9006_v62  ;;  %16646 = vmatprep.mubr.msk.f32.mxu1 %vm6301_vm2, %v9007_v6 }
 0x400   : > { %23131 = vst [vmem:[#allocation80_spill] sm:$0xff] %v20760_v46  ;;  %16868 = vmatprep.mubr.msk.f32.mxu0 %vm6301_vm2, %v9007_v6  ;;  %v20766_v37 = vpop.f32.mrf.mxu1  ;;  %v9009_v46 = vld [vmem:[#allocation3 + $0x7a] sm:$0xff] }
 0x401   : > { %v20768_v29 = vpop.f32.mrf.mxu0 }
 0x402   : > { %23132 = vst [vmem:[#allocation6_spill] sm:$0xff] %v20768_v29  ;;  %v20770_v31 = vpop.f32.mrf.mxu1  ;;  %16647 = vmatmul.mubr.msk.f32.gmra.mxu1 %vm6301_vm2, %v9008_v59 }
 0x403   : > { %v20772_v48 = vpop.f32.mrf.mxu0  ;;  %16869 = vmatmul.mubr.msk.f32.gmra.mxu0 %vm6301_vm2, %v9008_v59  ;;  %16649 = vmatprep.mubr.msk.f32.mxu1 %vm6301_vm2, %v9009_v46 }
 0x404   : > { %23133 = vst [vmem:[#allocation98_spill] sm:$0xff] %v20772_v48  ;;  %16871 = vmatprep.mubr.msk.f32.mxu0 %vm6301_vm2, %v9009_v46  ;;  %v20778_v62 = vpop.f32.mrf.mxu1  ;;  %v9011_v48 = vld [vmem:[#allocation3 + $0x8a] sm:$0xff] }
 0x405   : > { %v20780_v6 = vpop.f32.mrf.mxu0 }
 0x406   : > { %23134 = vst [vmem:[#allocation71_spill] sm:$0xff] %v20780_v6  ;;  %v20782_v29 = vpop.f32.mrf.mxu1  ;;  %16650 = vmatmul.mubr.msk.f32.gmra.mxu1 %vm6301_vm2, %v9010_v21 }
 0x407   : > { %v20784_v13 = vpop.f32.mrf.mxu0  ;;  %16872 = vmatmul.mubr.msk.f32.gmra.mxu0 %vm6301_vm2, %v9010_v21  ;;  %16652 = vmatprep.mubr.msk.f32.mxu1 %vm6301_vm2, %v9011_v48 }
 0x408   : > { %23135 = vst [vmem:[#allocation41_spill] sm:$0xff] %v20784_v13  ;;  %16874 = vmatprep.mubr.msk.f32.mxu0 %vm6301_vm2, %v9011_v48  ;;  %v20790_v59 = vpop.f32.mrf.mxu1  ;;  %v9013_v13 = vld [vmem:[#allocation3 + $0x9a] sm:$0xff] }
 0x409   : > { %v20792_v46 = vpop.f32.mrf.mxu0 }
 0x40a   : > { %23136 = vst [vmem:[#allocation8_spill] sm:$0xff] %v20792_v46  ;;  %v20794_v6 = vpop.f32.mrf.mxu1  ;;  %16653 = vmatmul.mubr.msk.f32.gmra.mxu1 %vm6301_vm2, %v9012_v2 }
 0x40b   : > { %v20796_v40 = vpop.f32.mrf.mxu0  ;;  %16875 = vmatmul.mubr.msk.f32.gmra.mxu0 %vm6301_vm2, %v9012_v2  ;;  %16655 = vmatprep.mubr.msk.f32.mxu1 %vm6301_vm2, %v9013_v13 }
 0x40c   : > { %23137 = vst [vmem:[#allocation99_spill] sm:$0xff] %v20796_v40  ;;  %16877 = vmatprep.mubr.msk.f32.mxu0 %vm6301_vm2, %v9013_v13  ;;  %v20802_v21 = vpop.f32.mrf.mxu1  ;;  %v9015_v40 = vld [vmem:[#allocation3 + $0xaa] sm:$0xff] }
 0x40d   : > { %v20804_v48 = vpop.f32.mrf.mxu0 }
 0x40e   : > { %23138 = vst [vmem:[#allocation84_spill] sm:$0xff] %v20804_v48  ;;  %v20806_v46 = vpop.f32.mrf.mxu1  ;;  %16656 = vmatmul.mubr.msk.f32.gmra.mxu1 %vm6301_vm2, %v9014_v4 }
 0x40f   : > { %v20808_v27 = vpop.f32.mrf.mxu0  ;;  %16878 = vmatmul.mubr.msk.f32.gmra.mxu0 %vm6301_vm2, %v9014_v4  ;;  %16658 = vmatprep.mubr.msk.f32.mxu1 %vm6301_vm2, %v9015_v40 }
 0x410   : > { %23139 = vst [vmem:[#allocation76_spill] sm:$0xff] %v20808_v27  ;;  %16880 = vmatprep.mubr.msk.f32.mxu0 %vm6301_vm2, %v9015_v40  ;;  %v20814_v2 = vpop.f32.mrf.mxu1  ;;  %v9017_v27 = vld [vmem:[#allocation3 + $0xba] sm:$0xff] }
 0x411   : > { %v20816_v13 = vpop.f32.mrf.mxu0 }
 0x412   : > { %23140 = vst [vmem:[#allocation18_spill] sm:$0xff] %v20816_v13  ;;  %v20818_v48 = vpop.f32.mrf.mxu1  ;;  %16659 = vmatmul.mubr.msk.f32.gmra.mxu1 %vm6301_vm2, %v9016_v11 }
 0x413   : > { %v20820_v26 = vpop.f32.mrf.mxu0  ;;  %16881 = vmatmul.mubr.msk.f32.gmra.mxu0 %vm6301_vm2, %v9016_v11  ;;  %16661 = vmatprep.mubr.msk.f32.mxu1 %vm6301_vm2, %v9017_v27 }
 0x414   : > { %23141 = vst [vmem:[#allocation33_spill] sm:$0xff] %v20820_v26  ;;  %16883 = vmatprep.mubr.msk.f32.mxu0 %vm6301_vm2, %v9017_v27  ;;  %v20826_v4 = vpop.f32.mrf.mxu1  ;;  %v9019_v26 = vld [vmem:[#allocation3 + $0xca] sm:$0xff] }
 0x415   : > { %v20828_v40 = vpop.f32.mrf.mxu0 }
 0x416   : > { %23142 = vst [vmem:[#allocation21_spill] sm:$0xff] %v20828_v40  ;;  %v20830_v13 = vpop.f32.mrf.mxu1  ;;  %16662 = vmatmul.mubr.msk.f32.gmra.mxu1 %vm6301_vm2, %v9018_v50 }
 0x417   : > { %v20832_v16 = vpop.f32.mrf.mxu0  ;;  %16884 = vmatmul.mubr.msk.f32.gmra.mxu0 %vm6301_vm2, %v9018_v50  ;;  %16664 = vmatprep.mubr.msk.f32.mxu1 %vm6301_vm2, %v9019_v26 }
 0x418   : > { %23143 = vst [vmem:[#allocation5_spill] sm:$0xff] %v20832_v16  ;;  %16886 = vmatprep.mubr.msk.f32.mxu0 %vm6301_vm2, %v9019_v26  ;;  %v20838_v11 = vpop.f32.mrf.mxu1  ;;  %v9021_v16 = vld [vmem:[#allocation3 + $0xda] sm:$0xff] }
 0x419   : > { %v20840_v27 = vpop.f32.mrf.mxu0 }
 0x41a   : > { %23144 = vst [vmem:[#allocation25_spill] sm:$0xff] %v20840_v27  ;;  %v20842_v40 = vpop.f32.mrf.mxu1  ;;  %16665 = vmatmul.mubr.msk.f32.gmra.mxu1 %vm6301_vm2, %v9020_v3 }
 0x41b   : > { %v20844_v15 = vpop.f32.mrf.mxu0  ;;  %16887 = vmatmul.mubr.msk.f32.gmra.mxu0 %vm6301_vm2, %v9020_v3  ;;  %16667 = vmatprep.mubr.msk.f32.mxu1 %vm6301_vm2, %v9021_v16 }
 0x41c   : > { %23145 = vst [vmem:[#allocation7_spill] sm:$0xff] %v20844_v15  ;;  %16889 = vmatprep.mubr.msk.f32.mxu0 %vm6301_vm2, %v9021_v16  ;;  %v20850_v50 = vpop.f32.mrf.mxu1  ;;  %v9023_v15 = vld [vmem:[#allocation3 + $0xea] sm:$0xff] }
 0x41d   : > { %v20852_v26 = vpop.f32.mrf.mxu0 }
 0x41e   : > { %23146 = vst [vmem:[#allocation74_spill] sm:$0xff] %v20852_v26  ;;  %v20854_v27 = vpop.f32.mrf.mxu1  ;;  %16668 = vmatmul.mubr.msk.f32.gmra.mxu1 %vm6301_vm2, %v9022_v34 }
 0x41f   : > { %v20856_v61 = vpop.f32.mrf.mxu0  ;;  %16890 = vmatmul.mubr.msk.f32.gmra.mxu0 %vm6301_vm2, %v9022_v34  ;;  %16670 = vmatprep.mubr.msk.f32.mxu1 %vm6301_vm2, %v9023_v15 }
 0x420   : > { %23147 = vst [vmem:[#allocation29_spill] sm:$0xff] %v20856_v61  ;;  %16892 = vmatprep.mubr.msk.f32.mxu0 %vm6301_vm2, %v9023_v15  ;;  %v20862_v3 = vpop.f32.mrf.mxu1  ;;  %v9025_v61 = vld [vmem:[#allocation3 + $0xfa] sm:$0xff] }
 0x421   : > { %23148 = vst [vmem:[#allocation37_spill] sm:$0xff] %v20862_v3  ;;  %v20864_v16 = vpop.f32.mrf.mxu0  ;;  %v21008_v3 = vld [vmem:[%s22625_s3 + $0x58] sm:$0xff] }
 0x422   : > { %23149 = vst [vmem:[#allocation40_spill] sm:$0xff] %v20864_v16  ;;  %v20866_v26 = vpop.f32.mrf.mxu1  ;;  %16671 = vmatmul.mubr.msk.f32.gmra.mxu1 %vm6301_vm2, %v9024_v54 }
 0x423   : > { %23150 = vst [vmem:[#allocation100_spill] sm:$0xff] %v20866_v26  ;;  %v20868_v30 = vpop.f32.mrf.mxu0  ;;  %16893 = vmatmul.mubr.msk.f32.gmra.mxu0 %vm6301_vm2, %v9024_v54  ;;  %16673 = vmatprep.mubr.msk.f32.mxu1 %vm6301_vm2, %v9025_v61 }
 0x424   : > { %23151 = vst [vmem:[#allocation101_spill] sm:$0xff] %v20868_v30  ;;  %16895 = vmatprep.mubr.msk.f32.mxu0 %vm6301_vm2, %v9025_v61  ;;  %v20874_v34 = vpop.f32.mrf.mxu1  ;;  %v9027_v30 = vld [vmem:[#allocation3 + $0x10a] sm:$0xff] }
 0x425   : > { %23152 = vst [vmem:[#allocation102_spill] sm:$0xff] %v20874_v34  ;;  %v20876_v15 = vpop.f32.mrf.mxu0  ;;  %v9028_v34 = vld [vmem:[#allocation3 + $0x112] sm:$0xff] }
 0x426   : > { %23153 = vst [vmem:[#allocation103_spill] sm:$0xff] %v20876_v15  ;;  %v20878_v16 = vpop.f32.mrf.mxu1  ;;  %16674 = vmatmul.mubr.msk.f32.gmra.mxu1 %vm6301_vm2, %v9026_v0 }
 0x427   : > { %23154 = vst [vmem:[#allocation104_spill] sm:$0xff] %v20878_v16  ;;  %v20880_v18 = vpop.f32.mrf.mxu0  ;;  %16896 = vmatmul.mubr.msk.f32.gmra.mxu0 %vm6301_vm2, %v9026_v0  ;;  %16676 = vmatprep.mubr.msk.f32.mxu1 %vm6301_vm2, %v9027_v30 }
 0x428   : > { %23155 = vst [vmem:[#allocation105_spill] sm:$0xff] %v20880_v18  ;;  %16898 = vmatprep.mubr.msk.f32.mxu0 %vm6301_vm2, %v9027_v30  ;;  %v20886_v54 = vpop.f32.mrf.mxu1  ;;  %v9029_v18 = vld [vmem:[#allocation3 + $0x11a] sm:$0xff] }
 0x429   : > { %23156 = vst [vmem:[#allocation106_spill] sm:$0xff] %v20886_v54  ;;  %v20888_v61 = vpop.f32.mrf.mxu0  ;;  %v9030_v54 = vld [vmem:[#allocation3 + $0x122] sm:$0xff] }
 0x42a   : > { %23157 = vst [vmem:[#allocation107_spill] sm:$0xff] %v20888_v61  ;;  %v20890_v15 = vpop.f32.mrf.mxu1  ;;  %16677 = vmatmul.mubr.msk.f32.gmra.mxu1 %vm6301_vm2, %v9028_v34 }
 0x42b   : > { %23158 = vst [vmem:[#allocation108_spill] sm:$0xff] %v20890_v15  ;;  %v20892_v26 = vpop.f32.mrf.mxu0  ;;  %16899 = vmatmul.mubr.msk.f32.gmra.mxu0 %vm6301_vm2, %v9028_v34  ;;  %16679 = vmatprep.mubr.msk.f32.mxu1 %vm6301_vm2, %v9029_v18 }
 0x42c   : > { %23159 = vst [vmem:[#allocation109_spill] sm:$0xff] %v20892_v26  ;;  %16901 = vmatprep.mubr.msk.f32.mxu0 %vm6301_vm2, %v9029_v18  ;;  %v20898_v0 = vpop.f32.mrf.mxu1  ;;  %v9031_v26 = vld [vmem:[#allocation3 + $0x12a] sm:$0xff] }
 0x42d   : > { %23160 = vst [vmem:[#allocation110_spill] sm:$0xff] %v20898_v0  ;;  %v20900_v30 = vpop.f32.mrf.mxu0  ;;  %v9032_v0 = vld [vmem:[#allocation3 + $0x132] sm:$0xff] }
 0x42e   : > { %23161 = vst [vmem:[#allocation111_spill] sm:$0xff] %v20900_v30  ;;  %v20902_v61 = vpop.f32.mrf.mxu1  ;;  %16680 = vmatmul.mubr.msk.f32.gmra.mxu1 %vm6301_vm2, %v9030_v54 }
 0x42f   : > { %23162 = vst [vmem:[#allocation112_spill] sm:$0xff] %v20902_v61  ;;  %v20904_v16 = vpop.f32.mrf.mxu0  ;;  %16902 = vmatmul.mubr.msk.f32.gmra.mxu0 %vm6301_vm2, %v9030_v54  ;;  %16682 = vmatprep.mubr.msk.f32.mxu1 %vm6301_vm2, %v9031_v26 }
 0x430   : > { %23163 = vst [vmem:[#allocation113_spill] sm:$0xff] %v20904_v16  ;;  %16904 = vmatprep.mubr.msk.f32.mxu0 %vm6301_vm2, %v9031_v26  ;;  %v20910_v34 = vpop.f32.mrf.mxu1  ;;  %v9033_v16 = vld [vmem:[#allocation3 + $0x13a] sm:$0xff] }
 0x431   : > { %23164 = vst [vmem:[#allocation114_spill] sm:$0xff] %v20910_v34  ;;  %v20912_v18 = vpop.f32.mrf.mxu0  ;;  %v9034_v34 = vld [vmem:[#allocation3 + $0x142] sm:$0xff] }
 0x432   : > { %23165 = vst [vmem:[#allocation115_spill] sm:$0xff] %v20912_v18  ;;  %v20914_v30 = vpop.f32.mrf.mxu1  ;;  %16683 = vmatmul.mubr.msk.f32.gmra.mxu1 %vm6301_vm2, %v9032_v0 }
 0x433   : > { %23166 = vst [vmem:[#allocation116_spill] sm:$0xff] %v20914_v30  ;;  %v20916_v15 = vpop.f32.mrf.mxu0  ;;  %16905 = vmatmul.mubr.msk.f32.gmra.mxu0 %vm6301_vm2, %v9032_v0  ;;  %16685 = vmatprep.mubr.msk.f32.mxu1 %vm6301_vm2, %v9033_v16 }
 0x434   : > { %23167 = vst [vmem:[#allocation117_spill] sm:$0xff] %v20916_v15  ;;  %16907 = vmatprep.mubr.msk.f32.mxu0 %vm6301_vm2, %v9033_v16  ;;  %v20922_v54 = vpop.f32.mrf.mxu1  ;;  %v9035_v15 = vld [vmem:[#allocation3 + $0x14a] sm:$0xff] }
 0x435   : > { %23168 = vst [vmem:[#allocation118_spill] sm:$0xff] %v20922_v54  ;;  %v20924_v26 = vpop.f32.mrf.mxu0  ;;  %v9036_v54 = vld [vmem:[#allocation3 + $0x152] sm:$0xff] }
 0x436   : > { %23169 = vst [vmem:[#allocation119_spill] sm:$0xff] %v20924_v26  ;;  %v20926_v18 = vpop.f32.mrf.mxu1  ;;  %16686 = vmatmul.mubr.msk.f32.gmra.mxu1 %vm6301_vm2, %v9034_v34 }
 0x437   : > { %23170 = vst [vmem:[#allocation120_spill] sm:$0xff] %v20926_v18  ;;  %v20928_v61 = vpop.f32.mrf.mxu0  ;;  %16908 = vmatmul.mubr.msk.f32.gmra.mxu0 %vm6301_vm2, %v9034_v34  ;;  %16688 = vmatprep.mubr.msk.f32.mxu1 %vm6301_vm2, %v9035_v15 }
 0x438   : > { %23171 = vst [vmem:[#allocation121_spill] sm:$0xff] %v20928_v61  ;;  %16910 = vmatprep.mubr.msk.f32.mxu0 %vm6301_vm2, %v9035_v15  ;;  %v20934_v0 = vpop.f32.mrf.mxu1  ;;  %v9037_v61 = vld [vmem:[#allocation3 + $0x15a] sm:$0xff] }
 0x439   : > { %23172 = vst [vmem:[#allocation122_spill] sm:$0xff] %v20934_v0  ;;  %v20936_v16 = vpop.f32.mrf.mxu0  ;;  %v9038_v0 = vld [vmem:[#allocation3 + $0x162] sm:$0xff] }
 0x43a   : > { %23173 = vst [vmem:[#allocation123_spill] sm:$0xff] %v20936_v16  ;;  %v20938_v26 = vpop.f32.mrf.mxu1  ;;  %16689 = vmatmul.mubr.msk.f32.gmra.mxu1 %vm6301_vm2, %v9036_v54 }
 0x43b   : > { %23174 = vst [vmem:[#allocation124_spill] sm:$0xff] %v20938_v26  ;;  %v20940_v30 = vpop.f32.mrf.mxu0  ;;  %16911 = vmatmul.mubr.msk.f32.gmra.mxu0 %vm6301_vm2, %v9036_v54  ;;  %16691 = vmatprep.mubr.msk.f32.mxu1 %vm6301_vm2, %v9037_v61 }
 0x43c   : > { %23175 = vst [vmem:[#allocation125_spill] sm:$0xff] %v20940_v30  ;;  %16913 = vmatprep.mubr.msk.f32.mxu0 %vm6301_vm2, %v9037_v61  ;;  %v20946_v34 = vpop.f32.mrf.mxu1  ;;  %v9039_v30 = vld [vmem:[#allocation3 + $0x16a] sm:$0xff] }
 0x43d   : > { %23176 = vst [vmem:[#allocation126_spill] sm:$0xff] %v20946_v34  ;;  %v20948_v15 = vpop.f32.mrf.mxu0  ;;  %v9040_v34 = vld [vmem:[#allocation3 + $0x172] sm:$0xff] }
 0x43e   : > { %23177 = vst [vmem:[#allocation127_spill] sm:$0xff] %v20948_v15  ;;  %v20950_v16 = vpop.f32.mrf.mxu1  ;;  %16692 = vmatmul.mubr.msk.f32.gmra.mxu1 %vm6301_vm2, %v9038_v0 }
 0x43f   : > { %23178 = vst [vmem:[#allocation128_spill] sm:$0xff] %v20950_v16  ;;  %v20952_v18 = vpop.f32.mrf.mxu0  ;;  %16914 = vmatmul.mubr.msk.f32.gmra.mxu0 %vm6301_vm2, %v9038_v0  ;;  %16694 = vmatprep.mubr.msk.f32.mxu1 %vm6301_vm2, %v9039_v30 }
 0x440   : > { %23179 = vst [vmem:[#allocation129_spill] sm:$0xff] %v20952_v18  ;;  %16916 = vmatprep.mubr.msk.f32.mxu0 %vm6301_vm2, %v9039_v30  ;;  %v20958_v54 = vpop.f32.mrf.mxu1  ;;  %v9041_v18 = vld [vmem:[#allocation3 + $0x17a] sm:$0xff] }
 0x441   : > { %23180 = vst [vmem:[#allocation130_spill] sm:$0xff] %v20958_v54  ;;  %v20960_v61 = vpop.f32.mrf.mxu0  ;;  %v9042_v54 = vld [vmem:[#allocation3 + $0x182] sm:$0xff] }
 0x442   : > { %23181 = vst [vmem:[#allocation131_spill] sm:$0xff] %v20960_v61  ;;  %v20962_v15 = vpop.f32.mrf.mxu1  ;;  %16695 = vmatmul.mubr.msk.f32.gmra.mxu1 %vm6301_vm2, %v9040_v34 }
 0x443   : > { %23182 = vst [vmem:[#allocation132_spill] sm:$0xff] %v20962_v15  ;;  %v20964_v26 = vpop.f32.mrf.mxu0  ;;  %16917 = vmatmul.mubr.msk.f32.gmra.mxu0 %vm6301_vm2, %v9040_v34  ;;  %16697 = vmatprep.mubr.msk.f32.mxu1 %vm6301_vm2, %v9041_v18  ;;  %v11787_v15 = vld [vmem:[#allocation3 + $0x31] sm:$0xff] }
 0x444   : > { %23183 = vst [vmem:[#allocation133_spill] sm:$0xff] %v20964_v26  ;;  %16919 = vmatprep.mubr.msk.f32.mxu0 %vm6301_vm2, %v9041_v18  ;;  %v20970_v0 = vpop.f32.mrf.mxu1  ;;  %v9043_v26 = vld [vmem:[#allocation3 + $0x18a] sm:$0xff] }
 0x445   : > { %23184 = vst [vmem:[#allocation134_spill] sm:$0xff] %v20970_v0  ;;  %v20972_v30 = vpop.f32.mrf.mxu0  ;;  %v9044_v0 = vld [vmem:[#allocation3 + $0x192] sm:$0xff] }
 0x446   : > { %23185 = vst [vmem:[#allocation135_spill] sm:$0xff] %v20972_v30  ;;  %v20974_v61 = vpop.f32.mrf.mxu1  ;;  %16698 = vmatmul.mubr.msk.f32.gmra.mxu1 %vm6301_vm2, %v9042_v54  ;;  %v7123_v30 = vadd.f32 %v20707_v17, %v20326_v14  ;;  %v7133_v17 = vadd.f32 %v20722_v7, %v20354_v58  ;;  %v7128_v58 = vadd.f32 %v20730_v32, %v20362_v56  ;;  %v23198_v32 = vld [vmem:[#allocation10_spill] sm:$0xff] }
 0x447   : > { %23186 = vst [vmem:[#allocation136_spill] sm:$0xff] %v20974_v61  ;;  %v20976_v16 = vpop.f32.mrf.mxu0  ;;  %16920 = vmatmul.mubr.msk.f32.gmra.mxu0 %vm6301_vm2, %v9042_v54  ;;  %16700 = vmatprep.mubr.msk.f32.mxu1 %vm6301_vm2, %v9043_v26  ;;  %v9695_v54 = vld [vmem:[#allocation3 + $0x18] sm:$0xff] }
 0x448   : > { %23187 = vst [vmem:[#allocation137_spill] sm:$0xff] %v20976_v16  ;;  %16922 = vmatprep.mubr.msk.f32.mxu0 %vm6301_vm2, %v9043_v26  ;;  %v20982_v34 = vpop.f32.mrf.mxu1  ;;  %v7118_v26 = vadd.f32 %v20716_v45, %v23192_v51 }
 0x449   : > { %23188 = vst [vmem:[#allocation138_spill] sm:$0xff] %v20982_v34  ;;  %v20984_v18 = vpop.f32.mrf.mxu0  ;;  %v9696_v34 = vld [vmem:[#allocation3 + $0x20] sm:$0xff] }
 0x44a   : > { %23189 = vst [vmem:[#allocation139_spill] sm:$0xff] %v20984_v18  ;;  %v20988_v61 = vpop.f32.mrf.mxu1  ;;  %16701 = vmatmul.mubr.msk.f32.gmra.mxu1 %vm6301_vm2, %v9044_v0 }
 0x44b   : > { %23190 = vst [vmem:[#allocation140_spill] sm:$0xff] %v20988_v61  ;;  %v20990_v16 = vpop.f32.mrf.mxu0  ;;  %16923 = vmatmul.mubr.msk.f32.gmra.mxu0 %vm6301_vm2, %v9044_v0  ;;  %16779 = vmatprep.mubr.msk.f32.mxu1 %vm6301_vm2, %v9695_v54  ;;  %v11788_v0 = vld [vmem:[#allocation3 + $0x39] sm:$0xff] }
 0x44c   : > { %23191 = vst [vmem:[#allocation141_spill] sm:$0xff] %v20990_v16  ;;  %17001 = vmatprep.mubr.msk.f32.mxu0 %vm6301_vm2, %v11787_v15  ;;  %v20998_v18 = vpop.f32.mrf.mxu1  ;;  %v23194_v16 = vld [vmem:[#allocation77_spill] sm:$0xff]  ;;  %v9697_v15 = vld [vmem:[#allocation3 + $0x28] sm:$0xff] }
 0x44d   : > { %v21000_v14 = vpop.f32.mrf.mxu0  ;;  %v7856_v61 = vadd.f32 %v23194_v16, %v7123_v30  ;;  %v11789_v16 = vld [vmem:[#allocation3 + $0x41] sm:$0xff]  ;;  %v23196_v30 = vld [vmem:[#allocation42_spill] sm:$0xff] }
 0x44e   : > { %23193 = vst [vmem:[#allocation49_spill] sm:$0xff] %v21000_v14  ;;  %v16485_v51 = vpop.f32.mrf.mxu1  ;;  %16780 = vmatmul.mubr.msk.f32.vlgmr.msra.gmra.mxu1 %vm6301_vm2, %v9696_v34  ;;  %v7855_v54 = vadd.f32 %v23196_v30, %v7118_v26  ;;  %v7143_v34 = vadd.f32 %v20734_v22, %v20369_v57  ;;  %v21037_v26 = vld [vmem:[#allocation3 + $0x38] sm:$0xff]  ;;  %v7138_v57 = vadd.f32 %v20742_v44, %v20379_v43  ;;  %v21054_v43 = vld [vmem:[#allocation3 + $0x40] sm:$0xff] }
 0x44f   : > { %v21010_v45 = vpop.f32.mrf.mxu0  ;;  %17002 = vmatmul.mubr.msk.f32.vlgmr.msra.gmra.mxu0 %vm6301_vm2, %v11788_v0  ;;  %v21016_v7 = vadd.f32 %v16485_v51, %v7856_v61  ;;  %16926 = vmatpush3.msra.mxu1 %v20705_v63  ;;  %v7858_v61 = vadd.f32 %v23198_v32, %v7133_v17  ;;  %v21030_v63 = vld [vmem:[#allocation3 + $0x30] sm:$0xff]  ;;  %v23200_v17 = vld [vmem:[#allocation51_spill] sm:$0xff]  ;;  %v7153_v32 = vadd.f32 %v20746_v9, %v20383_v28 }
 0x450   : > { %23195 = vst [vmem:[#allocation77_spill] sm:$0xff] %v21010_v45  ;;  %16782 = vmatprep.mubr.msk.f32.mxu1 %vm6301_vm2, %v9697_v15  ;;  %17004 = vmatprep.mubr.msk.f32.mxu0 %vm6301_vm2, %v11789_v16  ;;  %v8163_v45 = vpop.f32.mrf.mxu1  ;;  %v11790_v0 = vld [vmem:[#allocation3 + $0x49] sm:$0xff]  ;;  %v11791_v16 = vld [vmem:[#allocation3 + $0x51] sm:$0xff]  ;;  %v11792_v44 = vld [vmem:[#allocation3 + $0x59] sm:$0xff]  ;;  %v7148_v28 = vadd.f32 %v20754_v25, %v20393_v47 }
 0x451   : > { %v21022_v14 = vpop.f32.mrf.mxu0  ;;  %17073 = vmatprep.subr.mxu1 %v21008_v3  ;;  %v21027_v56 = vadd.f32 %v8163_v45, %v7855_v54  ;;  %v7857_v45 = vadd.f32 %v23200_v17, %v7128_v58  ;;  %v21061_v58 = vld [vmem:[#allocation3 + $0x48] sm:$0xff]  ;;  %v21078_v47 = vld [vmem:[#allocation3 + $0x50] sm:$0xff] }
 0x452   : > { %23197 = vst [vmem:[#allocation42_spill] sm:$0xff] %v21022_v14  ;;  %v16488_v51 = vpop.f32.mrf.mxu1  ;;  %16783 = vmatmul.mubr.msk.f32.gmra.mxu1 %vm6301_vm2, %v21030_v63  ;;  %v11794_v25 = vld [vmem:[#allocation3 + $0x69] sm:$0xff] }
 0x453   : > { %v21032_v15 = vpop.f32.mrf.mxu0  ;;  %17005 = vmatmul.mubr.msk.f32.gmra.mxu0 %vm6301_vm2, %v11790_v0  ;;  %v21041_v22 = vadd.f32 %v16488_v51, %v7858_v61  ;;  %16785 = vmatprep.mubr.msk.f32.mxu1 %vm6301_vm2, %v21037_v26 }
 0x454   : > { %23199 = vst [vmem:[#allocation10_spill] sm:$0xff] %v21032_v15  ;;  %17007 = vmatprep.mubr.msk.f32.mxu0 %vm6301_vm2, %v11791_v16  ;;  %v8173_v30 = vpop.f32.mrf.mxu1  ;;  %v23202_v15 = vld [vmem:[#allocation43_spill] sm:$0xff] }
 0x455   : > { %v21047_v54 = vpop.f32.mrf.mxu0  ;;  %v21051_v0 = vadd.f32 %v8173_v30, %v7857_v45  ;;  %v7860_v14 = vadd.f32 %v23202_v15, %v7143_v34  ;;  %v11793_v16 = vld [vmem:[#allocation3 + $0x61] sm:$0xff]  ;;  %v7163_v30 = vadd.f32 %v20758_v49, %v20397_v41  ;;  %v7158_v41 = vadd.f32 %v20766_v37, %v20407_v24  ;;  %v11796_v37 = vld [vmem:[#allocation3 + $0x79] sm:$0xff] }
 0x456   : > { %23201 = vst [vmem:[#allocation51_spill] sm:$0xff] %v21047_v54  ;;  %v16491_v61 = vpop.f32.mrf.mxu1  ;;  %16786 = vmatmul.mubr.msk.f32.gmra.mxu1 %vm6301_vm2, %v21054_v43  ;;  %v23204_v34 = vld [vmem:[#allocation12_spill] sm:$0xff]  ;;  %v21102_v24 = vld [vmem:[#allocation3 + $0x60] sm:$0xff] }
 0x457   : > { %v21056_v51 = vpop.f32.mrf.mxu0  ;;  %17008 = vmatmul.mubr.msk.f32.gmra.mxu0 %vm6301_vm2, %v11792_v44  ;;  %v21065_v9 = vadd.f32 %v16491_v61, %v7860_v14  ;;  %16788 = vmatprep.mubr.msk.f32.mxu1 %vm6301_vm2, %v21061_v58  ;;  %v7859_v15 = vadd.f32 %v23204_v34, %v7138_v57  ;;  %v21085_v57 = vld [vmem:[#allocation3 + $0x58] sm:$0xff] }
 0x458   : > { %23203 = vst [vmem:[#allocation43_spill] sm:$0xff] %v21056_v51  ;;  %17010 = vmatprep.mubr.msk.f32.mxu0 %vm6301_vm2, %v11793_v16  ;;  %v8183_v17 = vpop.f32.mrf.mxu1  ;;  %v23206_v51 = vld [vmem:[#allocation53_spill] sm:$0xff] }
 0x459   : > { %v21071_v45 = vpop.f32.mrf.mxu0  ;;  %v21075_v44 = vadd.f32 %v8183_v17, %v7859_v15  ;;  %v7862_v54 = vadd.f32 %v23206_v51, %v7153_v32  ;;  %v11795_v16 = vld [vmem:[#allocation3 + $0x71] sm:$0xff]  ;;  %v23208_v32 = vld [vmem:[#allocation44_spill] sm:$0xff]  ;;  %v7173_v17 = vadd.f32 %v20770_v31, %v20411_v38  ;;  %v7168_v38 = vadd.f32 %v20778_v62, %v20421_v23 }
 0x45a   : > { %23205 = vst [vmem:[#allocation12_spill] sm:$0xff] %v21071_v45  ;;  %v16494_v14 = vpop.f32.mrf.mxu1  ;;  %16789 = vmatmul.mubr.msk.f32.gmra.mxu1 %vm6301_vm2, %v21078_v47  ;;  %v7861_v51 = vadd.f32 %v23208_v32, %v7148_v28  ;;  %v21109_v28 = vld [vmem:[#allocation3 + $0x68] sm:$0xff]  ;;  %v21126_v23 = vld [vmem:[#allocation3 + $0x70] sm:$0xff] }
 0x45b   : > { %v21080_v61 = vpop.f32.mrf.mxu0  ;;  %17011 = vmatmul.mubr.msk.f32.gmra.mxu0 %vm6301_vm2, %v11794_v25  ;;  %v21089_v49 = vadd.f32 %v16494_v14, %v7862_v54  ;;  %16791 = vmatprep.mubr.msk.f32.mxu1 %vm6301_vm2, %v21085_v57  ;;  %v11798_v62 = vld [vmem:[#allocation3 + $0x89] sm:$0xff] }
 0x45c   : > { %23207 = vst [vmem:[#allocation53_spill] sm:$0xff] %v21080_v61  ;;  %17013 = vmatprep.mubr.msk.f32.mxu0 %vm6301_vm2, %v11795_v16  ;;  %v8193_v34 = vpop.f32.mrf.mxu1  ;;  %v23210_v61 = vld [vmem:[#allocation14_spill] sm:$0xff]  ;;  %v11797_v16 = vld [vmem:[#allocation3 + $0x81] sm:$0xff] }
 0x45d   : > { %v21095_v15 = vpop.f32.mrf.mxu0  ;;  %v21099_v25 = vadd.f32 %v8193_v34, %v7861_v51  ;;  %v7864_v45 = vadd.f32 %v23210_v61, %v7163_v30  ;;  %v23212_v30 = vld [vmem:[#allocation55_spill] sm:$0xff]  ;;  %v7183_v34 = vadd.f32 %v20782_v29, %v20425_v10  ;;  %v7178_v10 = vadd.f32 %v20790_v59, %v20435_v53 }
 0x45e   : > { %23209 = vst [vmem:[#allocation44_spill] sm:$0xff] %v21095_v15  ;;  %v16497_v54 = vpop.f32.mrf.mxu1  ;;  %16792 = vmatmul.mubr.msk.f32.gmra.mxu1 %vm6301_vm2, %v21102_v24  ;;  %v7863_v61 = vadd.f32 %v23212_v30, %v7158_v41  ;;  %v21133_v41 = vld [vmem:[#allocation3 + $0x78] sm:$0xff]  ;;  %v21150_v53 = vld [vmem:[#allocation3 + $0x80] sm:$0xff] }
 0x45f   : > { %v21104_v14 = vpop.f32.mrf.mxu0  ;;  %17014 = vmatmul.mubr.msk.f32.gmra.mxu0 %vm6301_vm2, %v11796_v37  ;;  %v21113_v31 = vadd.f32 %v16497_v54, %v7864_v45  ;;  %16794 = vmatprep.mubr.msk.f32.mxu1 %vm6301_vm2, %v21109_v28  ;;  %v11800_v59 = vld [vmem:[#allocation3 + $0x99] sm:$0xff] }
 0x460   : > { %23211 = vst [vmem:[#allocation14_spill] sm:$0xff] %v21104_v14  ;;  %17016 = vmatprep.mubr.msk.f32.mxu0 %vm6301_vm2, %v11797_v16  ;;  %v8203_v32 = vpop.f32.mrf.mxu1  ;;  %v23214_v14 = vld [vmem:[#allocation45_spill] sm:$0xff] }
 0x461   : > { %v21119_v51 = vpop.f32.mrf.mxu0  ;;  %v21123_v37 = vadd.f32 %v8203_v32, %v7863_v61  ;;  %v7866_v15 = vadd.f32 %v23214_v14, %v7173_v17  ;;  %v11799_v16 = vld [vmem:[#allocation3 + $0x91] sm:$0xff]  ;;  %v23216_v17 = vld [vmem:[#allocation16_spill] sm:$0xff]  ;;  %v7193_v32 = vadd.f32 %v20794_v6, %v20439_v60  ;;  %v7188_v60 = vadd.f32 %v20802_v21, %v20449_v19 }
 0x462   : > { %23213 = vst [vmem:[#allocation55_spill] sm:$0xff] %v21119_v51  ;;  %v16500_v45 = vpop.f32.mrf.mxu1  ;;  %16795 = vmatmul.mubr.msk.f32.gmra.mxu1 %vm6301_vm2, %v21126_v23  ;;  %v7865_v14 = vadd.f32 %v23216_v17, %v7168_v38  ;;  %v21157_v38 = vld [vmem:[#allocation3 + $0x88] sm:$0xff]  ;;  %v21174_v19 = vld [vmem:[#allocation3 + $0x90] sm:$0xff] }
 0x463   : > { %v21128_v54 = vpop.f32.mrf.mxu0  ;;  %17017 = vmatmul.mubr.msk.f32.gmra.mxu0 %vm6301_vm2, %v11798_v62  ;;  %v21137_v29 = vadd.f32 %v16500_v45, %v7866_v15  ;;  %16797 = vmatprep.mubr.msk.f32.mxu1 %vm6301_vm2, %v21133_v41  ;;  %v11802_v21 = vld [vmem:[#allocation3 + $0xa9] sm:$0xff] }
 0x464   : > { %23215 = vst [vmem:[#allocation45_spill] sm:$0xff] %v21128_v54  ;;  %17019 = vmatprep.mubr.msk.f32.mxu0 %vm6301_vm2, %v11799_v16  ;;  %v8213_v30 = vpop.f32.mrf.mxu1  ;;  %v23218_v54 = vld [vmem:[#allocation57_spill] sm:$0xff]  ;;  %v11801_v16 = vld [vmem:[#allocation3 + $0xa1] sm:$0xff] }
 0x465   : > { %v21143_v61 = vpop.f32.mrf.mxu0  ;;  %v21147_v62 = vadd.f32 %v8213_v30, %v7865_v14  ;;  %v7868_v51 = vadd.f32 %v23218_v54, %v7183_v34  ;;  %v23220_v34 = vld [vmem:[#allocation46_spill] sm:$0xff]  ;;  %v7203_v30 = vadd.f32 %v20806_v46, %v20453_v39  ;;  %v7198_v39 = vadd.f32 %v20814_v2, %v20463_v5  ;;  %v21198_v5 = vld [vmem:[#allocation3 + $0xa0] sm:$0xff] }
 0x466   : > { %23217 = vst [vmem:[#allocation16_spill] sm:$0xff] %v21143_v61  ;;  %v16503_v15 = vpop.f32.mrf.mxu1  ;;  %16798 = vmatmul.mubr.msk.f32.gmra.mxu1 %vm6301_vm2, %v21150_v53  ;;  %v7867_v54 = vadd.f32 %v23220_v34, %v7178_v10  ;;  %v21181_v10 = vld [vmem:[#allocation3 + $0x98] sm:$0xff] }
 0x467   : > { %v21152_v45 = vpop.f32.mrf.mxu0  ;;  %17020 = vmatmul.mubr.msk.f32.gmra.mxu0 %vm6301_vm2, %v11800_v59  ;;  %v21161_v6 = vadd.f32 %v16503_v15, %v7868_v51  ;;  %16800 = vmatprep.mubr.msk.f32.mxu1 %vm6301_vm2, %v21157_v38  ;;  %v11804_v2 = vld [vmem:[#allocation3 + $0xb9] sm:$0xff] }
 0x468   : > { %23219 = vst [vmem:[#allocation57_spill] sm:$0xff] %v21152_v45  ;;  %17022 = vmatprep.mubr.msk.f32.mxu0 %vm6301_vm2, %v11801_v16  ;;  %v8223_v17 = vpop.f32.mrf.mxu1  ;;  %v23222_v45 = vld [vmem:[#allocation19_spill] sm:$0xff]  ;;  %v11803_v16 = vld [vmem:[#allocation3 + $0xb1] sm:$0xff] }
 0x469   : > { %v21167_v14 = vpop.f32.mrf.mxu0  ;;  %v21171_v59 = vadd.f32 %v8223_v17, %v7867_v54  ;;  %v7870_v61 = vadd.f32 %v23222_v45, %v7193_v32  ;;  %v23224_v32 = vld [vmem:[#allocation59_spill] sm:$0xff]  ;;  %v7213_v17 = vadd.f32 %v20818_v48, %v20467_v1  ;;  %v7208_v1 = vadd.f32 %v20826_v4, %v20477_v33  ;;  %v21222_v33 = vld [vmem:[#allocation3 + $0xb0] sm:$0xff] }
 0x46a   : > { %23221 = vst [vmem:[#allocation46_spill] sm:$0xff] %v21167_v14  ;;  %v16506_v51 = vpop.f32.mrf.mxu1  ;;  %16801 = vmatmul.mubr.msk.f32.gmra.mxu1 %vm6301_vm2, %v21174_v19  ;;  %v7869_v45 = vadd.f32 %v23224_v32, %v7188_v60  ;;  %v21205_v60 = vld [vmem:[#allocation3 + $0xa8] sm:$0xff] }
 0x46b   : > { %v21176_v15 = vpop.f32.mrf.mxu0  ;;  %17023 = vmatmul.mubr.msk.f32.gmra.mxu0 %vm6301_vm2, %v11802_v21  ;;  %v21185_v46 = vadd.f32 %v16506_v51, %v7870_v61  ;;  %16803 = vmatprep.mubr.msk.f32.mxu1 %vm6301_vm2, %v21181_v10  ;;  %v11806_v4 = vld [vmem:[#allocation3 + $0xc9] sm:$0xff] }
 0x46c   : > { %23223 = vst [vmem:[#allocation19_spill] sm:$0xff] %v21176_v15  ;;  %17025 = vmatprep.mubr.msk.f32.mxu0 %vm6301_vm2, %v11803_v16  ;;  %v8233_v34 = vpop.f32.mrf.mxu1  ;;  %v23226_v15 = vld [vmem:[#allocation47_spill] sm:$0xff] }
 0x46d   : > { %v21191_v54 = vpop.f32.mrf.mxu0  ;;  %v21195_v21 = vadd.f32 %v8233_v34, %v7869_v45  ;;  %v7872_v14 = vadd.f32 %v23226_v15, %v7203_v30  ;;  %v11805_v16 = vld [vmem:[#allocation3 + $0xc1] sm:$0xff]  ;;  %v23228_v30 = vld [vmem:[#allocation22_spill] sm:$0xff]  ;;  %v7223_v34 = vadd.f32 %v20830_v13, %v20481_v8  ;;  %v7218_v8 = vadd.f32 %v20838_v11, %v20491_v20 }
 0x46e   : > { %23225 = vst [vmem:[#allocation59_spill] sm:$0xff] %v21191_v54  ;;  %v16509_v61 = vpop.f32.mrf.mxu1  ;;  %16804 = vmatmul.mubr.msk.f32.gmra.mxu1 %vm6301_vm2, %v21198_v5  ;;  %v7871_v15 = vadd.f32 %v23228_v30, %v7198_v39  ;;  %v21229_v39 = vld [vmem:[#allocation3 + $0xb8] sm:$0xff]  ;;  %v21246_v20 = vld [vmem:[#allocation3 + $0xc0] sm:$0xff] }
 0x46f   : > { %v21200_v51 = vpop.f32.mrf.mxu0  ;;  %17026 = vmatmul.mubr.msk.f32.gmra.mxu0 %vm6301_vm2, %v11804_v2  ;;  %v21209_v48 = vadd.f32 %v16509_v61, %v7872_v14  ;;  %16806 = vmatprep.mubr.msk.f32.mxu1 %vm6301_vm2, %v21205_v60  ;;  %v11808_v11 = vld [vmem:[#allocation3 + $0xd9] sm:$0xff] }
 0x470   : > { %23227 = vst [vmem:[#allocation47_spill] sm:$0xff] %v21200_v51  ;;  %17028 = vmatprep.mubr.msk.f32.mxu0 %vm6301_vm2, %v11805_v16  ;;  %v8243_v32 = vpop.f32.mrf.mxu1  ;;  %v23230_v51 = vld [vmem:[#allocation9_spill] sm:$0xff] }
 0x471   : > { %v21215_v45 = vpop.f32.mrf.mxu0  ;;  %v21219_v2 = vadd.f32 %v8243_v32, %v7871_v15  ;;  %v7874_v54 = vadd.f32 %v23230_v51, %v7213_v17  ;;  %v11807_v16 = vld [vmem:[#allocation3 + $0xd1] sm:$0xff]  ;;  %v7233_v32 = vadd.f32 %v20842_v40, %v20495_v12  ;;  %v7228_v12 = vadd.f32 %v20850_v50, %v20506_v52  ;;  %v11810_v50 = vld [vmem:[#allocation3 + $0xe9] sm:$0xff] }
 0x472   : > { %23229 = vst [vmem:[#allocation22_spill] sm:$0xff] %v21215_v45  ;;  %v16512_v14 = vpop.f32.mrf.mxu1  ;;  %16807 = vmatmul.mubr.msk.f32.gmra.mxu1 %vm6301_vm2, %v21222_v33  ;;  %v23232_v17 = vld [vmem:[#allocation61_spill] sm:$0xff]  ;;  %v23247_v45 = vld [vmem:[#allocation26_spill] sm:$0xff] }
 0x473   : > { %v21224_v61 = vpop.f32.mrf.mxu0  ;;  %17029 = vmatmul.mubr.msk.f32.gmra.mxu0 %vm6301_vm2, %v11806_v4  ;;  %v21233_v13 = vadd.f32 %v16512_v14, %v7874_v54  ;;  %16809 = vmatprep.mubr.msk.f32.mxu1 %vm6301_vm2, %v21229_v39  ;;  %v7873_v51 = vadd.f32 %v23232_v17, %v7208_v1  ;;  %v21253_v1 = vld [vmem:[#allocation3 + $0xc8] sm:$0xff]  ;;  %v21270_v52 = vld [vmem:[#allocation3 + $0xd0] sm:$0xff] }
 0x474   : > { %23231 = vst [vmem:[#allocation9_spill] sm:$0xff] %v21224_v61  ;;  %17031 = vmatprep.mubr.msk.f32.mxu0 %vm6301_vm2, %v11807_v16  ;;  %v8253_v30 = vpop.f32.mrf.mxu1  ;;  %v7876_v61 = vadd.f32 %v20483_v36, %v7223_v34  ;;  %v11809_v16 = vld [vmem:[#allocation3 + $0xe1] sm:$0xff]  ;;  %v23235_v36 = vld [vmem:[#allocation62_spill] sm:$0xff] }
 0x475   : > { %v21239_v15 = vpop.f32.mrf.mxu0  ;;  %v21243_v4 = vadd.f32 %v8253_v30, %v7873_v51  ;;  %v7875_v34 = vadd.f32 %v23235_v36, %v7218_v8  ;;  %v7243_v30 = vadd.f32 %v20854_v27, %v20510_v55  ;;  %v21277_v8 = vld [vmem:[#allocation3 + $0xd8] sm:$0xff]  ;;  %v23240_v55 = vld [vmem:[#allocation37_spill] sm:$0xff] }
 0x476   : > { %23233 = vst [vmem:[#allocation61_spill] sm:$0xff] %v21239_v15  ;;  %v16515_v54 = vpop.f32.mrf.mxu1  ;;  %16810 = vmatmul.mubr.msk.f32.gmra.mxu1 %vm6301_vm2, %v21246_v20  ;;  %23239 = vst [vmem:[#allocation145_spill] sm:$0xff] %v21277_v8  ;;  %v7238_v27 = vadd.f32 %v23240_v55, %v20521_v42  ;;  %v21294_v42 = vld [vmem:[#allocation3 + $0xe0] sm:$0xff] }
 0x477   : > { %v21248_v14 = vpop.f32.mrf.mxu0  ;;  %17032 = vmatmul.mubr.msk.f32.gmra.mxu0 %vm6301_vm2, %v11808_v11  ;;  %v21257_v40 = vadd.f32 %v16515_v54, %v7876_v61  ;;  %16812 = vmatprep.mubr.msk.f32.mxu1 %vm6301_vm2, %v21253_v1 }
 0x478   : > { %23234 = vst [vmem:[#allocation142_spill] sm:$0xff] %v21248_v14  ;;  %17034 = vmatprep.mubr.msk.f32.mxu0 %vm6301_vm2, %v11809_v16  ;;  %v8263_v17 = vpop.f32.mrf.mxu1  ;;  %v7878_v14 = vadd.f32 %v20497_v35, %v7233_v32  ;;  %v11811_v16 = vld [vmem:[#allocation3 + $0xf1] sm:$0xff]  ;;  %v23242_v35 = vld [vmem:[#allocation48_spill] sm:$0xff] }
 0x479   : > { %v21263_v51 = vpop.f32.mrf.mxu0  ;;  %v21267_v11 = vadd.f32 %v8263_v17, %v7875_v34  ;;  %v7877_v32 = vadd.f32 %v23242_v35, %v7228_v12  ;;  %v21301_v12 = vld [vmem:[#allocation3 + $0xe8] sm:$0xff]  ;;  %v23251_v35 = vld [vmem:[#allocation50_spill] sm:$0xff] }
 0x47a   : > { %23236 = vst [vmem:[#allocation62_spill] sm:$0xff] %v21263_v51  ;;  %v16518_v61 = vpop.f32.mrf.mxu1  ;;  %16813 = vmatmul.mubr.msk.f32.gmra.mxu1 %vm6301_vm2, %v21270_v52  ;;  %23250 = vst [vmem:[#allocation146_spill] sm:$0xff] %v21301_v12 }
 0x47b   : > { %23237 = vst [vmem:[#allocation143_spill] sm:$0xff] %v21267_v11  ;;  %v21272_v54 = vpop.f32.mrf.mxu0  ;;  %17035 = vmatmul.mubr.msk.f32.gmra.mxu0 %vm6301_vm2, %v11810_v50  ;;  %v21281_v36 = vadd.f32 %v16518_v61, %v7878_v14  ;;  %16815 = vmatprep.mubr.msk.f32.mxu1 %vm6301_vm2, %v21277_v8  ;;  %v23245_v50 = vld [vmem:[#allocation100_spill] sm:$0xff]  ;;  %v7880_v11 = vadd.f32 %v23247_v45, %v7243_v30  ;;  %v11812_v14 = vld [vmem:[#allocation3 + $0xf9] sm:$0xff] }
 0x47c   : > { %23238 = vst [vmem:[#allocation144_spill] sm:$0xff] %v21272_v54  ;;  %17037 = vmatprep.mubr.msk.f32.mxu0 %vm6301_vm2, %v11811_v16  ;;  %v8273_v34 = vpop.f32.mrf.mxu1  ;;  %v23244_v54 = vld [vmem:[#allocation64_spill] sm:$0xff]  ;;  %23248 = vst [vmem:[#allocation100_spill] sm:$0xff] %v21294_v42  ;;  %v23254_v45 = vld [vmem:[#allocation11_spill] sm:$0xff] }
 0x47d   : > { %23241 = vst [vmem:[#allocation37_spill] sm:$0xff] %v21281_v36  ;;  %v21287_v17 = vpop.f32.mrf.mxu0  ;;  %v7253_v51 = vadd.f32 %v23245_v50, %v23244_v54  ;;  %v21291_v15 = vadd.f32 %v8273_v34, %v7877_v32  ;;  %v11813_v16 = vld [vmem:[#allocation3 + $0x101] sm:$0xff]  ;;  %v23252_v54 = vld [vmem:[#allocation102_spill] sm:$0xff]  ;;  %v7879_v30 = vadd.f32 %v23254_v45, %v7238_v27 }
 0x47e   : > { %23243 = vst [vmem:[#allocation48_spill] sm:$0xff] %v21287_v17  ;;  %v16521_v61 = vpop.f32.mrf.mxu1  ;;  %16816 = vmatmul.mubr.msk.f32.gmra.mxu1 %vm6301_vm2, %v21294_v42  ;;  %v7248_v32 = vadd.f32 %v23252_v54, %v23251_v35  ;;  %v23256_v17 = vld [vmem:[#allocation13_spill] sm:$0xff]  ;;  %v21325_v27 = vld [vmem:[#allocation3 + $0xf8] sm:$0xff]  ;;  %v23263_v45 = vld [vmem:[#allocation88_spill] sm:$0xff] }
 0x47f   : > { %23246 = vst [vmem:[#allocation64_spill] sm:$0xff] %v21291_v15  ;;  %v21296_v55 = vpop.f32.mrf.mxu0  ;;  %17038 = vmatmul.mubr.msk.f32.gmra.mxu0 %vm6301_vm2, %v11812_v14  ;;  %v21305_v34 = vadd.f32 %v16521_v61, %v7880_v11  ;;  %16818 = vmatprep.mubr.msk.f32.mxu1 %vm6301_vm2, %v21301_v12  ;;  %v23257_v14 = vld [vmem:[#allocation104_spill] sm:$0xff]  ;;  %v23259_v42 = vld [vmem:[#allocation65_spill] sm:$0xff] }
 0x480   : > { %23249 = vst [vmem:[#allocation26_spill] sm:$0xff] %v21296_v55  ;;  %17040 = vmatprep.mubr.msk.f32.mxu0 %vm6301_vm2, %v11813_v16  ;;  %v8283_v50 = vpop.f32.mrf.mxu1  ;;  %v7263_v15 = vadd.f32 %v23257_v14, %v23256_v17  ;;  %v7882_v8 = vadd.f32 %v23259_v42, %v7253_v51  ;;  %v21318_v35 = vld [vmem:[#allocation3 + $0xf0] sm:$0xff]  ;;  %23262 = vst [vmem:[#allocation65_spill] sm:$0xff] %v21325_v27  ;;  %v23264_v17 = vld [vmem:[#allocation106_spill] sm:$0xff] }
 0x481   : > { %23253 = vst [vmem:[#allocation50_spill] sm:$0xff] %v21305_v34  ;;  %v21311_v55 = vpop.f32.mrf.mxu0  ;;  %v21315_v36 = vadd.f32 %v8283_v50, %v7879_v30  ;;  %23260 = vst [vmem:[#allocation13_spill] sm:$0xff] %v21318_v35  ;;  %v11814_v11 = vld [vmem:[#allocation3 + $0x109] sm:$0xff]  ;;  %v11815_v16 = vld [vmem:[#allocation3 + $0x111] sm:$0xff]  ;;  %v7258_v30 = vadd.f32 %v23264_v17, %v23263_v45 }
 0x482   : > { %23255 = vst [vmem:[#allocation102_spill] sm:$0xff] %v21311_v55  ;;  %v16524_v61 = vpop.f32.mrf.mxu1  ;;  %16819 = vmatmul.mubr.msk.f32.gmra.mxu1 %vm6301_vm2, %v21318_v35  ;;  %v23266_v51 = vld [vmem:[#allocation30_spill] sm:$0xff]  ;;  %v23268_v55 = vld [vmem:[#allocation79_spill] sm:$0xff] }
 0x483   : > { %23258 = vst [vmem:[#allocation11_spill] sm:$0xff] %v21315_v36  ;;  %v21320_v54 = vpop.f32.mrf.mxu0  ;;  %17041 = vmatmul.mubr.msk.f32.gmra.mxu0 %vm6301_vm2, %v11814_v11  ;;  %v21329_v50 = vadd.f32 %v16524_v61, %v7882_v8  ;;  %16821 = vmatprep.mubr.msk.f32.mxu1 %vm6301_vm2, %v21325_v27  ;;  %v7881_v42 = vadd.f32 %v23266_v51, %v7248_v32  ;;  %v23269_v11 = vld [vmem:[#allocation108_spill] sm:$0xff]  ;;  %v23271_v35 = vld [vmem:[#allocation87_spill] sm:$0xff]  ;;  %v23275_v51 = vld [vmem:[#allocation89_spill] sm:$0xff] }
 0x484   : > { %23261 = vst [vmem:[#allocation104_spill] sm:$0xff] %v21320_v54  ;;  %17043 = vmatprep.mubr.msk.f32.mxu0 %vm6301_vm2, %v11815_v16  ;;  %v8293_v14 = vpop.f32.mrf.mxu1  ;;  %v7273_v36 = vadd.f32 %v23269_v11, %v23268_v55  ;;  %v7884_v12 = vadd.f32 %v23271_v35, %v7263_v15  ;;  %v21342_v45 = vld [vmem:[#allocation3 + $0x100] sm:$0xff]  ;;  %v21349_v32 = vld [vmem:[#allocation3 + $0x108] sm:$0xff]  ;;  %v23276_v55 = vld [vmem:[#allocation110_spill] sm:$0xff] }
 0x485   : > { %23265 = vst [vmem:[#allocation88_spill] sm:$0xff] %v21329_v50  ;;  %v21335_v54 = vpop.f32.mrf.mxu0  ;;  %v21339_v34 = vadd.f32 %v8293_v14, %v7881_v42  ;;  %23272 = vst [vmem:[#allocation79_spill] sm:$0xff] %v21342_v45  ;;  %v11816_v8 = vld [vmem:[#allocation3 + $0x119] sm:$0xff]  ;;  %v11817_v16 = vld [vmem:[#allocation3 + $0x121] sm:$0xff]  ;;  %v7268_v42 = vadd.f32 %v23276_v55, %v23275_v51 }
 0x486   : > { %23267 = vst [vmem:[#allocation106_spill] sm:$0xff] %v21335_v54  ;;  %v16527_v61 = vpop.f32.mrf.mxu1  ;;  %16822 = vmatmul.mubr.msk.f32.gmra.mxu1 %vm6301_vm2, %v21342_v45  ;;  %23274 = vst [vmem:[#allocation87_spill] sm:$0xff] %v21349_v32  ;;  %v23278_v15 = vld [vmem:[#allocation52_spill] sm:$0xff]  ;;  %v23280_v54 = vld [vmem:[#allocation54_spill] sm:$0xff] }
 0x487   : > { %23270 = vst [vmem:[#allocation30_spill] sm:$0xff] %v21339_v34  ;;  %v21344_v17 = vpop.f32.mrf.mxu0  ;;  %17044 = vmatmul.mubr.msk.f32.gmra.mxu0 %vm6301_vm2, %v11816_v8  ;;  %v21353_v14 = vadd.f32 %v16527_v61, %v7884_v12  ;;  %16824 = vmatprep.mubr.msk.f32.mxu1 %vm6301_vm2, %v21349_v32  ;;  %v7883_v35 = vadd.f32 %v23278_v15, %v7258_v30  ;;  %v23281_v8 = vld [vmem:[#allocation112_spill] sm:$0xff]  ;;  %v23283_v45 = vld [vmem:[#allocation15_spill] sm:$0xff]  ;;  %v21366_v51 = vld [vmem:[#allocation3 + $0x110] sm:$0xff] }
 0x488   : > { %23273 = vst [vmem:[#allocation108_spill] sm:$0xff] %v21344_v17  ;;  %17046 = vmatprep.mubr.msk.f32.mxu0 %vm6301_vm2, %v11817_v16  ;;  %v8303_v11 = vpop.f32.mrf.mxu1  ;;  %v7283_v34 = vadd.f32 %v23281_v8, %v23280_v54  ;;  %v7886_v27 = vadd.f32 %v23283_v45, %v7273_v36  ;;  %23284 = vst [vmem:[#allocation54_spill] sm:$0xff] %v21366_v51  ;;  %v11818_v12 = vld [vmem:[#allocation3 + $0x129] sm:$0xff]  ;;  %v21373_v30 = vld [vmem:[#allocation3 + $0x118] sm:$0xff] }
 0x489   : > { %23277 = vst [vmem:[#allocation89_spill] sm:$0xff] %v21353_v14  ;;  %v21359_v17 = vpop.f32.mrf.mxu0  ;;  %v21363_v50 = vadd.f32 %v8303_v11, %v7883_v35  ;;  %23286 = vst [vmem:[#allocation15_spill] sm:$0xff] %v21373_v30  ;;  %v11819_v16 = vld [vmem:[#allocation3 + $0x131] sm:$0xff]  ;;  %v23290_v36 = vld [vmem:[#allocation32_spill] sm:$0xff] }
 0x48a   : > { %23279 = vst [vmem:[#allocation110_spill] sm:$0xff] %v21359_v17  ;;  %v16530_v61 = vpop.f32.mrf.mxu1  ;;  %16825 = vmatmul.mubr.msk.f32.gmra.mxu1 %vm6301_vm2, %v21366_v51  ;;  %v23287_v15 = vld [vmem:[#allocation17_spill] sm:$0xff]  ;;  %v23288_v54 = vld [vmem:[#allocation114_spill] sm:$0xff]  ;;  %v7885_v45 = vadd.f32 %v23290_v36, %v7268_v42  ;;  %v21397_v42 = vld [vmem:[#allocation3 + $0x128] sm:$0xff] }
 0x48b   : > { %23282 = vst [vmem:[#allocation52_spill] sm:$0xff] %v21363_v50  ;;  %v21368_v55 = vpop.f32.mrf.mxu0  ;;  %17047 = vmatmul.mubr.msk.f32.gmra.mxu0 %vm6301_vm2, %v11818_v12  ;;  %v7278_v35 = vadd.f32 %v23288_v54, %v23287_v15  ;;  %v21377_v11 = vadd.f32 %v16530_v61, %v7886_v27  ;;  %16827 = vmatprep.mubr.msk.f32.mxu1 %vm6301_vm2, %v21373_v30  ;;  %v23292_v17 = vld [vmem:[#allocation69_spill] sm:$0xff]  ;;  %v23293_v12 = vld [vmem:[#allocation116_spill] sm:$0xff]  ;;  %v21390_v15 = vld [vmem:[#allocation3 + $0x120] sm:$0xff] }
 0x48c   : > { %23285 = vst [vmem:[#allocation112_spill] sm:$0xff] %v21368_v55  ;;  %17049 = vmatprep.mubr.msk.f32.mxu0 %vm6301_vm2, %v11819_v16  ;;  %v8313_v8 = vpop.f32.mrf.mxu1  ;;  %v7293_v50 = vadd.f32 %v23293_v12, %v23292_v17  ;;  %v23295_v51 = vld [vmem:[#allocation81_spill] sm:$0xff]  ;;  %23296 = vst [vmem:[#allocation69_spill] sm:$0xff] %v21390_v15  ;;  %v11820_v27 = vld [vmem:[#allocation3 + $0x139] sm:$0xff] }
 0x48d   : > { %23289 = vst [vmem:[#allocation17_spill] sm:$0xff] %v21377_v11  ;;  %v21383_v55 = vpop.f32.mrf.mxu0  ;;  %v21387_v14 = vadd.f32 %v8313_v8, %v7885_v45  ;;  %v7888_v32 = vadd.f32 %v23295_v51, %v7283_v34  ;;  %23298 = vst [vmem:[#allocation81_spill] sm:$0xff] %v21397_v42  ;;  %v11821_v16 = vld [vmem:[#allocation3 + $0x141] sm:$0xff]  ;;  %v23300_v17 = vld [vmem:[#allocation118_spill] sm:$0xff] }
 0x48e   : > { %23291 = vst [vmem:[#allocation114_spill] sm:$0xff] %v21383_v55  ;;  %v16533_v61 = vpop.f32.mrf.mxu1  ;;  %16828 = vmatmul.mubr.msk.f32.gmra.mxu1 %vm6301_vm2, %v21390_v15  ;;  %v23299_v36 = vld [vmem:[#allocation83_spill] sm:$0xff]  ;;  %v23302_v34 = vld [vmem:[#allocation34_spill] sm:$0xff]  ;;  %v23307_v15 = vld [vmem:[#allocation56_spill] sm:$0xff] }
 0x48f   : > { %23294 = vst [vmem:[#allocation32_spill] sm:$0xff] %v21387_v14  ;;  %v21392_v54 = vpop.f32.mrf.mxu0  ;;  %17050 = vmatmul.mubr.msk.f32.gmra.mxu0 %vm6301_vm2, %v11820_v27  ;;  %v7288_v45 = vadd.f32 %v23300_v17, %v23299_v36  ;;  %v21401_v8 = vadd.f32 %v16533_v61, %v7888_v32  ;;  %16830 = vmatprep.mubr.msk.f32.mxu1 %vm6301_vm2, %v21397_v42  ;;  %v23304_v55 = vld [vmem:[#allocation70_spill] sm:$0xff]  ;;  %v23305_v27 = vld [vmem:[#allocation120_spill] sm:$0xff]  ;;  %v21414_v36 = vld [vmem:[#allocation3 + $0x130] sm:$0xff] }
 0x490   : > { %23297 = vst [vmem:[#allocation116_spill] sm:$0xff] %v21392_v54  ;;  %17052 = vmatprep.mubr.msk.f32.mxu0 %vm6301_vm2, %v11821_v16  ;;  %v7887_v51 = vadd.f32 %v23302_v34, %v7278_v35  ;;  %v8323_v12 = vpop.f32.mrf.mxu1  ;;  %v7303_v14 = vadd.f32 %v23305_v27, %v23304_v55  ;;  %v7890_v30 = vadd.f32 %v23307_v15, %v7293_v50  ;;  %23308 = vst [vmem:[#allocation70_spill] sm:$0xff] %v21414_v36  ;;  %v11822_v32 = vld [vmem:[#allocation3 + $0x149] sm:$0xff]  ;;  %v21421_v35 = vld [vmem:[#allocation3 + $0x138] sm:$0xff] }
 0x491   : > { %23301 = vst [vmem:[#allocation83_spill] sm:$0xff] %v21401_v8  ;;  %v21407_v54 = vpop.f32.mrf.mxu0  ;;  %23310 = vst [vmem:[#allocation56_spill] sm:$0xff] %v21421_v35  ;;  %v11823_v16 = vld [vmem:[#allocation3 + $0x151] sm:$0xff]  ;;  %v23314_v50 = vld [vmem:[#allocation20_spill] sm:$0xff] }
 0x492   : > { %23303 = vst [vmem:[#allocation118_spill] sm:$0xff] %v21407_v54  ;;  %v21411_v11 = vadd.f32 %v8323_v12, %v7887_v51  ;;  %v16536_v61 = vpop.f32.mrf.mxu1  ;;  %16831 = vmatmul.mubr.msk.f32.gmra.mxu1 %vm6301_vm2, %v21414_v36  ;;  %v23311_v34 = vld [vmem:[#allocation58_spill] sm:$0xff]  ;;  %v7889_v15 = vadd.f32 %v23314_v50, %v7288_v45  ;;  %v23316_v54 = vld [vmem:[#allocation24_spill] sm:$0xff]  ;;  %v23319_v36 = vld [vmem:[#allocation39_spill] sm:$0xff] }
 0x493   : > { %v21416_v17 = vpop.f32.mrf.mxu0  ;;  %17053 = vmatmul.mubr.msk.f32.gmra.mxu0 %vm6301_vm2, %v11822_v32  ;;  %v23312_v55 = vld [vmem:[#allocation122_spill] sm:$0xff]  ;;  %v21425_v12 = vadd.f32 %v16536_v61, %v7890_v30  ;;  %16833 = vmatprep.mubr.msk.f32.mxu1 %vm6301_vm2, %v21421_v35  ;;  %v23317_v32 = vld [vmem:[#allocation124_spill] sm:$0xff]  ;;  %v7892_v42 = vadd.f32 %v23319_v36, %v7303_v14  ;;  %v23323_v50 = vld [vmem:[#allocation91_spill] sm:$0xff] }
 0x494   : > { %23306 = vst [vmem:[#allocation34_spill] sm:$0xff] %v21411_v11  ;;  %23309 = vst [vmem:[#allocation120_spill] sm:$0xff] %v21416_v17  ;;  %v7298_v51 = vadd.f32 %v23312_v55, %v23311_v34  ;;  %17055 = vmatprep.mubr.msk.f32.mxu0 %vm6301_vm2, %v11823_v16  ;;  %v8333_v27 = vpop.f32.mrf.mxu1  ;;  %v7313_v11 = vadd.f32 %v23317_v32, %v23316_v54  ;;  %v21438_v34 = vld [vmem:[#allocation3 + $0x140] sm:$0xff]  ;;  %v21445_v45 = vld [vmem:[#allocation3 + $0x148] sm:$0xff] }
 0x495   : > { %23313 = vst [vmem:[#allocation58_spill] sm:$0xff] %v21425_v12  ;;  %v21431_v17 = vpop.f32.mrf.mxu0  ;;  %v21435_v8 = vadd.f32 %v8333_v27, %v7889_v15  ;;  %23320 = vst [vmem:[#allocation24_spill] sm:$0xff] %v21438_v34  ;;  %v11824_v30 = vld [vmem:[#allocation3 + $0x159] sm:$0xff]  ;;  %v11825_v16 = vld [vmem:[#allocation3 + $0x161] sm:$0xff] }
 0x496   : > { %23315 = vst [vmem:[#allocation122_spill] sm:$0xff] %v21431_v17  ;;  %v16539_v61 = vpop.f32.mrf.mxu1  ;;  %16834 = vmatmul.mubr.msk.f32.gmra.mxu1 %vm6301_vm2, %v21438_v34  ;;  %23322 = vst [vmem:[#allocation39_spill] sm:$0xff] %v21445_v45  ;;  %v23324_v54 = vld [vmem:[#allocation126_spill] sm:$0xff]  ;;  %v23326_v14 = vld [vmem:[#allocation85_spill] sm:$0xff] }
 0x497   : > { %23318 = vst [vmem:[#allocation20_spill] sm:$0xff] %v21435_v8  ;;  %v21440_v55 = vpop.f32.mrf.mxu0  ;;  %17056 = vmatmul.mubr.msk.f32.gmra.mxu0 %vm6301_vm2, %v11824_v30  ;;  %v7308_v15 = vadd.f32 %v23324_v54, %v23323_v50  ;;  %v21449_v27 = vadd.f32 %v16539_v61, %v7892_v42  ;;  %16836 = vmatprep.mubr.msk.f32.mxu1 %vm6301_vm2, %v21445_v45  ;;  %v23328_v17 = vld [vmem:[#allocation86_spill] sm:$0xff]  ;;  %v23329_v30 = vld [vmem:[#allocation128_spill] sm:$0xff]  ;;  %v21462_v50 = vld [vmem:[#allocation3 + $0x150] sm:$0xff] }
 0x498   : > { %23321 = vst [vmem:[#allocation124_spill] sm:$0xff] %v21440_v55  ;;  %17058 = vmatprep.mubr.msk.f32.mxu0 %vm6301_vm2, %v11825_v16  ;;  %v7891_v36 = vadd.f32 %v23326_v14, %v7298_v51  ;;  %v8343_v32 = vpop.f32.mrf.mxu1  ;;  %v7323_v8 = vadd.f32 %v23329_v30, %v23328_v17  ;;  %v23331_v34 = vld [vmem:[#allocation90_spill] sm:$0xff]  ;;  %23332 = vst [vmem:[#allocation86_spill] sm:$0xff] %v21462_v50  ;;  %v11826_v42 = vld [vmem:[#allocation3 + $0x169] sm:$0xff] }
 0x499   : > { %23325 = vst [vmem:[#allocation91_spill] sm:$0xff] %v21449_v27  ;;  %v21455_v55 = vpop.f32.mrf.mxu0  ;;  %v7894_v35 = vadd.f32 %v23331_v34, %v7313_v11  ;;  %v21469_v51 = vld [vmem:[#allocation3 + $0x158] sm:$0xff]  ;;  %v23335_v14 = vld [vmem:[#allocation93_spill] sm:$0xff]  ;;  %v23338_v11 = vld [vmem:[#allocation60_spill] sm:$0xff] }
 0x49a   : > { %23327 = vst [vmem:[#allocation126_spill] sm:$0xff] %v21455_v55  ;;  %v21459_v12 = vadd.f32 %v8343_v32, %v7891_v36  ;;  %v16542_v61 = vpop.f32.mrf.mxu1  ;;  %16837 = vmatmul.mubr.msk.f32.gmra.mxu1 %vm6301_vm2, %v21462_v50  ;;  %23334 = vst [vmem:[#allocation90_spill] sm:$0xff] %v21469_v51  ;;  %v11827_v16 = vld [vmem:[#allocation3 + $0x171] sm:$0xff]  ;;  %v7893_v34 = vadd.f32 %v23338_v11, %v7308_v15  ;;  %v23340_v55 = vld [vmem:[#allocation23_spill] sm:$0xff] }
 0x49b   : > { %v21464_v54 = vpop.f32.mrf.mxu0  ;;  %17059 = vmatmul.mubr.msk.f32.gmra.mxu0 %vm6301_vm2, %v11826_v42  ;;  %v23336_v17 = vld [vmem:[#allocation130_spill] sm:$0xff]  ;;  %v21473_v32 = vadd.f32 %v16542_v61, %v7894_v35  ;;  %16839 = vmatprep.mubr.msk.f32.mxu1 %vm6301_vm2, %v21469_v51  ;;  %v23341_v42 = vld [vmem:[#allocation132_spill] sm:$0xff] }
 0x49c   : > { %23330 = vst [vmem:[#allocation85_spill] sm:$0xff] %v21459_v12  ;;  %23333 = vst [vmem:[#allocation128_spill] sm:$0xff] %v21464_v54  ;;  %v7318_v36 = vadd.f32 %v23336_v17, %v23335_v14  ;;  %17061 = vmatprep.mubr.msk.f32.mxu0 %vm6301_vm2, %v11827_v16  ;;  %v8353_v30 = vpop.f32.mrf.mxu1  ;;  %v7333_v12 = vadd.f32 %v23341_v42, %v23340_v55  ;;  %v23343_v50 = vld [vmem:[#allocation92_spill] sm:$0xff]  ;;  %v21486_v14 = vld [vmem:[#allocation3 + $0x160] sm:$0xff] }
 0x49d   : > { %23337 = vst [vmem:[#allocation93_spill] sm:$0xff] %v21473_v32  ;;  %v21479_v54 = vpop.f32.mrf.mxu0  ;;  %v21483_v27 = vadd.f32 %v8353_v30, %v7893_v34  ;;  %v7896_v45 = vadd.f32 %v23343_v50, %v7323_v8  ;;  %23344 = vst [vmem:[#allocation23_spill] sm:$0xff] %v21486_v14  ;;  %v11828_v35 = vld [vmem:[#allocation3 + $0x179] sm:$0xff]  ;;  %v21493_v15 = vld [vmem:[#allocation3 + $0x168] sm:$0xff] }
 0x49e   : > { %23339 = vst [vmem:[#allocation130_spill] sm:$0xff] %v21479_v54  ;;  %v16545_v61 = vpop.f32.mrf.mxu1  ;;  %16840 = vmatmul.mubr.msk.f32.gmra.mxu1 %vm6301_vm2, %v21486_v14  ;;  %23346 = vst [vmem:[#allocation92_spill] sm:$0xff] %v21493_v15  ;;  %v11829_v16 = vld [vmem:[#allocation3 + $0x181] sm:$0xff]  ;;  %v23347_v11 = vld [vmem:[#allocation94_spill] sm:$0xff] }
 0x49f   : > { %23342 = vst [vmem:[#allocation60_spill] sm:$0xff] %v21483_v27  ;;  %v21488_v17 = vpop.f32.mrf.mxu0  ;;  %17062 = vmatmul.mubr.msk.f32.gmra.mxu0 %vm6301_vm2, %v11828_v35  ;;  %v23348_v55 = vld [vmem:[#allocation134_spill] sm:$0xff]  ;;  %v21497_v30 = vadd.f32 %v16545_v61, %v7896_v45  ;;  %16842 = vmatprep.mubr.msk.f32.mxu1 %vm6301_vm2, %v21493_v15  ;;  %v23350_v8 = vld [vmem:[#allocation63_spill] sm:$0xff]  ;;  %v23353_v35 = vld [vmem:[#allocation136_spill] sm:$0xff] }
 0x4a0   : > { %23345 = vst [vmem:[#allocation132_spill] sm:$0xff] %v21488_v17  ;;  %v7328_v34 = vadd.f32 %v23348_v55, %v23347_v11  ;;  %17064 = vmatprep.mubr.msk.f32.mxu0 %vm6301_vm2, %v11829_v16  ;;  %v7895_v50 = vadd.f32 %v23350_v8, %v7318_v36  ;;  %v8363_v42 = vpop.f32.mrf.mxu1  ;;  %v23352_v54 = vld [vmem:[#allocation27_spill] sm:$0xff]  ;;  %v23355_v14 = vld [vmem:[#allocation72_spill] sm:$0xff]  ;;  %v21510_v11 = vld [vmem:[#allocation3 + $0x170] sm:$0xff] }
 0x4a1   : > { %23349 = vst [vmem:[#allocation94_spill] sm:$0xff] %v21497_v30  ;;  %v21503_v17 = vpop.f32.mrf.mxu0  ;;  %v7343_v27 = vadd.f32 %v23353_v35, %v23352_v54  ;;  %v7898_v51 = vadd.f32 %v23355_v14, %v7333_v12  ;;  %23356 = vst [vmem:[#allocation27_spill] sm:$0xff] %v21510_v11  ;;  %v11830_v45 = vld [vmem:[#allocation3 + $0x189] sm:$0xff]  ;;  %v21517_v36 = vld [vmem:[#allocation3 + $0x178] sm:$0xff] }
 0x4a2   : > { %23351 = vst [vmem:[#allocation134_spill] sm:$0xff] %v21503_v17  ;;  %v21507_v32 = vadd.f32 %v8363_v42, %v7895_v50  ;;  %v16548_v61 = vpop.f32.mrf.mxu1  ;;  %16843 = vmatmul.mubr.msk.f32.gmra.mxu1 %vm6301_vm2, %v21510_v11  ;;  %v11831_v16 = vld [vmem:[#allocation3 + $0x191] sm:$0xff]  ;;  %v23358_v8 = vld [vmem:[#allocation95_spill] sm:$0xff]  ;;  %v23364_v30 = vld [vmem:[#allocation140_spill] sm:$0xff] }
 0x4a3   : > { %v21512_v55 = vpop.f32.mrf.mxu0  ;;  %17065 = vmatmul.mubr.msk.f32.gmra.mxu0 %vm6301_vm2, %v11830_v45  ;;  %v23359_v54 = vld [vmem:[#allocation138_spill] sm:$0xff]  ;;  %v21521_v42 = vadd.f32 %v16548_v61, %v7898_v51  ;;  %16845 = vmatprep.mubr.msk.f32.mxu1 %vm6301_vm2, %v21517_v36  ;;  %v11833_v45 = vld [vmem:[#allocation3 + $0x1a1] sm:$0xff] }
 0x4a4   : > { %23354 = vst [vmem:[#allocation63_spill] sm:$0xff] %v21507_v32  ;;  %23357 = vst [vmem:[#allocation136_spill] sm:$0xff] %v21512_v55  ;;  %v7338_v50 = vadd.f32 %v23359_v54, %v23358_v8  ;;  %17067 = vmatprep.mubr.msk.f32.mxu0 %vm6301_vm2, %v11831_v16  ;;  %v23361_v12 = vld [vmem:[#allocation66_spill] sm:$0xff]  ;;  %v8373_v55 = vpop.f32.mrf.mxu1  ;;  %v23363_v32 = vld [vmem:[#allocation31_spill] sm:$0xff] }
 0x4a5   : > { %23360 = vst [vmem:[#allocation72_spill] sm:$0xff] %v21521_v42  ;;  %v7897_v14 = vadd.f32 %v23361_v12, %v7328_v34  ;;  %v11832_v35 = vld [vmem:[#allocation3 + $0x199] sm:$0xff]  ;;  %v21527_v17 = vpop.f32.mrf.mxu0  ;;  %v7353_v11 = vadd.f32 %v23364_v30, %v23363_v32  ;;  %v23366_v8 = vld [vmem:[#allocation73_spill] sm:$0xff]  ;;  %v21540_v34 = vld [vmem:[#allocation3 + $0x188] sm:$0xff] }
 0x4a6   : > { %23362 = vst [vmem:[#allocation95_spill] sm:$0xff] %v21527_v17  ;;  %v7900_v51 = vadd.f32 %v23366_v8, %v7343_v27  ;;  %v21534_v61 = vld [vmem:[#allocation3 + $0x180] sm:$0xff]  ;;  %v16551_v54 = vpop.f32.mrf.mxu1  ;;  %v23368_v16 = vld [vmem:[#allocation96_spill] sm:$0xff] }
 0x4a7   : > { %v21531_v15 = vadd.f32 %v8373_v55, %v7897_v14  ;;  %v21536_v42 = vpop.f32.mrf.mxu0  ;;  %16846 = vmatmul.mubr.msk.f32.gmra.mxu1 %vm6301_vm2, %v21534_v61  ;;  %17068 = vmatmul.mubr.msk.f32.gmra.mxu0 %vm6301_vm2, %v11832_v35  ;;  %v7348_v12 = vadd.f32 %v20998_v18, %v23368_v16  ;;  %v23369_v27 = vld [vmem:[#allocation67_spill] sm:$0xff]  ;;  %v11834_v55 = vld [vmem:[#allocation3 + $0x1a9] sm:$0xff] }
 0x4a8   : > { %23367 = vst [vmem:[#allocation66_spill] sm:$0xff] %v21536_v42  ;;  %v21545_v32 = vadd.f32 %v16551_v54, %v7900_v51  ;;  %16848 = vmatprep.mubr.msk.f32.mxu1 %vm6301_vm2, %v21540_v34  ;;  %v7899_v30 = vadd.f32 %v23369_v27, %v7338_v50  ;;  %17070 = vmatprep.mubr.msk.f32.mxu0 %vm6301_vm2, %v11833_v45  ;;  %v8383_v14 = vpop.f32.mrf.mxu1  ;;  %v23371_v35 = vld [vmem:[#allocation75_spill] sm:$0xff]  ;;  %v23373_v45 = vld [vmem:[#allocation78_spill] sm:$0xff] }
 0x4a9   : > { %23365 = vst [vmem:[#allocation138_spill] sm:$0xff] %v21531_v15  ;;  %v21551_v8 = vpop.f32.mrf.mxu0  ;;  %v7902_v17 = vadd.f32 %v23371_v35, %v7353_v11  ;;  %v21556_v15 = vld [vmem:[#allocation3 + $0x190] sm:$0xff]  ;;  %v7901_v54 = vadd.f32 %v23373_v45, %v7348_v12 }
 0x4aa   : > { %23370 = vst [vmem:[#allocation31_spill] sm:$0xff] %v21551_v8  ;;  %v21553_v42 = vadd.f32 %v8383_v14, %v7899_v30  ;;  %v16554_v18 = vpop.f32.mrf.mxu1  ;;  %v23375_v30 = vld [vmem:[#allocation68_spill] sm:$0xff] }
 0x4ab   : > { %v21558_v51 = vpop.f32.mrf.mxu0  ;;  %16849 = vmatmul.mubr.msk.f32.gmra.mxu1 %vm6301_vm2, %v21556_v15  ;;  %17071 = vmatmul.mubr.msk.f32.gmra.mxu0 %vm6301_vm2, %v11834_v55  ;;  %v21563_v50 = vadd.f32 %v16554_v18, %v7902_v17  ;;  %v8950_v14 = vadd.f32 %v23375_v30, %v21016_v7  ;;  %v21578_v17 = vld [vmem:[%s22626_s4] ss:$0 sm:$0xff]  ;;  %v23376_v7 = vld [vmem:[#allocation35_spill] sm:$0xff] }
 0x4ac   : > { %23372 = vst [vmem:[#allocation140_spill] sm:$0xff] %v21558_v51  ;;  %16927 = vmatprep.mubr.msk.f32.mxu1 %vm6301_vm2, %v21030_v63  ;;  %v8393_v16 = vpop.f32.mrf.mxu1  ;;  %v8949_v12 = vadd.f32 %v23376_v7, %v21027_v56 }
 0x4ad   : > { %v21568_v27 = vpop.f32.mrf.mxu0  ;;  %v21570_v11 = vadd.f32 %v8393_v16, %v7901_v54  ;;  %v23377_v16 = vld [vmem:[#allocation28_spill] sm:$0xff] }
 0x4ae   : > { %23374 = vst [vmem:[#allocation73_spill] sm:$0xff] %v21568_v27  ;;  %v16633_v35 = vpop.f32.mrf.mxu1  ;;  %v8952_v30 = vadd.f32 %v23377_v16, %v21041_v22  ;;  %v23378_v22 = vld [vmem:[#allocation4_spill] sm:$0xff]  ;;  %v23379_v16 = vld [vmem:[#allocation82_spill] sm:$0xff] }
 0x4af   : > { %v21580_v55 = vpop.f32.mrf.mxu0  ;;  %16928 = vmatmul.mubr.msk.f32.vlgmr.msra.gmra.mxu1 %vm6301_vm2, %v21037_v26  ;;  %v9497_v63 = vadd.f32 %v16633_v35, %v8950_v14  ;;  %v8951_v35 = vadd.f32 %v23378_v22, %v21051_v0  ;;  %v12357_v27 = vld [vmem:[#allocation3 + $0xea] sm:$0xff] }
 0x4b0   : > { %17074 = vmatpush3.msra.mxu1 %v21008_v3  ;;  %16930 = vmatprep.mubr.msk.f32.mxu1 %vm6301_vm2, %v21054_v43  ;;  %v9257_v18 = vpop.f32.mrf.mxu1 }
 0x4b1   : > { %v9552_v45 = vadd.f32 %v21578_v17, %v9497_v63  ;;  %v9496_v54 = vadd.f32 %v9257_v18, %v8949_v12  ;;  %v21597_v3 = vpop.f32.mrf.mxu0 }
 0x4b2   : > { %v16636_v26 = vpop.f32.mrf.mxu1 }
 0x4b3   : > { %16931 = vmatmul.mubr.msk.f32.gmra.mxu1 %vm6301_vm2, %v21061_v58  ;;  %v9600_v56 = vmax.f32 %v9552_v45, 0.0  ;;  %v9551_v43 = vadd.f32 %v21578_v17, %v9496_v54  ;;  %v9499_v14 = vadd.f32 %v16636_v26, %v8952_v30  ;;  %v8954_v58 = vadd.f32 %v23379_v16, %v21065_v9  ;;  %v21610_v45 = vpop.f32.mrf.mxu0  ;;  %v23380_v26 = vld [vmem:[#allocation97_spill] sm:$0xff] }
 0x4b4   : > { %16933 = vmatprep.mubr.msk.f32.mxu1 %vm6301_vm2, %v21078_v47  ;;  %v9267_v63 = vpop.f32.mrf.mxu1 }
 0x4b5   : > { %9648 = vst [vmem:[%s21595_s11 + $0x8] sm:$0xff] %v9600_v56  ;;  %v9599_v7 = vmax.f32 %v9551_v43, 0.0  ;;  %v9554_v12 = vadd.f32 %v21578_v17, %v9499_v14  ;;  %v9498_v18 = vadd.f32 %v9267_v63, %v8951_v35  ;;  %v8953_v56 = vadd.f32 %v23380_v26, %v21075_v44  ;;  %v21624_v63 = vpop.f32.mrf.mxu0 }
 0x4b6   : > { %v16639_v54 = vpop.f32.mrf.mxu1 }
 0x4b7   : > { %16934 = vmatmul.mubr.msk.f32.gmra.mxu1 %vm6301_vm2, %v21085_v57  ;;  %9647 = vst [vmem:[%s21595_s11] sm:$0xff] %v9599_v7  ;;  %v9602_v47 = vmax.f32 %v9554_v12, 0.0  ;;  %v9553_v0 = vadd.f32 %v21578_v17, %v9498_v18  ;;  %v9501_v30 = vadd.f32 %v16639_v54, %v8954_v58  ;;  %v23381_v57 = vld [vmem:[#allocation36_spill] sm:$0xff]  ;;  %v23382_v18 = vld [vmem:[#allocation38_spill] sm:$0xff] }
 0x4b8   : > { %16936 = vmatprep.mubr.msk.f32.mxu1 %vm6301_vm2, %v21102_v24  ;;  %v9277_v43 = vpop.f32.mrf.mxu1  ;;  %v8956_v35 = vadd.f32 %v23381_v57, %v21089_v49  ;;  %v8955_v16 = vadd.f32 %v23382_v18, %v21099_v25 }
 0x4b9   : > { %9650 = vst [vmem:[%s21595_s11 + $0x30] sm:$0xff] %v9602_v47  ;;  %v9601_v9 = vmax.f32 %v9553_v0, 0.0  ;;  %v9556_v14 = vadd.f32 %v21578_v17, %v9501_v30  ;;  %v9500_v22 = vadd.f32 %v9277_v43, %v8953_v56  ;;  %v21638_v30 = vpop.f32.mrf.mxu0  ;;  %v23384_v43 = vld [vmem:[#allocation6_spill] sm:$0xff] }
 0x4ba   : > { %v16642_v7 = vpop.f32.mrf.mxu1 }
 0x4bb   : > { %16937 = vmatmul.mubr.msk.f32.gmra.mxu1 %vm6301_vm2, %v21109_v28  ;;  %9649 = vst [vmem:[%s21595_s11 + $0x10] sm:$0xff] %v9601_v9  ;;  %v9604_v24 = vmax.f32 %v9556_v14, 0.0  ;;  %v9555_v44 = vadd.f32 %v21578_v17, %v9500_v22  ;;  %v9503_v12 = vadd.f32 %v16642_v7, %v8956_v35  ;;  %v23383_v28 = vld [vmem:[#allocation80_spill] sm:$0xff]  ;;  %v8957_v9 = vadd.f32 %v23384_v43, %v21123_v37  ;;  %v21652_v7 = vpop.f32.mrf.mxu0 }
 0x4bc   : > { %16939 = vmatprep.mubr.msk.f32.mxu1 %vm6301_vm2, %v21126_v23  ;;  %v9287_v58 = vpop.f32.mrf.mxu1  ;;  %v8958_v0 = vadd.f32 %v23383_v28, %v21113_v31 }
 0x4bd   : > { %9652 = vst [vmem:[%s21595_s11 + $0x40] sm:$0xff] %v9604_v24  ;;  %v9603_v49 = vmax.f32 %v9555_v44, 0.0  ;;  %v9558_v54 = vadd.f32 %v21578_v17, %v9503_v12  ;;  %v9502_v47 = vadd.f32 %v9287_v58, %v8955_v16  ;;  %v23386_v12 = vld [vmem:[#allocation71_spill] sm:$0xff] }
 0x4be   : > { %v16645_v26 = vpop.f32.mrf.mxu1  ;;  %v8959_v18 = vadd.f32 %v23386_v12, %v21147_v62 }
 0x4bf   : > { %16940 = vmatmul.mubr.msk.f32.gmra.mxu1 %vm6301_vm2, %v21133_v41  ;;  %9651 = vst [vmem:[%s21595_s11 + $0x38] sm:$0xff] %v9603_v49  ;;  %v9606_v23 = vmax.f32 %v9558_v54, 0.0  ;;  %v9557_v25 = vadd.f32 %v21578_v17, %v9502_v47  ;;  %v9505_v56 = vadd.f32 %v16645_v26, %v8958_v0  ;;  %v23385_v41 = vld [vmem:[#allocation98_spill] sm:$0xff]  ;;  %v21666_v47 = vpop.f32.mrf.mxu0  ;;  %v23388_v26 = vld [vmem:[#allocation8_spill] sm:$0xff] }
 0x4c0   : > { %16942 = vmatprep.mubr.msk.f32.mxu1 %vm6301_vm2, %v21150_v53  ;;  %v9297_v14 = vpop.f32.mrf.mxu1  ;;  %v8960_v35 = vadd.f32 %v23385_v41, %v21137_v29 }
 0x4c1   : > { %9654 = vst [vmem:[%s21595_s11 + $0x68] sm:$0xff] %v9606_v23  ;;  %v9605_v31 = vmax.f32 %v9557_v25, 0.0  ;;  %v9560_v22 = vadd.f32 %v21578_v17, %v9505_v56  ;;  %v9504_v57 = vadd.f32 %v9297_v14, %v8957_v9  ;;  %v8961_v23 = vadd.f32 %v23388_v26, %v21171_v59  ;;  %v21680_v14 = vpop.f32.mrf.mxu0 }
 0x4c2   : > { %v16648_v24 = vpop.f32.mrf.mxu1 }
 0x4c3   : > { %16943 = vmatmul.mubr.msk.f32.gmra.mxu1 %vm6301_vm2, %v21157_v38  ;;  %9653 = vst [vmem:[%s21595_s11 + $0x60] sm:$0xff] %v9605_v31  ;;  %v9608_v53 = vmax.f32 %v9560_v22, 0.0  ;;  %v9559_v37 = vadd.f32 %v21578_v17, %v9504_v57  ;;  %v9507_v44 = vadd.f32 %v16648_v24, %v8960_v35  ;;  %v23387_v38 = vld [vmem:[#allocation41_spill] sm:$0xff]  ;;  %v23390_v57 = vld [vmem:[#allocation84_spill] sm:$0xff] }
 0x4c4   : > { %16945 = vmatprep.mubr.msk.f32.mxu1 %vm6301_vm2, %v21174_v19  ;;  %v9307_v16 = vpop.f32.mrf.mxu1  ;;  %v8962_v54 = vadd.f32 %v23387_v38, %v21161_v6  ;;  %v8963_v41 = vadd.f32 %v23390_v57, %v21195_v21 }
 0x4c5   : > { %9656 = vst [vmem:[%s21595_s11 + $0x90] sm:$0xff] %v9608_v53  ;;  %v9607_v29 = vmax.f32 %v9559_v37, 0.0  ;;  %v9562_v58 = vadd.f32 %v21578_v17, %v9507_v44  ;;  %v9506_v49 = vadd.f32 %v9307_v16, %v8959_v18  ;;  %v21694_v44 = vpop.f32.mrf.mxu0  ;;  %v23392_v16 = vld [vmem:[#allocation18_spill] sm:$0xff] }
 0x4c6   : > { %v16651_v28 = vpop.f32.mrf.mxu1 }
 0x4c7   : > { %16946 = vmatmul.mubr.msk.f32.gmra.mxu1 %vm6301_vm2, %v21181_v10  ;;  %9655 = vst [vmem:[%s21595_s11 + $0x70] sm:$0xff] %v9607_v29  ;;  %v9610_v19 = vmax.f32 %v9562_v58, 0.0  ;;  %v9561_v62 = vadd.f32 %v21578_v17, %v9506_v49  ;;  %v9509_v0 = vadd.f32 %v16651_v28, %v8962_v54  ;;  %v23389_v10 = vld [vmem:[#allocation99_spill] sm:$0xff]  ;;  %v8965_v29 = vadd.f32 %v23392_v16, %v21219_v2  ;;  %v21708_v28 = vpop.f32.mrf.mxu0 }
 0x4c8   : > { %16948 = vmatprep.mubr.msk.f32.mxu1 %vm6301_vm2, %v21198_v5  ;;  %v9317_v25 = vpop.f32.mrf.mxu1  ;;  %v8964_v9 = vadd.f32 %v23389_v10, %v21185_v46 }
 0x4c9   : > { %9658 = vst [vmem:[%s21595_s11 + $0xa0] sm:$0xff] %v9610_v19  ;;  %v9609_v6 = vmax.f32 %v9561_v62, 0.0  ;;  %v9564_v56 = vadd.f32 %v21578_v17, %v9509_v0  ;;  %v9508_v43 = vadd.f32 %v9317_v25, %v8961_v23  ;;  %v23394_v0 = vld [vmem:[#allocation21_spill] sm:$0xff] }
 0x4ca   : > { %v16654_v31 = vpop.f32.mrf.mxu1  ;;  %v8967_v26 = vadd.f32 %v23394_v0, %v21243_v4 }
 0x4cb   : > { %16949 = vmatmul.mubr.msk.f32.gmra.mxu1 %vm6301_vm2, %v21205_v60  ;;  %9657 = vst [vmem:[%s21595_s11 + $0x98] sm:$0xff] %v9609_v6  ;;  %v9612_v5 = vmax.f32 %v9564_v56, 0.0  ;;  %v9563_v59 = vadd.f32 %v21578_v17, %v9508_v43  ;;  %v9511_v22 = vadd.f32 %v16654_v31, %v8964_v9  ;;  %v23391_v60 = vld [vmem:[#allocation76_spill] sm:$0xff]  ;;  %v21722_v43 = vpop.f32.mrf.mxu0  ;;  %v23396_v9 = vld [vmem:[#allocation145_spill] sm:$0xff] }
 0x4cc   : > { %16951 = vmatprep.mubr.msk.f32.mxu1 %vm6301_vm2, %v21222_v33  ;;  %v9327_v35 = vpop.f32.mrf.mxu1  ;;  %v8966_v37 = vadd.f32 %v23391_v60, %v21209_v48 }
 0x4cd   : > { %9660 = vst [vmem:[%s21595_s11 + $0xc8] sm:$0xff] %v9612_v5  ;;  %v9611_v46 = vmax.f32 %v9563_v59, 0.0  ;;  %v9566_v24 = vadd.f32 %v21578_v17, %v9511_v22  ;;  %v9510_v53 = vadd.f32 %v9327_v35, %v8963_v41  ;;  %v23397_v5 = vld [vmem:[#allocation100_spill] sm:$0xff]  ;;  %v23398_v59 = vld [vmem:[#allocation143_spill] sm:$0xff]  ;;  %v23399_v22 = vld [vmem:[#allocation25_spill] sm:$0xff] }
 0x4ce   : > { %v16657_v12 = vpop.f32.mrf.mxu1  ;;  %v8969_v57 = vadd.f32 %v23399_v22, %v23398_v59  ;;  %v23412_v59 = vld [vmem:[#allocation88_spill] sm:$0xff]  ;;  %v23413_v22 = vld [vmem:[#allocation101_spill] sm:$0xff] }
 0x4cf   : > { %16952 = vmatmul.mubr.msk.f32.gmra.mxu1 %vm6301_vm2, %v21229_v39  ;;  %9659 = vst [vmem:[%s21595_s11 + $0xc0] sm:$0xff] %v9611_v46  ;;  %v9614_v33 = vmax.f32 %v9566_v24, 0.0  ;;  %v9565_v21 = vadd.f32 %v21578_v17, %v9510_v53  ;;  %v9513_v18 = vadd.f32 %v16657_v12, %v8966_v37  ;;  %v23393_v39 = vld [vmem:[#allocation33_spill] sm:$0xff]  ;;  %v23401_v53 = vld [vmem:[#allocation7_spill] sm:$0xff]  ;;  %v21736_v37 = vpop.f32.mrf.mxu0 }
 0x4d0   : > { %16954 = vmatprep.mubr.msk.f32.mxu1 %vm6301_vm2, %v21246_v20  ;;  %v9337_v58 = vpop.f32.mrf.mxu1  ;;  %v8968_v54 = vadd.f32 %v23393_v39, %v21233_v13  ;;  %v23400_v24 = vld [vmem:[#allocation37_spill] sm:$0xff] }
 0x4d1   : > { %9662 = vst [vmem:[%s21595_s11 + $0xf0] sm:$0xff] %v9614_v33  ;;  %v9613_v48 = vmax.f32 %v9565_v21, 0.0  ;;  %v9568_v49 = vadd.f32 %v21578_v17, %v9513_v18  ;;  %v9512_v38 = vadd.f32 %v9337_v58, %v8965_v29  ;;  %v8972_v60 = vadd.f32 %v23401_v53, %v23400_v24  ;;  %v23402_v33 = vld [vmem:[#allocation146_spill] sm:$0xff]  ;;  %v23403_v29 = vld [vmem:[#allocation13_spill] sm:$0xff]  ;;  %v23404_v58 = vld [vmem:[#allocation64_spill] sm:$0xff]  ;;  %v21750_v0 = vpop.f32.mrf.mxu0 }
 0x4d2   : > { %v16660_v19 = vpop.f32.mrf.mxu1 }
 0x4d3   : > { %16955 = vmatmul.mubr.msk.f32.gmra.mxu1 %vm6301_vm2, %v21253_v1  ;;  %9661 = vst [vmem:[%s21595_s11 + $0xd0] sm:$0xff] %v9613_v48  ;;  %v9616_v20 = vmax.f32 %v9568_v49, 0.0  ;;  %v9567_v2 = vadd.f32 %v21578_v17, %v9512_v38  ;;  %v9515_v62 = vadd.f32 %v16660_v19, %v8968_v54  ;;  %v23395_v1 = vld [vmem:[#allocation5_spill] sm:$0xff]  ;;  %v23405_v48 = vld [vmem:[#allocation74_spill] sm:$0xff] }
 0x4d4   : > { %16957 = vmatprep.mubr.msk.f32.mxu1 %vm6301_vm2, %v21270_v52  ;;  %v9347_v23 = vpop.f32.mrf.mxu1  ;;  %v8970_v56 = vadd.f32 %v23395_v1, %v21257_v40  ;;  %v8971_v49 = vadd.f32 %v23405_v48, %v23404_v58  ;;  %v23409_v1 = vld [vmem:[#allocation79_spill] sm:$0xff]  ;;  %v23418_v48 = vld [vmem:[#allocation89_spill] sm:$0xff] }
 0x4d5   : > { %9664 = vst [vmem:[%s21595_s11 + $0x100] sm:$0xff] %v9616_v20  ;;  %v9615_v13 = vmax.f32 %v9567_v2, 0.0  ;;  %v9570_v25 = vadd.f32 %v21578_v17, %v9515_v62  ;;  %v9514_v6 = vadd.f32 %v9347_v23, %v8967_v26  ;;  %v23406_v20 = vld [vmem:[#allocation50_spill] sm:$0xff]  ;;  %v23407_v2 = vld [vmem:[#allocation29_spill] sm:$0xff] }
 0x4d6   : > { %v16663_v10 = vpop.f32.mrf.mxu1  ;;  %v8974_v62 = vadd.f32 %v23407_v2, %v23406_v20  ;;  %v23408_v23 = vld [vmem:[#allocation65_spill] sm:$0xff] }
 0x4d7   : > { %16958 = vmatmul.mubr.msk.f32.gmra.mxu1 %vm6301_vm2, %v23396_v9  ;;  %9663 = vst [vmem:[%s21595_s11 + $0xf8] sm:$0xff] %v9615_v13  ;;  %v9618_v52 = vmax.f32 %v9570_v25, 0.0  ;;  %v9569_v4 = vadd.f32 %v21578_v17, %v9514_v6  ;;  %v9517_v31 = vadd.f32 %v16663_v10, %v8970_v56  ;;  %v23410_v56 = vld [vmem:[#allocation11_spill] sm:$0xff]  ;;  %v23411_v10 = vld [vmem:[#allocation40_spill] sm:$0xff] }
 0x4d8   : > { %16960 = vmatprep.mubr.msk.f32.mxu1 %vm6301_vm2, %v23397_v5  ;;  %v9357_v41 = vpop.f32.mrf.mxu1  ;;  %v8973_v9 = vadd.f32 %v23411_v10, %v23410_v56 }
 0x4d9   : > { %9666 = vst [vmem:[%s21595_s11 + $0x128] sm:$0xff] %v9618_v52  ;;  %v9617_v40 = vmax.f32 %v9569_v4, 0.0  ;;  %v9572_v35 = vadd.f32 %v21578_v17, %v9517_v31  ;;  %v9516_v46 = vadd.f32 %v9357_v41, %v8969_v57  ;;  %v8976_v57 = vadd.f32 %v23413_v22, %v23412_v59  ;;  %v21764_v41 = vpop.f32.mrf.mxu0  ;;  %v23426_v59 = vld [vmem:[#allocation81_spill] sm:$0xff] }
 0x4da   : > { %v16666_v12 = vpop.f32.mrf.mxu1 }
 0x4db   : > { %16961 = vmatmul.mubr.msk.f32.gmra.mxu1 %vm6301_vm2, %v23402_v33  ;;  %9665 = vst [vmem:[%s21595_s11 + $0x120] sm:$0xff] %v9617_v40  ;;  %v9620_v21 = vmax.f32 %v9572_v35, 0.0  ;;  %v9571_v18 = vadd.f32 %v21578_v17, %v9516_v46  ;;  %v9519_v16 = vadd.f32 %v16666_v12, %v8972_v60  ;;  %v23414_v35 = vld [vmem:[#allocation87_spill] sm:$0xff]  ;;  %v23415_v60 = vld [vmem:[#allocation54_spill] sm:$0xff] }
 0x4dc   : > { %16963 = vmatprep.mubr.msk.f32.mxu1 %vm6301_vm2, %v23403_v29  ;;  %v9367_v38 = vpop.f32.mrf.mxu1  ;;  %v23416_v12 = vld [vmem:[#allocation30_spill] sm:$0xff]  ;;  %v23417_v33 = vld [vmem:[#allocation103_spill] sm:$0xff] }
 0x4dd   : > { %9668 = vst [vmem:[%s21595_s11 + $0x150] sm:$0xff] %v9620_v21  ;;  %v9619_v39 = vmax.f32 %v9571_v18, 0.0  ;;  %v9574_v54 = vadd.f32 %v21578_v17, %v9519_v16  ;;  %v9518_v19 = vadd.f32 %v9367_v38, %v8971_v49  ;;  %v8975_v21 = vadd.f32 %v23417_v33, %v23416_v12  ;;  %v23419_v49 = vld [vmem:[#allocation105_spill] sm:$0xff] }
 0x4de   : > { %v16669_v26 = vpop.f32.mrf.mxu1  ;;  %v8978_v38 = vadd.f32 %v23419_v49, %v23418_v48  ;;  %v23432_v49 = vld [vmem:[#allocation56_spill] sm:$0xff] }
 0x4df   : > { %16964 = vmatmul.mubr.msk.f32.gmra.mxu1 %vm6301_vm2, %v23408_v23  ;;  %9667 = vst [vmem:[%s21595_s11 + $0x130] sm:$0xff] %v9619_v39  ;;  %v9622_v13 = vmax.f32 %v9574_v54, 0.0  ;;  %v9573_v25 = vadd.f32 %v21578_v17, %v9518_v19  ;;  %v9521_v6 = vadd.f32 %v16669_v26, %v8974_v62  ;;  %v21778_v39 = vpop.f32.mrf.mxu0  ;;  %v23420_v19 = vld [vmem:[#allocation15_spill] sm:$0xff]  ;;  %v23421_v26 = vld [vmem:[#allocation69_spill] sm:$0xff]  ;;  %v23422_v23 = vld [vmem:[#allocation52_spill] sm:$0xff] }
 0x4e0   : > { %16966 = vmatprep.mubr.msk.f32.mxu1 %vm6301_vm2, %v23409_v1  ;;  %v9377_v52 = vpop.f32.mrf.mxu1 }
 0x4e1   : > { %9670 = vst [vmem:[%s21595_s11 + $0x160] sm:$0xff] %v9622_v13  ;;  %v9621_v4 = vmax.f32 %v9573_v25, 0.0  ;;  %v9576_v31 = vadd.f32 %v21578_v17, %v9521_v6  ;;  %v9520_v5 = vadd.f32 %v9377_v52, %v8973_v9  ;;  %v23423_v13 = vld [vmem:[#allocation107_spill] sm:$0xff]  ;;  %v23424_v9 = vld [vmem:[#allocation17_spill] sm:$0xff] }
 0x4e2   : > { %v16672_v40 = vpop.f32.mrf.mxu1  ;;  %v8977_v25 = vadd.f32 %v23423_v13, %v23422_v23  ;;  %v23425_v52 = vld [vmem:[#allocation109_spill] sm:$0xff] }
 0x4e3   : > { %16967 = vmatmul.mubr.msk.f32.gmra.mxu1 %vm6301_vm2, %v23414_v35  ;;  %9669 = vst [vmem:[%s21595_s11 + $0x158] sm:$0xff] %v9621_v4  ;;  %v9624_v46 = vmax.f32 %v9576_v31, 0.0  ;;  %v9575_v24 = vadd.f32 %v21578_v17, %v9520_v5  ;;  %v9523_v53 = vadd.f32 %v16672_v40, %v8976_v57  ;;  %v8980_v4 = vadd.f32 %v23425_v52, %v23424_v9  ;;  %v21792_v31 = vpop.f32.mrf.mxu0  ;;  %v23427_v35 = vld [vmem:[#allocation70_spill] sm:$0xff] }
 0x4e4   : > { %16969 = vmatprep.mubr.msk.f32.mxu1 %vm6301_vm2, %v23415_v60  ;;  %v9387_v18 = vpop.f32.mrf.mxu1 }
 0x4e5   : > { %9672 = vst [vmem:[%s21595_s11 + $0x188] sm:$0xff] %v9624_v46  ;;  %v9623_v16 = vmax.f32 %v9575_v24, 0.0  ;;  %v9578_v29 = vadd.f32 %v21578_v17, %v9523_v53  ;;  %v9522_v58 = vadd.f32 %v9387_v18, %v8975_v21  ;;  %v23428_v46 = vld [vmem:[#allocation32_spill] sm:$0xff]  ;;  %v23429_v24 = vld [vmem:[#allocation111_spill] sm:$0xff] }
 0x4e6   : > { %v16675_v54 = vpop.f32.mrf.mxu1  ;;  %v8979_v53 = vadd.f32 %v23429_v24, %v23428_v46  ;;  %v23430_v18 = vld [vmem:[#allocation83_spill] sm:$0xff] }
 0x4e7   : > { %16970 = vmatmul.mubr.msk.f32.gmra.mxu1 %vm6301_vm2, %v23420_v19  ;;  %9671 = vst [vmem:[%s21595_s11 + $0x180] sm:$0xff] %v9623_v16  ;;  %v9626_v20 = vmax.f32 %v9578_v29, 0.0  ;;  %v9577_v2 = vadd.f32 %v21578_v17, %v9522_v58  ;;  %v9525_v62 = vadd.f32 %v16675_v54, %v8978_v38  ;;  %v23431_v16 = vld [vmem:[#allocation113_spill] sm:$0xff]  ;;  %v21806_v58 = vpop.f32.mrf.mxu0 }
 0x4e8   : > { %16972 = vmatprep.mubr.msk.f32.mxu1 %vm6301_vm2, %v23421_v26  ;;  %v9397_v6 = vpop.f32.mrf.mxu1  ;;  %v8982_v29 = vadd.f32 %v23431_v16, %v23430_v18 }
 0x4e9   : > { %9674 = vst [vmem:[%s21595_s11 + $0x1b0] sm:$0xff] %v9626_v20  ;;  %v9625_v1 = vmax.f32 %v9577_v2, 0.0  ;;  %v9580_v56 = vadd.f32 %v21578_v17, %v9525_v62  ;;  %v9524_v10 = vadd.f32 %v9397_v6, %v8977_v25  ;;  %v23433_v20 = vld [vmem:[#allocation24_spill] sm:$0xff]  ;;  %v23434_v2 = vld [vmem:[#allocation34_spill] sm:$0xff]  ;;  %v23435_v62 = vld [vmem:[#allocation115_spill] sm:$0xff]  ;;  %v21820_v9 = vpop.f32.mrf.mxu0 }
 0x4ea   : > { %v16678_v5 = vpop.f32.mrf.mxu1  ;;  %v8981_v26 = vadd.f32 %v23435_v62, %v23434_v2  ;;  %v23447_v2 = vld [vmem:[#allocation123_spill] sm:$0xff] }
 0x4eb   : > { %16973 = vmatmul.mubr.msk.f32.gmra.mxu1 %vm6301_vm2, %v23426_v59  ;;  %9673 = vst [vmem:[%s21595_s11 + $0x190] sm:$0xff] %v9625_v1  ;;  %v9628_v22 = vmax.f32 %v9580_v56, 0.0  ;;  %v9579_v57 = vadd.f32 %v21578_v17, %v9524_v10  ;;  %v9527_v40 = vadd.f32 %v16678_v5, %v8980_v4  ;;  %v23436_v1 = vld [vmem:[#allocation58_spill] sm:$0xff]  ;;  %v23437_v56 = vld [vmem:[#allocation117_spill] sm:$0xff]  ;;  %v23438_v4 = vld [vmem:[#allocation39_spill] sm:$0xff]  ;;  %v21834_v16 = vpop.f32.mrf.mxu0 }
 0x4ec   : > { %16975 = vmatprep.mubr.msk.f32.mxu1 %vm6301_vm2, %v23427_v35  ;;  %v9407_v60 = vpop.f32.mrf.mxu1  ;;  %v8984_v10 = vadd.f32 %v23437_v56, %v23436_v1  ;;  %v23441_v35 = vld [vmem:[#allocation119_spill] sm:$0xff]  ;;  %v23449_v1 = vld [vmem:[#allocation125_spill] sm:$0xff] }
 0x4ed   : > { %9676 = vst [vmem:[%s21595_s11 + $0x1c0] sm:$0xff] %v9628_v22  ;;  %v9627_v12 = vmax.f32 %v9579_v57, 0.0  ;;  %v9582_v33 = vadd.f32 %v21578_v17, %v9527_v40  ;;  %v9526_v21 = vadd.f32 %v9407_v60, %v8979_v53  ;;  %v23439_v57 = vld [vmem:[#allocation86_spill] sm:$0xff]  ;;  %v23440_v40 = vld [vmem:[#allocation20_spill] sm:$0xff] }
 0x4ee   : > { %v16681_v48 = vpop.f32.mrf.mxu1  ;;  %v8983_v46 = vadd.f32 %v23441_v35, %v23440_v40  ;;  %v23452_v40 = vld [vmem:[#allocation60_spill] sm:$0xff]  ;;  %v23453_v35 = vld [vmem:[#allocation127_spill] sm:$0xff] }
 0x4ef   : > { %16976 = vmatmul.mubr.msk.f32.gmra.mxu1 %vm6301_vm2, %v23432_v49  ;;  %9675 = vst [vmem:[%s21595_s11 + $0x1b8] sm:$0xff] %v9627_v12  ;;  %v9630_v38 = vmax.f32 %v9582_v33, 0.0  ;;  %v9581_v54 = vadd.f32 %v21578_v17, %v9526_v21  ;;  %v9529_v19 = vadd.f32 %v16681_v48, %v8982_v29  ;;  %v23442_v33 = vld [vmem:[#allocation91_spill] sm:$0xff]  ;;  %v23443_v21 = vld [vmem:[#allocation121_spill] sm:$0xff]  ;;  %v23444_v48 = vld [vmem:[#allocation90_spill] sm:$0xff] }
 0x4f0   : > { %16978 = vmatprep.mubr.msk.f32.mxu1 %vm6301_vm2, %v23433_v20  ;;  %v9417_v23 = vpop.f32.mrf.mxu1  ;;  %v8986_v18 = vadd.f32 %v23443_v21, %v23442_v33  ;;  %v23446_v20 = vld [vmem:[#allocation85_spill] sm:$0xff]  ;;  %v23454_v33 = vld [vmem:[#allocation94_spill] sm:$0xff] }
 0x4f1   : > { %9678 = vst [vmem:[%s21595_s11 + $0x1e8] sm:$0xff] %v9630_v38  ;;  %v9629_v13 = vmax.f32 %v9581_v54, 0.0  ;;  %v9584_v25 = vadd.f32 %v21578_v17, %v9529_v19  ;;  %v9528_v6 = vadd.f32 %v9417_v23, %v8981_v26  ;;  %v23445_v19 = vld [vmem:[#allocation23_spill] sm:$0xff]  ;;  %v8985_v62 = vadd.f32 %v23447_v2, %v23446_v20  ;;  %v23455_v21 = vld [vmem:[#allocation129_spill] sm:$0xff] }
 0x4f2   : > { %v16684_v52 = vpop.f32.mrf.mxu1  ;;  %v23457_v20 = vld [vmem:[#allocation131_spill] sm:$0xff] }
 0x4f3   : > { %16979 = vmatmul.mubr.msk.f32.gmra.mxu1 %vm6301_vm2, %v23438_v4  ;;  %9677 = vst [vmem:[%s21595_s11 + $0x1e0] sm:$0xff] %v9629_v13  ;;  %v9632_v5 = vmax.f32 %v9584_v25, 0.0  ;;  %v9583_v59 = vadd.f32 %v21578_v17, %v9528_v6  ;;  %v9531_v22 = vadd.f32 %v16684_v52, %v8984_v10  ;;  %v23448_v6 = vld [vmem:[#allocation93_spill] sm:$0xff]  ;;  %v21848_v10 = vpop.f32.mrf.mxu0  ;;  %v23450_v4 = vld [vmem:[#allocation92_spill] sm:$0xff] }
 0x4f4   : > { %16981 = vmatprep.mubr.msk.f32.mxu1 %vm6301_vm2, %v23439_v57  ;;  %v9427_v24 = vpop.f32.mrf.mxu1  ;;  %v8988_v56 = vadd.f32 %v23449_v1, %v23448_v6  ;;  %v23451_v57 = vld [vmem:[#allocation27_spill] sm:$0xff] }
 0x4f5   : > { %9680 = vst [vmem:[%s21595_s11 + $0x210] sm:$0xff] %v9632_v5  ;;  %v9631_v53 = vmax.f32 %v9583_v59, 0.0  ;;  %v9586_v60 = vadd.f32 %v21578_v17, %v9531_v22  ;;  %v9530_v12 = vadd.f32 %v9427_v24, %v8983_v46  ;;  %v8987_v46 = vadd.f32 %v23453_v35, %v23452_v40  ;;  %v11286_v35 = vld [vmem:[#allocation3 + $0x1a0] sm:$0xff] }
 0x4f6   : > { %v16687_v29 = vpop.f32.mrf.mxu1 }
 0x4f7   : > { %16982 = vmatmul.mubr.msk.f32.gmra.mxu1 %vm6301_vm2, %v23444_v48  ;;  %9679 = vst [vmem:[%s21595_s11 + $0x1f0] sm:$0xff] %v9631_v53  ;;  %v9634_v49 = vmax.f32 %v9586_v60, 0.0  ;;  %v9585_v38 = vadd.f32 %v21578_v17, %v9530_v12  ;;  %v9533_v54 = vadd.f32 %v16687_v29, %v8986_v18  ;;  %v8990_v18 = vadd.f32 %v23455_v21, %v23454_v33  ;;  %v21862_v29 = vpop.f32.mrf.mxu0 }
 0x4f8   : > { %16984 = vmatprep.mubr.msk.f32.mxu1 %vm6301_vm2, %v23445_v19  ;;  %v9437_v26 = vpop.f32.mrf.mxu1  ;;  %v23456_v19 = vld [vmem:[#allocation63_spill] sm:$0xff] }
 0x4f9   : > { %9682 = vst [vmem:[%s21595_s11 + $0x220] sm:$0xff] %v9634_v49  ;;  %v9633_v23 = vmax.f32 %v9585_v38, 0.0  ;;  %v9588_v13 = vadd.f32 %v21578_v17, %v9533_v54  ;;  %v9532_v25 = vadd.f32 %v9437_v26, %v8985_v62  ;;  %v8989_v2 = vadd.f32 %v23457_v20, %v23456_v19  ;;  %v21876_v1 = vpop.f32.mrf.mxu0 }
 0x4fa   : > { %v16690_v52 = vpop.f32.mrf.mxu1 }
 0x4fb   : > { %16985 = vmatmul.mubr.msk.f32.gmra.mxu1 %vm6301_vm2, %v23450_v4  ;;  %9681 = vst [vmem:[%s21595_s11 + $0x218] sm:$0xff] %v9633_v23  ;;  %v9636_v5 = vmax.f32 %v9588_v13, 0.0  ;;  %v9587_v59 = vadd.f32 %v21578_v17, %v9532_v25  ;;  %v9535_v22 = vadd.f32 %v16690_v52, %v8988_v56  ;;  %v23459_v25 = vld [vmem:[#allocation133_spill] sm:$0xff] }
 0x4fc   : > { %16987 = vmatprep.mubr.msk.f32.mxu1 %vm6301_vm2, %v23451_v57  ;;  %v9447_v24 = vpop.f32.mrf.mxu1  ;;  %v11285_v57 = vld [vmem:[#allocation3 + $0x198] sm:$0xff] }
 0x4fd   : > { %9684 = vst [vmem:[%s21595_s11 + $0x248] sm:$0xff] %v9636_v5  ;;  %v9635_v53 = vmax.f32 %v9587_v59, 0.0  ;;  %v9590_v60 = vadd.f32 %v21578_v17, %v9535_v22  ;;  %v9534_v12 = vadd.f32 %v9447_v24, %v8987_v46  ;;  %v23460_v5 = vld [vmem:[#allocation138_spill] sm:$0xff]  ;;  %v23461_v59 = vld [vmem:[#allocation135_spill] sm:$0xff] }
 0x4fe   : > { %v16693_v48 = vpop.f32.mrf.mxu1  ;;  %v8991_v22 = vadd.f32 %v23461_v59, %v23460_v5  ;;  %v12335_v5 = vld [vmem:[#allocation3 + $0x3a] sm:$0xff] }
 0x4ff   : > { %16988 = vmatmul.mubr.msk.f32.gmra.mxu1 %vm6301_vm2, %v21517_v36  ;;  %9683 = vst [vmem:[%s21595_s11 + $0x240] sm:$0xff] %v9635_v53  ;;  %v9638_v49 = vmax.f32 %v9590_v60, 0.0  ;;  %v9589_v38 = vadd.f32 %v21578_v17, %v9534_v12  ;;  %v9537_v54 = vadd.f32 %v16693_v48, %v8990_v18  ;;  %v23458_v36 = vld [vmem:[#allocation72_spill] sm:$0xff]  ;;  %v23462_v53 = vld [vmem:[#allocation137_spill] sm:$0xff]  ;;  %v21890_v12 = vpop.f32.mrf.mxu0  ;;  %v23463_v48 = vld [vmem:[#allocation139_spill] sm:$0xff] }
 0x500   : > { %16990 = vmatprep.mubr.msk.f32.mxu1 %vm6301_vm2, %v21534_v61  ;;  %v9457_v62 = vpop.f32.mrf.mxu1  ;;  %v8992_v6 = vadd.f32 %v23459_v25, %v23458_v36  ;;  %v8994_v60 = vadd.f32 %v23462_v53, %v21545_v32 }
 0x501   : > { %9686 = vst [vmem:[%s21595_s11 + $0x270] sm:$0xff] %v9638_v49  ;;  %v9637_v26 = vmax.f32 %v9589_v38, 0.0  ;;  %v9592_v23 = vadd.f32 %v21578_v17, %v9537_v54  ;;  %v9536_v13 = vadd.f32 %v9457_v62, %v8989_v2  ;;  %v8993_v49 = vadd.f32 %v23463_v48, %v21553_v42  ;;  %v11287_v38 = vld [vmem:[#allocation3 + $0x1a8] sm:$0xff]  ;;  %v23464_v2 = vld [vmem:[#allocation141_spill] sm:$0xff] }
 0x502   : > { %v16696_v56 = vpop.f32.mrf.mxu1  ;;  %v8996_v62 = vadd.f32 %v23464_v2, %v21563_v50 }
 0x503   : > { %16991 = vmatmul.mubr.msk.f32.gmra.mxu1 %vm6301_vm2, %v21540_v34  ;;  %9685 = vst [vmem:[%s21595_s11 + $0x250] sm:$0xff] %v9637_v26  ;;  %v9640_v61 = vmax.f32 %v9592_v23, 0.0  ;;  %v9591_v52 = vadd.f32 %v21578_v17, %v9536_v13  ;;  %v9539_v4 = vadd.f32 %v16696_v56, %v8992_v6  ;;  %v21902_v26 = vpop.f32.mrf.mxu0  ;;  %v12334_v13 = vld [vmem:[#allocation3 + $0x32] sm:$0xff] }
 0x504   : > { %16993 = vmatprep.mubr.msk.f32.mxu1 %vm6301_vm2, %v21556_v15  ;;  %v9467_v40 = vpop.f32.mrf.mxu1  ;;  %v23465_v6 = vld [vmem:[#allocation49_spill] sm:$0xff] }
 0x505   : > { %9688 = vst [vmem:[%s21595_s11 + $0x280] sm:$0xff] %v9640_v61  ;;  %v9639_v46 = vmax.f32 %v9591_v52, 0.0  ;;  %v9594_v34 = vadd.f32 %v21578_v17, %v9539_v4  ;;  %v9538_v24 = vadd.f32 %v9467_v40, %v8991_v22  ;;  %v8995_v56 = vadd.f32 %v23465_v6, %v21570_v11  ;;  %v21912_v59 = vpop.f32.mrf.mxu0  ;;  %v12346_v6 = vld [vmem:[#allocation3 + $0x92] sm:$0xff] }
 0x506   : > { %v16699_v33 = vpop.f32.mrf.mxu1  ;;  %23466 = vst [vmem:[#allocation96_spill] sm:$0xff] %v21912_v59 }
 0x507   : > { %16994 = vmatmul.mubr.msk.f32.gmra.mxu1 %vm6301_vm2, %v11285_v57  ;;  %9687 = vst [vmem:[%s21595_s11 + $0x278] sm:$0xff] %v9639_v46  ;;  %v9642_v15 = vmax.f32 %v9594_v34, 0.0  ;;  %v9593_v21 = vadd.f32 %v21578_v17, %v9538_v24  ;;  %v9541_v18 = vadd.f32 %v16699_v33, %v8994_v60  ;;  %v12336_v57 = vld [vmem:[#allocation3 + $0x42] sm:$0xff]  ;;  %v12337_v34 = vld [vmem:[#allocation3 + $0x4a] sm:$0xff]  ;;  %v21923_v24 = vpop.f32.mrf.mxu0  ;;  %v12338_v60 = vld [vmem:[#allocation3 + $0x52] sm:$0xff] }
 0x508   : > { %16996 = vmatprep.mubr.msk.f32.mxu1 %vm6301_vm2, %v11286_v35  ;;  %v9477_v54 = vpop.f32.mrf.mxu1  ;;  %23467 = vst [vmem:[#allocation67_spill] sm:$0xff] %v21923_v24 }
 0x509   : > { %9690 = vst [vmem:[%s21595_s11 + $0x2a8] sm:$0xff] %v9642_v15  ;;  %v9641_v32 = vmax.f32 %v9593_v21, 0.0  ;;  %v9596_v19 = vadd.f32 %v21578_v17, %v9541_v18  ;;  %v9540_v20 = vadd.f32 %v9477_v54, %v8993_v49  ;;  %v21932_v15 = vpop.f32.mrf.mxu0  ;;  %v12340_v18 = vld [vmem:[#allocation3 + $0x62] sm:$0xff]  ;;  %v12341_v49 = vld [vmem:[#allocation3 + $0x6a] sm:$0xff] }
 0x50a   : > { %v16702_v23 = vpop.f32.mrf.mxu1  ;;  %23468 = vst [vmem:[#allocation75_spill] sm:$0xff] %v21932_v15  ;;  %v12367_v15 = vld [vmem:[#allocation3 + $0x13a] sm:$0xff] }
 0x50b   : > { %16997 = vmatmul.mubr.msk.f32.gmra.mxu1 %vm6301_vm2, %v11287_v38  ;;  %9689 = vst [vmem:[%s21595_s11 + $0x2a0] sm:$0xff] %v9641_v32  ;;  %v9644_v42 = vmax.f32 %v9596_v19, 0.0  ;;  %v9595_v36 = vadd.f32 %v21578_v17, %v9540_v20  ;;  %v9543_v25 = vadd.f32 %v16702_v23, %v8996_v62  ;;  %v21940_v38 = vpop.f32.mrf.mxu0  ;;  %v12342_v32 = vld [vmem:[#allocation3 + $0x72] sm:$0xff]  ;;  %v12343_v20 = vld [vmem:[#allocation3 + $0x7a] sm:$0xff]  ;;  %v12344_v23 = vld [vmem:[#allocation3 + $0x82] sm:$0xff] }
 0x50c   : > { %17075 = vmatprep.mubr.msk.f32.mxu1 %vm6301_vm2, %v12334_v13  ;;  %v9487_v61 = vpop.f32.mrf.mxu1  ;;  %23469 = vst [vmem:[#allocation78_spill] sm:$0xff] %v21940_v38 }
 0x50d   : > { %9692 = vst [vmem:[%s21595_s11 + $0x2d0] sm:$0xff] %v9644_v42  ;;  %v9643_v50 = vmax.f32 %v9595_v36, 0.0  ;;  %v9598_v52 = vadd.f32 %v21578_v17, %v9543_v25  ;;  %v9542_v4 = vadd.f32 %v9487_v61, %v8995_v56  ;;  %v21948_v2 = vpop.f32.mrf.mxu0  ;;  %v12345_v42 = vld [vmem:[#allocation3 + $0x8a] sm:$0xff]  ;;  %v12347_v61 = vld [vmem:[#allocation3 + $0x9a] sm:$0xff] }
 0x50e   : > { %v21914_v22 = vpop.f32.mrf.mxu1  ;;  %23470 = vst [vmem:[#allocation68_spill] sm:$0xff] %v21948_v2  ;;  %v12365_v2 = vld [vmem:[#allocation3 + $0x12a] sm:$0xff] }
 0x50f   : > { %17076 = vmatmul.mubr.msk.f32.vlgmr.msra.gmra.mxu1 %vm6301_vm2, %v12335_v5  ;;  %9691 = vst [vmem:[%s21595_s11 + $0x2b0] sm:$0xff] %v9643_v50  ;;  %v9646_v40 = vmax.f32 %v9598_v52, 0.0  ;;  %v9597_v11 = vadd.f32 %v21578_v17, %v9542_v4  ;;  %v12339_v17 = vld [vmem:[#allocation3 + $0x5a] sm:$0xff]  ;;  %v21956_v36 = vpop.f32.mrf.mxu0  ;;  %v12348_v4 = vld [vmem:[#allocation3 + $0xa2] sm:$0xff] }
 0x510   : > { %17078 = vmatprep.mubr.msk.f32.mxu1 %vm6301_vm2, %v12336_v57  ;;  %v21920_v35 = vpop.f32.mrf.mxu1  ;;  %23471 = vst [vmem:[#allocation35_spill] sm:$0xff] %v21956_v36  ;;  %v12349_v57 = vld [vmem:[#allocation3 + $0xaa] sm:$0xff] }
 0x511   : > { %9694 = vst [vmem:[%s21595_s11 + $0x2e0] sm:$0xff] %v9646_v40  ;;  %v9645_v46 = vmax.f32 %v9597_v11, 0.0  ;;  %v21964_v50 = vpop.f32.mrf.mxu0 }
 0x512   : > { %v21925_v53 = vpop.f32.mrf.mxu1  ;;  %23472 = vst [vmem:[#allocation28_spill] sm:$0xff] %v21964_v50  ;;  %v12363_v50 = vld [vmem:[#allocation3 + $0x11a] sm:$0xff] }
 0x513   : > { %17079 = vmatmul.mubr.msk.f32.gmra.mxu1 %vm6301_vm2, %v12337_v34  ;;  %9693 = vst [vmem:[%s21595_s11 + $0x2d8] sm:$0xff] %v9645_v46  ;;  %v21972_v40 = vpop.f32.mrf.mxu0  ;;  %v12350_v46 = vld [vmem:[#allocation3 + $0xb2] sm:$0xff] }
 0x514   : > { %17081 = vmatprep.mubr.msk.f32.mxu1 %vm6301_vm2, %v12338_v60  ;;  %v21930_v33 = vpop.f32.mrf.mxu1  ;;  %23473 = vst [vmem:[#allocation4_spill] sm:$0xff] %v21972_v40  ;;  %v12351_v60 = vld [vmem:[#allocation3 + $0xba] sm:$0xff] }
 0x516   : > { %v21934_v21 = vpop.f32.mrf.mxu1 }
 0x517   : > { %17082 = vmatmul.mubr.msk.f32.gmra.mxu1 %vm6301_vm2, %v12339_v17  ;;  %v21980_v17 = vpop.f32.mrf.mxu0 }
 0x518   : > { %17084 = vmatprep.mubr.msk.f32.mxu1 %vm6301_vm2, %v12340_v18  ;;  %v21938_v48 = vpop.f32.mrf.mxu1  ;;  %23474 = vst [vmem:[#allocation82_spill] sm:$0xff] %v21980_v17  ;;  %v12361_v17 = vld [vmem:[#allocation3 + $0x10a] sm:$0xff] }
 0x51a   : > { %v21942_v54 = vpop.f32.mrf.mxu1 }
 0x51b   : > { %17085 = vmatmul.mubr.msk.f32.gmra.mxu1 %vm6301_vm2, %v12341_v49  ;;  %v12352_v49 = vld [vmem:[#allocation3 + $0xc2] sm:$0xff] }
 0x51c   : > { %17087 = vmatprep.mubr.msk.f32.mxu1 %vm6301_vm2, %v12342_v32  ;;  %v21946_v19 = vpop.f32.mrf.mxu1 }
 0x51e   : > { %v21950_v62 = vpop.f32.mrf.mxu1 }
 0x51f   : > { %17088 = vmatmul.mubr.msk.f32.gmra.mxu1 %vm6301_vm2, %v12343_v20  ;;  %v12353_v20 = vld [vmem:[#allocation3 + $0xca] sm:$0xff] }
 0x520   : > { %17090 = vmatprep.mubr.msk.f32.mxu1 %vm6301_vm2, %v12344_v23  ;;  %v21954_v13 = vpop.f32.mrf.mxu1  ;;  %v21988_v23 = vpop.f32.mrf.mxu0 }
 0x521   : > { %23475 = vst [vmem:[#allocation97_spill] sm:$0xff] %v21988_v23 }
 0x522   : > { %v21958_v25 = vpop.f32.mrf.mxu1 }
 0x523   : > { %17091 = vmatmul.mubr.msk.f32.gmra.mxu1 %vm6301_vm2, %v12345_v42 }
 0x524   : > { %17093 = vmatprep.mubr.msk.f32.mxu1 %vm6301_vm2, %v12346_v6  ;;  %v21962_v56 = vpop.f32.mrf.mxu1  ;;  %v12354_v6 = vld [vmem:[#allocation3 + $0xd2] sm:$0xff] }
 0x526   : > { %v21966_v52 = vpop.f32.mrf.mxu1 }
 0x527   : > { %17094 = vmatmul.mubr.msk.f32.gmra.mxu1 %vm6301_vm2, %v12347_v61 }
 0x528   : > { %17096 = vmatprep.mubr.msk.f32.mxu1 %vm6301_vm2, %v12348_v4  ;;  %v21970_v5 = vpop.f32.mrf.mxu1  ;;  %v12355_v4 = vld [vmem:[#allocation3 + $0xda] sm:$0xff] }
 0x52a   : > { %v21974_v11 = vpop.f32.mrf.mxu1 }
 0x52b   : > { %17097 = vmatmul.mubr.msk.f32.gmra.mxu1 %vm6301_vm2, %v12349_v57  ;;  %v21996_v57 = vpop.f32.mrf.mxu0 }
 0x52c   : > { %17099 = vmatprep.mubr.msk.f32.mxu1 %vm6301_vm2, %v12350_v46  ;;  %v21978_v34 = vpop.f32.mrf.mxu1  ;;  %23476 = vst [vmem:[#allocation36_spill] sm:$0xff] %v21996_v57  ;;  %v12359_v57 = vld [vmem:[#allocation3 + $0xfa] sm:$0xff] }
 0x52d   : > { %v22004_v51 = vpop.f32.mrf.mxu0 }
 0x52e   : > { %v21982_v18 = vpop.f32.mrf.mxu1  ;;  %23477 = vst [vmem:[#allocation38_spill] sm:$0xff] %v22004_v51 }
 0x52f   : > { %17100 = vmatmul.mubr.msk.f32.gmra.mxu1 %vm6301_vm2, %v12351_v60  ;;  %v12356_v60 = vld [vmem:[#allocation3 + $0xe2] sm:$0xff]  ;;  %v22012_v23 = vpop.f32.mrf.mxu0 }
 0x530   : > { %17102 = vmatprep.mubr.msk.f32.mxu1 %vm6301_vm2, %v12352_v49  ;;  %v21986_v32 = vpop.f32.mrf.mxu1  ;;  %23478 = vst [vmem:[#allocation80_spill] sm:$0xff] %v22012_v23 }
 0x531   : > { %v22020_v40 = vpop.f32.mrf.mxu0 }
 0x532   : > { %v21990_v42 = vpop.f32.mrf.mxu1  ;;  %23479 = vst [vmem:[#allocation6_spill] sm:$0xff] %v22020_v40 }
 0x533   : > { %17103 = vmatmul.mubr.msk.f32.gmra.mxu1 %vm6301_vm2, %v12353_v20  ;;  %v22028_v36 = vpop.f32.mrf.mxu0 }
 0x534   : > { %17105 = vmatprep.mubr.msk.f32.mxu1 %vm6301_vm2, %v12354_v6  ;;  %v21994_v61 = vpop.f32.mrf.mxu1  ;;  %v12358_v6 = vld [vmem:[#allocation3 + $0xf2] sm:$0xff]  ;;  %23482 = vst [vmem:[#allocation41_spill] sm:$0xff] %v22028_v36 }
 0x535   : > { %v22036_v38 = vpop.f32.mrf.mxu0 }
 0x536   : > { %v21998_v46 = vpop.f32.mrf.mxu1  ;;  %23485 = vst [vmem:[#allocation84_spill] sm:$0xff] %v22036_v38 }
 0x537   : > { %17106 = vmatmul.mubr.msk.f32.gmra.mxu1 %vm6301_vm2, %v12355_v4 }
 0x538   : > { %17108 = vmatprep.mubr.msk.f32.mxu1 %vm6301_vm2, %v12356_v60  ;;  %v22002_v49 = vpop.f32.mrf.mxu1  ;;  %v12360_v60 = vld [vmem:[#allocation3 + $0x102] sm:$0xff] }
 0x53a   : > { %v22006_v20 = vpop.f32.mrf.mxu1 }
 0x53b   : > { %17109 = vmatmul.mubr.msk.f32.gmra.mxu1 %vm6301_vm2, %v12357_v27 }
 0x53c   : > { %17111 = vmatprep.mubr.msk.f32.mxu1 %vm6301_vm2, %v12358_v6  ;;  %v22010_v8 = vpop.f32.mrf.mxu1  ;;  %v12362_v6 = vld [vmem:[#allocation3 + $0x112] sm:$0xff] }
 0x53e   : > { %v22014_v4 = vpop.f32.mrf.mxu1 }
 0x53f   : > { %17112 = vmatmul.mubr.msk.f32.gmra.mxu1 %vm6301_vm2, %v12359_v57 }
 0x540   : > { %17114 = vmatprep.mubr.msk.f32.mxu1 %vm6301_vm2, %v12360_v60  ;;  %v22018_v51 = vpop.f32.mrf.mxu1  ;;  %v12364_v60 = vld [vmem:[#allocation3 + $0x122] sm:$0xff] }
 0x542   : > { %v22022_v27 = vpop.f32.mrf.mxu1 }
 0x543   : > { %23480 = vst [vmem:[#allocation98_spill] sm:$0xff] %v22022_v27  ;;  %17115 = vmatmul.mubr.msk.f32.gmra.mxu1 %vm6301_vm2, %v12361_v17  ;;  %v23517_v27 = vld [vmem:[#allocation43_spill] sm:$0xff] }
 0x544   : > { %17117 = vmatprep.mubr.msk.f32.mxu1 %vm6301_vm2, %v12362_v6  ;;  %v22026_v23 = vpop.f32.mrf.mxu1  ;;  %v12366_v6 = vld [vmem:[#allocation3 + $0x132] sm:$0xff] }
 0x545   : > { %23481 = vst [vmem:[#allocation71_spill] sm:$0xff] %v22026_v23 }
 0x546   : > { %v22030_v57 = vpop.f32.mrf.mxu1 }
 0x547   : > { %23483 = vst [vmem:[#allocation8_spill] sm:$0xff] %v22030_v57  ;;  %17118 = vmatmul.mubr.msk.f32.gmra.mxu1 %vm6301_vm2, %v12363_v50  ;;  %v22044_v57 = vpop.f32.mrf.mxu0 }
 0x548   : > { %17120 = vmatprep.mubr.msk.f32.mxu1 %vm6301_vm2, %v12364_v60  ;;  %v22034_v40 = vpop.f32.mrf.mxu1  ;;  %23488 = vst [vmem:[#allocation33_spill] sm:$0xff] %v22044_v57  ;;  %v12368_v60 = vld [vmem:[#allocation3 + $0x142] sm:$0xff] }
 0x549   : > { %23484 = vst [vmem:[#allocation99_spill] sm:$0xff] %v22034_v40  ;;  %v22052_v40 = vpop.f32.mrf.mxu0 }
 0x54a   : > { %v22038_v17 = vpop.f32.mrf.mxu1  ;;  %23491 = vst [vmem:[#allocation145_spill] sm:$0xff] %v22052_v40 }
 0x54b   : > { %23486 = vst [vmem:[#allocation76_spill] sm:$0xff] %v22038_v17  ;;  %17121 = vmatmul.mubr.msk.f32.gmra.mxu1 %vm6301_vm2, %v12365_v2  ;;  %v12369_v17 = vld [vmem:[#allocation3 + $0x14a] sm:$0xff] }
 0x54c   : > { %17123 = vmatprep.mubr.msk.f32.mxu1 %vm6301_vm2, %v12366_v6  ;;  %v22042_v36 = vpop.f32.mrf.mxu1  ;;  %v12370_v6 = vld [vmem:[#allocation3 + $0x152] sm:$0xff] }
 0x54d   : > { %23487 = vst [vmem:[#allocation18_spill] sm:$0xff] %v22042_v36  ;;  %v22060_v36 = vpop.f32.mrf.mxu0 }
 0x54e   : > { %v22046_v50 = vpop.f32.mrf.mxu1  ;;  %23494 = vst [vmem:[#allocation25_spill] sm:$0xff] %v22060_v36 }
 0x54f   : > { %23489 = vst [vmem:[#allocation21_spill] sm:$0xff] %v22046_v50  ;;  %17124 = vmatmul.mubr.msk.f32.gmra.mxu1 %vm6301_vm2, %v12367_v15  ;;  %v12371_v50 = vld [vmem:[#allocation3 + $0x15a] sm:$0xff] }
 0x550   : > { %17126 = vmatprep.mubr.msk.f32.mxu1 %vm6301_vm2, %v12368_v60  ;;  %v22050_v38 = vpop.f32.mrf.mxu1  ;;  %v12372_v60 = vld [vmem:[#allocation3 + $0x162] sm:$0xff] }
 0x551   : > { %23490 = vst [vmem:[#allocation5_spill] sm:$0xff] %v22050_v38  ;;  %v22068_v38 = vpop.f32.mrf.mxu0 }
 0x552   : > { %v22054_v2 = vpop.f32.mrf.mxu1  ;;  %23497 = vst [vmem:[#allocation146_spill] sm:$0xff] %v22068_v38 }
 0x553   : > { %23492 = vst [vmem:[#allocation100_spill] sm:$0xff] %v22054_v2  ;;  %17127 = vmatmul.mubr.msk.f32.gmra.mxu1 %vm6301_vm2, %v12369_v17  ;;  %v12373_v2 = vld [vmem:[#allocation3 + $0x16a] sm:$0xff] }
 0x554   : > { %17129 = vmatprep.mubr.msk.f32.mxu1 %vm6301_vm2, %v12370_v6  ;;  %v22058_v57 = vpop.f32.mrf.mxu1  ;;  %v12374_v6 = vld [vmem:[#allocation3 + $0x172] sm:$0xff] }
 0x555   : > { %23493 = vst [vmem:[#allocation143_spill] sm:$0xff] %v22058_v57  ;;  %v22076_v57 = vpop.f32.mrf.mxu0 }
 0x556   : > { %v22062_v15 = vpop.f32.mrf.mxu1  ;;  %23500 = vst [vmem:[#allocation74_spill] sm:$0xff] %v22076_v57  ;;  %v12379_v57 = vld [vmem:[#allocation3 + $0x19a] sm:$0xff] }
 0x557   : > { %23495 = vst [vmem:[#allocation37_spill] sm:$0xff] %v22062_v15  ;;  %17130 = vmatmul.mubr.msk.f32.gmra.mxu1 %vm6301_vm2, %v12371_v50  ;;  %v12375_v15 = vld [vmem:[#allocation3 + $0x17a] sm:$0xff] }
 0x558   : > { %17132 = vmatprep.mubr.msk.f32.mxu1 %vm6301_vm2, %v12372_v60  ;;  %v22066_v40 = vpop.f32.mrf.mxu1  ;;  %v12376_v60 = vld [vmem:[#allocation3 + $0x182] sm:$0xff] }
 0x559   : > { %23496 = vst [vmem:[#allocation7_spill] sm:$0xff] %v22066_v40  ;;  %v22084_v40 = vpop.f32.mrf.mxu0 }
 0x55a   : > { %v22070_v17 = vpop.f32.mrf.mxu1  ;;  %23503 = vst [vmem:[#allocation65_spill] sm:$0xff] %v22084_v40 }
 0x55b   : > { %23498 = vst [vmem:[#allocation13_spill] sm:$0xff] %v22070_v17  ;;  %17133 = vmatmul.mubr.msk.f32.gmra.mxu1 %vm6301_vm2, %v12373_v2  ;;  %v12377_v17 = vld [vmem:[#allocation3 + $0x18a] sm:$0xff] }
 0x55c   : > { %17135 = vmatprep.mubr.msk.f32.mxu1 %vm6301_vm2, %v12374_v6  ;;  %v22074_v36 = vpop.f32.mrf.mxu1  ;;  %v12378_v6 = vld [vmem:[#allocation3 + $0x192] sm:$0xff] }
 0x55d   : > { %23499 = vst [vmem:[#allocation64_spill] sm:$0xff] %v22074_v36 }
 0x55e   : > { %v22078_v50 = vpop.f32.mrf.mxu1 }
 0x55f   : > { %23501 = vst [vmem:[#allocation50_spill] sm:$0xff] %v22078_v50  ;;  %17136 = vmatmul.mubr.msk.f32.gmra.mxu1 %vm6301_vm2, %v12375_v15  ;;  %v12380_v50 = vld [vmem:[#allocation3 + $0x1a2] sm:$0xff]  ;;  %v22092_v15 = vpop.f32.mrf.mxu0 }
 0x560   : > { %17138 = vmatprep.mubr.msk.f32.mxu1 %vm6301_vm2, %v12376_v60  ;;  %v22082_v38 = vpop.f32.mrf.mxu1  ;;  %23506 = vst [vmem:[#allocation40_spill] sm:$0xff] %v22092_v15  ;;  %v12381_v60 = vld [vmem:[#allocation3 + $0x1aa] sm:$0xff] }
 0x561   : > { %23502 = vst [vmem:[#allocation29_spill] sm:$0xff] %v22082_v38  ;;  %v22102_v38 = vpop.f32.mrf.mxu0 }
 0x562   : > { %v22086_v2 = vpop.f32.mrf.mxu1  ;;  %23510 = vst [vmem:[#allocation87_spill] sm:$0xff] %v22102_v38 }
 0x563   : > { %23504 = vst [vmem:[#allocation79_spill] sm:$0xff] %v22086_v2  ;;  %17139 = vmatmul.mubr.msk.f32.gmra.mxu1 %vm6301_vm2, %v12377_v17  ;;  %v23509_v2 = vld [vmem:[#allocation77_spill] sm:$0xff] }
 0x564   : > { %17141 = vmatprep.mubr.msk.f32.mxu1 %vm6301_vm2, %v12378_v6  ;;  %v22090_v36 = vpop.f32.mrf.mxu1  ;;  %v10460_v17 = vadd.f32 %v21914_v22, %v23509_v2  ;;  %v23516_v22 = vld [vmem:[#allocation51_spill] sm:$0xff] }
 0x565   : > { %23505 = vst [vmem:[#allocation11_spill] sm:$0xff] %v22090_v36  ;;  %v23512_v36 = vld [vmem:[#allocation42_spill] sm:$0xff]  ;;  %v10465_v2 = vadd.f32 %v21930_v33, %v23516_v22 }
 0x566   : > { %v10455_v15 = vadd.f32 %v21920_v35, %v23512_v36  ;;  %v11193_v23 = vadd.f32 %v21580_v55, %v10460_v17  ;;  %v10480_v35 = vadd.f32 %v21934_v21, %v23517_v27  ;;  %v23518_v17 = vld [vmem:[#allocation12_spill] sm:$0xff] }
 0x567   : > { %v22094_v24 = vpop.f32.mrf.mxu1  ;;  %17142 = vmatmul.mubr.msk.f32.gmra.mxu1 %vm6301_vm2, %v12379_v57  ;;  %v23514_v57 = vld [vmem:[#allocation10_spill] sm:$0xff] }
 0x568   : > { %23507 = vst [vmem:[#allocation88_spill] sm:$0xff] %v22094_v24  ;;  %17144 = vmatprep.mubr.msk.f32.mxu1 %vm6301_vm2, %v12380_v50  ;;  %v10470_v50 = vadd.f32 %v21925_v53, %v23514_v57  ;;  %v11197_v21 = vadd.f32 %v21638_v30, %v10480_v35  ;;  %v23522_v35 = vld [vmem:[#allocation55_spill] sm:$0xff] }
 0x569   : > { %v22098_v40 = vpop.f32.mrf.mxu1 }
 0x56a   : > { %23508 = vst [vmem:[#allocation101_spill] sm:$0xff] %v22098_v40  ;;  %v22114_v40 = vpop.f32.mrf.mxu0  ;;  %v11195_v53 = vadd.f32 %v21610_v45, %v10470_v50 }
 0x56b   : > { %v22104_v6 = vpop.f32.mrf.mxu1  ;;  %17145 = vmatmul.mubr.msk.f32.gmra.mxu1 %vm6301_vm2, %v12381_v60  ;;  %23515 = vst [vmem:[#allocation103_spill] sm:$0xff] %v22114_v40  ;;  %v11192_v60 = vadd.f32 %v21597_v3, %v10455_v15  ;;  %v10475_v40 = vadd.f32 %v21938_v48, %v23518_v17  ;;  %v23519_v3 = vld [vmem:[#allocation53_spill] sm:$0xff]  ;;  %v10495_v17 = vadd.f32 %v21954_v13, %v23522_v35 }
 0x56c   : > { %23511 = vst [vmem:[#allocation54_spill] sm:$0xff] %v22104_v6  ;;  %v22126_v57 = vpop.f32.mrf.mxu0 }
 0x56d   : > { %v22109_v24 = vpop.f32.mrf.mxu1  ;;  %v11196_v48 = vadd.f32 %v21652_v7, %v10475_v40  ;;  %v23523_v7 = vld [vmem:[#allocation45_spill] sm:$0xff]  ;;  %v11200_v13 = vadd.f32 %v21708_v28, %v10495_v17  ;;  %v23527_v28 = vld [vmem:[#allocation19_spill] sm:$0xff] }
 0x56e   : > { %23513 = vst [vmem:[#allocation30_spill] sm:$0xff] %v22109_v24  ;;  %v22138_v27 = vpop.f32.mrf.mxu0  ;;  %v10510_v40 = vadd.f32 %v21958_v25, %v23523_v7  ;;  %v10530_v17 = vadd.f32 %v21974_v11, %v23527_v28  ;;  %v23528_v7 = vld [vmem:[#allocation59_spill] sm:$0xff] }
 0x56f   : > { %v16929_v59 = vpop.f32.mrf.mxu1 }
 0x570   : > { %v22118_v38 = vadd.f32 %v16929_v59, %v11193_v23  ;;  %v11194_v59 = vadd.f32 %v21624_v63, %v10465_v2  ;;  %v10490_v23 = vadd.f32 %v21942_v54, %v23519_v3  ;;  %v23521_v63 = vld [vmem:[#allocation14_spill] sm:$0xff]  ;;  %v11203_v25 = vadd.f32 %v21722_v43, %v10510_v40 }
 0x571   : > { %v11500_v6 = vpop.f32.mrf.mxu1  ;;  %v10500_v2 = vadd.f32 %v21950_v62, %v23521_v63  ;;  %v10525_v40 = vadd.f32 %v21978_v34, %v23528_v7  ;;  %v11207_v11 = vadd.f32 %v21778_v39, %v10530_v17 }
 0x572   : > { %v22123_v36 = vadd.f32 %v11500_v6, %v11192_v60  ;;  %v23520_v6 = vld [vmem:[#allocation44_spill] sm:$0xff]  ;;  %v11199_v54 = vadd.f32 %v21666_v47, %v10490_v23 }
 0x573   : > { %v16932_v55 = vpop.f32.mrf.mxu1  ;;  %v10485_v50 = vadd.f32 %v21946_v19, %v23520_v6  ;;  %v11201_v62 = vadd.f32 %v21694_v44, %v10500_v2  ;;  %v23524_v23 = vld [vmem:[#allocation16_spill] sm:$0xff]  ;;  %v23526_v2 = vld [vmem:[#allocation46_spill] sm:$0xff]  ;;  %v11206_v34 = vadd.f32 %v21792_v31, %v10525_v40 }
 0x574   : > { %v22130_v24 = vadd.f32 %v16932_v55, %v11195_v53  ;;  %v22150_v55 = vpop.f32.mrf.mxu0  ;;  %v23533_v31 = vld [vmem:[#allocation142_spill] sm:$0xff] }
 0x575   : > { %v11510_v33 = vpop.f32.mrf.mxu1  ;;  %v11198_v19 = vadd.f32 %v21680_v14, %v10485_v50  ;;  %v23525_v14 = vld [vmem:[#allocation57_spill] sm:$0xff]  ;;  %v23534_v40 = vld [vmem:[#allocation62_spill] sm:$0xff] }
 0x576   : > { %v22135_v15 = vadd.f32 %v11510_v33, %v11194_v59  ;;  %v10520_v50 = vadd.f32 %v21966_v52, %v23525_v14 }
 0x577   : > { %v16935_v45 = vpop.f32.mrf.mxu1 }
 0x578   : > { %v22142_v22 = vadd.f32 %v16935_v45, %v11197_v21  ;;  %v22162_v21 = vpop.f32.mrf.mxu0  ;;  %v10505_v45 = vadd.f32 %v21962_v56, %v23524_v23  ;;  %v11205_v52 = vadd.f32 %v21750_v0, %v10520_v50 }
 0x579   : > { %v11520_v60 = vpop.f32.mrf.mxu1 }
 0x57a   : > { %v22147_v53 = vadd.f32 %v11520_v60, %v11196_v48  ;;  %v22174_v63 = vpop.f32.mrf.mxu0  ;;  %v11202_v56 = vadd.f32 %v21736_v37, %v10505_v45  ;;  %v23529_v37 = vld [vmem:[#allocation47_spill] sm:$0xff] }
 0x57b   : > { %v16938_v30 = vpop.f32.mrf.mxu1  ;;  %v10540_v23 = vadd.f32 %v21982_v18, %v23529_v37 }
 0x57c   : > { %v22154_v59 = vadd.f32 %v16938_v30, %v11199_v54  ;;  %v10515_v54 = vadd.f32 %v21970_v5, %v23526_v2 }
 0x57d   : > { %v11530_v33 = vpop.f32.mrf.mxu1  ;;  %v11209_v18 = vadd.f32 %v21806_v58, %v10540_v23 }
 0x57e   : > { %v22159_v3 = vadd.f32 %v11530_v33, %v11198_v19  ;;  %v22186_v33 = vpop.f32.mrf.mxu0  ;;  %v11204_v5 = vadd.f32 %v21764_v41, %v10515_v54  ;;  %v23531_v41 = vld [vmem:[#allocation9_spill] sm:$0xff] }
 0x57f   : > { %v16941_v47 = vpop.f32.mrf.mxu1 }
 0x580   : > { %v22166_v6 = vadd.f32 %v16941_v47, %v11201_v62 }
 0x581   : > { %v11540_v48 = vpop.f32.mrf.mxu1 }
 0x582   : > { %v22171_v60 = vadd.f32 %v11540_v48, %v11200_v13  ;;  %v22198_v13 = vpop.f32.mrf.mxu0  ;;  %v23530_v48 = vld [vmem:[#allocation22_spill] sm:$0xff] }
 0x583   : > { %v16944_v44 = vpop.f32.mrf.mxu1  ;;  %v10535_v14 = vadd.f32 %v21986_v32, %v23530_v48  ;;  %v23536_v48 = vld [vmem:[#allocation48_spill] sm:$0xff] }
 0x584   : > { %v22178_v30 = vadd.f32 %v16944_v44, %v11203_v25  ;;  %v10550_v44 = vadd.f32 %v21990_v42, %v23531_v41  ;;  %v22210_v54 = vpop.f32.mrf.mxu0 }
 0x585   : > { %v11550_v35 = vpop.f32.mrf.mxu1  ;;  %v11208_v32 = vadd.f32 %v21820_v9, %v10535_v14  ;;  %v23535_v9 = vld [vmem:[#allocation144_spill] sm:$0xff]  ;;  %v10565_v14 = vadd.f32 %v22010_v8, %v23536_v48 }
 0x586   : > { %v22183_v19 = vadd.f32 %v11550_v35, %v11202_v56  ;;  %v23532_v56 = vld [vmem:[#allocation61_spill] sm:$0xff]  ;;  %v11211_v42 = vadd.f32 %v21834_v16, %v10550_v44  ;;  %v22222_v7 = vpop.f32.mrf.mxu0  ;;  %v10570_v23 = vadd.f32 %v22006_v20, %v23535_v9 }
 0x587   : > { %v16947_v43 = vpop.f32.mrf.mxu1  ;;  %v10545_v35 = vadd.f32 %v21994_v61, %v23532_v56  ;;  %v11214_v8 = vadd.f32 %v21902_v26, %v10565_v14  ;;  %v23549_v26 = vld [vmem:[#allocation108_spill] sm:$0xff]  ;;  %v23552_v14 = vld [vmem:[#allocation75_spill] sm:$0xff] }
 0x588   : > { %v22190_v62 = vadd.f32 %v16947_v43, %v11205_v52  ;;  %v10560_v52 = vadd.f32 %v21998_v46, %v23533_v31  ;;  %v11215_v20 = vadd.f32 %v21890_v12, %v10570_v23 }
 0x589   : > { %v11560_v47 = vpop.f32.mrf.mxu1  ;;  %v11210_v61 = vadd.f32 %v21848_v10, %v10545_v35  ;;  %v23537_v10 = vld [vmem:[#allocation26_spill] sm:$0xff] }
 0x58a   : > { %v22195_v45 = vadd.f32 %v11560_v47, %v11204_v5  ;;  %v10555_v5 = vadd.f32 %v22002_v49, %v23534_v40  ;;  %v11213_v46 = vadd.f32 %v21862_v29, %v10560_v52  ;;  %v10580_v41 = vadd.f32 %v22014_v4, %v23537_v10  ;;  %v23544_v4 = vld [vmem:[#allocation96_spill] sm:$0xff]  ;;  %v23545_v40 = vld [vmem:[#allocation106_spill] sm:$0xff] }
 0x58b   : > { %v16950_v0 = vpop.f32.mrf.mxu1 }
 0x58c   : > { %v22202_v50 = vadd.f32 %v16950_v0, %v11207_v11  ;;  %v22234_v0 = vpop.f32.mrf.mxu0  ;;  %v11212_v49 = vadd.f32 %v21876_v1, %v10555_v5  ;;  %v23541_v1 = vld [vmem:[#allocation104_spill] sm:$0xff]  ;;  %v23546_v5 = vld [vmem:[#allocation71_spill] sm:$0xff] }
 0x58d   : > { %v11570_v25 = vpop.f32.mrf.mxu1 }
 0x58e   : > { %v22207_v2 = vadd.f32 %v11570_v25, %v11206_v34 }
 0x58f   : > { %v16953_v39 = vpop.f32.mrf.mxu1 }
 0x590   : > { %v22214_v28 = vadd.f32 %v16953_v39, %v11209_v18  ;;  %v22246_v18 = vpop.f32.mrf.mxu0  ;;  %v23539_v39 = vld [vmem:[#allocation102_spill] sm:$0xff] }
 0x591   : > { %v11580_v17 = vpop.f32.mrf.mxu1  ;;  %v10575_v56 = vadd.f32 %v22018_v51, %v23539_v39  ;;  %v23548_v51 = vld [vmem:[#allocation67_spill] sm:$0xff] }
 0x592   : > { %v22219_v43 = vadd.f32 %v11580_v17, %v11208_v32  ;;  %v23542_v17 = vld [vmem:[#allocation98_spill] sm:$0xff] }
 0x593   : > { %v16956_v58 = vpop.f32.mrf.mxu1  ;;  %v10590_v31 = vadd.f32 %v23542_v17, %v23541_v1  ;;  %v11216_v9 = vadd.f32 %v23548_v51, %v10575_v56  ;;  %v23557_v56 = vld [vmem:[#allocation112_spill] sm:$0xff]  ;;  %v23561_v51 = vld [vmem:[#allocation114_spill] sm:$0xff] }
 0x594   : > { %v22226_v47 = vadd.f32 %v16956_v58, %v11211_v42  ;;  %v11217_v42 = vadd.f32 %v23544_v4, %v10580_v41  ;;  %v22258_v58 = vpop.f32.mrf.mxu0  ;;  %v23553_v41 = vld [vmem:[#allocation110_spill] sm:$0xff]  ;;  %v23558_v17 = vld [vmem:[#allocation76_spill] sm:$0xff] }
 0x595   : > { %v11590_v37 = vpop.f32.mrf.mxu1  ;;  %v10610_v4 = vadd.f32 %v23558_v17, %v23557_v56  ;;  %v23569_v56 = vld [vmem:[#allocation118_spill] sm:$0xff]  ;;  %v23570_v17 = vld [vmem:[#allocation5_spill] sm:$0xff] }
 0x596   : > { %v22231_v11 = vadd.f32 %v11590_v37, %v11210_v61  ;;  %v10585_v61 = vadd.f32 %v23546_v5, %v23545_v40 }
 0x597   : > { %v16959_v16 = vpop.f32.mrf.mxu1 }
 0x598   : > { %v22238_v34 = vadd.f32 %v16959_v16, %v11213_v46  ;;  %v23550_v46 = vld [vmem:[#allocation8_spill] sm:$0xff] }
 0x599   : > { %v11600_v25 = vpop.f32.mrf.mxu1  ;;  %v10600_v16 = vadd.f32 %v23550_v46, %v23549_v26  ;;  %v23564_v46 = vld [vmem:[#allocation35_spill] sm:$0xff] }
 0x59a   : > { %v22243_v44 = vadd.f32 %v11600_v25, %v11212_v49  ;;  %v11219_v49 = vadd.f32 %v23552_v14, %v10590_v31  ;;  %v22270_v25 = vpop.f32.mrf.mxu0 }
 0x59b   : > { %v16962_v29 = vpop.f32.mrf.mxu1 }
 0x59c   : > { %23538 = vst [vmem:[#allocation89_spill] sm:$0xff] %v22243_v44  ;;  %v22250_v35 = vadd.f32 %v16962_v29, %v11215_v20  ;;  %v23554_v20 = vld [vmem:[#allocation99_spill] sm:$0xff]  ;;  %v22282_v5 = vpop.f32.mrf.mxu0 }
 0x59d   : > { %v11610_v32 = vpop.f32.mrf.mxu1  ;;  %v10595_v29 = vadd.f32 %v23554_v20, %v23553_v41 }
 0x59e   : > { %23540 = vst [vmem:[#allocation105_spill] sm:$0xff] %v22250_v35  ;;  %v22255_v52 = vadd.f32 %v11610_v32, %v11214_v8  ;;  %v23556_v8 = vld [vmem:[#allocation78_spill] sm:$0xff] }
 0x59f   : > { %v16965_v12 = vpop.f32.mrf.mxu1  ;;  %v11218_v32 = vadd.f32 %v23556_v8, %v10585_v61  ;;  %v11220_v14 = vadd.f32 %v23564_v46, %v10595_v29  ;;  %v23565_v61 = vld [vmem:[#allocation116_spill] sm:$0xff] }
 0x5a0   : > { %23543 = vst [vmem:[#allocation15_spill] sm:$0xff] %v22255_v52  ;;  %v22262_v37 = vadd.f32 %v16965_v12, %v11217_v42  ;;  %v23560_v12 = vld [vmem:[#allocation68_spill] sm:$0xff] }
 0x5a1   : > { %v11620_v23 = vpop.f32.mrf.mxu1  ;;  %v11221_v40 = vadd.f32 %v23560_v12, %v10600_v16  ;;  %v23568_v8 = vld [vmem:[#allocation28_spill] sm:$0xff]  ;;  %v10615_v12 = vadd.f32 %v23570_v17, %v23569_v56  ;;  %v23582_v17 = vld [vmem:[#allocation37_spill] sm:$0xff] }
 0x5a2   : > { %23547 = vst [vmem:[#allocation69_spill] sm:$0xff] %v22262_v37  ;;  %v22267_v48 = vadd.f32 %v11620_v23, %v11216_v9  ;;  %v23562_v9 = vld [vmem:[#allocation18_spill] sm:$0xff]  ;;  %v23573_v29 = vld [vmem:[#allocation120_spill] sm:$0xff] }
 0x5a3   : > { %v16968_v10 = vpop.f32.mrf.mxu1  ;;  %v10605_v23 = vadd.f32 %v23562_v9, %v23561_v51  ;;  %v23574_v9 = vld [vmem:[#allocation100_spill] sm:$0xff] }
 0x5a4   : > { %23551 = vst [vmem:[#allocation52_spill] sm:$0xff] %v22267_v48  ;;  %v22274_v39 = vadd.f32 %v16968_v10, %v11219_v49  ;;  %v23566_v10 = vld [vmem:[#allocation21_spill] sm:$0xff]  ;;  %v10630_v46 = vadd.f32 %v23574_v9, %v23573_v29  ;;  %v23585_v9 = vld [vmem:[#allocation126_spill] sm:$0xff] }
 0x5a5   : > { %v11630_v1 = vpop.f32.mrf.mxu1  ;;  %v10620_v41 = vadd.f32 %v23566_v10, %v23565_v61  ;;  %v23577_v10 = vld [vmem:[#allocation122_spill] sm:$0xff] }
 0x5a6   : > { %23555 = vst [vmem:[#allocation107_spill] sm:$0xff] %v22274_v39  ;;  %v22279_v42 = vadd.f32 %v11630_v1, %v11218_v32  ;;  %v11223_v32 = vadd.f32 %v23568_v8, %v10610_v4  ;;  %v22294_v1 = vpop.f32.mrf.mxu0  ;;  %v23578_v8 = vld [vmem:[#allocation143_spill] sm:$0xff] }
 0x5a7   : > { %v16971_v31 = vpop.f32.mrf.mxu1 }
 0x5a8   : > { %23559 = vst [vmem:[#allocation17_spill] sm:$0xff] %v22279_v42  ;;  %v22286_v26 = vadd.f32 %v16971_v31, %v11221_v40  ;;  %v23572_v40 = vld [vmem:[#allocation4_spill] sm:$0xff]  ;;  %v22306_v61 = vpop.f32.mrf.mxu0 }
 0x5a9   : > { %v11640_v49 = vpop.f32.mrf.mxu1  ;;  %v11222_v31 = vadd.f32 %v23572_v40, %v10605_v23  ;;  %v23581_v23 = vld [vmem:[#allocation124_spill] sm:$0xff] }
 0x5aa   : > { %23563 = vst [vmem:[#allocation109_spill] sm:$0xff] %v22286_v26  ;;  %v22291_v20 = vadd.f32 %v11640_v49, %v11220_v14  ;;  %v23576_v14 = vld [vmem:[#allocation82_spill] sm:$0xff]  ;;  %v10640_v40 = vadd.f32 %v23582_v17, %v23581_v23  ;;  %v22318_v29 = vpop.f32.mrf.mxu0 }
 0x5ab   : > { %v16974_v16 = vpop.f32.mrf.mxu1  ;;  %v11225_v49 = vadd.f32 %v23576_v14, %v10620_v41  ;;  %v23586_v14 = vld [vmem:[#allocation7_spill] sm:$0xff]  ;;  %v23593_v17 = vld [vmem:[#allocation130_spill] sm:$0xff] }
 0x5ac   : > { %23567 = vst [vmem:[#allocation81_spill] sm:$0xff] %v22291_v20  ;;  %v22298_v42 = vadd.f32 %v16974_v16, %v11223_v32  ;;  %v10625_v20 = vadd.f32 %v23578_v8, %v23577_v10  ;;  %v23580_v32 = vld [vmem:[#allocation97_spill] sm:$0xff]  ;;  %v22330_v23 = vpop.f32.mrf.mxu0 }
 0x5ad   : > { %v11650_v51 = vpop.f32.mrf.mxu1  ;;  %v11224_v16 = vadd.f32 %v23580_v32, %v10615_v12  ;;  %v23589_v12 = vld [vmem:[#allocation128_spill] sm:$0xff]  ;;  %v23590_v8 = vld [vmem:[#allocation13_spill] sm:$0xff] }
 0x5ae   : > { %23571 = vst [vmem:[#allocation70_spill] sm:$0xff] %v22298_v42  ;;  %v22303_v26 = vadd.f32 %v11650_v51, %v11222_v31  ;;  %v23584_v31 = vld [vmem:[#allocation36_spill] sm:$0xff]  ;;  %v10650_v32 = vadd.f32 %v23590_v8, %v23589_v12  ;;  %v22342_v12 = vpop.f32.mrf.mxu0  ;;  %v23601_v8 = vld [vmem:[#allocation134_spill] sm:$0xff] }
 0x5af   : > { %v16977_v4 = vpop.f32.mrf.mxu1  ;;  %v11227_v51 = vadd.f32 %v23584_v31, %v10630_v46  ;;  %v23594_v31 = vld [vmem:[#allocation64_spill] sm:$0xff] }
 0x5b0   : > { %23575 = vst [vmem:[#allocation32_spill] sm:$0xff] %v22303_v26  ;;  %v22310_v39 = vadd.f32 %v16977_v4, %v11225_v49  ;;  %v10635_v26 = vadd.f32 %v23586_v14, %v23585_v9  ;;  %v23588_v49 = vld [vmem:[#allocation38_spill] sm:$0xff] }
 0x5b1   : > { %v11660_v56 = vpop.f32.mrf.mxu1  ;;  %v11226_v4 = vadd.f32 %v23588_v49, %v10625_v20  ;;  %v23597_v20 = vld [vmem:[#allocation132_spill] sm:$0xff]  ;;  %v23598_v14 = vld [vmem:[#allocation50_spill] sm:$0xff] }
 0x5b2   : > { %23579 = vst [vmem:[#allocation111_spill] sm:$0xff] %v22310_v39  ;;  %v22315_v42 = vadd.f32 %v11660_v56, %v11224_v16  ;;  %v23592_v16 = vld [vmem:[#allocation80_spill] sm:$0xff]  ;;  %v10660_v49 = vadd.f32 %v23598_v14, %v23597_v20  ;;  %v22354_v20 = vpop.f32.mrf.mxu0  ;;  %v23609_v14 = vld [vmem:[#allocation95_spill] sm:$0xff] }
 0x5b3   : > { %v16980_v41 = vpop.f32.mrf.mxu1  ;;  %v11229_v56 = vadd.f32 %v23592_v16, %v10640_v40  ;;  %v23602_v16 = vld [vmem:[#allocation29_spill] sm:$0xff] }
 0x5b4   : > { %23583 = vst [vmem:[#allocation83_spill] sm:$0xff] %v22315_v42  ;;  %v22322_v48 = vadd.f32 %v16980_v41, %v11227_v51  ;;  %v10645_v42 = vadd.f32 %v23594_v31, %v23593_v17  ;;  %v23596_v51 = vld [vmem:[#allocation6_spill] sm:$0xff]  ;;  %v23606_v31 = vld [vmem:[#allocation79_spill] sm:$0xff] }
 0x5b5   : > { %v11670_v10 = vpop.f32.mrf.mxu1  ;;  %v11228_v41 = vadd.f32 %v23596_v51, %v10635_v26  ;;  %v23605_v26 = vld [vmem:[#allocation136_spill] sm:$0xff] }
 0x5b6   : > { %23587 = vst [vmem:[#allocation113_spill] sm:$0xff] %v22322_v48  ;;  %v22327_v39 = vadd.f32 %v11670_v10, %v11226_v4  ;;  %v23600_v4 = vld [vmem:[#allocation41_spill] sm:$0xff]  ;;  %v10670_v51 = vadd.f32 %v23606_v31, %v23605_v26  ;;  %v22366_v26 = vpop.f32.mrf.mxu0  ;;  %v23618_v31 = vld [vmem:[#allocation31_spill] sm:$0xff] }
 0x5b7   : > { %v16983_v46 = vpop.f32.mrf.mxu1  ;;  %v11231_v10 = vadd.f32 %v23600_v4, %v10650_v32  ;;  %v23610_v4 = vld [vmem:[#allocation11_spill] sm:$0xff]  ;;  %23617 = vst [vmem:[#allocation86_spill] sm:$0xff] %v22366_v26 }
 0x5b8   : > { %23591 = vst [vmem:[#allocation56_spill] sm:$0xff] %v22327_v39  ;;  %v22334_v37 = vadd.f32 %v16983_v46, %v11229_v56  ;;  %v10655_v39 = vadd.f32 %v23602_v16, %v23601_v8  ;;  %v23604_v56 = vld [vmem:[#allocation84_spill] sm:$0xff] }
 0x5b9   : > { %v11680_v9 = vpop.f32.mrf.mxu1  ;;  %v11230_v46 = vadd.f32 %v23604_v56, %v10645_v42  ;;  %v23613_v42 = vld [vmem:[#allocation66_spill] sm:$0xff]  ;;  %v23614_v16 = vld [vmem:[#allocation88_spill] sm:$0xff] }
 0x5ba   : > { %23595 = vst [vmem:[#allocation24_spill] sm:$0xff] %v22334_v37  ;;  %v22339_v48 = vadd.f32 %v11680_v9, %v11228_v41  ;;  %v23608_v41 = vld [vmem:[#allocation33_spill] sm:$0xff]  ;;  %v10680_v56 = vadd.f32 %v23614_v16, %v23613_v42  ;;  %v22378_v42 = vpop.f32.mrf.mxu0 }
 0x5bb   : > { %v16986_v40 = vpop.f32.mrf.mxu1  ;;  %v11233_v9 = vadd.f32 %v23608_v41, %v10660_v49  ;;  %v23619_v41 = vld [vmem:[#allocation101_spill] sm:$0xff] }
 0x5bc   : > { %23599 = vst [vmem:[#allocation34_spill] sm:$0xff] %v22339_v48  ;;  %v22346_v52 = vadd.f32 %v16986_v40, %v11231_v10  ;;  %v10665_v48 = vadd.f32 %v23610_v4, %v23609_v14  ;;  %v23612_v10 = vld [vmem:[#allocation145_spill] sm:$0xff]  ;;  %v23622_v4 = vld [vmem:[#allocation54_spill] sm:$0xff] }
 0x5bd   : > { %v11690_v17 = vpop.f32.mrf.mxu1  ;;  %v11232_v40 = vadd.f32 %v23612_v10, %v10655_v39  ;;  %v23621_v39 = vld [vmem:[#allocation140_spill] sm:$0xff]  ;;  %v23625_v16 = vld [vmem:[#allocation73_spill] sm:$0xff] }
 0x5be   : > { %23603 = vst [vmem:[#allocation115_spill] sm:$0xff] %v22346_v52  ;;  %v22351_v37 = vadd.f32 %v11690_v17, %v11230_v46  ;;  %v23616_v46 = vld [vmem:[#allocation25_spill] sm:$0xff]  ;;  %v10690_v10 = vadd.f32 %v23622_v4, %v23621_v39  ;;  %v22388_v39 = vpop.f32.mrf.mxu0 }
 0x5bf   : > { %v16989_v32 = vpop.f32.mrf.mxu1  ;;  %v11235_v17 = vadd.f32 %v23616_v46, %v10670_v51  ;;  %v23626_v46 = vld [vmem:[#allocation30_spill] sm:$0xff] }
 0x5c0   : > { %23607 = vst [vmem:[#allocation58_spill] sm:$0xff] %v22351_v37  ;;  %v22358_v35 = vadd.f32 %v16989_v32, %v11233_v9  ;;  %v10675_v37 = vadd.f32 %v23619_v41, %v23618_v31  ;;  %v23620_v9 = vld [vmem:[#allocation146_spill] sm:$0xff]  ;;  %v23628_v41 = vld [vmem:[#allocation40_spill] sm:$0xff] }
 0x5c1   : > { %v11700_v8 = vpop.f32.mrf.mxu1  ;;  %v11234_v32 = vadd.f32 %v23620_v9, %v10665_v48  ;;  %v11239_v9 = vadd.f32 %v23628_v41, %v10690_v10  ;;  %v22402_v10 = vld [vmem:[%s22626_s4] ss:$0 sm:$0xff] }
 0x5c2   : > { %23611 = vst [vmem:[#allocation117_spill] sm:$0xff] %v22358_v35  ;;  %v22363_v52 = vadd.f32 %v11700_v8, %v11232_v40  ;;  %v23624_v40 = vld [vmem:[#allocation74_spill] sm:$0xff] }
 0x5c3   : > { %v16992_v49 = vpop.f32.mrf.mxu1  ;;  %v11237_v8 = vadd.f32 %v23624_v40, %v10680_v56  ;;  %v23629_v56 = vld [vmem:[#allocation87_spill] sm:$0xff] }
 0x5c4   : > { %23615 = vst [vmem:[#allocation39_spill] sm:$0xff] %v22363_v52  ;;  %v22370_v44 = vadd.f32 %v16992_v49, %v11235_v17  ;;  %v10685_v52 = vadd.f32 %v23626_v46, %v23625_v16  ;;  %v23627_v17 = vld [vmem:[#allocation65_spill] sm:$0xff]  ;;  %v22397_v16 = vpop.f32.mrf.mxu0 }
 0x5c5   : > { %v11710_v14 = vpop.f32.mrf.mxu1  ;;  %v11236_v49 = vadd.f32 %v23627_v17, %v10675_v37  ;;  %v12286_v17 = vadd.f32 %v22126_v57, %v22123_v36 }
 0x5c6   : > { %v22375_v35 = vadd.f32 %v11710_v14, %v11234_v32  ;;  %v11238_v4 = vadd.f32 %v23629_v56, %v10685_v52  ;;  %v22409_v41 = vpop.f32.mrf.mxu0 }
 0x5c7   : > { %v16995_v51 = vpop.f32.mrf.mxu1 }
 0x5c8   : > { %23623 = vst [vmem:[#allocation20_spill] sm:$0xff] %v22375_v35  ;;  %v22382_v26 = vadd.f32 %v16995_v51, %v11237_v8  ;;  %v23630_v8 = vld [vmem:[#allocation103_spill] sm:$0xff] }
 0x5c9   : > { %v11720_v31 = vpop.f32.mrf.mxu1  ;;  %v12287_v51 = vadd.f32 %v23630_v8, %v22118_v38  ;;  %v12289_v38 = vadd.f32 %v22138_v27, %v22130_v24  ;;  %v12291_v24 = vadd.f32 %v22162_v21, %v22142_v22  ;;  %v22418_v27 = vpop.f32.mrf.mxu0  ;;  %v12293_v22 = vadd.f32 %v22186_v33, %v22154_v59 }
 0x5ca   : > { %v22385_v48 = vadd.f32 %v11720_v31, %v11236_v49  ;;  %v12295_v59 = vadd.f32 %v22210_v54, %v22166_v6  ;;  %v12297_v6 = vadd.f32 %v22234_v0, %v22178_v30  ;;  %v12299_v30 = vadd.f32 %v22258_v58, %v22190_v62 }
 0x5cb   : > { %v16998_v32 = vpop.f32.mrf.mxu1  ;;  %v22428_v21 = vpop.f32.mrf.mxu0  ;;  %v12301_v62 = vadd.f32 %v22282_v5, %v22202_v50  ;;  %v12303_v50 = vadd.f32 %v22306_v61, %v22214_v28  ;;  %v12305_v28 = vadd.f32 %v22330_v23, %v22226_v47  ;;  %v12307_v47 = vadd.f32 %v22354_v20, %v22238_v34  ;;  %v23633_v34 = vld [vmem:[#allocation105_spill] sm:$0xff] }
 0x5cc   : > { %v22390_v14 = vadd.f32 %v16998_v32, %v11239_v9  ;;  %v12309_v20 = vadd.f32 %v22378_v42, %v23633_v34  ;;  %v23635_v42 = vld [vmem:[#allocation69_spill] sm:$0xff] }
 0x5cd   : > { %v11730_v40 = vpop.f32.mrf.mxu1  ;;  %v22438_v33 = vpop.f32.mrf.mxu0 }
 0x5ce   : > { %v22393_v35 = vadd.f32 %v11730_v40, %v11238_v4  ;;  %v12288_v40 = vadd.f32 %v22150_v55, %v22135_v15  ;;  %v12290_v15 = vadd.f32 %v22174_v63, %v22147_v53  ;;  %v12292_v53 = vadd.f32 %v22198_v13, %v22159_v3 }
 0x5cf   : > { %v17077_v37 = vpop.f32.mrf.mxu1  ;;  %v12294_v3 = vadd.f32 %v22222_v7, %v22171_v60  ;;  %v22448_v54 = vpop.f32.mrf.mxu0  ;;  %v12296_v60 = vadd.f32 %v22246_v18, %v22183_v19  ;;  %v12298_v19 = vadd.f32 %v22270_v25, %v22195_v45  ;;  %v12300_v45 = vadd.f32 %v22294_v1, %v22207_v2 }
 0x5d0   : > { %v12834_v46 = vadd.f32 %v17077_v37, %v12287_v51  ;;  %v12302_v2 = vadd.f32 %v22318_v29, %v22219_v43  ;;  %v12304_v43 = vadd.f32 %v22342_v12, %v22231_v11  ;;  %v23632_v11 = vld [vmem:[#allocation86_spill] sm:$0xff] }
 0x5d1   : > { %v12594_v52 = vpop.f32.mrf.mxu1  ;;  %v22458_v0 = vpop.f32.mrf.mxu0 }
 0x5d2   : > { %v12889_v49 = vadd.f32 %v22402_v10, %v12834_v46  ;;  %v12833_v31 = vadd.f32 %v12594_v52, %v12286_v17 }
 0x5d3   : > { %v17080_v9 = vpop.f32.mrf.mxu1  ;;  %v22468_v58 = vpop.f32.mrf.mxu0 }
 0x5d4   : > { %v12937_v32 = vmax.f32 %v12889_v49, 0.0  ;;  %v12888_v56 = vadd.f32 %v22402_v10, %v12833_v31  ;;  %v12836_v4 = vadd.f32 %v17080_v9, %v12289_v38 }
 0x5d5   : > { %v12604_v36 = vpop.f32.mrf.mxu1  ;;  %v22478_v5 = vpop.f32.mrf.mxu0 }
 0x5d6   : > { %14226 = vst [vmem:[%s21595_s11 + $0x20] sm:$0xff] %v12937_v32  ;;  %v12936_v57 = vmax.f32 %v12888_v56, 0.0  ;;  %v12891_v8 = vadd.f32 %v22402_v10, %v12836_v4  ;;  %v12835_v51 = vadd.f32 %v12604_v36, %v12288_v40 }
 0x5d7   : > { %v17083_v37 = vpop.f32.mrf.mxu1  ;;  %v22488_v61 = vpop.f32.mrf.mxu0 }
 0x5d8   : > { %14225 = vst [vmem:[%s21595_s11 + $0x18] sm:$0xff] %v12936_v57  ;;  %v12939_v46 = vmax.f32 %v12891_v8, 0.0  ;;  %v12890_v17 = vadd.f32 %v22402_v10, %v12835_v51  ;;  %v12838_v52 = vadd.f32 %v17083_v37, %v12291_v24 }
 0x5d9   : > { %v12614_v55 = vpop.f32.mrf.mxu1  ;;  %v22498_v23 = vpop.f32.mrf.mxu0 }
 0x5da   : > { %14228 = vst [vmem:[%s21595_s11 + $0x48] sm:$0xff] %v12939_v46  ;;  %v12938_v49 = vmax.f32 %v12890_v17, 0.0  ;;  %v12893_v31 = vadd.f32 %v22402_v10, %v12838_v52  ;;  %v12837_v38 = vadd.f32 %v12614_v55, %v12290_v15 }
 0x5db   : > { %v17086_v9 = vpop.f32.mrf.mxu1 }
 0x5dc   : > { %14227 = vst [vmem:[%s21595_s11 + $0x28] sm:$0xff] %v12938_v49  ;;  %v12941_v32 = vmax.f32 %v12893_v31, 0.0  ;;  %v12892_v56 = vadd.f32 %v22402_v10, %v12837_v38  ;;  %v12840_v4 = vadd.f32 %v17086_v9, %v12293_v22 }
 0x5dd   : > { %v12624_v63 = vpop.f32.mrf.mxu1 }
 0x5de   : > { %14230 = vst [vmem:[%s21595_s11 + $0x58] sm:$0xff] %v12941_v32  ;;  %v12940_v40 = vmax.f32 %v12892_v56, 0.0  ;;  %v12895_v36 = vadd.f32 %v22402_v10, %v12840_v4  ;;  %v12839_v57 = vadd.f32 %v12624_v63, %v12292_v53 }
 0x5df   : > { %v17089_v8 = vpop.f32.mrf.mxu1 }
 0x5e0   : > { %14229 = vst [vmem:[%s21595_s11 + $0x50] sm:$0xff] %v12940_v40  ;;  %v12943_v51 = vmax.f32 %v12895_v36, 0.0  ;;  %v12894_v24 = vadd.f32 %v22402_v10, %v12839_v57  ;;  %v12842_v37 = vadd.f32 %v17089_v8, %v12295_v59 }
 0x5e1   : > { %v12634_v13 = vpop.f32.mrf.mxu1 }
 0x5e2   : > { %14232 = vst [vmem:[%s21595_s11 + $0x80] sm:$0xff] %v12943_v51  ;;  %v12942_v46 = vmax.f32 %v12894_v24, 0.0  ;;  %v12897_v17 = vadd.f32 %v22402_v10, %v12842_v37  ;;  %v12841_v52 = vadd.f32 %v12634_v13, %v12294_v3 }
 0x5e3   : > { %v17092_v15 = vpop.f32.mrf.mxu1 }
 0x5e4   : > { %14231 = vst [vmem:[%s21595_s11 + $0x78] sm:$0xff] %v12942_v46  ;;  %v12945_v55 = vmax.f32 %v12897_v17, 0.0  ;;  %v12896_v49 = vadd.f32 %v22402_v10, %v12841_v52  ;;  %v12844_v31 = vadd.f32 %v17092_v15, %v12297_v6 }
 0x5e5   : > { %v12644_v7 = vpop.f32.mrf.mxu1 }
 0x5e6   : > { %14234 = vst [vmem:[%s21595_s11 + $0xa8] sm:$0xff] %v12945_v55  ;;  %v12944_v38 = vmax.f32 %v12896_v49, 0.0  ;;  %v12899_v22 = vadd.f32 %v22402_v10, %v12844_v31  ;;  %v12843_v9 = vadd.f32 %v12644_v7, %v12296_v60 }
 0x5e7   : > { %v17095_v32 = vpop.f32.mrf.mxu1 }
 0x5e8   : > { %14233 = vst [vmem:[%s21595_s11 + $0x88] sm:$0xff] %v12944_v38  ;;  %v12947_v56 = vmax.f32 %v12899_v22, 0.0  ;;  %v12898_v4 = vadd.f32 %v22402_v10, %v12843_v9  ;;  %v12846_v53 = vadd.f32 %v17095_v32, %v12299_v30 }
 0x5e9   : > { %v12654_v18 = vpop.f32.mrf.mxu1 }
 0x5ea   : > { %14236 = vst [vmem:[%s21595_s11 + $0xb8] sm:$0xff] %v12947_v56  ;;  %v12946_v63 = vmax.f32 %v12898_v4, 0.0  ;;  %v12901_v40 = vadd.f32 %v22402_v10, %v12846_v53  ;;  %v12845_v36 = vadd.f32 %v12654_v18, %v12298_v19  ;;  %v23631_v53 = vld [vmem:[#allocation89_spill] sm:$0xff] }
 0x5eb   : > { %v17098_v57 = vpop.f32.mrf.mxu1  ;;  %v12306_v12 = vadd.f32 %v23632_v11, %v23631_v53 }
 0x5ec   : > { %14235 = vst [vmem:[%s21595_s11 + $0xb0] sm:$0xff] %v12946_v63  ;;  %v12949_v59 = vmax.f32 %v12901_v40, 0.0  ;;  %v12900_v8 = vadd.f32 %v22402_v10, %v12845_v36  ;;  %v12848_v51 = vadd.f32 %v17098_v57, %v12301_v62  ;;  %v22508_v36 = vpop.f32.mrf.mxu0 }
 0x5ed   : > { %v12664_v25 = vpop.f32.mrf.mxu1 }
 0x5ee   : > { %14238 = vst [vmem:[%s21595_s11 + $0xe0] sm:$0xff] %v12949_v59  ;;  %v12948_v24 = vmax.f32 %v12900_v8, 0.0  ;;  %v12903_v37 = vadd.f32 %v22402_v10, %v12848_v51  ;;  %v12847_v3 = vadd.f32 %v12664_v25, %v12300_v45  ;;  %v23634_v51 = vld [vmem:[#allocation15_spill] sm:$0xff] }
 0x5ef   : > { %v17101_v13 = vpop.f32.mrf.mxu1  ;;  %v12308_v45 = vadd.f32 %v22388_v39, %v23634_v51 }
 0x5f0   : > { %14237 = vst [vmem:[%s21595_s11 + $0xd8] sm:$0xff] %v12948_v24  ;;  %v12951_v46 = vmax.f32 %v12903_v37, 0.0  ;;  %v12902_v17 = vadd.f32 %v22402_v10, %v12847_v3  ;;  %v12850_v52 = vadd.f32 %v17101_v13, %v12303_v50  ;;  %v12311_v50 = vadd.f32 %v22397_v16, %v23635_v42  ;;  %v22518_v13 = vpop.f32.mrf.mxu0  ;;  %v23637_v16 = vld [vmem:[#allocation107_spill] sm:$0xff] }
 0x5f1   : > { %v12674_v1 = vpop.f32.mrf.mxu1  ;;  %v23643_v42 = vld [vmem:[#allocation111_spill] sm:$0xff] }
 0x5f2   : > { %14240 = vst [vmem:[%s21595_s11 + $0x108] sm:$0xff] %v12951_v46  ;;  %v12950_v6 = vmax.f32 %v12902_v17, 0.0  ;;  %v12905_v15 = vadd.f32 %v22402_v10, %v12850_v52  ;;  %v12849_v55 = vadd.f32 %v12674_v1, %v12302_v2  ;;  %v23636_v1 = vld [vmem:[#allocation52_spill] sm:$0xff] }
 0x5f3   : > { %v17104_v49 = vpop.f32.mrf.mxu1  ;;  %v12310_v39 = vadd.f32 %v22409_v41, %v23636_v1  ;;  %v23644_v1 = vld [vmem:[#allocation83_spill] sm:$0xff] }
 0x5f4   : > { %14239 = vst [vmem:[%s21595_s11 + $0xe8] sm:$0xff] %v12950_v6  ;;  %v12953_v31 = vmax.f32 %v12905_v15, 0.0  ;;  %v12904_v60 = vadd.f32 %v22402_v10, %v12849_v55  ;;  %v12852_v7 = vadd.f32 %v17104_v49, %v12305_v28  ;;  %v12313_v49 = vadd.f32 %v22418_v27, %v23637_v16  ;;  %v23639_v27 = vld [vmem:[#allocation109_spill] sm:$0xff] }
 0x5f5   : > { %v12684_v29 = vpop.f32.mrf.mxu1 }
 0x5f6   : > { %14242 = vst [vmem:[%s21595_s11 + $0x118] sm:$0xff] %v12953_v31  ;;  %v12952_v38 = vmax.f32 %v12904_v60, 0.0  ;;  %v12907_v22 = vadd.f32 %v22402_v10, %v12852_v7  ;;  %v12851_v9 = vadd.f32 %v12684_v29, %v12304_v43  ;;  %v22528_v31 = vpop.f32.mrf.mxu0 }
 0x5f7   : > { %v17107_v30 = vpop.f32.mrf.mxu1 }
 0x5f8   : > { %14241 = vst [vmem:[%s21595_s11 + $0x110] sm:$0xff] %v12952_v38  ;;  %v12955_v32 = vmax.f32 %v12907_v22, 0.0  ;;  %v12906_v56 = vadd.f32 %v22402_v10, %v12851_v9  ;;  %v12854_v4 = vadd.f32 %v17107_v30, %v12307_v47  ;;  %v23638_v38 = vld [vmem:[#allocation17_spill] sm:$0xff] }
 0x5f9   : > { %v12694_v19 = vpop.f32.mrf.mxu1  ;;  %v12312_v41 = vadd.f32 %v22428_v21, %v23638_v38 }
 0x5fa   : > { %14244 = vst [vmem:[%s21595_s11 + $0x140] sm:$0xff] %v12955_v32  ;;  %v12954_v18 = vmax.f32 %v12906_v56, 0.0  ;;  %v12909_v63 = vadd.f32 %v22402_v10, %v12854_v4  ;;  %v12853_v40 = vadd.f32 %v12694_v19, %v12306_v12  ;;  %v12315_v32 = vadd.f32 %v22438_v33, %v23639_v27  ;;  %v22538_v56 = vpop.f32.mrf.mxu0  ;;  %v23640_v19 = vld [vmem:[#allocation81_spill] sm:$0xff]  ;;  %v23641_v33 = vld [vmem:[#allocation70_spill] sm:$0xff] }
 0x5fb   : > { %v17110_v62 = vpop.f32.mrf.mxu1  ;;  %v12314_v21 = vadd.f32 %v22448_v54, %v23640_v19 }
 0x5fc   : > { %14243 = vst [vmem:[%s21595_s11 + $0x138] sm:$0xff] %v12954_v18  ;;  %v12957_v57 = vmax.f32 %v12909_v63, 0.0  ;;  %v12908_v59 = vadd.f32 %v22402_v10, %v12853_v40  ;;  %v12856_v8 = vadd.f32 %v17110_v62, %v12309_v20  ;;  %v12317_v20 = vadd.f32 %v22458_v0, %v23641_v33  ;;  %v12237_v62 = vpop.f32.mrf.mxu0 }
 0x5fd   : > { %v12704_v25 = vpop.f32.mrf.mxu1  ;;  %v12319_v0 = vadd.f32 %v22478_v5, %v23643_v42 }
 0x5fe   : > { %14246 = vst [vmem:[%s21595_s11 + $0x168] sm:$0xff] %v12957_v57  ;;  %v12956_v24 = vmax.f32 %v12908_v59, 0.0  ;;  %v12911_v37 = vadd.f32 %v22402_v10, %v12856_v8  ;;  %v12855_v3 = vadd.f32 %v12704_v25, %v12308_v45  ;;  %v23642_v45 = vld [vmem:[#allocation32_spill] sm:$0xff] }
 0x5ff   : > { %v17113_v46 = vpop.f32.mrf.mxu1  ;;  %v12316_v54 = vadd.f32 %v22468_v58, %v23642_v45  ;;  %v12318_v58 = vadd.f32 %v22488_v61, %v23644_v1 }
 0x600   : > { %14245 = vst [vmem:[%s21595_s11 + $0x148] sm:$0xff] %v12956_v24  ;;  %v12959_v17 = vmax.f32 %v12911_v37, 0.0  ;;  %v12910_v52 = vadd.f32 %v22402_v10, %v12855_v3  ;;  %v12858_v2 = vadd.f32 %v17113_v46, %v12311_v50  ;;  %v17063_v50 = vpop.f32.mrf.mxu0 }
 0x601   : > { %v12714_v6 = vpop.f32.mrf.mxu1 }
 0x602   : > { %14248 = vst [vmem:[%s21595_s11 + $0x178] sm:$0xff] %v12959_v17  ;;  %v12958_v15 = vmax.f32 %v12910_v52, 0.0  ;;  %v12913_v55 = vadd.f32 %v22402_v10, %v12858_v2  ;;  %v12857_v28 = vadd.f32 %v12714_v6, %v12310_v39  ;;  %v12247_v16 = vpop.f32.mrf.mxu0 }
 0x603   : > { %v17116_v60 = vpop.f32.mrf.mxu1 }
 0x604   : > { %14247 = vst [vmem:[%s21595_s11 + $0x170] sm:$0xff] %v12958_v15  ;;  %v12961_v7 = vmax.f32 %v12913_v55, 0.0  ;;  %v12912_v43 = vadd.f32 %v22402_v10, %v12857_v28  ;;  %v12860_v29 = vadd.f32 %v17116_v60, %v12313_v49  ;;  %v23645_v28 = vld [vmem:[#allocation113_spill] sm:$0xff] }
 0x605   : > { %v12724_v22 = vpop.f32.mrf.mxu1  ;;  %v12321_v5 = vadd.f32 %v22498_v23, %v23645_v28  ;;  %v23653_v28 = vld [vmem:[#allocation20_spill] sm:$0xff] }
 0x606   : > { %14250 = vst [vmem:[%s21595_s11 + $0x1a0] sm:$0xff] %v12961_v7  ;;  %v12960_v9 = vmax.f32 %v12912_v43, 0.0  ;;  %v12915_v47 = vadd.f32 %v22402_v10, %v12860_v29  ;;  %v12859_v30 = vadd.f32 %v12724_v22, %v12312_v41  ;;  %v23646_v29 = vld [vmem:[#allocation56_spill] sm:$0xff] }
 0x607   : > { %v17119_v4 = vpop.f32.mrf.mxu1  ;;  %v12320_v61 = vadd.f32 %v22508_v36, %v23646_v29 }
 0x608   : > { %14249 = vst [vmem:[%s21595_s11 + $0x198] sm:$0xff] %v12960_v9  ;;  %v12963_v53 = vmax.f32 %v12915_v47, 0.0  ;;  %v12914_v11 = vadd.f32 %v22402_v10, %v12859_v30  ;;  %v12862_v12 = vadd.f32 %v17119_v4, %v12315_v32  ;;  %v23647_v47 = vld [vmem:[#allocation24_spill] sm:$0xff]  ;;  %v17066_v30 = vpop.f32.mrf.mxu0 }
 0x609   : > { %v12734_v18 = vpop.f32.mrf.mxu1  ;;  %v12323_v23 = vadd.f32 %v22518_v13, %v23647_v47 }
 0x60a   : > { %14252 = vst [vmem:[%s21595_s11 + $0x1c8] sm:$0xff] %v12963_v53  ;;  %v12962_v63 = vmax.f32 %v12914_v11, 0.0  ;;  %v12917_v40 = vadd.f32 %v22402_v10, %v12862_v12  ;;  %v12861_v34 = vadd.f32 %v12734_v18, %v12314_v21  ;;  %v23648_v11 = vld [vmem:[#allocation34_spill] sm:$0xff] }
 0x60b   : > { %v17122_v57 = vpop.f32.mrf.mxu1  ;;  %v12322_v36 = vadd.f32 %v22528_v31, %v23648_v11 }
 0x60c   : > { %14251 = vst [vmem:[%s21595_s11 + $0x1a8] sm:$0xff] %v12962_v63  ;;  %v12965_v59 = vmax.f32 %v12917_v40, 0.0  ;;  %v12916_v8 = vadd.f32 %v22402_v10, %v12861_v34  ;;  %v12864_v51 = vadd.f32 %v17122_v57, %v12317_v20  ;;  %v23649_v63 = vld [vmem:[#allocation115_spill] sm:$0xff]  ;;  %v12257_v40 = vpop.f32.mrf.mxu0 }
 0x60d   : > { %v12744_v25 = vpop.f32.mrf.mxu1  ;;  %v12325_v13 = vadd.f32 %v22538_v56, %v23649_v63 }
 0x60e   : > { %14254 = vst [vmem:[%s21595_s11 + $0x1d8] sm:$0xff] %v12965_v59  ;;  %v12964_v24 = vmax.f32 %v12916_v8, 0.0  ;;  %v12919_v37 = vadd.f32 %v22402_v10, %v12864_v51  ;;  %v12863_v3 = vadd.f32 %v12744_v25, %v12316_v54  ;;  %v23650_v59 = vld [vmem:[#allocation58_spill] sm:$0xff]  ;;  %v17069_v8 = vpop.f32.mrf.mxu0 }
 0x60f   : > { %v17125_v46 = vpop.f32.mrf.mxu1  ;;  %v12324_v31 = vadd.f32 %v12237_v62, %v23650_v59 }
 0x610   : > { %14253 = vst [vmem:[%s21595_s11 + $0x1d0] sm:$0xff] %v12964_v24  ;;  %v12967_v17 = vmax.f32 %v12919_v37, 0.0  ;;  %v12918_v52 = vadd.f32 %v22402_v10, %v12863_v3  ;;  %v12866_v2 = vadd.f32 %v17125_v46, %v12319_v0  ;;  %v23651_v24 = vld [vmem:[#allocation117_spill] sm:$0xff]  ;;  %v23652_v46 = vld [vmem:[#allocation39_spill] sm:$0xff]  ;;  %v12267_v62 = vpop.f32.mrf.mxu0 }
 0x611   : > { %v12754_v39 = vpop.f32.mrf.mxu1  ;;  %v12327_v56 = vadd.f32 %v17063_v50, %v23651_v24 }
 0x612   : > { %14256 = vst [vmem:[%s21595_s11 + $0x200] sm:$0xff] %v12967_v17  ;;  %v12966_v6 = vmax.f32 %v12918_v52, 0.0  ;;  %v12921_v15 = vadd.f32 %v22402_v10, %v12866_v2  ;;  %v12865_v55 = vadd.f32 %v12754_v39, %v12318_v58  ;;  %v12326_v17 = vadd.f32 %v12247_v16, %v23652_v46  ;;  %v17072_v16 = vpop.f32.mrf.mxu0 }
 0x613   : > { %v17128_v49 = vpop.f32.mrf.mxu1  ;;  %v12329_v39 = vadd.f32 %v17066_v30, %v22370_v44 }
 0x614   : > { %14255 = vst [vmem:[%s21595_s11 + $0x1f8] sm:$0xff] %v12966_v6  ;;  %v12969_v60 = vmax.f32 %v12921_v15, 0.0  ;;  %v12920_v7 = vadd.f32 %v22402_v10, %v12865_v55  ;;  %v12868_v43 = vadd.f32 %v17128_v49, %v12321_v5  ;;  %v12328_v5 = vadd.f32 %v12257_v40, %v23653_v28 }
 0x615   : > { %v12764_v38 = vpop.f32.mrf.mxu1 }
 0x616   : > { %14258 = vst [vmem:[%s21595_s11 + $0x228] sm:$0xff] %v12969_v60  ;;  %v12968_v41 = vmax.f32 %v12920_v7, 0.0  ;;  %v12923_v22 = vadd.f32 %v22402_v10, %v12868_v43  ;;  %v12867_v9 = vadd.f32 %v12764_v38, %v12320_v61  ;;  %v12331_v60 = vadd.f32 %v17069_v8, %v22382_v26 }
 0x617   : > { %v17131_v27 = vpop.f32.mrf.mxu1  ;;  %v12330_v61 = vadd.f32 %v12267_v62, %v22385_v48 }
 0x618   : > { %14257 = vst [vmem:[%s21595_s11 + $0x208] sm:$0xff] %v12968_v41  ;;  %v12971_v32 = vmax.f32 %v12923_v22, 0.0  ;;  %v12922_v4 = vadd.f32 %v22402_v10, %v12867_v9  ;;  %v12870_v53 = vadd.f32 %v17131_v27, %v12323_v23  ;;  %v12277_v9 = vpop.f32.mrf.mxu0  ;;  %v12333_v23 = vadd.f32 %v17072_v16, %v22390_v14 }
 0x619   : > { %v12774_v12 = vpop.f32.mrf.mxu1  ;;  %v12332_v48 = vadd.f32 %v12277_v9, %v22393_v35 }
 0x61a   : > { %14260 = vst [vmem:[%s21595_s11 + $0x238] sm:$0xff] %v12971_v32  ;;  %v12970_v19 = vmax.f32 %v12922_v4, 0.0  ;;  %v12925_v21 = vadd.f32 %v22402_v10, %v12870_v53  ;;  %v12869_v18 = vadd.f32 %v12774_v12, %v12322_v36 }
 0x61b   : > { %v17134_v34 = vpop.f32.mrf.mxu1 }
 0x61c   : > { %14259 = vst [vmem:[%s21595_s11 + $0x230] sm:$0xff] %v12970_v19  ;;  %v12973_v33 = vmax.f32 %v12925_v21, 0.0  ;;  %v12924_v20 = vadd.f32 %v22402_v10, %v12869_v18  ;;  %v12872_v57 = vadd.f32 %v17134_v34, %v12325_v13 }
 0x61d   : > { %v12784_v51 = vpop.f32.mrf.mxu1 }
 0x61e   : > { %14262 = vst [vmem:[%s21595_s11 + $0x260] sm:$0xff] %v12973_v33  ;;  %v12972_v45 = vmax.f32 %v12924_v20, 0.0  ;;  %v12927_v54 = vadd.f32 %v22402_v10, %v12872_v57  ;;  %v12871_v25 = vadd.f32 %v12784_v51, %v12324_v31 }
 0x61f   : > { %v17137_v37 = vpop.f32.mrf.mxu1 }
 0x620   : > { %14261 = vst [vmem:[%s21595_s11 + $0x258] sm:$0xff] %v12972_v45  ;;  %v12975_v3 = vmax.f32 %v12927_v54, 0.0  ;;  %v12926_v42 = vadd.f32 %v22402_v10, %v12871_v25  ;;  %v12874_v0 = vadd.f32 %v17137_v37, %v12327_v56 }
 0x621   : > { %v12794_v52 = vpop.f32.mrf.mxu1 }
 0x622   : > { %14264 = vst [vmem:[%s21595_s11 + $0x288] sm:$0xff] %v12975_v3  ;;  %v12974_v2 = vmax.f32 %v12926_v42, 0.0  ;;  %v12929_v1 = vadd.f32 %v22402_v10, %v12874_v0  ;;  %v12873_v58 = vadd.f32 %v12794_v52, %v12326_v17 }
 0x623   : > { %v17140_v50 = vpop.f32.mrf.mxu1 }
 0x624   : > { %14263 = vst [vmem:[%s21595_s11 + $0x268] sm:$0xff] %v12974_v2  ;;  %v12977_v6 = vmax.f32 %v12929_v1, 0.0  ;;  %v12928_v15 = vadd.f32 %v22402_v10, %v12873_v58  ;;  %v12876_v55 = vadd.f32 %v17140_v50, %v12329_v39 }
 0x625   : > { %v12804_v49 = vpop.f32.mrf.mxu1 }
 0x626   : > { %14266 = vst [vmem:[%s21595_s11 + $0x298] sm:$0xff] %v12977_v6  ;;  %v12976_v7 = vmax.f32 %v12928_v15, 0.0  ;;  %v12931_v43 = vadd.f32 %v22402_v10, %v12876_v55  ;;  %v12875_v29 = vadd.f32 %v12804_v49, %v12328_v5 }
 0x627   : > { %v17143_v44 = vpop.f32.mrf.mxu1 }
 0x628   : > { %14265 = vst [vmem:[%s21595_s11 + $0x290] sm:$0xff] %v12976_v7  ;;  %v12979_v38 = vmax.f32 %v12931_v43, 0.0  ;;  %v12930_v41 = vadd.f32 %v22402_v10, %v12875_v29  ;;  %v12878_v22 = vadd.f32 %v17143_v44, %v12331_v60 }
 0x629   : > { %v12814_v47 = vpop.f32.mrf.mxu1 }
 0x62a   : > { %14268 = vst [vmem:[%s21595_s11 + $0x2c0] sm:$0xff] %v12979_v38  ;;  %v12978_v26 = vmax.f32 %v12930_v41, 0.0  ;;  %v12933_v30 = vadd.f32 %v22402_v10, %v12878_v22  ;;  %v12877_v27 = vadd.f32 %v12814_v47, %v12330_v61 }
 0x62b   : > { %v17146_v32 = vpop.f32.mrf.mxu1 }
 0x62c   : > { %14267 = vst [vmem:[%s21595_s11 + $0x2b8] sm:$0xff] %v12978_v26  ;;  %v12981_v4 = vmax.f32 %v12933_v30, 0.0  ;;  %v12932_v53 = vadd.f32 %v22402_v10, %v12877_v27  ;;  %v12880_v11 = vadd.f32 %v17146_v32, %v12333_v23 }
 0x62d   : > { %v12824_v36 = vpop.f32.mrf.mxu1 }
 0x62e   : > { %14270 = vst [vmem:[%s21595_s11 + $0x2e8] sm:$0xff] %v12981_v4  ;;  %v12980_v12 = vmax.f32 %v12932_v53, 0.0  ;;  %v12935_v14 = vadd.f32 %v22402_v10, %v12880_v11  ;;  %v12879_v19 = vadd.f32 %v12824_v36, %v12332_v48 }
 0x630   : > { %14269 = vst [vmem:[%s21595_s11 + $0x2c8] sm:$0xff] %v12980_v12  ;;  %v12983_v21 = vmax.f32 %v12935_v14, 0.0  ;;  %v12934_v18 = vadd.f32 %v22402_v10, %v12879_v19 }
 0x632   : > { %14272 = vst [vmem:[%s21595_s11 + $0x2f8] sm:$0xff] %v12983_v21  ;;  %v12982_v63 = vmax.f32 %v12934_v18, 0.0 }
 0x634   : > { %14271 = vst [vmem:[%s21595_s11 + $0x2f0] sm:$0xff] %v12982_v63 }
 0x635 PF: > { %s15_s20 = sadd.s32 1, %s17200_s20   ;;  %s23654_s18 = smov %s17196_s19 }
 0x636   : > { %p12_p5 = scmp.ge.s32.totalorder %s15_s20, 4   ;;  %s23655_s19 = smov %s23657_s21 }
 0x638   :  { %14 = sbr.rel (!%p12_p5) target bundleno = 2 (0x2), region = 90 }

</bundles_post_ra>
